<compile_context>
chip_gen: v5e
topology: v5e:2x2
jax: 0.10.0
libtpu: 0.0.40
codegen_flags: <defaults>
</compile_context>

<pallas_src>
import jax
import jax.numpy as jnp
from jax import lax
from jax.experimental import pallas as pl
from jax.experimental.pallas import tpu as pltpu

VOCAB = 4300
VOCAB_PAD = 4608          # 36 * 128 (lane-dense vocab tiles)
SEG_VOCAB = 3
SEQ = 59
SEQ_PAD = 64              # 8-aligned sequence length
DMODEL = 256
NHEAD = 4
DHEAD = DMODEL // NHEAD
DFF = 1024
NLAYERS = 2
LN_EPS = 1e-5
NEG_INF = -1e9
VT = 768                  # vocab tile width -> 6 grid steps (pipelined weight stream)


# ----------------------------- Pallas kernels ------------------------------

def _layernorm(x, g, b):
    mu = jnp.mean(x, axis=-1, keepdims=True)
    d = x - mu
    var = jnp.mean(d * d, axis=-1, keepdims=True)
    return d * lax.rsqrt(var + LN_EPS) * g + b


def encoder_kernel(emb_ref, pos_ref, bias_ref,
                   wqkv_ref, bqkv_ref, wo_ref, bo_ref, ln1g_ref, ln1b_ref,
                   w1_ref, b1_ref, w2_ref, b2_ref, ln2g_ref, ln2b_ref,
                   wy_ref,
                   xo_ref, y_ref,
                   x_sc):
    """One (batch, layer) grid step: embeddings init at l==0, one encoder layer,
    fc_y + bf16 writeback at the last layer."""
    l = pl.program_id(1)
    n_l = pl.num_programs(1)

    # --- init residual stream from embeddings on the first layer step ---
    @pl.when(l == 0)
    def _():
        x_sc[...] = emb_ref[0] + pos_ref[...]

    x = x_sc[...]                                     # (Sp, D) f32 residual stream
    x_bf = x.astype(jnp.bfloat16)

    # key-padding mask, hoisted out of the head loop (additive bias on keys)
    bias2d = jnp.broadcast_to(bias_ref[0], (SEQ_PAD, SEQ_PAD))

    # --- fused QKV projection: single full-width (D, 3D) bf16 matmul ---
    # (Wq, bq pre-scaled by 1/sqrt(DHEAD) at init.)
    qkv = (jnp.dot(x_bf, wqkv_ref[0], preferred_element_type=jnp.float32)
           + bqkv_ref[0]).astype(jnp.bfloat16)        # (Sp, 3D)

    ctx = []
    for h in range(NHEAD):
        q = qkv[:, h * DHEAD:(h + 1) * DHEAD]
        k = qkv[:, DMODEL + h * DHEAD:DMODEL + (h + 1) * DHEAD]
        v = qkv[:, 2 * DMODEL + h * DHEAD:2 * DMODEL + (h + 1) * DHEAD]
        # q @ k.T without an explicit transpose
        s = lax.dot_general(q, k, (((1,), (1,)), ((), ())),
                            preferred_element_type=jnp.float32) + bias2d
        m = jnp.max(s, axis=-1, keepdims=True)
        e = jnp.exp(s - m)
        p = (e / jnp.sum(e, axis=-1, keepdims=True)).astype(jnp.bfloat16)
        ctx.append(jnp.dot(p, v, preferred_element_type=jnp.float32))
    # lane-dense context: one full 256-lane value (no masked 64-lane stores)
    ctx = jnp.concatenate(ctx, axis=-1).astype(jnp.bfloat16)          # (Sp, D)

    attn = jnp.dot(ctx, wo_ref[0], preferred_element_type=jnp.float32) + bo_ref[0]
    x = _layernorm(x + attn, ln1g_ref[0], ln1b_ref[0])

    # --- feed-forward (bf16 matmuls, f32 accumulate) ---
    h1 = jnp.maximum(
        jnp.dot(x.astype(jnp.bfloat16), w1_ref[0],
                preferred_element_type=jnp.float32) + b1_ref[0], 0.0)
    ff = jnp.dot(h1.astype(jnp.bfloat16), w2_ref[0],
                 preferred_element_type=jnp.float32) + b2_ref[0]
    x = _layernorm(x + ff, ln2g_ref[0], ln2b_ref[0])

    x_sc[...] = x

    # --- epilogue on the last layer: bf16 output for the vocab tail + fused fc_y ---
    @pl.when(l == n_l - 1)
    def _():
        xo_ref[0] = x.astype(jnp.bfloat16)
        # fc_y as VPU multiply + reduce (weight padded rows 59..63 are zero)
        y0 = jnp.sum(x * wy_ref[0])
        y1 = jnp.sum(x * wy_ref[1])
        lane = lax.broadcasted_iota(jnp.int32, (1, 128), 1)
        yvec = jnp.where(lane == 0, y0, jnp.where(lane == 1, y1, 0.0))
        y_ref[...] = yvec.reshape(1, 1, 128)


def tail_kernel(x_ref, w_ref, b_ref, o_ref):
    # (MT, D) bf16 @ (D, VT) bf16 -> f32 acc; VT multiple of 128 (unmasked stores)
    o_ref[...] = (jnp.dot(x_ref[...], w_ref[...],
                          preferred_element_type=jnp.float32) + b_ref[...])


# ------------------------------- wrappers -----------------------------------

def fused_encoder(emb, pos, bias, p):
    """emb: (B, Sp, D) f32, pos: (Sp, D) f32, bias: (B, 1, Sp) f32."""
    B = emb.shape[0]
    args = (emb, pos, bias,
            p["wqkv"], p["bqkv"], p["wo"], p["bo"], p["ln1g"], p["ln1b"],
            p["w1"], p["b1"], p["w2"], p["b2"], p["ln2g"], p["ln2b"],
            p["wy"])
    in_specs = [
        pl.BlockSpec((1, SEQ_PAD, DMODEL), lambda b, l: (b, 0, 0)),       # emb
        pl.BlockSpec((SEQ_PAD, DMODEL), lambda b, l: (0, 0)),             # pos (no tile)
        pl.BlockSpec((1, 1, SEQ_PAD), lambda b, l: (b, 0, 0)),            # key mask bias
        pl.BlockSpec((1, DMODEL, 3 * DMODEL), lambda b, l: (l, 0, 0)),    # wqkv (bf16)
        pl.BlockSpec((1, 1, 3 * DMODEL), lambda b, l: (l, 0, 0)),         # bqkv
        pl.BlockSpec((1, DMODEL, DMODEL), lambda b, l: (l, 0, 0)),        # wo (bf16)
        pl.BlockSpec((1, 1, DMODEL), lambda b, l: (l, 0, 0)),             # bo
        pl.BlockSpec((1, 1, DMODEL), lambda b, l: (l, 0, 0)),             # ln1g
        pl.BlockSpec((1, 1, DMODEL), lambda b, l: (l, 0, 0)),             # ln1b
        pl.BlockSpec((1, DMODEL, DFF), lambda b, l: (l, 0, 0)),           # w1 (bf16)
        pl.BlockSpec((1, 1, DFF), lambda b, l: (l, 0, 0)),                # b1
        pl.BlockSpec((1, DFF, DMODEL), lambda b, l: (l, 0, 0)),           # w2 (bf16)
        pl.BlockSpec((1, 1, DMODEL), lambda b, l: (l, 0, 0)),             # b2
        pl.BlockSpec((1, 1, DMODEL), lambda b, l: (l, 0, 0)),             # ln2g
        pl.BlockSpec((1, 1, DMODEL), lambda b, l: (l, 0, 0)),             # ln2b
        pl.BlockSpec((2, SEQ_PAD, DMODEL), lambda b, l: (0, 0, 0)),       # fc_y weight
    ]
    out_specs = [
        pl.BlockSpec((1, SEQ_PAD, DMODEL), lambda b, l: (b, 0, 0)),       # x bf16
        pl.BlockSpec((1, 1, 128), lambda b, l: (b, 0, 0)),                # y (lane-padded)
    ]
    out_shape = [
        jax.ShapeDtypeStruct((B, SEQ_PAD, DMODEL), jnp.bfloat16),
        jax.ShapeDtypeStruct((B, 1, 128), jnp.float32),
    ]
    return pl.pallas_call(
        encoder_kernel,
        out_shape=out_shape,
        grid=(B, NLAYERS),
        in_specs=in_specs,
        out_specs=out_specs,
        scratch_shapes=[pltpu.VMEM((SEQ_PAD, DMODEL), jnp.float32)],      # residual carry
        compiler_params=pltpu.CompilerParams(
            dimension_semantics=("parallel", "arbitrary")),
    )(*args)


def vocab_tail(x_bf16, w_bf16, b_pad):
    M = x_bf16.shape[0]
    MT = 128 if M % 128 == 0 else 64
    grid = (M // MT, VOCAB_PAD // VT)          # 6 vocab steps -> weight DMA is pipelined
    return pl.pallas_call(
        tail_kernel,
        out_shape=jax.ShapeDtypeStruct((M, VOCAB_PAD), jnp.float32),
        grid=grid,
        in_specs=[pl.BlockSpec((MT, DMODEL), lambda i, j: (i, 0)),
                  pl.BlockSpec((DMODEL, VT), lambda i, j: (0, j)),
                  pl.BlockSpec((1, VT), lambda i, j: (0, j))],
        out_specs=pl.BlockSpec((MT, VT), lambda i, j: (i, j)),
        compiler_params=pltpu.CompilerParams(
            dimension_semantics=("parallel", "parallel")),   # both v7x TCs busy
    )(x_bf16, w_bf16, b_pad)


# ------------------------------ parameters ----------------------------------

def init_params(key):
    def nrm(k, shape, scale=0.02):
        return jax.random.normal(k, shape, jnp.float32) * scale

    keys = jax.random.split(key, 8 + NLAYERS)
    qscale = 1.0 / (DHEAD ** 0.5)

    pos = jax.random.normal(keys[2], (SEQ, DMODEL), jnp.float32) / 10.0
    pos_pad = jnp.zeros((SEQ_PAD, DMODEL), jnp.float32).at[:SEQ].set(pos)

    w_tail = nrm(keys[3], (DMODEL, VOCAB))
    w_tail_pad = jnp.zeros((DMODEL, VOCAB_PAD), jnp.float32).at[:, :VOCAB].set(w_tail)

    # fc_y weight stored as (2, Sp, D); padded rows 59..63 are zero
    w_y = nrm(keys[4], (2, SEQ, DMODEL))
    w_y_pad = jnp.zeros((2, SEQ_PAD, DMODEL), jnp.float32).at[:, :SEQ, :].set(w_y)

    params = {
        "embed": nrm(keys[0], (VOCAB, DMODEL)),
        "seg_embed": nrm(keys[1], (SEG_VOCAB, DMODEL)),
        "pos_pad": pos_pad,
        "w_tail": w_tail_pad.astype(jnp.bfloat16),            # bf16 streamed weight
        "b_tail": jnp.zeros((1, VOCAB_PAD), jnp.float32),
        "wy": w_y_pad,
        "b_y": jnp.zeros((1, 2), jnp.float32),
    }

    wqkv, wo, w1, w2 = [], [], [], []
    for li in range(NLAYERS):
        lk = jax.random.split(keys[8 + li], 6)
        # fused QKV weight (D, 3D): [Wq * 1/sqrt(Dh) | Wk | Wv]; head h = lanes h*64:(h+1)*64
        wqkv.append(jnp.concatenate(
            [nrm(lk[0], (DMODEL, DMODEL)) * qscale,
             nrm(lk[1], (DMODEL, DMODEL)),
             nrm(lk[2], (DMODEL, DMODEL))], axis=1))
        wo.append(nrm(lk[3], (DMODEL, DMODEL)))
        w1.append(nrm(lk[4], (DMODEL, DFF)))
        w2.append(nrm(lk[5], (DFF, DMODEL)))

    params.update({
        "wqkv": jnp.stack(wqkv).astype(jnp.bfloat16),
        # biases are zero; bq would also be pre-scaled by 1/sqrt(Dh)
        "bqkv": jnp.zeros((NLAYERS, 1, 3 * DMODEL), jnp.float32),
        "wo": jnp.stack(wo).astype(jnp.bfloat16),
        "bo": jnp.zeros((NLAYERS, 1, DMODEL), jnp.float32),
        "ln1g": jnp.ones((NLAYERS, 1, DMODEL), jnp.float32),
        "ln1b": jnp.zeros((NLAYERS, 1, DMODEL), jnp.float32),
        "w1": jnp.stack(w1).astype(jnp.bfloat16),
        "b1": jnp.zeros((NLAYERS, 1, DFF), jnp.float32),
        "w2": jnp.stack(w2).astype(jnp.bfloat16),
        "b2": jnp.zeros((NLAYERS, 1, DMODEL), jnp.float32),
        "ln2g": jnp.ones((NLAYERS, 1, DMODEL), jnp.float32),
        "ln2b": jnp.zeros((NLAYERS, 1, DMODEL), jnp.float32),
    })
    return params


# ------------------------------ forward pass ---------------------------------

def gpt_forward(params, x_head, seg):
    B = x_head.shape[0]
    pad = SEQ_PAD - SEQ

    # glue: pad sequence to 64 (pad token id 0) and do the embedding table gathers in JAX
    xh_p = jnp.pad(x_head, ((0, 0), (0, pad)))
    seg_p = jnp.pad(seg, ((0, 0), (0, pad)))
    emb = (jnp.take(params["embed"], xh_p, axis=0)
           + jnp.take(params["seg_embed"], seg_p, axis=0))               # (B, Sp, D)

    # key-padding mask: pad token id == 0 -> additive -1e9 bias on keys
    bias = jnp.where(xh_p == 0, NEG_INF, 0.0).astype(jnp.float32)[:, None, :]  # (B,1,Sp)

    # one fused kernel: embedding sum + both encoder layers + fc_y epilogue (bf16 x out)
    x_bf, y_pad = fused_encoder(emb, params["pos_pad"], bias, params)

    # vocab projection (dominant, HBM-bound): bf16 inputs, lane-dense 768-wide tiles
    logits = vocab_tail(x_bf.reshape(B * SEQ_PAD, DMODEL),
                        params["w_tail"], params["b_tail"])
    x_tail = logits.reshape(B, SEQ_PAD, VOCAB_PAD)[:, :SEQ, :VOCAB]

    y = y_pad[:, 0, :2] + params["b_y"]
    return x_tail, y


if __name__ == "__main__":
    key = jax.random.PRNGKey(0)
    k_tok, k_seg, k_param = jax.random.split(key, 3)

    B = 2
    x_head = jax.random.randint(k_tok, (B, SEQ), 1, VOCAB, dtype=jnp.int32)
    # zero out a few trailing positions to exercise the key-padding mask
    x_head = x_head.at[:, SEQ - 4:].set(0)
    seg = jax.random.randint(k_seg, (B, SEQ), 0, SEG_VOCAB, dtype=jnp.int32)

    params = init_params(k_param)

    fwd = jax.jit(gpt_forward)
    x_tail, y = fwd(params, x_head, seg)
    jax.block_until_ready((x_tail, y))

    assert x_tail.shape == (B, SEQ, VOCAB) and y.shape == (B, 2)
    assert bool(jnp.all(jnp.isfinite(x_tail))) and bool(jnp.all(jnp.isfinite(y)))
    print("KERNEL_OK")
</pallas_src>

<mosaic_0001>
module attributes {stable_mosaic.version = 11 : i64} {
  func.func @encoder_kernel(%arg0: i32, %arg1: i32, %arg2: memref<1x64x256xf32, #tpu.memory_space<vmem>>, %arg3: memref<64x256xf32, #tpu.memory_space<vmem>>, %arg4: memref<1x1x64xf32, #tpu.memory_space<vmem>>, %arg5: memref<1x256x768xbf16, #tpu.memory_space<vmem>>, %arg6: memref<1x1x768xf32, #tpu.memory_space<vmem>>, %arg7: memref<1x256x256xbf16, #tpu.memory_space<vmem>>, %arg8: memref<1x1x256xf32, #tpu.memory_space<vmem>>, %arg9: memref<1x1x256xf32, #tpu.memory_space<vmem>>, %arg10: memref<1x1x256xf32, #tpu.memory_space<vmem>>, %arg11: memref<1x256x1024xbf16, #tpu.memory_space<vmem>>, %arg12: memref<1x1x1024xf32, #tpu.memory_space<vmem>>, %arg13: memref<1x1024x256xbf16, #tpu.memory_space<vmem>>, %arg14: memref<1x1x256xf32, #tpu.memory_space<vmem>>, %arg15: memref<1x1x256xf32, #tpu.memory_space<vmem>>, %arg16: memref<1x1x256xf32, #tpu.memory_space<vmem>>, %arg17: memref<2x64x256xf32, #tpu.memory_space<vmem>>, %arg18: memref<1x64x256xbf16, #tpu.memory_space<vmem>>, %arg19: memref<1x1x128xf32, #tpu.memory_space<vmem>>, %arg20: memref<64x256xf32, #tpu.memory_space<vmem>>) attributes {dimension_semantics = [#tpu.dimension_semantics<parallel>, #tpu.dimension_semantics<arbitrary>], iteration_bounds = array<i64: 2, 2>, scalar_prefetch = 0 : i64, scratch_operands = 1 : i64, tpu.core_type = #tpu.core_type<tc>, window_params = [{transform_indices = @transform_0, window_bounds = array<i64: 1, 64, 256>}, {pipeline_mode = #tpu.pipeline_mode<synchronous>, transform_indices = @transform_1, window_bounds = array<i64: 64, 256>}, {transform_indices = @transform_2, window_bounds = array<i64: 1, 1, 64>}, {transform_indices = @transform_3, window_bounds = array<i64: 1, 256, 768>}, {transform_indices = @transform_4, window_bounds = array<i64: 1, 1, 768>}, {transform_indices = @transform_5, window_bounds = array<i64: 1, 256, 256>}, {transform_indices = @transform_6, window_bounds = array<i64: 1, 1, 256>}, {transform_indices = @transform_7, window_bounds = array<i64: 1, 1, 256>}, {transform_indices = @transform_8, window_bounds = array<i64: 1, 1, 256>}, {transform_indices = @transform_9, window_bounds = array<i64: 1, 256, 1024>}, {transform_indices = @transform_10, window_bounds = array<i64: 1, 1, 1024>}, {transform_indices = @transform_11, window_bounds = array<i64: 1, 1024, 256>}, {transform_indices = @transform_12, window_bounds = array<i64: 1, 1, 256>}, {transform_indices = @transform_13, window_bounds = array<i64: 1, 1, 256>}, {transform_indices = @transform_14, window_bounds = array<i64: 1, 1, 256>}, {pipeline_mode = #tpu.pipeline_mode<synchronous>, transform_indices = @transform_15, window_bounds = array<i64: 2, 64, 256>}, {transform_indices = @transform_16, window_bounds = array<i64: 1, 64, 256>}, {transform_indices = @transform_17, window_bounds = array<i64: 1, 1, 128>}]} {
    %c0_i32 = arith.constant 0 : i32
    %0 = arith.cmpi eq, %arg1, %c0_i32 : i32
    %1 = arith.extui %0 : i1 to i32
    %c0_i32_0 = arith.constant 0 : i32
    %2 = arith.cmpi ne, %1, %c0_i32_0 : i32
    scf.if %2 {
      %c0_74 = arith.constant 0 : index
      %c0_75 = arith.constant 0 : index
      %c0_76 = arith.constant 0 : index
      %162 = vector.load %arg2[%c0_74, %c0_75, %c0_76] : memref<1x64x256xf32, #tpu.memory_space<vmem>>, vector<1x64x256xf32>
      %163 = vector.shape_cast %162 : vector<1x64x256xf32> to vector<64x256xf32>
      %c0_77 = arith.constant 0 : index
      %c0_78 = arith.constant 0 : index
      %164 = vector.load %arg3[%c0_77, %c0_78] : memref<64x256xf32, #tpu.memory_space<vmem>>, vector<64x256xf32>
      %165 = arith.addf %163, %164 : vector<64x256xf32>
      %c0_79 = arith.constant 0 : index
      %c0_80 = arith.constant 0 : index
      %166 = vector.load %arg20[%c0_79, %c0_80] : memref<64x256xf32, #tpu.memory_space<vmem>>, vector<64x256xf32>
      tpu.vector_store %arg20[%c0_79, %c0_80], %165 {strides = array<i32>} : memref<64x256xf32, #tpu.memory_space<vmem>>, vector<64x256xf32>,
    } else {
    }
    %c0 = arith.constant 0 : index
    %c0_1 = arith.constant 0 : index
    %3 = vector.load %arg20[%c0, %c0_1] : memref<64x256xf32, #tpu.memory_space<vmem>>, vector<64x256xf32>
    %4 = arith.truncf %3 : vector<64x256xf32> to vector<64x256xbf16>
    %c0_2 = arith.constant 0 : index
    %c0_3 = arith.constant 0 : index
    %c0_4 = arith.constant 0 : index
    %5 = vector.load %arg4[%c0_2, %c0_3, %c0_4] : memref<1x1x64xf32, #tpu.memory_space<vmem>>, vector<1x1x64xf32>
    %6 = vector.shape_cast %5 : vector<1x1x64xf32> to vector<1x64xf32>
    %7 = vector.shape_cast %6 : vector<1x64xf32> to vector<1x64xf32>
    %8 = vector.broadcast %7 : vector<1x64xf32> to vector<64x64xf32>
    %c0_5 = arith.constant 0 : index
    %c0_6 = arith.constant 0 : index
    %c0_7 = arith.constant 0 : index
    %9 = vector.load %arg5[%c0_5, %c0_6, %c0_7] : memref<1x256x768xbf16, #tpu.memory_space<vmem>>, vector<1x256x768xbf16>
    %10 = vector.shape_cast %9 : vector<1x256x768xbf16> to vector<256x768xbf16>
    %cst = arith.constant dense<0.000000e+00> : vector<64x768xf32>
    %11 = tpu.matmul %4, %10, %cst {dimension_numbers = #tpu.dot_dimension_numbers<[1], [0], [0], [1], [0, 0, 1, 1], [], []>} : vector<64x256xbf16>, vector<256x768xbf16>, vector<64x768xf32> -> vector<64x768xf32>
    %c0_8 = arith.constant 0 : index
    %c0_9 = arith.constant 0 : index
    %c0_10 = arith.constant 0 : index
    %12 = vector.load %arg6[%c0_8, %c0_9, %c0_10] : memref<1x1x768xf32, #tpu.memory_space<vmem>>, vector<1x1x768xf32>
    %13 = vector.shape_cast %12 : vector<1x1x768xf32> to vector<1x768xf32>
    %14 = vector.broadcast %13 : vector<1x768xf32> to vector<64x768xf32>
    %15 = arith.addf %11, %14 : vector<64x768xf32>
    %16 = arith.truncf %15 : vector<64x768xf32> to vector<64x768xbf16>
    %17 = vector.extract_strided_slice %16 {offsets = [0, 0], sizes = [64, 64], strides = [1, 1]} : vector<64x768xbf16> to vector<64x64xbf16>
    %18 = vector.extract_strided_slice %16 {offsets = [0, 256], sizes = [64, 64], strides = [1, 1]} : vector<64x768xbf16> to vector<64x64xbf16>
    %19 = vector.extract_strided_slice %16 {offsets = [0, 512], sizes = [64, 64], strides = [1, 1]} : vector<64x768xbf16> to vector<64x64xbf16>
    %cst_11 = arith.constant dense<0.000000e+00> : vector<64x64xf32>
    %20 = tpu.matmul %17, %18, %cst_11 {dimension_numbers = #tpu.dot_dimension_numbers<[1], [1], [0], [0], [0, 0, 1, 0], [], []>} : vector<64x64xbf16>, vector<64x64xbf16>, vector<64x64xf32> -> vector<64x64xf32>
    %21 = arith.addf %20, %8 : vector<64x64xf32>
    %cst_12 = arith.constant dense<0xFF800000> : vector<64xf32>
    %22 = vector.multi_reduction <maximumf>, %21, %cst_12 [1] : vector<64x64xf32> to vector<64xf32>
    %23 = vector.shape_cast %22 : vector<64xf32> to vector<64x1xf32>
    %24 = vector.broadcast %23 : vector<64x1xf32> to vector<64x64xf32>
    %25 = arith.subf %21, %24 : vector<64x64xf32>
    %26 = math.exp %25 : vector<64x64xf32>
    %cst_13 = arith.constant dense<0.000000e+00> : vector<64xf32>
    %27 = vector.multi_reduction <add>, %26, %cst_13 [1] : vector<64x64xf32> to vector<64xf32>
    %28 = vector.shape_cast %27 : vector<64xf32> to vector<64x1xf32>
    %29 = vector.broadcast %28 : vector<64x1xf32> to vector<64x64xf32>
    %30 = arith.divf %26, %29 : vector<64x64xf32>
    %31 = arith.truncf %30 : vector<64x64xf32> to vector<64x64xbf16>
    %cst_14 = arith.constant dense<0.000000e+00> : vector<64x64xf32>
    %32 = tpu.matmul %31, %19, %cst_14 {dimension_numbers = #tpu.dot_dimension_numbers<[1], [0], [0], [1], [0, 0, 1, 1], [], []>} : vector<64x64xbf16>, vector<64x64xbf16>, vector<64x64xf32> -> vector<64x64xf32>
    %33 = vector.extract_strided_slice %16 {offsets = [0, 64], sizes = [64, 64], strides = [1, 1]} : vector<64x768xbf16> to vector<64x64xbf16>
    %34 = vector.extract_strided_slice %16 {offsets = [0, 320], sizes = [64, 64], strides = [1, 1]} : vector<64x768xbf16> to vector<64x64xbf16>
    %35 = vector.extract_strided_slice %16 {offsets = [0, 576], sizes = [64, 64], strides = [1, 1]} : vector<64x768xbf16> to vector<64x64xbf16>
    %cst_15 = arith.constant dense<0.000000e+00> : vector<64x64xf32>
    %36 = tpu.matmul %33, %34, %cst_15 {dimension_numbers = #tpu.dot_dimension_numbers<[1], [1], [0], [0], [0, 0, 1, 0], [], []>} : vector<64x64xbf16>, vector<64x64xbf16>, vector<64x64xf32> -> vector<64x64xf32>
    %37 = arith.addf %36, %8 : vector<64x64xf32>
    %cst_16 = arith.constant dense<0xFF800000> : vector<64xf32>
    %38 = vector.multi_reduction <maximumf>, %37, %cst_16 [1] : vector<64x64xf32> to vector<64xf32>
    %39 = vector.shape_cast %38 : vector<64xf32> to vector<64x1xf32>
    %40 = vector.broadcast %39 : vector<64x1xf32> to vector<64x64xf32>
    %41 = arith.subf %37, %40 : vector<64x64xf32>
    %42 = math.exp %41 : vector<64x64xf32>
    %cst_17 = arith.constant dense<0.000000e+00> : vector<64xf32>
    %43 = vector.multi_reduction <add>, %42, %cst_17 [1] : vector<64x64xf32> to vector<64xf32>
    %44 = vector.shape_cast %43 : vector<64xf32> to vector<64x1xf32>
    %45 = vector.broadcast %44 : vector<64x1xf32> to vector<64x64xf32>
    %46 = arith.divf %42, %45 : vector<64x64xf32>
    %47 = arith.truncf %46 : vector<64x64xf32> to vector<64x64xbf16>
    %cst_18 = arith.constant dense<0.000000e+00> : vector<64x64xf32>
    %48 = tpu.matmul %47, %35, %cst_18 {dimension_numbers = #tpu.dot_dimension_numbers<[1], [0], [0], [1], [0, 0, 1, 1], [], []>} : vector<64x64xbf16>, vector<64x64xbf16>, vector<64x64xf32> -> vector<64x64xf32>
    %49 = vector.extract_strided_slice %16 {offsets = [0, 128], sizes = [64, 64], strides = [1, 1]} : vector<64x768xbf16> to vector<64x64xbf16>
    %50 = vector.extract_strided_slice %16 {offsets = [0, 384], sizes = [64, 64], strides = [1, 1]} : vector<64x768xbf16> to vector<64x64xbf16>
    %51 = vector.extract_strided_slice %16 {offsets = [0, 640], sizes = [64, 64], strides = [1, 1]} : vector<64x768xbf16> to vector<64x64xbf16>
    %cst_19 = arith.constant dense<0.000000e+00> : vector<64x64xf32>
    %52 = tpu.matmul %49, %50, %cst_19 {dimension_numbers = #tpu.dot_dimension_numbers<[1], [1], [0], [0], [0, 0, 1, 0], [], []>} : vector<64x64xbf16>, vector<64x64xbf16>, vector<64x64xf32> -> vector<64x64xf32>
    %53 = arith.addf %52, %8 : vector<64x64xf32>
    %cst_20 = arith.constant dense<0xFF800000> : vector<64xf32>
    %54 = vector.multi_reduction <maximumf>, %53, %cst_20 [1] : vector<64x64xf32> to vector<64xf32>
    %55 = vector.shape_cast %54 : vector<64xf32> to vector<64x1xf32>
    %56 = vector.broadcast %55 : vector<64x1xf32> to vector<64x64xf32>
    %57 = arith.subf %53, %56 : vector<64x64xf32>
    %58 = math.exp %57 : vector<64x64xf32>
    %cst_21 = arith.constant dense<0.000000e+00> : vector<64xf32>
    %59 = vector.multi_reduction <add>, %58, %cst_21 [1] : vector<64x64xf32> to vector<64xf32>
    %60 = vector.shape_cast %59 : vector<64xf32> to vector<64x1xf32>
    %61 = vector.broadcast %60 : vector<64x1xf32> to vector<64x64xf32>
    %62 = arith.divf %58, %61 : vector<64x64xf32>
    %63 = arith.truncf %62 : vector<64x64xf32> to vector<64x64xbf16>
    %cst_22 = arith.constant dense<0.000000e+00> : vector<64x64xf32>
    %64 = tpu.matmul %63, %51, %cst_22 {dimension_numbers = #tpu.dot_dimension_numbers<[1], [0], [0], [1], [0, 0, 1, 1], [], []>} : vector<64x64xbf16>, vector<64x64xbf16>, vector<64x64xf32> -> vector<64x64xf32>
    %65 = vector.extract_strided_slice %16 {offsets = [0, 192], sizes = [64, 64], strides = [1, 1]} : vector<64x768xbf16> to vector<64x64xbf16>
    %66 = vector.extract_strided_slice %16 {offsets = [0, 448], sizes = [64, 64], strides = [1, 1]} : vector<64x768xbf16> to vector<64x64xbf16>
    %67 = vector.extract_strided_slice %16 {offsets = [0, 704], sizes = [64, 64], strides = [1, 1]} : vector<64x768xbf16> to vector<64x64xbf16>
    %cst_23 = arith.constant dense<0.000000e+00> : vector<64x64xf32>
    %68 = tpu.matmul %65, %66, %cst_23 {dimension_numbers = #tpu.dot_dimension_numbers<[1], [1], [0], [0], [0, 0, 1, 0], [], []>} : vector<64x64xbf16>, vector<64x64xbf16>, vector<64x64xf32> -> vector<64x64xf32>
    %69 = arith.addf %68, %8 : vector<64x64xf32>
    %cst_24 = arith.constant dense<0xFF800000> : vector<64xf32>
    %70 = vector.multi_reduction <maximumf>, %69, %cst_24 [1] : vector<64x64xf32> to vector<64xf32>
    %71 = vector.shape_cast %70 : vector<64xf32> to vector<64x1xf32>
    %72 = vector.broadcast %71 : vector<64x1xf32> to vector<64x64xf32>
    %73 = arith.subf %69, %72 : vector<64x64xf32>
    %74 = math.exp %73 : vector<64x64xf32>
    %cst_25 = arith.constant dense<0.000000e+00> : vector<64xf32>
    %75 = vector.multi_reduction <add>, %74, %cst_25 [1] : vector<64x64xf32> to vector<64xf32>
    %76 = vector.shape_cast %75 : vector<64xf32> to vector<64x1xf32>
    %77 = vector.broadcast %76 : vector<64x1xf32> to vector<64x64xf32>
    %78 = arith.divf %74, %77 : vector<64x64xf32>
    %79 = arith.truncf %78 : vector<64x64xf32> to vector<64x64xbf16>
    %cst_26 = arith.constant dense<0.000000e+00> : vector<64x64xf32>
    %80 = tpu.matmul %79, %67, %cst_26 {dimension_numbers = #tpu.dot_dimension_numbers<[1], [0], [0], [1], [0, 0, 1, 1], [], []>} : vector<64x64xbf16>, vector<64x64xbf16>, vector<64x64xf32> -> vector<64x64xf32>
    %81 = tpu.concatenate %32, %48, %64, %80 in 1 : vector<64x64xf32>, vector<64x64xf32>, vector<64x64xf32>, vector<64x64xf32> -> vector<64x256xf32>
    %82 = arith.truncf %81 : vector<64x256xf32> to vector<64x256xbf16>
    %c0_27 = arith.constant 0 : index
    %c0_28 = arith.constant 0 : index
    %c0_29 = arith.constant 0 : index
    %83 = vector.load %arg7[%c0_27, %c0_28, %c0_29] : memref<1x256x256xbf16, #tpu.memory_space<vmem>>, vector<1x256x256xbf16>
    %84 = vector.shape_cast %83 : vector<1x256x256xbf16> to vector<256x256xbf16>
    %cst_30 = arith.constant dense<0.000000e+00> : vector<64x256xf32>
    %85 = tpu.matmul %82, %84, %cst_30 {dimension_numbers = #tpu.dot_dimension_numbers<[1], [0], [0], [1], [0, 0, 1, 1], [], []>} : vector<64x256xbf16>, vector<256x256xbf16>, vector<64x256xf32> -> vector<64x256xf32>
    %c0_31 = arith.constant 0 : index
    %c0_32 = arith.constant 0 : index
    %c0_33 = arith.constant 0 : index
    %86 = vector.load %arg8[%c0_31, %c0_32, %c0_33] : memref<1x1x256xf32, #tpu.memory_space<vmem>>, vector<1x1x256xf32>
    %87 = vector.shape_cast %86 : vector<1x1x256xf32> to vector<1x256xf32>
    %88 = vector.broadcast %87 : vector<1x256xf32> to vector<64x256xf32>
    %89 = arith.addf %85, %88 : vector<64x256xf32>
    %90 = arith.addf %3, %89 : vector<64x256xf32>
    %c0_34 = arith.constant 0 : index
    %c0_35 = arith.constant 0 : index
    %c0_36 = arith.constant 0 : index
    %91 = vector.load %arg9[%c0_34, %c0_35, %c0_36] : memref<1x1x256xf32, #tpu.memory_space<vmem>>, vector<1x1x256xf32>
    %92 = vector.shape_cast %91 : vector<1x1x256xf32> to vector<1x256xf32>
    %c0_37 = arith.constant 0 : index
    %c0_38 = arith.constant 0 : index
    %c0_39 = arith.constant 0 : index
    %93 = vector.load %arg10[%c0_37, %c0_38, %c0_39] : memref<1x1x256xf32, #tpu.memory_space<vmem>>, vector<1x1x256xf32>
    %94 = vector.shape_cast %93 : vector<1x1x256xf32> to vector<1x256xf32>
    %cst_40 = arith.constant dense<0.000000e+00> : vector<64xf32>
    %95 = vector.multi_reduction <add>, %90, %cst_40 [1] : vector<64x256xf32> to vector<64xf32>
    %96 = vector.shape_cast %95 : vector<64xf32> to vector<64x1xf32>
    %cst_41 = arith.constant 2.560000e+02 : f32
    %97 = vector.broadcast %cst_41 : f32 to vector<64x1xf32>
    %98 = arith.divf %96, %97 : vector<64x1xf32>
    %99 = vector.broadcast %98 : vector<64x1xf32> to vector<64x256xf32>
    %100 = arith.subf %90, %99 : vector<64x256xf32>
    %101 = arith.mulf %100, %100 : vector<64x256xf32>
    %cst_42 = arith.constant dense<0.000000e+00> : vector<64xf32>
    %102 = vector.multi_reduction <add>, %101, %cst_42 [1] : vector<64x256xf32> to vector<64xf32>
    %103 = vector.shape_cast %102 : vector<64xf32> to vector<64x1xf32>
    %cst_43 = arith.constant 2.560000e+02 : f32
    %104 = vector.broadcast %cst_43 : f32 to vector<64x1xf32>
    %105 = arith.divf %103, %104 : vector<64x1xf32>
    %cst_44 = arith.constant 9.99999974E-6 : f32
    %106 = vector.broadcast %cst_44 : f32 to vector<64x1xf32>
    %107 = arith.addf %105, %106 : vector<64x1xf32>
    %108 = math.rsqrt %107 : vector<64x1xf32>
    %109 = vector.broadcast %108 : vector<64x1xf32> to vector<64x256xf32>
    %110 = arith.mulf %100, %109 : vector<64x256xf32>
    %111 = vector.broadcast %92 : vector<1x256xf32> to vector<64x256xf32>
    %112 = arith.mulf %110, %111 : vector<64x256xf32>
    %113 = vector.broadcast %94 : vector<1x256xf32> to vector<64x256xf32>
    %114 = arith.addf %112, %113 : vector<64x256xf32>
    %115 = arith.truncf %114 : vector<64x256xf32> to vector<64x256xbf16>
    %c0_45 = arith.constant 0 : index
    %c0_46 = arith.constant 0 : index
    %c0_47 = arith.constant 0 : index
    %116 = vector.load %arg11[%c0_45, %c0_46, %c0_47] : memref<1x256x1024xbf16, #tpu.memory_space<vmem>>, vector<1x256x1024xbf16>
    %117 = vector.shape_cast %116 : vector<1x256x1024xbf16> to vector<256x1024xbf16>
    %cst_48 = arith.constant dense<0.000000e+00> : vector<64x1024xf32>
    %118 = tpu.matmul %115, %117, %cst_48 {dimension_numbers = #tpu.dot_dimension_numbers<[1], [0], [0], [1], [0, 0, 1, 1], [], []>} : vector<64x256xbf16>, vector<256x1024xbf16>, vector<64x1024xf32> -> vector<64x1024xf32>
    %c0_49 = arith.constant 0 : index
    %c0_50 = arith.constant 0 : index
    %c0_51 = arith.constant 0 : index
    %119 = vector.load %arg12[%c0_49, %c0_50, %c0_51] : memref<1x1x1024xf32, #tpu.memory_space<vmem>>, vector<1x1x1024xf32>
    %120 = vector.shape_cast %119 : vector<1x1x1024xf32> to vector<1x1024xf32>
    %121 = vector.broadcast %120 : vector<1x1024xf32> to vector<64x1024xf32>
    %122 = arith.addf %118, %121 : vector<64x1024xf32>
    %cst_52 = arith.constant 0.000000e+00 : f32
    %123 = vector.broadcast %cst_52 : f32 to vector<64x1024xf32>
    %124 = arith.maximumf %122, %123 : vector<64x1024xf32>
    %125 = arith.truncf %124 : vector<64x1024xf32> to vector<64x1024xbf16>
    %c0_53 = arith.constant 0 : index
    %c0_54 = arith.constant 0 : index
    %c0_55 = arith.constant 0 : index
    %126 = vector.load %arg13[%c0_53, %c0_54, %c0_55] : memref<1x1024x256xbf16, #tpu.memory_space<vmem>>, vector<1x1024x256xbf16>
    %127 = vector.shape_cast %126 : vector<1x1024x256xbf16> to vector<1024x256xbf16>
    %cst_56 = arith.constant dense<0.000000e+00> : vector<64x256xf32>
    %128 = tpu.matmul %125, %127, %cst_56 {dimension_numbers = #tpu.dot_dimension_numbers<[1], [0], [0], [1], [0, 0, 1, 1], [], []>} : vector<64x1024xbf16>, vector<1024x256xbf16>, vector<64x256xf32> -> vector<64x256xf32>
    %c0_57 = arith.constant 0 : index
    %c0_58 = arith.constant 0 : index
    %c0_59 = arith.constant 0 : index
    %129 = vector.load %arg14[%c0_57, %c0_58, %c0_59] : memref<1x1x256xf32, #tpu.memory_space<vmem>>, vector<1x1x256xf32>
    %130 = vector.shape_cast %129 : vector<1x1x256xf32> to vector<1x256xf32>
    %131 = vector.broadcast %130 : vector<1x256xf32> to vector<64x256xf32>
    %132 = arith.addf %128, %131 : vector<64x256xf32>
    %133 = arith.addf %114, %132 : vector<64x256xf32>
    %c0_60 = arith.constant 0 : index
    %c0_61 = arith.constant 0 : index
    %c0_62 = arith.constant 0 : index
    %134 = vector.load %arg15[%c0_60, %c0_61, %c0_62] : memref<1x1x256xf32, #tpu.memory_space<vmem>>, vector<1x1x256xf32>
    %135 = vector.shape_cast %134 : vector<1x1x256xf32> to vector<1x256xf32>
    %c0_63 = arith.constant 0 : index
    %c0_64 = arith.constant 0 : index
    %c0_65 = arith.constant 0 : index
    %136 = vector.load %arg16[%c0_63, %c0_64, %c0_65] : memref<1x1x256xf32, #tpu.memory_space<vmem>>, vector<1x1x256xf32>
    %137 = vector.shape_cast %136 : vector<1x1x256xf32> to vector<1x256xf32>
    %cst_66 = arith.constant dense<0.000000e+00> : vector<64xf32>
    %138 = vector.multi_reduction <add>, %133, %cst_66 [1] : vector<64x256xf32> to vector<64xf32>
    %139 = vector.shape_cast %138 : vector<64xf32> to vector<64x1xf32>
    %cst_67 = arith.constant 2.560000e+02 : f32
    %140 = vector.broadcast %cst_67 : f32 to vector<64x1xf32>
    %141 = arith.divf %139, %140 : vector<64x1xf32>
    %142 = vector.broadcast %141 : vector<64x1xf32> to vector<64x256xf32>
    %143 = arith.subf %133, %142 : vector<64x256xf32>
    %144 = arith.mulf %143, %143 : vector<64x256xf32>
    %cst_68 = arith.constant dense<0.000000e+00> : vector<64xf32>
    %145 = vector.multi_reduction <add>, %144, %cst_68 [1] : vector<64x256xf32> to vector<64xf32>
    %146 = vector.shape_cast %145 : vector<64xf32> to vector<64x1xf32>
    %cst_69 = arith.constant 2.560000e+02 : f32
    %147 = vector.broadcast %cst_69 : f32 to vector<64x1xf32>
    %148 = arith.divf %146, %147 : vector<64x1xf32>
    %cst_70 = arith.constant 9.99999974E-6 : f32
    %149 = vector.broadcast %cst_70 : f32 to vector<64x1xf32>
    %150 = arith.addf %148, %149 : vector<64x1xf32>
    %151 = math.rsqrt %150 : vector<64x1xf32>
    %152 = vector.broadcast %151 : vector<64x1xf32> to vector<64x256xf32>
    %153 = arith.mulf %143, %152 : vector<64x256xf32>
    %154 = vector.broadcast %135 : vector<1x256xf32> to vector<64x256xf32>
    %155 = arith.mulf %153, %154 : vector<64x256xf32>
    %156 = vector.broadcast %137 : vector<1x256xf32> to vector<64x256xf32>
    %157 = arith.addf %155, %156 : vector<64x256xf32>
    %c0_71 = arith.constant 0 : index
    %c0_72 = arith.constant 0 : index
    %158 = vector.load %arg20[%c0_71, %c0_72] : memref<64x256xf32, #tpu.memory_space<vmem>>, vector<64x256xf32>
    tpu.vector_store %arg20[%c0_71, %c0_72], %157 {strides = array<i32>} : memref<64x256xf32, #tpu.memory_space<vmem>>, vector<64x256xf32>,
    %c1_i32 = arith.constant 1 : i32
    %159 = arith.cmpi eq, %arg1, %c1_i32 : i32
    %160 = arith.extui %159 : i1 to i32
    %c0_i32_73 = arith.constant 0 : i32
    %161 = arith.cmpi ne, %160, %c0_i32_73 : i32
    scf.if %161 {
      %162 = arith.truncf %157 : vector<64x256xf32> to vector<64x256xbf16>
      %c0_74 = arith.constant 0 : index
      %c0_75 = arith.constant 0 : index
      %c0_76 = arith.constant 0 : index
      %163 = vector.load %arg18[%c0_74, %c0_75, %c0_76] : memref<1x64x256xbf16, #tpu.memory_space<vmem>>, vector<1x64x256xbf16>
      %164 = vector.shape_cast %163 : vector<1x64x256xbf16> to vector<64x256xbf16>
      %165 = vector.shape_cast %162 : vector<64x256xbf16> to vector<1x64x256xbf16>
      tpu.vector_store %arg18[%c0_74, %c0_75, %c0_76], %165 {strides = array<i32>} : memref<1x64x256xbf16, #tpu.memory_space<vmem>>, vector<1x64x256xbf16>,
      %c0_77 = arith.constant 0 : index
      %c0_78 = arith.constant 0 : index
      %c0_79 = arith.constant 0 : index
      %166 = vector.load %arg17[%c0_77, %c0_78, %c0_79] : memref<2x64x256xf32, #tpu.memory_space<vmem>>, vector<1x64x256xf32>
      %167 = vector.shape_cast %166 : vector<1x64x256xf32> to vector<64x256xf32>
      %168 = arith.mulf %157, %167 : vector<64x256xf32>
      %169 = vector.shape_cast %168 : vector<64x256xf32> to vector<1x64x256xf32>
      %cst_80 = arith.constant dense<0.000000e+00> : vector<1xf32>
      %170 = vector.multi_reduction <add>, %169, %cst_80 [1, 2] : vector<1x64x256xf32> to vector<1xf32>
      %171 = vector.shape_cast %170 : vector<1xf32> to vector<1x1x1xf32>
      %172 = vector.extract %171[0, 0, 0] : f32 from vector<1x1x1xf32>
      %c1 = arith.constant 1 : index
      %c0_81 = arith.constant 0 : index
      %c0_82 = arith.constant 0 : index
      %173 = vector.load %arg17[%c1, %c0_81, %c0_82] : memref<2x64x256xf32, #tpu.memory_space<vmem>>, vector<1x64x256xf32>
      %174 = vector.shape_cast %173 : vector<1x64x256xf32> to vector<64x256xf32>
      %175 = arith.mulf %157, %174 : vector<64x256xf32>
      %176 = vector.shape_cast %175 : vector<64x256xf32> to vector<1x64x256xf32>
      %cst_83 = arith.constant dense<0.000000e+00> : vector<1xf32>
      %177 = vector.multi_reduction <add>, %176, %cst_83 [1, 2] : vector<1x64x256xf32> to vector<1xf32>
      %178 = vector.shape_cast %177 : vector<1xf32> to vector<1x1x1xf32>
      %179 = vector.extract %178[0, 0, 0] : f32 from vector<1x1x1xf32>
      %180 = tpu.iota {dimensions = array<i32: 1>} : vector<1x128xi32>
      %c0_i32_84 = arith.constant 0 : i32
      %181 = vector.broadcast %c0_i32_84 : i32 to vector<1x128xi32>
      %182 = arith.cmpi eq, %180, %181 : vector<1x128xi32>
      %c1_i32_85 = arith.constant 1 : i32
      %183 = vector.broadcast %c1_i32_85 : i32 to vector<1x128xi32>
      %184 = arith.cmpi eq, %180, %183 : vector<1x128xi32>
      %cst_86 = arith.constant 0.000000e+00 : f32
      %185 = vector.broadcast %179 : f32 to vector<1x128xf32>
      %186 = vector.broadcast %cst_86 : f32 to vector<1x128xf32>
      %187 = arith.select %184, %185, %186 : vector<1x128xi1>, vector<1x128xf32>
      %188 = vector.broadcast %172 : f32 to vector<1x128xf32>
      %189 = arith.select %182, %188, %187 : vector<1x128xi1>, vector<1x128xf32>
      %190 = vector.shape_cast %189 : vector<1x128xf32> to vector<1x1x128xf32>
      %c0_87 = arith.constant 0 : index
      %c0_88 = arith.constant 0 : index
      %c0_89 = arith.constant 0 : index
      %191 = vector.load %arg19[%c0_87, %c0_88, %c0_89] : memref<1x1x128xf32, #tpu.memory_space<vmem>>, vector<1x1x128xf32>
      tpu.vector_store %arg19[%c0_87, %c0_88, %c0_89], %190 {strides = array<i32>} : memref<1x1x128xf32, #tpu.memory_space<vmem>>, vector<1x1x128xf32>,
    } else {
    }
    return
  }
  func.func @transform_0(%arg0: i32, %arg1: i32) -> (i32, i32, i32) {
    %c0_i32 = arith.constant 0 : i32
    %c0_i32_0 = arith.constant 0 : i32
    %c0_i32_1 = arith.constant 0 : i32
    return %arg0, %c0_i32, %c0_i32_0 : i32, i32, i32
  }
  func.func @transform_1(%arg0: i32, %arg1: i32) -> (i32, i32) {
    %c0_i32 = arith.constant 0 : i32
    %c0_i32_0 = arith.constant 0 : i32
    %c0_i32_1 = arith.constant 0 : i32
    return %c0_i32, %c0_i32_0 : i32, i32
  }
  func.func @transform_2(%arg0: i32, %arg1: i32) -> (i32, i32, i32) {
    %c0_i32 = arith.constant 0 : i32
    %c0_i32_0 = arith.constant 0 : i32
    %c0_i32_1 = arith.constant 0 : i32
    return %arg0, %c0_i32, %c0_i32_0 : i32, i32, i32
  }
  func.func @transform_3(%arg0: i32, %arg1: i32) -> (i32, i32, i32) {
    %c0_i32 = arith.constant 0 : i32
    %c0_i32_0 = arith.constant 0 : i32
    %c0_i32_1 = arith.constant 0 : i32
    return %arg1, %c0_i32, %c0_i32_0 : i32, i32, i32
  }
  func.func @transform_4(%arg0: i32, %arg1: i32) -> (i32, i32, i32) {
    %c0_i32 = arith.constant 0 : i32
    %c0_i32_0 = arith.constant 0 : i32
    %c0_i32_1 = arith.constant 0 : i32
    return %arg1, %c0_i32, %c0_i32_0 : i32, i32, i32
  }
  func.func @transform_5(%arg0: i32, %arg1: i32) -> (i32, i32, i32) {
    %c0_i32 = arith.constant 0 : i32
    %c0_i32_0 = arith.constant 0 : i32
    %c0_i32_1 = arith.constant 0 : i32
    return %arg1, %c0_i32, %c0_i32_0 : i32, i32, i32
  }
  func.func @transform_6(%arg0: i32, %arg1: i32) -> (i32, i32, i32) {
    %c0_i32 = arith.constant 0 : i32
    %c0_i32_0 = arith.constant 0 : i32
    %c0_i32_1 = arith.constant 0 : i32
    return %arg1, %c0_i32, %c0_i32_0 : i32, i32, i32
  }
  func.func @transform_7(%arg0: i32, %arg1: i32) -> (i32, i32, i32) {
    %c0_i32 = arith.constant 0 : i32
    %c0_i32_0 = arith.constant 0 : i32
    %c0_i32_1 = arith.constant 0 : i32
    return %arg1, %c0_i32, %c0_i32_0 : i32, i32, i32
  }
  func.func @transform_8(%arg0: i32, %arg1: i32) -> (i32, i32, i32) {
    %c0_i32 = arith.constant 0 : i32
    %c0_i32_0 = arith.constant 0 : i32
    %c0_i32_1 = arith.constant 0 : i32
    return %arg1, %c0_i32, %c0_i32_0 : i32, i32, i32
  }
  func.func @transform_9(%arg0: i32, %arg1: i32) -> (i32, i32, i32) {
    %c0_i32 = arith.constant 0 : i32
    %c0_i32_0 = arith.constant 0 : i32
    %c0_i32_1 = arith.constant 0 : i32
    return %arg1, %c0_i32, %c0_i32_0 : i32, i32, i32
  }
  func.func @transform_10(%arg0: i32, %arg1: i32) -> (i32, i32, i32) {
    %c0_i32 = arith.constant 0 : i32
    %c0_i32_0 = arith.constant 0 : i32
    %c0_i32_1 = arith.constant 0 : i32
    return %arg1, %c0_i32, %c0_i32_0 : i32, i32, i32
  }
  func.func @transform_11(%arg0: i32, %arg1: i32) -> (i32, i32, i32) {
    %c0_i32 = arith.constant 0 : i32
    %c0_i32_0 = arith.constant 0 : i32
    %c0_i32_1 = arith.constant 0 : i32
    return %arg1, %c0_i32, %c0_i32_0 : i32, i32, i32
  }
  func.func @transform_12(%arg0: i32, %arg1: i32) -> (i32, i32, i32) {
    %c0_i32 = arith.constant 0 : i32
    %c0_i32_0 = arith.constant 0 : i32
    %c0_i32_1 = arith.constant 0 : i32
    return %arg1, %c0_i32, %c0_i32_0 : i32, i32, i32
  }
  func.func @transform_13(%arg0: i32, %arg1: i32) -> (i32, i32, i32) {
    %c0_i32 = arith.constant 0 : i32
    %c0_i32_0 = arith.constant 0 : i32
    %c0_i32_1 = arith.constant 0 : i32
    return %arg1, %c0_i32, %c0_i32_0 : i32, i32, i32
  }
  func.func @transform_14(%arg0: i32, %arg1: i32) -> (i32, i32, i32) {
    %c0_i32 = arith.constant 0 : i32
    %c0_i32_0 = arith.constant 0 : i32
    %c0_i32_1 = arith.constant 0 : i32
    return %arg1, %c0_i32, %c0_i32_0 : i32, i32, i32
  }
  func.func @transform_15(%arg0: i32, %arg1: i32) -> (i32, i32, i32) {
    %c0_i32 = arith.constant 0 : i32
    %c0_i32_0 = arith.constant 0 : i32
    %c0_i32_1 = arith.constant 0 : i32
    %c0_i32_2 = arith.constant 0 : i32
    return %c0_i32, %c0_i32_0, %c0_i32_1 : i32, i32, i32
  }
  func.func @transform_16(%arg0: i32, %arg1: i32) -> (i32, i32, i32) {
    %c0_i32 = arith.constant 0 : i32
    %c0_i32_0 = arith.constant 0 : i32
    %c0_i32_1 = arith.constant 0 : i32
    return %arg0, %c0_i32, %c0_i32_0 : i32, i32, i32
  }
  func.func @transform_17(%arg0: i32, %arg1: i32) -> (i32, i32, i32) {
    %c0_i32 = arith.constant 0 : i32
    %c0_i32_0 = arith.constant 0 : i32
    %c0_i32_1 = arith.constant 0 : i32
    return %arg0, %c0_i32, %c0_i32_0 : i32, i32, i32
  }
}

module attributes {stable_mosaic.version = 11 : i64} {
  func.func @tail_kernel(%arg0: i32, %arg1: i32, %arg2: memref<128x256xbf16, #tpu.memory_space<vmem>>, %arg3: memref<256x768xbf16, #tpu.memory_space<vmem>>, %arg4: memref<1x768xf32, #tpu.memory_space<vmem>>, %arg5: memref<128x768xf32, #tpu.memory_space<vmem>>) attributes {dimension_semantics = [#tpu.dimension_semantics<parallel>, #tpu.dimension_semantics<parallel>], iteration_bounds = array<i64: 1, 6>, scalar_prefetch = 0 : i64, scratch_operands = 0 : i64, tpu.core_type = #tpu.core_type<tc>, window_params = [{transform_indices = @transform_0, window_bounds = array<i64: 128, 256>}, {transform_indices = @transform_1, window_bounds = array<i64: 256, 768>}, {transform_indices = @transform_2, window_bounds = array<i64: 1, 768>}, {transform_indices = @transform_3, window_bounds = array<i64: 128, 768>}]} {
    %c0 = arith.constant 0 : index
    %c0_0 = arith.constant 0 : index
    %0 = vector.load %arg2[%c0, %c0_0] : memref<128x256xbf16, #tpu.memory_space<vmem>>, vector<128x256xbf16>
    %c0_1 = arith.constant 0 : index
    %c0_2 = arith.constant 0 : index
    %1 = vector.load %arg3[%c0_1, %c0_2] : memref<256x768xbf16, #tpu.memory_space<vmem>>, vector<256x768xbf16>
    %cst = arith.constant dense<0.000000e+00> : vector<128x768xf32>
    %2 = tpu.matmul %0, %1, %cst {dimension_numbers = #tpu.dot_dimension_numbers<[1], [0], [0], [1], [0, 0, 1, 1], [], []>} : vector<128x256xbf16>, vector<256x768xbf16>, vector<128x768xf32> -> vector<128x768xf32>
    %c0_3 = arith.constant 0 : index
    %c0_4 = arith.constant 0 : index
    %3 = vector.load %arg4[%c0_3, %c0_4] : memref<1x768xf32, #tpu.memory_space<vmem>>, vector<1x768xf32>
    %4 = vector.broadcast %3 : vector<1x768xf32> to vector<128x768xf32>
    %5 = arith.addf %2, %4 : vector<128x768xf32>
    %c0_5 = arith.constant 0 : index
    %c0_6 = arith.constant 0 : index
    %6 = vector.load %arg5[%c0_5, %c0_6] : memref<128x768xf32, #tpu.memory_space<vmem>>, vector<128x768xf32>
    tpu.vector_store %arg5[%c0_5, %c0_6], %5 {strides = array<i32>} : memref<128x768xf32, #tpu.memory_space<vmem>>, vector<128x768xf32>,
    return
  }
  func.func @transform_0(%arg0: i32, %arg1: i32) -> (i32, i32) {
    %c0_i32 = arith.constant 0 : i32
    %c0_i32_0 = arith.constant 0 : i32
    return %arg0, %c0_i32 : i32, i32
  }
  func.func @transform_1(%arg0: i32, %arg1: i32) -> (i32, i32) {
    %c0_i32 = arith.constant 0 : i32
    %c0_i32_0 = arith.constant 0 : i32
    return %c0_i32, %arg1 : i32, i32
  }
  func.func @transform_2(%arg0: i32, %arg1: i32) -> (i32, i32) {
    %c0_i32 = arith.constant 0 : i32
    %c0_i32_0 = arith.constant 0 : i32
    return %c0_i32, %arg1 : i32, i32
  }
  func.func @transform_3(%arg0: i32, %arg1: i32) -> (i32, i32) {
    %c0_i32 = arith.constant 0 : i32
    return %arg0, %arg1 : i32, i32
  }
}

</mosaic_0001>

<bundles_post_ra>
// kernel: gpt_forward.3
= control target key start
LH: loop header
LB: loop body
LE: loop exit
PB: predicated region body
PF: predicated region fallthrough
CT: control target
= control target key end

     0   :  { %s2792_s12 = smov 0   ;;  %s2794_s13 = smov 0   ;;  %s3894_s0 = inlined_call_operand.vmem [shape: bf16[128,256], index: 0, kind: input, shape index: {}]   ;;  %s3895_s1 = inlined_call_operand.vmem [shape: bf16[256,4608], index: 1, kind: input, shape index: {}]   ;;  %s3896_s2 = inlined_call_operand.vmem [shape: f32[1,4608], index: 2, kind: input, shape index: {}]   ;;  %s3897_s3 = inlined_call_operand.vmem [shape: f32[128,4608], index: 3, kind: output, shape index: {}]  }
   0x1   :  { %s2796_s14 = smov 0   ;;  %s2798_s15 = smov 0  }
   0x2   :  { %s2800_s16 = smov 0  }
   0x3 LB: > { %s22_s17 = sadd.s32 1, %s2766_s15  ;;  %s2118_s18 = sadd.s32 4294967295, %s2770_s16   ;;  %s2770_s16 = sphi %s2800_s16, %s13_s16   ;;  %s2766_s15 = sphi %s2798_s15, %s3902_s15   ;;  %s2762_s14 = sphi %s2796_s14, %s3901_s14   ;;  %s2758_s13 = sphi %s2794_s13, %s3900_s13   ;;  %s2754_s12 = sphi %s2792_s12, %s3899_s12  }
   0x4   : > { %p23_p0 = scmp.ge.s32.totalorder %s22_s17, 6  ;;  %p65_p1 = scmp.ne.s32.totalorder %s2758_s13, %s2754_s12 }
   0x5   : > { %p66_p2 = scmp.eq.s32.totalorder %s2770_s16, 0  ;;  %p123_p4 = scmp.eq.s32.totalorder %s2118_s18, 5 }
   0x6   : > { %s3904_s17 = smov (%p23_p0, %s22_s17), 0  ;;  %s58_s20 = sadd.s32 1, %s2758_s13 }
   0x7   : > { %p67_p3 = por %p66_p2, %p65_p1  ;;  %s55_s19 = ssub.s32 %s2766_s15, %s3904_s17 }
   0x8   : > { %p56_p5 = scmp.eq.s32.totalorder %s55_s19, 0  ;;  %p2827_p6 = por %p123_p4, %p65_p1 }
   0x9   : > { %p2122_p7 = scmp.ge.s32.totalorder %s2770_s16, 6 }
   0xa   : > { %s2832_s22 = scalar_select %p56_p5, %s2758_s13, %s58_s20  }
   0xb   : > { %155 = sbr.rel (%p2122_p7) target bundleno = 117 (0x75), region = 20 }
  0x10   : > { %158 = sbr.rel (!%p67_p3) target bundleno = 117 (0x75), region = 24  ;;  %s160_s23 = sand.u32 (%p67_p3), 1, %s2758_s13  }
  0x11   : > { %s2576_s24 = smul.u32 (%p67_p3), 24, %s2766_s15 }
  0x12   : > { %s2690_s25 = smul.u32 (%p67_p3), 768, %s160_s23 }
  0x13   : > { %s2840_s28 = scalar_lea.vmem (%p67_p3), %s3895_s1, %s2576_s24 }
  0x14   : > { %v178_v0 = vld [vmem:[%s2840_s28] sm:$0xff] (%p67_p3)  ;;  %v180_v1 = vld [vmem:[%s2840_s28 + $0x8] sm:$0xff] (%p67_p3)  ;;  %v182_v2 = vld [vmem:[%s2840_s28 + $0x10] sm:$0xff] (%p67_p3)  ;;  %s2845_s29 = scalar_lea.vmem (%p67_p3), [#allocation2], %s2690_s25 }
  0x15   : > { %179 = vst [vmem:[%s2845_s29] sm:$0xff] %v178_v0  ;;  %v184_v3 = vld [vmem:[%s2840_s28 + $0x90] sm:$0xff]  ;;  %v186_v4 = vld [vmem:[%s2840_s28 + $0x98] sm:$0xff]  ;;  %v188_v5 = vld [vmem:[%s2840_s28 + $0xa0] sm:$0xff] }
  0x16   : > { %181 = vst [vmem:[%s2845_s29 + $0x8] sm:$0xff] %v180_v1  ;;  %v190_v6 = vld [vmem:[%s2840_s28 + $0x120] sm:$0xff]  ;;  %v192_v7 = vld [vmem:[%s2840_s28 + $0x128] sm:$0xff]  ;;  %v194_v8 = vld [vmem:[%s2840_s28 + $0x130] sm:$0xff] }
  0x17   : > { %183 = vst [vmem:[%s2845_s29 + $0x10] sm:$0xff] %v182_v2  ;;  %v196_v9 = vld [vmem:[%s2840_s28 + $0x1b0] sm:$0xff]  ;;  %v198_v10 = vld [vmem:[%s2840_s28 + $0x1b8] sm:$0xff]  ;;  %v200_v11 = vld [vmem:[%s2840_s28 + $0x1c0] sm:$0xff] }
  0x18   : > { %185 = vst [vmem:[%s2845_s29 + $0x18] sm:$0xff] %v184_v3  ;;  %v202_v12 = vld [vmem:[%s2840_s28 + $0x240] sm:$0xff]  ;;  %v204_v13 = vld [vmem:[%s2840_s28 + $0x248] sm:$0xff]  ;;  %v206_v14 = vld [vmem:[%s2840_s28 + $0x250] sm:$0xff] }
  0x19   : > { %187 = vst [vmem:[%s2845_s29 + $0x20] sm:$0xff] %v186_v4  ;;  %v208_v15 = vld [vmem:[%s2840_s28 + $0x2d0] sm:$0xff]  ;;  %v210_v16 = vld [vmem:[%s2840_s28 + $0x2d8] sm:$0xff]  ;;  %v212_v17 = vld [vmem:[%s2840_s28 + $0x2e0] sm:$0xff] }
  0x1a   : > { %189 = vst [vmem:[%s2845_s29 + $0x28] sm:$0xff] %v188_v5  ;;  %v214_v18 = vld [vmem:[%s2840_s28 + $0x360] sm:$0xff]  ;;  %v216_v19 = vld [vmem:[%s2840_s28 + $0x368] sm:$0xff]  ;;  %v218_v20 = vld [vmem:[%s2840_s28 + $0x370] sm:$0xff] }
  0x1b   : > { %191 = vst [vmem:[%s2845_s29 + $0x30] sm:$0xff] %v190_v6  ;;  %v220_v21 = vld [vmem:[%s2840_s28 + $0x3f0] sm:$0xff]  ;;  %v222_v22 = vld [vmem:[%s2840_s28 + $0x3f8] sm:$0xff]  ;;  %v224_v23 = vld [vmem:[%s2840_s28 + $0x400] sm:$0xff] }
  0x1c   : > { %193 = vst [vmem:[%s2845_s29 + $0x38] sm:$0xff] %v192_v7  ;;  %v226_v24 = vld [vmem:[%s2840_s28 + $0x480] sm:$0xff]  ;;  %v228_v25 = vld [vmem:[%s2840_s28 + $0x488] sm:$0xff]  ;;  %v230_v26 = vld [vmem:[%s2840_s28 + $0x490] sm:$0xff] }
  0x1d   : > { %195 = vst [vmem:[%s2845_s29 + $0x40] sm:$0xff] %v194_v8  ;;  %v232_v27 = vld [vmem:[%s2840_s28 + $0x510] sm:$0xff]  ;;  %v234_v28 = vld [vmem:[%s2840_s28 + $0x518] sm:$0xff]  ;;  %v236_v29 = vld [vmem:[%s2840_s28 + $0x520] sm:$0xff] }
  0x1e   : > { %197 = vst [vmem:[%s2845_s29 + $0x48] sm:$0xff] %v196_v9  ;;  %v238_v30 = vld [vmem:[%s2840_s28 + $0x5a0] sm:$0xff]  ;;  %v240_v31 = vld [vmem:[%s2840_s28 + $0x5a8] sm:$0xff]  ;;  %v242_v32 = vld [vmem:[%s2840_s28 + $0x5b0] sm:$0xff] }
  0x1f   : > { %199 = vst [vmem:[%s2845_s29 + $0x50] sm:$0xff] %v198_v10  ;;  %v244_v33 = vld [vmem:[%s2840_s28 + $0x630] sm:$0xff]  ;;  %v246_v34 = vld [vmem:[%s2840_s28 + $0x638] sm:$0xff]  ;;  %v248_v35 = vld [vmem:[%s2840_s28 + $0x640] sm:$0xff] }
  0x20   : > { %201 = vst [vmem:[%s2845_s29 + $0x58] sm:$0xff] %v200_v11  ;;  %v250_v36 = vld [vmem:[%s2840_s28 + $0x6c0] sm:$0xff]  ;;  %v252_v37 = vld [vmem:[%s2840_s28 + $0x6c8] sm:$0xff]  ;;  %v254_v38 = vld [vmem:[%s2840_s28 + $0x6d0] sm:$0xff] }
  0x21   : > { %203 = vst [vmem:[%s2845_s29 + $0x60] sm:$0xff] %v202_v12  ;;  %v256_v39 = vld [vmem:[%s2840_s28 + $0x750] sm:$0xff]  ;;  %v258_v40 = vld [vmem:[%s2840_s28 + $0x758] sm:$0xff]  ;;  %v260_v41 = vld [vmem:[%s2840_s28 + $0x760] sm:$0xff] }
  0x22   : > { %205 = vst [vmem:[%s2845_s29 + $0x68] sm:$0xff] %v204_v13  ;;  %v262_v42 = vld [vmem:[%s2840_s28 + $0x7e0] sm:$0xff]  ;;  %v264_v43 = vld [vmem:[%s2840_s28 + $0x7e8] sm:$0xff]  ;;  %v266_v44 = vld [vmem:[%s2840_s28 + $0x7f0] sm:$0xff] }
  0x23   : > { %207 = vst [vmem:[%s2845_s29 + $0x70] sm:$0xff] %v206_v14  ;;  %v268_v45 = vld [vmem:[%s2840_s28 + $0x870] sm:$0xff]  ;;  %v270_v46 = vld [vmem:[%s2840_s28 + $0x878] sm:$0xff]  ;;  %v272_v47 = vld [vmem:[%s2840_s28 + $0x880] sm:$0xff] }
  0x24   : > { %209 = vst [vmem:[%s2845_s29 + $0x78] sm:$0xff] %v208_v15  ;;  %v274_v48 = vld [vmem:[%s2840_s28 + $0x900] sm:$0xff]  ;;  %v276_v49 = vld [vmem:[%s2840_s28 + $0x908] sm:$0xff]  ;;  %v278_v50 = vld [vmem:[%s2840_s28 + $0x910] sm:$0xff] }
  0x25   : > { %211 = vst [vmem:[%s2845_s29 + $0x80] sm:$0xff] %v210_v16  ;;  %v280_v51 = vld [vmem:[%s2840_s28 + $0x990] sm:$0xff]  ;;  %v282_v52 = vld [vmem:[%s2840_s28 + $0x998] sm:$0xff]  ;;  %v284_v53 = vld [vmem:[%s2840_s28 + $0x9a0] sm:$0xff] }
  0x26   : > { %213 = vst [vmem:[%s2845_s29 + $0x88] sm:$0xff] %v212_v17  ;;  %v286_v54 = vld [vmem:[%s2840_s28 + $0xa20] sm:$0xff]  ;;  %v288_v55 = vld [vmem:[%s2840_s28 + $0xa28] sm:$0xff]  ;;  %v290_v56 = vld [vmem:[%s2840_s28 + $0xa30] sm:$0xff] }
  0x27   : > { %215 = vst [vmem:[%s2845_s29 + $0x90] sm:$0xff] %v214_v18  ;;  %v292_v57 = vld [vmem:[%s2840_s28 + $0xab0] sm:$0xff]  ;;  %v294_v58 = vld [vmem:[%s2840_s28 + $0xab8] sm:$0xff]  ;;  %v296_v59 = vld [vmem:[%s2840_s28 + $0xac0] sm:$0xff] }
  0x28   : > { %217 = vst [vmem:[%s2845_s29 + $0x98] sm:$0xff] %v216_v19  ;;  %v298_v60 = vld [vmem:[%s2840_s28 + $0xb40] sm:$0xff]  ;;  %v300_v61 = vld [vmem:[%s2840_s28 + $0xb48] sm:$0xff]  ;;  %v302_v62 = vld [vmem:[%s2840_s28 + $0xb50] sm:$0xff] }
  0x29   : > { %219 = vst [vmem:[%s2845_s29 + $0xa0] sm:$0xff] %v218_v20  ;;  %v304_v63 = vld [vmem:[%s2840_s28 + $0xbd0] sm:$0xff]  ;;  %v306_v0 = vld [vmem:[%s2840_s28 + $0xbd8] sm:$0xff]  ;;  %v308_v1 = vld [vmem:[%s2840_s28 + $0xbe0] sm:$0xff] }
  0x2a   : > { %221 = vst [vmem:[%s2845_s29 + $0xa8] sm:$0xff] %v220_v21  ;;  %v310_v2 = vld [vmem:[%s2840_s28 + $0xc60] sm:$0xff]  ;;  %v312_v3 = vld [vmem:[%s2840_s28 + $0xc68] sm:$0xff]  ;;  %v314_v4 = vld [vmem:[%s2840_s28 + $0xc70] sm:$0xff] }
  0x2b   : > { %223 = vst [vmem:[%s2845_s29 + $0xb0] sm:$0xff] %v222_v22  ;;  %v316_v5 = vld [vmem:[%s2840_s28 + $0xcf0] sm:$0xff]  ;;  %v318_v6 = vld [vmem:[%s2840_s28 + $0xcf8] sm:$0xff]  ;;  %v320_v7 = vld [vmem:[%s2840_s28 + $0xd00] sm:$0xff] }
  0x2c   : > { %225 = vst [vmem:[%s2845_s29 + $0xb8] sm:$0xff] %v224_v23  ;;  %v322_v8 = vld [vmem:[%s2840_s28 + $0xd80] sm:$0xff]  ;;  %v324_v9 = vld [vmem:[%s2840_s28 + $0xd88] sm:$0xff]  ;;  %v326_v10 = vld [vmem:[%s2840_s28 + $0xd90] sm:$0xff] }
  0x2d   : > { %227 = vst [vmem:[%s2845_s29 + $0xc0] sm:$0xff] %v226_v24  ;;  %v328_v11 = vld [vmem:[%s2840_s28 + $0xe10] sm:$0xff]  ;;  %v330_v12 = vld [vmem:[%s2840_s28 + $0xe18] sm:$0xff]  ;;  %v332_v13 = vld [vmem:[%s2840_s28 + $0xe20] sm:$0xff] }
  0x2e   : > { %229 = vst [vmem:[%s2845_s29 + $0xc8] sm:$0xff] %v228_v25  ;;  %v334_v14 = vld [vmem:[%s2840_s28 + $0xea0] sm:$0xff]  ;;  %v336_v15 = vld [vmem:[%s2840_s28 + $0xea8] sm:$0xff]  ;;  %v338_v16 = vld [vmem:[%s2840_s28 + $0xeb0] sm:$0xff] }
  0x2f   : > { %231 = vst [vmem:[%s2845_s29 + $0xd0] sm:$0xff] %v230_v26  ;;  %v340_v17 = vld [vmem:[%s2840_s28 + $0xf30] sm:$0xff]  ;;  %v342_v18 = vld [vmem:[%s2840_s28 + $0xf38] sm:$0xff]  ;;  %v344_v19 = vld [vmem:[%s2840_s28 + $0xf40] sm:$0xff] }
  0x30   : > { %233 = vst [vmem:[%s2845_s29 + $0xd8] sm:$0xff] %v232_v27  ;;  %v346_v20 = vld [vmem:[%s2840_s28 + $0xfc0] sm:$0xff]  ;;  %v348_v21 = vld [vmem:[%s2840_s28 + $0xfc8] sm:$0xff]  ;;  %v350_v22 = vld [vmem:[%s2840_s28 + $0xfd0] sm:$0xff] }
  0x31   : > { %235 = vst [vmem:[%s2845_s29 + $0xe0] sm:$0xff] %v234_v28  ;;  %v352_v23 = vld [vmem:[%s2840_s28 + $0x1050] sm:$0xff]  ;;  %v354_v24 = vld [vmem:[%s2840_s28 + $0x1058] sm:$0xff]  ;;  %v356_v25 = vld [vmem:[%s2840_s28 + $0x1060] sm:$0xff] }
  0x32   : > { %237 = vst [vmem:[%s2845_s29 + $0xe8] sm:$0xff] %v236_v29  ;;  %v358_v26 = vld [vmem:[%s2840_s28 + $0x10e0] sm:$0xff]  ;;  %v360_v27 = vld [vmem:[%s2840_s28 + $0x10e8] sm:$0xff]  ;;  %v362_v28 = vld [vmem:[%s2840_s28 + $0x10f0] sm:$0xff] }
  0x33   : > { %239 = vst [vmem:[%s2845_s29 + $0xf0] sm:$0xff] %v238_v30  ;;  %v364_v29 = vld [vmem:[%s2840_s28 + $0x1170] sm:$0xff]  ;;  %v366_v30 = vld [vmem:[%s2840_s28 + $0x1178] sm:$0xff] }
  0x34   : > { %241 = vst [vmem:[%s2845_s29 + $0xf8] sm:$0xff] %v240_v31  ;;  %v368_v31 = vld [vmem:[%s2840_s28 + $0x1180] sm:$0xff] }
  0x35   : > { %243 = vst [vmem:[%s2845_s29 + $0x100] sm:$0xff] %v242_v32 }
  0x36   : > { %245 = vst [vmem:[%s2845_s29 + $0x108] sm:$0xff] %v244_v33 }
  0x37   : > { %247 = vst [vmem:[%s2845_s29 + $0x110] sm:$0xff] %v246_v34 }
  0x38   : > { %249 = vst [vmem:[%s2845_s29 + $0x118] sm:$0xff] %v248_v35 }
  0x39   : > { %251 = vst [vmem:[%s2845_s29 + $0x120] sm:$0xff] %v250_v36 }
  0x3a   : > { %253 = vst [vmem:[%s2845_s29 + $0x128] sm:$0xff] %v252_v37 }
  0x3b   : > { %255 = vst [vmem:[%s2845_s29 + $0x130] sm:$0xff] %v254_v38 }
  0x3c   : > { %257 = vst [vmem:[%s2845_s29 + $0x138] sm:$0xff] %v256_v39 }
  0x3d   : > { %259 = vst [vmem:[%s2845_s29 + $0x140] sm:$0xff] %v258_v40 }
  0x3e   : > { %261 = vst [vmem:[%s2845_s29 + $0x148] sm:$0xff] %v260_v41 }
  0x3f   : > { %263 = vst [vmem:[%s2845_s29 + $0x150] sm:$0xff] %v262_v42 }
  0x40   : > { %265 = vst [vmem:[%s2845_s29 + $0x158] sm:$0xff] %v264_v43 }
  0x41   : > { %267 = vst [vmem:[%s2845_s29 + $0x160] sm:$0xff] %v266_v44 }
  0x42   : > { %269 = vst [vmem:[%s2845_s29 + $0x168] sm:$0xff] %v268_v45 }
  0x43   : > { %271 = vst [vmem:[%s2845_s29 + $0x170] sm:$0xff] %v270_v46 }
  0x44   : > { %273 = vst [vmem:[%s2845_s29 + $0x178] sm:$0xff] %v272_v47 }
  0x45   : > { %275 = vst [vmem:[%s2845_s29 + $0x180] sm:$0xff] %v274_v48 }
  0x46   : > { %277 = vst [vmem:[%s2845_s29 + $0x188] sm:$0xff] %v276_v49 }
  0x47   : > { %279 = vst [vmem:[%s2845_s29 + $0x190] sm:$0xff] %v278_v50 }
  0x48   : > { %281 = vst [vmem:[%s2845_s29 + $0x198] sm:$0xff] %v280_v51 }
  0x49   : > { %283 = vst [vmem:[%s2845_s29 + $0x1a0] sm:$0xff] %v282_v52 }
  0x4a   : > { %285 = vst [vmem:[%s2845_s29 + $0x1a8] sm:$0xff] %v284_v53 }
  0x4b   : > { %287 = vst [vmem:[%s2845_s29 + $0x1b0] sm:$0xff] %v286_v54 }
  0x4c   : > { %289 = vst [vmem:[%s2845_s29 + $0x1b8] sm:$0xff] %v288_v55 }
  0x4d   : > { %291 = vst [vmem:[%s2845_s29 + $0x1c0] sm:$0xff] %v290_v56 }
  0x4e   : > { %293 = vst [vmem:[%s2845_s29 + $0x1c8] sm:$0xff] %v292_v57 }
  0x4f   : > { %295 = vst [vmem:[%s2845_s29 + $0x1d0] sm:$0xff] %v294_v58 }
  0x50   : > { %297 = vst [vmem:[%s2845_s29 + $0x1d8] sm:$0xff] %v296_v59 }
  0x51   : > { %299 = vst [vmem:[%s2845_s29 + $0x1e0] sm:$0xff] %v298_v60 }
  0x52   : > { %301 = vst [vmem:[%s2845_s29 + $0x1e8] sm:$0xff] %v300_v61 }
  0x53   : > { %303 = vst [vmem:[%s2845_s29 + $0x1f0] sm:$0xff] %v302_v62 }
  0x54   : > { %305 = vst [vmem:[%s2845_s29 + $0x1f8] sm:$0xff] %v304_v63 }
  0x55   : > { %307 = vst [vmem:[%s2845_s29 + $0x200] sm:$0xff] %v306_v0 }
  0x56   : > { %309 = vst [vmem:[%s2845_s29 + $0x208] sm:$0xff] %v308_v1 }
  0x57   : > { %311 = vst [vmem:[%s2845_s29 + $0x210] sm:$0xff] %v310_v2 }
  0x58   : > { %313 = vst [vmem:[%s2845_s29 + $0x218] sm:$0xff] %v312_v3 }
  0x59   : > { %315 = vst [vmem:[%s2845_s29 + $0x220] sm:$0xff] %v314_v4 }
  0x5a   : > { %317 = vst [vmem:[%s2845_s29 + $0x228] sm:$0xff] %v316_v5 }
  0x5b   : > { %319 = vst [vmem:[%s2845_s29 + $0x230] sm:$0xff] %v318_v6 }
  0x5c   : > { %321 = vst [vmem:[%s2845_s29 + $0x238] sm:$0xff] %v320_v7 }
  0x5d   : > { %323 = vst [vmem:[%s2845_s29 + $0x240] sm:$0xff] %v322_v8 }
  0x5e   : > { %325 = vst [vmem:[%s2845_s29 + $0x248] sm:$0xff] %v324_v9 }
  0x5f   : > { %327 = vst [vmem:[%s2845_s29 + $0x250] sm:$0xff] %v326_v10 }
  0x60   : > { %329 = vst [vmem:[%s2845_s29 + $0x258] sm:$0xff] %v328_v11 }
  0x61   : > { %331 = vst [vmem:[%s2845_s29 + $0x260] sm:$0xff] %v330_v12 }
  0x62   : > { %333 = vst [vmem:[%s2845_s29 + $0x268] sm:$0xff] %v332_v13 }
  0x63   : > { %335 = vst [vmem:[%s2845_s29 + $0x270] sm:$0xff] %v334_v14 }
  0x64   : > { %337 = vst [vmem:[%s2845_s29 + $0x278] sm:$0xff] %v336_v15 }
  0x65   : > { %339 = vst [vmem:[%s2845_s29 + $0x280] sm:$0xff] %v338_v16 }
  0x66   : > { %341 = vst [vmem:[%s2845_s29 + $0x288] sm:$0xff] %v340_v17 }
  0x67   : > { %343 = vst [vmem:[%s2845_s29 + $0x290] sm:$0xff] %v342_v18 }
  0x68   : > { %345 = vst [vmem:[%s2845_s29 + $0x298] sm:$0xff] %v344_v19 }
  0x69   : > { %347 = vst [vmem:[%s2845_s29 + $0x2a0] sm:$0xff] %v346_v20 }
  0x6a   : > { %349 = vst [vmem:[%s2845_s29 + $0x2a8] sm:$0xff] %v348_v21 }
  0x6b   : > { %351 = vst [vmem:[%s2845_s29 + $0x2b0] sm:$0xff] %v350_v22 }
  0x6c   : > { %353 = vst [vmem:[%s2845_s29 + $0x2b8] sm:$0xff] %v352_v23 }
  0x6d   : > { %355 = vst [vmem:[%s2845_s29 + $0x2c0] sm:$0xff] %v354_v24 }
  0x6e   : > { %357 = vst [vmem:[%s2845_s29 + $0x2c8] sm:$0xff] %v356_v25 }
  0x6f   : > { %359 = vst [vmem:[%s2845_s29 + $0x2d0] sm:$0xff] %v358_v26 }
  0x70   : > { %361 = vst [vmem:[%s2845_s29 + $0x2d8] sm:$0xff] %v360_v27 }
  0x71   : > { %363 = vst [vmem:[%s2845_s29 + $0x2e0] sm:$0xff] %v362_v28 }
  0x72   : > { %365 = vst [vmem:[%s2845_s29 + $0x2e8] sm:$0xff] %v364_v29 }
  0x73   : > { %367 = vst [vmem:[%s2845_s29 + $0x2f0] sm:$0xff] %v366_v30 }
  0x74   : > { %369 = vst [vmem:[%s2845_s29 + $0x2f8] sm:$0xff] %v368_v31 }
  0x75 PF: > { %p2124_p8 = scmp.ge.s32.totalorder %s2770_s16, 1  ;;  %p382_p9 = scmp.lt.s32.totalorder %s2770_s16, 7 }
  0x77   : > { %p383_p10 = pnand %p2124_p8, %p382_p9 }
  0x78   : > { %s389_s30 = sand.u32 (!%p383_p10), 1, %s2754_s12   ;;  %s429_s8 = smul.u32 (!%p383_p10), 6, %s2762_s14 }
  0x79   : > { %386 = sbr.rel (%p383_p10) target bundleno = 722 (0x2d2), region = 51 }
  0x7a   : > { %s3039_s4 = smul.u32 (!%p383_p10), 768, %s389_s30  ;;  %p430_p11 = scmp.lt.s32.totalorder (!%p383_p10), %s429_s8, 35 }
  0x7c   : > { %s3042_s5 = scalar_lea.vmem (!%p383_p10), [#allocation2], %s3039_s4  ;;  %s3365_s27 = scalar_lea.vmem (!%p383_p10), [#allocation3], %s3039_s4 }
  0x7e   : > { %v2359_v32 = vld [vmem:[%s3042_s5 + $0x150] sm:$0xf]  ;;  %v2638_v33 = vld [vmem:[%s3042_s5 + $0x164] sm:$0xf0]  ;;  %v2635_v37 = vld [vmem:[%s3042_s5 + $0x154] sm:$0xf] }
  0x7f   : > { %v2551_v34 = vld [vmem:[%s3042_s5 + $0x2d0] sm:$0xf]  ;;  %v2360_v35 = vor.u32 %v2638_v33, %v2359_v32  ;;  %v2686_v36 = vld [vmem:[%s3042_s5 + $0x2e4] sm:$0xf0]  ;;  %v2361_v38 = vld [vmem:[%s3042_s5 + $0x168] sm:$0xf0] }
  0x80   : > { %v2552_v39 = vor.u32 %v2686_v36, %v2551_v34  ;;  %v2364_v40 = vor.u32 %v2635_v37, %v2361_v38  ;;  %v2683_v41 = vld [vmem:[%s3042_s5 + $0x2d4] sm:$0xf]  ;;  %v2553_v42 = vld [vmem:[%s3042_s5 + $0x2e8] sm:$0xf0]  ;;  %v2335_v43 = vld [vmem:[%s3042_s5 + $0x120] sm:$0xf] }
  0x81   : > { %1122 = vmatpush.bf16.msra.mxu0 %v2360_v35  ;;  %v2556_v44 = vor.u32 %v2683_v41, %v2553_v42  ;;  %v2632_v45 = vld [vmem:[%s3042_s5 + $0x134] sm:$0xf0]  ;;  %v2527_v46 = vld [vmem:[%s3042_s5 + $0x2a0] sm:$0xf]  ;;  %v2629_v50 = vld [vmem:[%s3042_s5 + $0x124] sm:$0xf] }
  0x82   : > { %v2680_v47 = vld [vmem:[%s3042_s5 + $0x2b4] sm:$0xf0]  ;;  %1171 = vmatpush.bf16.msra.mxu1 %v2552_v39  ;;  %1220 = vmatpush.bf16.msra.mxu2 %v2364_v40  ;;  %v2336_v48 = vor.u32 %v2632_v45, %v2335_v43  ;;  %v2337_v51 = vld [vmem:[%s3042_s5 + $0x138] sm:$0xf0]  ;;  %v2677_v52 = vld [vmem:[%s3042_s5 + $0x2a4] sm:$0xf] }
  0x83   : > { %v2528_v49 = vor.u32 %v2680_v47, %v2527_v46  ;;  %1269 = vmatpush.bf16.msra.mxu3 %v2556_v44  ;;  %v2340_v53 = vor.u32 %v2629_v50, %v2337_v51  ;;  %v2529_v54 = vld [vmem:[%s3042_s5 + $0x2b8] sm:$0xf0]  ;;  %v2311_v55 = vld [vmem:[%s3042_s5 + $0xf0] sm:$0xf]  ;;  %v2626_v56 = vld [vmem:[%s3042_s5 + $0x104] sm:$0xf0] }
  0x84   : > { %v2532_v57 = vor.u32 %v2677_v52, %v2529_v54  ;;  %v2503_v58 = vld [vmem:[%s3042_s5 + $0x270] sm:$0xf]  ;;  %v2674_v59 = vld [vmem:[%s3042_s5 + $0x284] sm:$0xf0]  ;;  %v2623_v60 = vld [vmem:[%s3042_s5 + $0xf4] sm:$0xf]  ;;  %v2312_v61 = vor.u32 %v2626_v56, %v2311_v55 }
  0x85   : > { %1123 = vmatpush.bf16.msra.mxu0 %v2336_v48  ;;  %v2313_v62 = vld [vmem:[%s3042_s5 + $0x108] sm:$0xf0]  ;;  %v2671_v63 = vld [vmem:[%s3042_s5 + $0x274] sm:$0xf]  ;;  %v2504_v1 = vor.u32 %v2674_v59, %v2503_v58  ;;  %v2287_v3 = vld [vmem:[%s3042_s5 + $0xc0] sm:$0xf] }
  0x86   : > { %v2505_v0 = vld [vmem:[%s3042_s5 + $0x288] sm:$0xf0]  ;;  %1172 = vmatpush.bf16.msra.mxu1 %v2528_v49  ;;  %1221 = vmatpush.bf16.msra.mxu2 %v2340_v53  ;;  %v2316_v2 = vor.u32 %v2623_v60, %v2313_v62  ;;  %v2620_v4 = vld [vmem:[%s3042_s5 + $0xd4] sm:$0xf0]  ;;  %v2479_v5 = vld [vmem:[%s3042_s5 + $0x240] sm:$0xf] }
  0x87   : > { %1270 = vmatpush.bf16.msra.mxu3 %v2532_v57  ;;  %v2508_v6 = vor.u32 %v2671_v63, %v2505_v0  ;;  %v2668_v7 = vld [vmem:[%s3042_s5 + $0x254] sm:$0xf0]  ;;  %v2617_v8 = vld [vmem:[%s3042_s5 + $0xc4] sm:$0xf]  ;;  %v2289_v9 = vld [vmem:[%s3042_s5 + $0xd8] sm:$0xf0]  ;;  %v2288_v12 = vor.u32 %v2620_v4, %v2287_v3 }
  0x88   : > { %v2665_v10 = vld [vmem:[%s3042_s5 + $0x244] sm:$0xf]  ;;  %v2481_v11 = vld [vmem:[%s3042_s5 + $0x258] sm:$0xf0]  ;;  %v2480_v13 = vor.u32 %v2668_v7, %v2479_v5  ;;  %v2292_v14 = vor.u32 %v2617_v8, %v2289_v9  ;;  %v2263_v15 = vld [vmem:[%s3042_s5 + $0x90] sm:$0xf] }
  0x89   : > { %1124 = vmatpush.bf16.msra.mxu0 %v2312_v61  ;;  %v2614_v16 = vld [vmem:[%s3042_s5 + $0xa4] sm:$0xf0]  ;;  %v2455_v17 = vld [vmem:[%s3042_s5 + $0x210] sm:$0xf]  ;;  %v2484_v18 = vor.u32 %v2665_v10, %v2481_v11  ;;  %v2611_v20 = vld [vmem:[%s3042_s5 + $0x94] sm:$0xf] }
  0x8a   : > { %1173 = vmatpush.bf16.msra.mxu1 %v2504_v1  ;;  %1222 = vmatpush.bf16.msra.mxu2 %v2316_v2  ;;  %v2662_v19 = vld [vmem:[%s3042_s5 + $0x224] sm:$0xf0]  ;;  %v2265_v21 = vld [vmem:[%s3042_s5 + $0xa8] sm:$0xf0]  ;;  %v2659_v22 = vld [vmem:[%s3042_s5 + $0x214] sm:$0xf]  ;;  %v2264_v24 = vor.u32 %v2614_v16, %v2263_v15 }
  0x8b   : > { %1271 = vmatpush.bf16.msra.mxu3 %v2508_v6  ;;  %v2457_v23 = vld [vmem:[%s3042_s5 + $0x228] sm:$0xf0]  ;;  %v2456_v25 = vor.u32 %v2662_v19, %v2455_v17  ;;  %v2268_v26 = vor.u32 %v2611_v20, %v2265_v21  ;;  %v2239_v27 = vld [vmem:[%s3042_s5 + $0x60] sm:$0xf]  ;;  %v2608_v28 = vld [vmem:[%s3042_s5 + $0x74] sm:$0xf0] }
  0x8c   : > { %v2431_v29 = vld [vmem:[%s3042_s5 + $0x1e0] sm:$0xf]  ;;  %v2460_v30 = vor.u32 %v2659_v22, %v2457_v23  ;;  %v2656_v31 = vld [vmem:[%s3042_s5 + $0x1f4] sm:$0xf0]  ;;  %v2605_v32 = vld [vmem:[%s3042_s5 + $0x64] sm:$0xf]  ;;  %v2240_v36 = vor.u32 %v2608_v28, %v2239_v27 }
  0x8d   : > { %1125 = vmatpush.bf16.msra.mxu0 %v2288_v12  ;;  %v2241_v33 = vld [vmem:[%s3042_s5 + $0x78] sm:$0xf0]  ;;  %v2653_v34 = vld [vmem:[%s3042_s5 + $0x1e4] sm:$0xf]  ;;  %v2432_v37 = vor.u32 %v2656_v31, %v2431_v29  ;;  %v2215_v39 = vld [vmem:[%s3042_s5 + $0x30] sm:$0xf] }
  0x8e   : > { %1174 = vmatpush.bf16.msra.mxu1 %v2480_v13  ;;  %1223 = vmatpush.bf16.msra.mxu2 %v2292_v14  ;;  %v2433_v35 = vld [vmem:[%s3042_s5 + $0x1f8] sm:$0xf0]  ;;  %v2244_v38 = vor.u32 %v2605_v32, %v2241_v33  ;;  %v2602_v40 = vld [vmem:[%s3042_s5 + $0x44] sm:$0xf0]  ;;  %v2407_v41 = vld [vmem:[%s3042_s5 + $0x1b0] sm:$0xf] }
  0x8f   : > { %1272 = vmatpush.bf16.msra.mxu3 %v2484_v18  ;;  %v2436_v42 = vor.u32 %v2653_v34, %v2433_v35  ;;  %v2650_v43 = vld [vmem:[%s3042_s5 + $0x1c4] sm:$0xf0]  ;;  %v2599_v44 = vld [vmem:[%s3042_s5 + $0x34] sm:$0xf]  ;;  %v2217_v45 = vld [vmem:[%s3042_s5 + $0x48] sm:$0xf0]  ;;  %v2216_v48 = vor.u32 %v2602_v40, %v2215_v39 }
  0x90   : > { %v2647_v46 = vld [vmem:[%s3042_s5 + $0x1b4] sm:$0xf]  ;;  %v2409_v47 = vld [vmem:[%s3042_s5 + $0x1c8] sm:$0xf0]  ;;  %v2191_v49 = vld [vmem:[%s3042_s5] sm:$0xf]  ;;  %v2408_v51 = vor.u32 %v2650_v43, %v2407_v41  ;;  %v2220_v52 = vor.u32 %v2599_v44, %v2217_v45 }
  0x91   : > { %1126 = vmatpush.bf16.msra.mxu0 %v2264_v24  ;;  %v2596_v50 = vld [vmem:[%s3042_s5 + $0x14] sm:$0xf0]  ;;  %v2383_v53 = vld [vmem:[%s3042_s5 + $0x180] sm:$0xf]  ;;  %v2593_v55 = vld [vmem:[%s3042_s5 + $0x4] sm:$0xf]  ;;  %v2412_v56 = vor.u32 %v2647_v46, %v2409_v47 }
  0x92   : > { %1175 = vmatpush.bf16.msra.mxu1 %v2456_v25  ;;  %1224 = vmatpush.bf16.msra.mxu2 %v2268_v26  ;;  %v2644_v54 = vld [vmem:[%s3042_s5 + $0x194] sm:$0xf0]  ;;  %v2193_v57 = vld [vmem:[%s3042_s5 + $0x18] sm:$0xf0]  ;;  %v2641_v58 = vld [vmem:[%s3042_s5 + $0x184] sm:$0xf]  ;;  %v2192_v63 = vor.u32 %v2596_v50, %v2191_v49 }
  0x93   : > { %1273 = vmatpush.bf16.msra.mxu3 %v2460_v30  ;;  %v2385_v59 = vld [vmem:[%s3042_s5 + $0x198] sm:$0xf0]  ;;  %v2127_v60 = vld [vmem:[%s3894_s0] sm:$0xf]  ;;  %v2369_v62 = vld [vmem:[%s3042_s5 + $0x170] sm:$0xf0]  ;;  %v2384_v3 = vor.u32 %v2644_v54, %v2383_v53  ;;  %v2196_v4 = vor.u32 %v2593_v55, %v2193_v57 }
  0x94   : > { %v2636_v61 = vld [vmem:[%s3042_s5 + $0x15c] sm:$0xf]  ;;  %v2578_v0 = vld [vmem:[%s3894_s0 + $0x4] sm:$0xf0]  ;;  %v2561_v2 = vld [vmem:[%s3042_s5 + $0x2f0] sm:$0xf0]  ;;  %v2388_v7 = vor.u32 %v2641_v58, %v2385_v59 }
  0x95   : > { %1127 = vmatpush.bf16.msra.mxu0 %v2240_v36  ;;  %v2684_v1 = vld [vmem:[%s3042_s5 + $0x2dc] sm:$0xf]  ;;  %v2577_v5 = vld [vmem:[%s3894_s0 + $0x4] sm:$0xf]  ;;  %v2129_v6 = vld [vmem:[%s3894_s0 + $0x8] sm:$0xf0]  ;;  %v2372_v8 = vor.u32 %v2636_v61, %v2369_v62  ;;  %v3127_v12 = vor.u32 %v2578_v0, %v2127_v60 }
  0x96   : > { %1176 = vmatpush.bf16.msra.mxu1 %v2432_v37  ;;  %1225 = vmatpush.bf16.msra.mxu2 %v2244_v38  ;;  %v2367_v9 = vld [vmem:[%s3042_s5 + $0x158] sm:$0xf]  ;;  %v2639_v10 = vld [vmem:[%s3042_s5 + $0x16c] sm:$0xf0]  ;;  %v2564_v13 = vor.u32 %v2684_v1, %v2561_v2  ;;  %v2630_v15 = vld [vmem:[%s3042_s5 + $0x12c] sm:$0xf]  ;;  %v3132_v17 = vor.u32 %v2577_v5, %v2129_v6 }
  0x97   : > { %1274 = vmatpush.bf16.msra.mxu3 %v2436_v42  ;;  %v2559_v11 = vld [vmem:[%s3042_s5 + $0x2d8] sm:$0xf]  ;;  %v2687_v14 = vld [vmem:[%s3042_s5 + $0x2ec] sm:$0xf0]  ;;  %v2345_v16 = vld [vmem:[%s3042_s5 + $0x140] sm:$0xf0]  ;;  %v2368_v20 = vor.u32 %v2639_v10, %v2367_v9 }
  0x98   : > { %v2678_v18 = vld [vmem:[%s3042_s5 + $0x2ac] sm:$0xf]  ;;  %v2537_v19 = vld [vmem:[%s3042_s5 + $0x2c0] sm:$0xf0]  ;;  %v2560_v21 = vor.u32 %v2687_v14, %v2559_v11  ;;  %v2348_v22 = vor.u32 %v2630_v15, %v2345_v16  ;;  %v2343_v23 = vld [vmem:[%s3042_s5 + $0x128] sm:$0xf] }
  0x99   : > { %1128 = vmatpush.bf16.msra.mxu0 %v2216_v48  ;;  %v2633_v24 = vld [vmem:[%s3042_s5 + $0x13c] sm:$0xf0]  ;;  %v2540_v25 = vor.u32 %v2678_v18, %v2537_v19  ;;  %v2535_v26 = vld [vmem:[%s3042_s5 + $0x2a8] sm:$0xf]  ;;  %v2624_v29 = vld [vmem:[%s3042_s5 + $0xfc] sm:$0xf] }
  0x9a   : > { %1177 = vmatpush.bf16.msra.mxu1 %v2408_v51  ;;  %1226 = vmatpush.bf16.msra.mxu2 %v2220_v52  ;;  %v2681_v27 = vld [vmem:[%s3042_s5 + $0x2bc] sm:$0xf0]  ;;  %v2344_v28 = vor.u32 %v2633_v24, %v2343_v23  ;;  %v2321_v30 = vld [vmem:[%s3042_s5 + $0x110] sm:$0xf0]  ;;  %v2672_v31 = vld [vmem:[%s3042_s5 + $0x27c] sm:$0xf] }
  0x9b   : > { %1275 = vmatpush.bf16.msra.mxu3 %v2412_v56  ;;  %v2536_v32 = vor.u32 %v2681_v27, %v2535_v26  ;;  %v2324_v33 = vor.u32 %v2624_v29, %v2321_v30  ;;  %v2513_v34 = vld [vmem:[%s3042_s5 + $0x290] sm:$0xf0]  ;;  %v2319_v35 = vld [vmem:[%s3042_s5 + $0xf8] sm:$0xf]  ;;  %v2627_v36 = vld [vmem:[%s3042_s5 + $0x10c] sm:$0xf0] }
  0x9c   : > { %v2516_v37 = vor.u32 %v2672_v31, %v2513_v34  ;;  %v2511_v38 = vld [vmem:[%s3042_s5 + $0x278] sm:$0xf]  ;;  %v2675_v39 = vld [vmem:[%s3042_s5 + $0x28c] sm:$0xf0]  ;;  %v2320_v40 = vor.u32 %v2627_v36, %v2319_v35  ;;  %v2579_v44 = vld [vmem:[%s3894_s0 + $0x14] sm:$0xf] }
  0x9d   : > { %1129 = vmatpush.bf16.msra.mxu0 %v2192_v63  ;;  %v2512_v41 = vor.u32 %v2675_v39, %v2511_v38  ;;  %v2135_v42 = vld [vmem:[%s3894_s0 + $0x10] sm:$0xf]  ;;  %v2580_v43 = vld [vmem:[%s3894_s0 + $0x14] sm:$0xf0]  ;;  %v2137_v45 = vld [vmem:[%s3894_s0 + $0x18] sm:$0xf0] }
  0x9e   : > { %1178 = vmatpush.bf16.msra.mxu1 %v2384_v3  ;;  %1227 = vmatpush.bf16.msra.mxu2 %v2196_v4  ;;  %v3164_v46 = vor.u32 %v2580_v43, %v2135_v42  ;;  %v3166_v47 = vor.u32 %v2579_v44, %v2137_v45  ;;  %v2618_v48 = vld [vmem:[%s3042_s5 + $0xcc] sm:$0xf]  ;;  %v2297_v49 = vld [vmem:[%s3042_s5 + $0xe0] sm:$0xf0]  ;;  %v2295_v53 = vld [vmem:[%s3042_s5 + $0xc8] sm:$0xf] }
  0x9f   : > { %1276 = vmatpush.bf16.msra.mxu3 %v2388_v7  ;;  %v2666_v50 = vld [vmem:[%s3042_s5 + $0x24c] sm:$0xf]  ;;  %v2300_v51 = vor.u32 %v2618_v48, %v2297_v49  ;;  %v2489_v52 = vld [vmem:[%s3042_s5 + $0x260] sm:$0xf0]  ;;  %v2621_v54 = vld [vmem:[%s3042_s5 + $0xdc] sm:$0xf0] }
  0xa0   : > { %1130 = vmatmul.bf16.vlgmr.msra.gmra.mxu0 %v3127_v12  ;;  %v2492_v55 = vor.u32 %v2666_v50, %v2489_v52  ;;  %v2296_v56 = vor.u32 %v2621_v54, %v2295_v53  ;;  %v2487_v57 = vld [vmem:[%s3042_s5 + $0x248] sm:$0xf]  ;;  %v2669_v58 = vld [vmem:[%s3042_s5 + $0x25c] sm:$0xf0]  ;;  %v2581_v62 = vld [vmem:[%s3894_s0 + $0x24] sm:$0xf] }
  0xa1   : > { %1179 = vmatmul.bf16.vlgmr.msra.gmra.mxu1 %v3132_v17  ;;  %1228 = vmatmul.bf16.vlgmr.msra.gmra.mxu2 %v3127_v12  ;;  %v2488_v59 = vor.u32 %v2669_v58, %v2487_v57  ;;  %v2143_v60 = vld [vmem:[%s3894_s0 + $0x20] sm:$0xf]  ;;  %v2582_v61 = vld [vmem:[%s3894_s0 + $0x24] sm:$0xf0]  ;;  %v2145_v63 = vld [vmem:[%s3894_s0 + $0x28] sm:$0xf0] }
  0xa2   : > { %1416 = vmatpush.bf16.msrb.mxu2 %v2372_v8  ;;  %1277 = vmatmul.bf16.vlgmr.msra.gmra.mxu3 %v3132_v17  ;;  %v3192_v0 = vor.u32 %v2582_v61, %v2143_v60  ;;  %v3194_v1 = vor.u32 %v2581_v62, %v2145_v63  ;;  %v2612_v2 = vld [vmem:[%s3042_s5 + $0x9c] sm:$0xf]  ;;  %v2273_v3 = vld [vmem:[%s3042_s5 + $0xb0] sm:$0xf0]  ;;  %v2271_v7 = vld [vmem:[%s3042_s5 + $0x98] sm:$0xf] }
  0xa3   : > { %1465 = vmatpush.bf16.msrb.mxu3 %v2564_v13  ;;  %1318 = vmatpush.bf16.msrb.mxu0 %v2368_v20  ;;  %v2660_v4 = vld [vmem:[%s3042_s5 + $0x21c] sm:$0xf]  ;;  %v2276_v5 = vor.u32 %v2612_v2, %v2273_v3  ;;  %v2465_v6 = vld [vmem:[%s3042_s5 + $0x230] sm:$0xf0]  ;;  %v2615_v8 = vld [vmem:[%s3042_s5 + $0xac] sm:$0xf0] }
  0xa4   : > { %1367 = vmatpush.bf16.msrb.mxu1 %v2560_v21  ;;  %v2468_v9 = vor.u32 %v2660_v4, %v2465_v6  ;;  %v2272_v10 = vor.u32 %v2615_v8, %v2271_v7  ;;  %v2463_v11 = vld [vmem:[%s3042_s5 + $0x218] sm:$0xf]  ;;  %v2663_v13 = vld [vmem:[%s3042_s5 + $0x22c] sm:$0xf0]  ;;  %v2583_v18 = vld [vmem:[%s3894_s0 + $0x34] sm:$0xf] }
  0xa5   : > { %v2464_v14 = vor.u32 %v2663_v13, %v2463_v11  ;;  %v2151_v15 = vld [vmem:[%s3894_s0 + $0x30] sm:$0xf]  ;;  %v2584_v16 = vld [vmem:[%s3894_s0 + $0x34] sm:$0xf0]  ;;  %v2153_v19 = vld [vmem:[%s3894_s0 + $0x38] sm:$0xf0] }
  0xa6   : > { %1417 = vmatpush.bf16.msrb.mxu2 %v2348_v22  ;;  %v3220_v20 = vor.u32 %v2584_v16, %v2151_v15  ;;  %v3222_v21 = vor.u32 %v2583_v18, %v2153_v19  ;;  %v2606_v22 = vld [vmem:[%s3042_s5 + $0x6c] sm:$0xf]  ;;  %v2249_v23 = vld [vmem:[%s3042_s5 + $0x80] sm:$0xf0]  ;;  %v2247_v27 = vld [vmem:[%s3042_s5 + $0x68] sm:$0xf] }
  0xa7   : > { %1466 = vmatpush.bf16.msrb.mxu3 %v2540_v25  ;;  %1319 = vmatpush.bf16.msrb.mxu0 %v2344_v28  ;;  %v2654_v24 = vld [vmem:[%s3042_s5 + $0x1ec] sm:$0xf]  ;;  %v2252_v25 = vor.u32 %v2606_v22, %v2249_v23  ;;  %v2441_v26 = vld [vmem:[%s3042_s5 + $0x200] sm:$0xf0]  ;;  %v2609_v28 = vld [vmem:[%s3042_s5 + $0x7c] sm:$0xf0] }
  0xa8   : > { %1368 = vmatpush.bf16.msrb.mxu1 %v2536_v32  ;;  %v2444_v29 = vor.u32 %v2654_v24, %v2441_v26  ;;  %v2248_v30 = vor.u32 %v2609_v28, %v2247_v27  ;;  %v2439_v31 = vld [vmem:[%s3042_s5 + $0x1e8] sm:$0xf]  ;;  %v2657_v32 = vld [vmem:[%s3042_s5 + $0x1fc] sm:$0xf0]  ;;  %v2585_v36 = vld [vmem:[%s3894_s0 + $0x44] sm:$0xf] }
  0xa9   : > { %v2159_v34 = vld [vmem:[%s3894_s0 + $0x40] sm:$0xf]  ;;  %v2586_v35 = vld [vmem:[%s3894_s0 + $0x44] sm:$0xf0]  ;;  %v2648_v42 = vld [vmem:[%s3042_s5 + $0x1bc] sm:$0xf] }
  0xaa   : > { %1418 = vmatpush.bf16.msrb.mxu2 %v2324_v33  ;;  %v2440_v33 = vor.u32 %v2657_v32, %v2439_v31  ;;  %v3248_v38 = vor.u32 %v2586_v35, %v2159_v34  ;;  %v2417_v44 = vld [vmem:[%s3042_s5 + $0x1d0] sm:$0xf0]  ;;  %v2223_v45 = vld [vmem:[%s3042_s5 + $0x38] sm:$0xf]  ;;  %v2603_v48 = vld [vmem:[%s3042_s5 + $0x4c] sm:$0xf0] }
  0xab   : > { %1467 = vmatpush.bf16.msrb.mxu3 %v2516_v37  ;;  %1320 = vmatpush.bf16.msrb.mxu0 %v2320_v40  ;;  %v2161_v37 = vld [vmem:[%s3894_s0 + $0x48] sm:$0xf0]  ;;  %v2600_v40 = vld [vmem:[%s3042_s5 + $0x3c] sm:$0xf]  ;;  %v2420_v49 = vor.u32 %v2648_v42, %v2417_v44  ;;  %v2224_v50 = vor.u32 %v2603_v48, %v2223_v45  ;;  %v2651_v52 = vld [vmem:[%s3042_s5 + $0x1cc] sm:$0xf0] }
  0xac   : > { %1369 = vmatpush.bf16.msrb.mxu1 %v2512_v41  ;;  %v3250_v39 = vor.u32 %v2585_v36, %v2161_v37  ;;  %v2225_v41 = vld [vmem:[%s3042_s5 + $0x50] sm:$0xf0]  ;;  %v2167_v54 = vld [vmem:[%s3894_s0 + $0x50] sm:$0xf]  ;;  %v2169_v57 = vld [vmem:[%s3894_s0 + $0x58] sm:$0xf0] }
  0xad   : > { %v2228_v43 = vor.u32 %v2600_v40, %v2225_v41  ;;  %v2594_v60 = vld [vmem:[%s3042_s5 + $0xc] sm:$0xf]  ;;  %v2201_v61 = vld [vmem:[%s3042_s5 + $0x20] sm:$0xf0]  ;;  %v2199_v3 = vld [vmem:[%s3042_s5 + $0x8] sm:$0xf] }
  0xae   : > { %1419 = vmatpush.bf16.msrb.mxu2 %v2300_v51  ;;  %v2415_v51 = vld [vmem:[%s3042_s5 + $0x1b8] sm:$0xf]  ;;  %v2642_v62 = vld [vmem:[%s3042_s5 + $0x18c] sm:$0xf]  ;;  %v2204_v63 = vor.u32 %v2594_v60, %v2201_v61  ;;  %v2393_v2 = vld [vmem:[%s3042_s5 + $0x1a0] sm:$0xf0] }
  0xaf   : > { %1468 = vmatpush.bf16.msrb.mxu3 %v2492_v55  ;;  %1321 = vmatpush.bf16.msrb.mxu0 %v2296_v56  ;;  %v2416_v53 = vor.u32 %v2651_v52, %v2415_v51  ;;  %v2588_v55 = vld [vmem:[%s3894_s0 + $0x54] sm:$0xf0]  ;;  %v2587_v56 = vld [vmem:[%s3894_s0 + $0x54] sm:$0xf]  ;;  %v2597_v4 = vld [vmem:[%s3042_s5 + $0x1c] sm:$0xf0] }
  0xb0   : > { %1135 = vmatmul.bf16.gmra.mxu0 %v3164_v46  ;;  %1370 = vmatpush.bf16.msrb.mxu1 %v2488_v59  ;;  %v3276_v58 = vor.u32 %v2588_v55, %v2167_v54  ;;  %v3278_v59 = vor.u32 %v2587_v56, %v2169_v57  ;;  %v2200_v6 = vor.u32 %v2597_v4, %v2199_v3  ;;  %v2391_v7 = vld [vmem:[%s3042_s5 + $0x188] sm:$0xf]  ;;  %v2645_v8 = vld [vmem:[%s3042_s5 + $0x19c] sm:$0xf0]  ;;  %v2589_v13 = vld [vmem:[%s3894_s0 + $0x64] sm:$0xf] }
  0xb1   : > { %1184 = vmatmul.bf16.gmra.mxu1 %v3166_v47  ;;  %1233 = vmatmul.bf16.gmra.mxu2 %v3164_v46  ;;  %v2590_v11 = vld [vmem:[%s3894_s0 + $0x64] sm:$0xf0]  ;;  %v2637_v18 = vld [vmem:[%s3042_s5 + $0x164] sm:$0xf]  ;;  %v2377_v19 = vld [vmem:[%s3042_s5 + $0x178] sm:$0xf0] }
  0xb2   : > { %1282 = vmatmul.bf16.gmra.mxu3 %v3166_v47  ;;  %1420 = vmatpush.bf16.msrb.mxu2 %v2276_v5  ;;  %v2396_v5 = vor.u32 %v2642_v62, %v2393_v2  ;;  %v2685_v22 = vld [vmem:[%s3042_s5 + $0x2e4] sm:$0xf]  ;;  %v2380_v23 = vor.u32 %v2637_v18, %v2377_v19  ;;  %v2569_v24 = vld [vmem:[%s3042_s5 + $0x2f8] sm:$0xf0]  ;;  %v2183_v26 = vld [vmem:[%s3894_s0 + $0x70] sm:$0xf] }
  0xb3   : > { %1469 = vmatpush.bf16.msrb.mxu3 %v2468_v9  ;;  %1322 = vmatpush.bf16.msrb.mxu0 %v2272_v10  ;;  %v2392_v9 = vor.u32 %v2645_v8, %v2391_v7  ;;  %v2175_v10 = vld [vmem:[%s3894_s0 + $0x60] sm:$0xf]  ;;  %v2592_v27 = vld [vmem:[%s3894_s0 + $0x74] sm:$0xf0]  ;;  %v2591_v28 = vld [vmem:[%s3894_s0 + $0x74] sm:$0xf] }
  0xb4   : > { %1371 = vmatpush.bf16.msrb.mxu1 %v2464_v14  ;;  %v2177_v14 = vld [vmem:[%s3894_s0 + $0x68] sm:$0xf0]  ;;  %v3304_v15 = vor.u32 %v2590_v11, %v2175_v10  ;;  %v2640_v31 = vld [vmem:[%s3042_s5 + $0x174] sm:$0xf0]  ;;  %v2567_v32 = vld [vmem:[%s3042_s5 + $0x2e0] sm:$0xf]  ;;  %v3333_v35 = vor.u32 %v2592_v27, %v2183_v26 }
  0xb5   : > { %v3306_v16 = vor.u32 %v2589_v13, %v2177_v14  ;;  %v2688_v34 = vld [vmem:[%s3042_s5 + $0x2f4] sm:$0xf0]  ;;  %s3906_s8 = smov (!%p430_p11, %s429_s8), 35  ;;  %v2631_v40 = vld [vmem:[%s3042_s5 + $0x134] sm:$0xf]  ;;  %s2689_s4 = smul.u32 (%p2827_p6), 48, %s2762_s14 }
  0xb6   : > { %1421 = vmatpush.bf16.msrb.mxu2 %v2252_v25  ;;  %v2572_v25 = vor.u32 %v2685_v22, %v2569_v24  ;;  %v2568_v36 = vor.u32 %v2688_v34, %v2567_v32  ;;  %v2353_v41 = vld [vmem:[%s3042_s5 + $0x148] sm:$0xf0]  ;;  %v2679_v42 = vld [vmem:[%s3042_s5 + $0x2b4] sm:$0xf]  ;;  %s432_s26 = scalar_lea.vmem %s3896_s2, %s3906_s8  ;;  %v2634_v51 = vld [vmem:[%s3042_s5 + $0x144] sm:$0xf0] }
  0xb7   : > { %1470 = vmatpush.bf16.msrb.mxu3 %v2444_v29  ;;  %1323 = vmatpush.bf16.msrb.mxu0 %v2248_v30  ;;  %v2185_v29 = vld [vmem:[%s3894_s0 + $0x78] sm:$0xf0]  ;;  %v2375_v30 = vld [vmem:[%s3042_s5 + $0x160] sm:$0xf]  ;;  %v2545_v44 = vld [vmem:[%s3042_s5 + $0x2c8] sm:$0xf0]  ;;  %s3687_s29 = scalar_lea.vmem (%p2827_p6), %s3897_s3, %s2689_s4 }
  0xb8   : > { %1372 = vmatpush.bf16.msrb.mxu1 %v2440_v33  ;;  %v2376_v33 = vor.u32 %v2640_v31, %v2375_v30  ;;  %v3335_v37 = vor.u32 %v2591_v28, %v2185_v29  ;;  %v2548_v45 = vor.u32 %v2679_v42, %v2545_v44  ;;  %v3348_v48 = vld [vmem:[%s432_s26] sm:$0x3f]  ;;  %v2543_v52 = vld [vmem:[%s3042_s5 + $0x2b0] sm:$0xf]  ;;  %v2682_v54 = vld [vmem:[%s3042_s5 + $0x2c4] sm:$0xf0] }
  0xb9   : > { %v2544_v55 = vor.u32 %v2682_v54, %v2543_v52  ;;  %v3362_v62 = vperm.slane %v3348_v48, 1  ;;  %v2329_v2 = vld [vmem:[%s3042_s5 + $0x118] sm:$0xf0]  ;;  %v2673_v3 = vld [vmem:[%s3042_s5 + $0x284] sm:$0xf] }
  0xba   : > { %1422 = vmatpush.bf16.msrb.mxu2 %v2228_v43  ;;  %v2356_v43 = vor.u32 %v2631_v40, %v2353_v41  ;;  %v2327_v19 = vld [vmem:[%s3042_s5 + $0x100] sm:$0xf]  ;;  %v2628_v22 = vld [vmem:[%s3042_s5 + $0x114] sm:$0xf0]  ;;  %v2305_v40 = vld [vmem:[%s3042_s5 + $0xe8] sm:$0xf0] }
  0xbb   : > { %1471 = vmatpush.bf16.msrb.mxu3 %v2420_v49  ;;  %1324 = vmatpush.bf16.msrb.mxu0 %v2224_v50  ;;  %v3351_v49 = vperm.slane %v3348_v48, 0  ;;  %v2351_v50 = vld [vmem:[%s3042_s5 + $0x130] sm:$0xf]  ;;  %v2519_v24 = vld [vmem:[%s3042_s5 + $0x280] sm:$0xf] }
  0xbc   : > { %1373 = vmatpush.bf16.msrb.mxu1 %v2416_v53  ;;  %v2352_v53 = vor.u32 %v2634_v51, %v2351_v50  ;;  %v2667_v42 = vld [vmem:[%s3042_s5 + $0x254] sm:$0xf] }
  0xbe   : > { %1423 = vmatpush.bf16.msrb.mxu2 %v2204_v63  ;;  %v2625_v63 = vld [vmem:[%s3042_s5 + $0x104] sm:$0xf] }
  0xbf   : > { %1472 = vmatpush.bf16.msrb.mxu3 %v2396_v5  ;;  %1325 = vmatpush.bf16.msrb.mxu0 %v2200_v6  ;;  %v2332_v4 = vor.u32 %v2625_v63, %v2329_v2  ;;  %v2521_v5 = vld [vmem:[%s3042_s5 + $0x298] sm:$0xf0]  ;;  %v2495_v63 = vld [vmem:[%s3042_s5 + $0x250] sm:$0xf]  ;;  %v2670_v2 = vld [vmem:[%s3042_s5 + $0x264] sm:$0xf0] }
  0xc0   : > { %1140 = vmatmul.bf16.gmra.mxu0 %v3192_v0  ;;  %1374 = vmatpush.bf16.msrb.mxu1 %v2392_v9  ;;  %v2524_v7 = vor.u32 %v2673_v3, %v2521_v5 }
  0xc1   : > { %1189 = vmatmul.bf16.gmra.mxu1 %v3194_v1  ;;  %1238 = vmatmul.bf16.gmra.mxu2 %v3192_v0 }
  0xc2   : > { %1287 = vmatmul.bf16.gmra.mxu3 %v3194_v1  ;;  %1612 = vmatpush.bf16.msra.mxu2 %v2380_v23  ;;  %v2328_v23 = vor.u32 %v2628_v22, %v2327_v19  ;;  %v2661_v19 = vld [vmem:[%s3042_s5 + $0x224] sm:$0xf]  ;;  %v2473_v22 = vld [vmem:[%s3042_s5 + $0x238] sm:$0xf0] }
  0xc3   : > { %1661 = vmatpush.bf16.msra.mxu3 %v2572_v25  ;;  %1514 = vmatpush.bf16.msra.mxu0 %v2376_v33  ;;  %v2676_v25 = vld [vmem:[%s3042_s5 + $0x294] sm:$0xf0] }
  0xc4   : > { %1563 = vmatpush.bf16.msra.mxu1 %v2568_v36  ;;  %v2520_v27 = vor.u32 %v2676_v25, %v2519_v24  ;;  %v2619_v36 = vld [vmem:[%s3042_s5 + $0xd4] sm:$0xf]  ;;  %v2476_v24 = vor.u32 %v2661_v19, %v2473_v22 }
  0xc5   : > { %v2308_v41 = vor.u32 %v2619_v36, %v2305_v40  ;;  %v2471_v36 = vld [vmem:[%s3042_s5 + $0x220] sm:$0xf]  ;;  %v2664_v40 = vld [vmem:[%s3042_s5 + $0x234] sm:$0xf0] }
  0xc6   : > { %1613 = vmatpush.bf16.msra.mxu2 %v2356_v43  ;;  %v2497_v43 = vld [vmem:[%s3042_s5 + $0x268] sm:$0xf0] }
  0xc7   : > { %1662 = vmatpush.bf16.msra.mxu3 %v2548_v45  ;;  %1515 = vmatpush.bf16.msra.mxu0 %v2352_v53  ;;  %v2500_v45 = vor.u32 %v2667_v42, %v2497_v43  ;;  %v2472_v42 = vor.u32 %v2664_v40, %v2471_v36 }
  0xc8   : > { %1564 = vmatpush.bf16.msra.mxu1 %v2544_v55 }
  0xca   : > { %1614 = vmatpush.bf16.msra.mxu2 %v2332_v4  ;;  %v2496_v4 = vor.u32 %v2670_v2, %v2495_v63 }
  0xcb   : > { %1663 = vmatpush.bf16.msra.mxu3 %v2524_v7  ;;  %1516 = vmatpush.bf16.msra.mxu0 %v2328_v23 }
  0xcc   : > { %1565 = vmatpush.bf16.msra.mxu1 %v2520_v27 }
  0xce   : > { %1615 = vmatpush.bf16.msra.mxu2 %v2308_v41 }
  0xcf   : > { %1664 = vmatpush.bf16.msra.mxu3 %v2500_v45 }
  0xd0   : > { %1145 = vmatmul.bf16.gmra.mxu0 %v3220_v20  ;;  %1566 = vmatpush.bf16.msra.mxu1 %v2496_v4 }
  0xd1   : > { %1194 = vmatmul.bf16.gmra.mxu1 %v3222_v21  ;;  %1243 = vmatmul.bf16.gmra.mxu2 %v3220_v20 }
  0xd2   : > { %1292 = vmatmul.bf16.gmra.mxu3 %v3222_v21 }
  0xd3   : > { %1665 = vmatpush.bf16.msra.mxu3 %v2476_v24 }
  0xd4   : > { %1567 = vmatpush.bf16.msra.mxu1 %v2472_v42 }
  0xe0   : > { %1150 = vmatmul.bf16.gmra.mxu0 %v3248_v38 }
  0xe1   : > { %1199 = vmatmul.bf16.gmra.mxu1 %v3250_v39  ;;  %1248 = vmatmul.bf16.gmra.mxu2 %v3248_v38 }
  0xe2   : > { %1297 = vmatmul.bf16.gmra.mxu3 %v3250_v39 }
  0xf0   : > { %1155 = vmatmul.bf16.gmra.mxu0 %v3276_v58 }
  0xf1   : > { %1204 = vmatmul.bf16.gmra.mxu1 %v3278_v59  ;;  %1253 = vmatmul.bf16.gmra.mxu2 %v3276_v58 }
  0xf2   : > { %1302 = vmatmul.bf16.gmra.mxu3 %v3278_v59 }
 0x100   : > { %1160 = vmatmul.bf16.gmra.mxu0 %v3304_v15 }
 0x101   : > { %1209 = vmatmul.bf16.gmra.mxu1 %v3306_v16  ;;  %1258 = vmatmul.bf16.gmra.mxu2 %v3304_v15 }
 0x102   : > { %1307 = vmatmul.bf16.gmra.mxu3 %v3306_v16 }
 0x110   : > { %1165 = vmatmul.bf16.gmra.mxu0 %v3333_v35 }
 0x111   : > { %1214 = vmatmul.bf16.gmra.mxu1 %v3335_v37  ;;  %1263 = vmatmul.bf16.gmra.mxu2 %v3333_v35 }
 0x112   : > { %1312 = vmatmul.bf16.gmra.mxu3 %v3335_v37 }
 0x11d   : > { %v1131_v56 = vpop.f32.mrf.mxu0 }
 0x11e   : > { %v1132_v57 = vadd.f32 %v1131_v56, %v3351_v49  ;;  %v1180_v60 = vpop.f32.mrf.mxu1 }
 0x120   : > { %v1181_v61 = vadd.f32 %v1180_v60, %v1132_v57  ;;  %1326 = vmatmul.bf16.vlgmr.msrb.gmra.mxu0 %v3127_v12  ;;  %v2303_v57 = vld [vmem:[%s3042_s5 + $0xd0] sm:$0xf]  ;;  %v2622_v60 = vld [vmem:[%s3042_s5 + $0xe4] sm:$0xf0] }
 0x121   : > { %1375 = vmatmul.bf16.vlgmr.msrb.gmra.mxu1 %v3132_v17  ;;  %1424 = vmatmul.bf16.vlgmr.msrb.gmra.mxu2 %v3127_v12 }
 0x122   : > { %1710 = vst [vmem:[%s3365_s27] sm:$0xff] %v1181_v61  ;;  %1473 = vmatmul.bf16.vlgmr.msrb.gmra.mxu3 %v3132_v17  ;;  %v2304_v61 = vor.u32 %v2622_v60, %v2303_v57  ;;  %v2655_v57 = vld [vmem:[%s3042_s5 + $0x1f4] sm:$0xf]  ;;  %v2449_v60 = vld [vmem:[%s3042_s5 + $0x208] sm:$0xf0] }
 0x123   : > { %v2452_v63 = vor.u32 %v2655_v57, %v2449_v60 }
 0x124   : > { %v1229_v6 = vpop.f32.mrf.mxu2  ;;  %1517 = vmatpush.bf16.msra.mxu0 %v2304_v61 }
 0x125   : > { %v1230_v8 = vadd.f32 %v1229_v6, %v3362_v62  ;;  %v1278_v9 = vpop.f32.mrf.mxu3  ;;  %v1133_v10 = vpop.f32.mrf.mxu0  ;;  %1666 = vmatpush.bf16.msra.mxu3 %v2452_v63 }
 0x126   : > { %v1134_v11 = vadd.f32 %v1133_v10, %v3351_v49  ;;  %v1182_v13 = vpop.f32.mrf.mxu1 }
 0x127   : > { %v1279_v14 = vadd.f32 %v1278_v9, %v1230_v8 }
 0x128   : > { %v1183_v18 = vadd.f32 %v1182_v13, %v1134_v11  ;;  %v2613_v13 = vld [vmem:[%s3042_s5 + $0xa4] sm:$0xf] }
 0x129   : > { %1711 = vst [vmem:[%s3365_s27 + $0x8] sm:$0xff] %v1279_v14  ;;  %v2281_v14 = vld [vmem:[%s3042_s5 + $0xb8] sm:$0xf0] }
 0x12a   : > { %1716 = vst [vmem:[%s3365_s27 + $0x30] sm:$0xff] %v1183_v18  ;;  %v2284_v18 = vor.u32 %v2613_v13, %v2281_v14  ;;  %v2447_v13 = vld [vmem:[%s3042_s5 + $0x1f0] sm:$0xf]  ;;  %v2658_v14 = vld [vmem:[%s3042_s5 + $0x204] sm:$0xf0] }
 0x12b   : > { %v2448_v19 = vor.u32 %v2658_v14, %v2447_v13 }
 0x12c   : > { %v1231_v26 = vpop.f32.mrf.mxu2  ;;  %1616 = vmatpush.bf16.msra.mxu2 %v2284_v18 }
 0x12d   : > { %v1232_v28 = vadd.f32 %v1231_v26, %v3362_v62  ;;  %v1280_v29 = vpop.f32.mrf.mxu3  ;;  %v1136_v30 = vpop.f32.mrf.mxu0  ;;  %1568 = vmatpush.bf16.msra.mxu1 %v2448_v19 }
 0x12e   : > { %v1137_v31 = vadd.f32 %v1136_v30, %v3351_v49  ;;  %v1185_v32 = vpop.f32.mrf.mxu1 }
 0x12f   : > { %v1281_v33 = vadd.f32 %v1280_v29, %v1232_v28 }
 0x130   : > { %v1186_v34 = vadd.f32 %v1185_v32, %v1137_v31  ;;  %1331 = vmatmul.bf16.gmra.mxu0 %v3164_v46  ;;  %v2279_v32 = vld [vmem:[%s3042_s5 + $0xa0] sm:$0xf] }
 0x131   : > { %1717 = vst [vmem:[%s3365_s27 + $0x38] sm:$0xff] %v1281_v33  ;;  %1380 = vmatmul.bf16.gmra.mxu1 %v3166_v47  ;;  %1429 = vmatmul.bf16.gmra.mxu2 %v3164_v46  ;;  %v2616_v33 = vld [vmem:[%s3042_s5 + $0xb4] sm:$0xf0] }
 0x132   : > { %1722 = vst [vmem:[%s3365_s27 + $0x60] sm:$0xff] %v1186_v34  ;;  %1478 = vmatmul.bf16.gmra.mxu3 %v3166_v47  ;;  %v2280_v34 = vor.u32 %v2616_v33, %v2279_v32  ;;  %v2649_v32 = vld [vmem:[%s3042_s5 + $0x1c4] sm:$0xf]  ;;  %v2425_v33 = vld [vmem:[%s3042_s5 + $0x1d8] sm:$0xf0] }
 0x133   : > { %v2428_v36 = vor.u32 %v2649_v32, %v2425_v33 }
 0x134   : > { %v1234_v44 = vpop.f32.mrf.mxu2  ;;  %1518 = vmatpush.bf16.msra.mxu0 %v2280_v34 }
 0x135   : > { %v1235_v50 = vadd.f32 %v1234_v44, %v3362_v62  ;;  %v1283_v51 = vpop.f32.mrf.mxu3  ;;  %v1138_v52 = vpop.f32.mrf.mxu0  ;;  %1667 = vmatpush.bf16.msra.mxu3 %v2428_v36 }
 0x136   : > { %v1139_v53 = vadd.f32 %v1138_v52, %v3351_v49  ;;  %v1187_v54 = vpop.f32.mrf.mxu1 }
 0x137   : > { %v1284_v55 = vadd.f32 %v1283_v51, %v1235_v50 }
 0x138   : > { %v1188_v56 = vadd.f32 %v1187_v54, %v1139_v53  ;;  %v2607_v54 = vld [vmem:[%s3042_s5 + $0x74] sm:$0xf] }
 0x139   : > { %1723 = vst [vmem:[%s3365_s27 + $0x68] sm:$0xff] %v1284_v55  ;;  %v2257_v55 = vld [vmem:[%s3042_s5 + $0x88] sm:$0xf0] }
 0x13a   : > { %1728 = vst [vmem:[%s3365_s27 + $0x90] sm:$0xff] %v1188_v56  ;;  %v2260_v56 = vor.u32 %v2607_v54, %v2257_v55  ;;  %v2423_v54 = vld [vmem:[%s3042_s5 + $0x1c0] sm:$0xf]  ;;  %v2652_v55 = vld [vmem:[%s3042_s5 + $0x1d4] sm:$0xf0] }
 0x13b   : > { %v2424_v57 = vor.u32 %v2652_v55, %v2423_v54 }
 0x13c   : > { %v1236_v3 = vpop.f32.mrf.mxu2  ;;  %1617 = vmatpush.bf16.msra.mxu2 %v2260_v56 }
 0x13d   : > { %v1237_v5 = vadd.f32 %v1236_v3, %v3362_v62  ;;  %v1285_v6 = vpop.f32.mrf.mxu3  ;;  %v1141_v7 = vpop.f32.mrf.mxu0  ;;  %1569 = vmatpush.bf16.msra.mxu1 %v2424_v57 }
 0x13e   : > { %v1142_v8 = vadd.f32 %v1141_v7, %v3351_v49  ;;  %v1190_v9 = vpop.f32.mrf.mxu1 }
 0x13f   : > { %v1286_v10 = vadd.f32 %v1285_v6, %v1237_v5 }
 0x140   : > { %v1191_v11 = vadd.f32 %v1190_v9, %v1142_v8  ;;  %1336 = vmatmul.bf16.gmra.mxu0 %v3192_v0  ;;  %v2255_v9 = vld [vmem:[%s3042_s5 + $0x70] sm:$0xf] }
 0x141   : > { %1729 = vst [vmem:[%s3365_s27 + $0x98] sm:$0xff] %v1286_v10  ;;  %1385 = vmatmul.bf16.gmra.mxu1 %v3194_v1  ;;  %1434 = vmatmul.bf16.gmra.mxu2 %v3192_v0  ;;  %v2610_v10 = vld [vmem:[%s3042_s5 + $0x84] sm:$0xf0] }
 0x142   : > { %1734 = vst [vmem:[%s3365_s27 + $0xc0] sm:$0xff] %v1191_v11  ;;  %1483 = vmatmul.bf16.gmra.mxu3 %v3194_v1  ;;  %v2256_v11 = vor.u32 %v2610_v10, %v2255_v9  ;;  %v2643_v9 = vld [vmem:[%s3042_s5 + $0x194] sm:$0xf]  ;;  %v2401_v10 = vld [vmem:[%s3042_s5 + $0x1a8] sm:$0xf0] }
 0x143   : > { %v2404_v13 = vor.u32 %v2643_v9, %v2401_v10 }
 0x144   : > { %v1239_v23 = vpop.f32.mrf.mxu2  ;;  %1519 = vmatpush.bf16.msra.mxu0 %v2256_v11 }
 0x145   : > { %v1240_v25 = vadd.f32 %v1239_v23, %v3362_v62  ;;  %v1288_v26 = vpop.f32.mrf.mxu3  ;;  %v1143_v27 = vpop.f32.mrf.mxu0  ;;  %1668 = vmatpush.bf16.msra.mxu3 %v2404_v13 }
 0x146   : > { %v1144_v28 = vadd.f32 %v1143_v27, %v3351_v49  ;;  %v1192_v29 = vpop.f32.mrf.mxu1 }
 0x147   : > { %v1289_v30 = vadd.f32 %v1288_v26, %v1240_v25 }
 0x148   : > { %v1193_v31 = vadd.f32 %v1192_v29, %v1144_v28  ;;  %v2601_v29 = vld [vmem:[%s3042_s5 + $0x44] sm:$0xf] }
 0x149   : > { %1735 = vst [vmem:[%s3365_s27 + $0xc8] sm:$0xff] %v1289_v30  ;;  %v2233_v30 = vld [vmem:[%s3042_s5 + $0x58] sm:$0xf0] }
 0x14a   : > { %1740 = vst [vmem:[%s3365_s27 + $0xf0] sm:$0xff] %v1193_v31  ;;  %v2236_v31 = vor.u32 %v2601_v29, %v2233_v30  ;;  %v2399_v29 = vld [vmem:[%s3042_s5 + $0x190] sm:$0xf]  ;;  %v2646_v30 = vld [vmem:[%s3042_s5 + $0x1a4] sm:$0xf0] }
 0x14b   : > { %v2400_v32 = vor.u32 %v2646_v30, %v2399_v29 }
 0x14c   : > { %v1241_v41 = vpop.f32.mrf.mxu2  ;;  %1618 = vmatpush.bf16.msra.mxu2 %v2236_v31 }
 0x14d   : > { %v1242_v43 = vadd.f32 %v1241_v41, %v3362_v62  ;;  %v1290_v44 = vpop.f32.mrf.mxu3  ;;  %v1146_v45 = vpop.f32.mrf.mxu0  ;;  %1570 = vmatpush.bf16.msra.mxu1 %v2400_v32 }
 0x14e   : > { %v1147_v50 = vadd.f32 %v1146_v45, %v3351_v49  ;;  %v1195_v51 = vpop.f32.mrf.mxu1 }
 0x14f   : > { %v1291_v52 = vadd.f32 %v1290_v44, %v1242_v43 }
 0x150   : > { %v1196_v53 = vadd.f32 %v1195_v51, %v1147_v50  ;;  %1341 = vmatmul.bf16.gmra.mxu0 %v3220_v20  ;;  %v2231_v51 = vld [vmem:[%s3042_s5 + $0x40] sm:$0xf] }
 0x151   : > { %1741 = vst [vmem:[%s3365_s27 + $0xf8] sm:$0xff] %v1291_v52  ;;  %1390 = vmatmul.bf16.gmra.mxu1 %v3222_v21  ;;  %1439 = vmatmul.bf16.gmra.mxu2 %v3220_v20  ;;  %v2604_v52 = vld [vmem:[%s3042_s5 + $0x54] sm:$0xf0] }
 0x152   : > { %1746 = vst [vmem:[%s3365_s27 + $0x120] sm:$0xff] %v1196_v53  ;;  %1488 = vmatmul.bf16.gmra.mxu3 %v3222_v21  ;;  %v2232_v53 = vor.u32 %v2604_v52, %v2231_v51 }
 0x154   : > { %v1244_v61 = vpop.f32.mrf.mxu2  ;;  %1520 = vmatpush.bf16.msra.mxu0 %v2232_v53 }
 0x155   : > { %v1245_v2 = vadd.f32 %v1244_v61, %v3362_v62  ;;  %v1293_v3 = vpop.f32.mrf.mxu3  ;;  %v1148_v4 = vpop.f32.mrf.mxu0 }
 0x156   : > { %v1149_v5 = vadd.f32 %v1148_v4, %v3351_v49  ;;  %v1197_v6 = vpop.f32.mrf.mxu1 }
 0x157   : > { %v1294_v7 = vadd.f32 %v1293_v3, %v1245_v2 }
 0x158   : > { %v1198_v8 = vadd.f32 %v1197_v6, %v1149_v5  ;;  %v2595_v6 = vld [vmem:[%s3042_s5 + $0x14] sm:$0xf] }
 0x159   : > { %1747 = vst [vmem:[%s3365_s27 + $0x128] sm:$0xff] %v1294_v7  ;;  %v2209_v7 = vld [vmem:[%s3042_s5 + $0x28] sm:$0xf0] }
 0x15a   : > { %1752 = vst [vmem:[%s3365_s27 + $0x150] sm:$0xff] %v1198_v8  ;;  %v2212_v8 = vor.u32 %v2595_v6, %v2209_v7 }
 0x15c   : > { %v1246_v18 = vpop.f32.mrf.mxu2  ;;  %1619 = vmatpush.bf16.msra.mxu2 %v2212_v8 }
 0x15d   : > { %v1247_v22 = vadd.f32 %v1246_v18, %v3362_v62  ;;  %v1295_v23 = vpop.f32.mrf.mxu3  ;;  %v1151_v24 = vpop.f32.mrf.mxu0 }
 0x15e   : > { %v1152_v25 = vadd.f32 %v1151_v24, %v3351_v49  ;;  %v1200_v26 = vpop.f32.mrf.mxu1 }
 0x15f   : > { %v1296_v27 = vadd.f32 %v1295_v23, %v1247_v22 }
 0x160   : > { %v1201_v28 = vadd.f32 %v1200_v26, %v1152_v25  ;;  %1346 = vmatmul.bf16.gmra.mxu0 %v3248_v38  ;;  %v2207_v26 = vld [vmem:[%s3042_s5 + $0x10] sm:$0xf] }
 0x161   : > { %1753 = vst [vmem:[%s3365_s27 + $0x158] sm:$0xff] %v1296_v27  ;;  %1395 = vmatmul.bf16.gmra.mxu1 %v3250_v39  ;;  %1444 = vmatmul.bf16.gmra.mxu2 %v3248_v38  ;;  %v2598_v27 = vld [vmem:[%s3042_s5 + $0x24] sm:$0xf0] }
 0x162   : > { %1758 = vst [vmem:[%s3365_s27 + $0x180] sm:$0xff] %v1201_v28  ;;  %1493 = vmatmul.bf16.gmra.mxu3 %v3250_v39  ;;  %v2208_v28 = vor.u32 %v2598_v27, %v2207_v26  ;;  %v3515_v27 = vperm.slane %v3348_v48, 3 }
 0x164   : > { %v1249_v34 = vpop.f32.mrf.mxu2  ;;  %1521 = vmatpush.bf16.msra.mxu0 %v2208_v28 }
 0x165   : > { %v1250_v40 = vadd.f32 %v1249_v34, %v3362_v62  ;;  %v1298_v41 = vpop.f32.mrf.mxu3  ;;  %v1153_v42 = vpop.f32.mrf.mxu0 }
 0x166   : > { %v1154_v43 = vadd.f32 %v1153_v42, %v3351_v49  ;;  %v1202_v44 = vpop.f32.mrf.mxu1 }
 0x167   : > { %v1299_v45 = vadd.f32 %v1298_v41, %v1250_v40 }
 0x168   : > { %v1203_v50 = vadd.f32 %v1202_v44, %v1154_v43 }
 0x169   : > { %1759 = vst [vmem:[%s3365_s27 + $0x188] sm:$0xff] %v1299_v45 }
 0x16a   : > { %1764 = vst [vmem:[%s3365_s27 + $0x1b0] sm:$0xff] %v1203_v50 }
 0x16c   : > { %v1251_v56 = vpop.f32.mrf.mxu2 }
 0x16d   : > { %v1252_v60 = vadd.f32 %v1251_v56, %v3362_v62  ;;  %v1300_v61 = vpop.f32.mrf.mxu3  ;;  %v1156_v63 = vpop.f32.mrf.mxu0 }
 0x16e   : > { %v1157_v2 = vadd.f32 %v1156_v63, %v3351_v49  ;;  %v1205_v3 = vpop.f32.mrf.mxu1 }
 0x16f   : > { %v1301_v4 = vadd.f32 %v1300_v61, %v1252_v60 }
 0x170   : > { %v1206_v5 = vadd.f32 %v1205_v3, %v1157_v2  ;;  %1351 = vmatmul.bf16.gmra.mxu0 %v3276_v58 }
 0x171   : > { %1765 = vst [vmem:[%s3365_s27 + $0x1b8] sm:$0xff] %v1301_v4  ;;  %1400 = vmatmul.bf16.gmra.mxu1 %v3278_v59  ;;  %1449 = vmatmul.bf16.gmra.mxu2 %v3276_v58 }
 0x172   : > { %1770 = vst [vmem:[%s3365_s27 + $0x1e0] sm:$0xff] %v1206_v5  ;;  %1498 = vmatmul.bf16.gmra.mxu3 %v3278_v59 }
 0x174   : > { %v1254_v11 = vpop.f32.mrf.mxu2 }
 0x175   : > { %v1255_v14 = vadd.f32 %v1254_v11, %v3362_v62  ;;  %v1303_v18 = vpop.f32.mrf.mxu3  ;;  %v1158_v19 = vpop.f32.mrf.mxu0 }
 0x176   : > { %v1159_v22 = vadd.f32 %v1158_v19, %v3351_v49  ;;  %v1207_v23 = vpop.f32.mrf.mxu1 }
 0x177   : > { %v1304_v24 = vadd.f32 %v1303_v18, %v1255_v14  ;;  %v3506_v14 = vperm.slane %v3348_v48, 2 }
 0x178   : > { %v1208_v25 = vadd.f32 %v1207_v23, %v1159_v22 }
 0x179   : > { %1771 = vst [vmem:[%s3365_s27 + $0x1e8] sm:$0xff] %v1304_v24 }
 0x17a   : > { %1776 = vst [vmem:[%s3365_s27 + $0x210] sm:$0xff] %v1208_v25 }
 0x17c   : > { %v1256_v31 = vpop.f32.mrf.mxu2 }
 0x17d   : > { %v1257_v33 = vadd.f32 %v1256_v31, %v3362_v62  ;;  %v1305_v34 = vpop.f32.mrf.mxu3  ;;  %v1161_v36 = vpop.f32.mrf.mxu0 }
 0x17e   : > { %v1162_v40 = vadd.f32 %v1161_v36, %v3351_v49  ;;  %v1210_v41 = vpop.f32.mrf.mxu1 }
 0x17f   : > { %v1306_v42 = vadd.f32 %v1305_v34, %v1257_v33 }
 0x180   : > { %v1211_v43 = vadd.f32 %v1210_v41, %v1162_v40  ;;  %1356 = vmatmul.bf16.gmra.mxu0 %v3304_v15 }
 0x181   : > { %1777 = vst [vmem:[%s3365_s27 + $0x218] sm:$0xff] %v1306_v42  ;;  %1405 = vmatmul.bf16.gmra.mxu1 %v3306_v16  ;;  %1454 = vmatmul.bf16.gmra.mxu2 %v3304_v15 }
 0x182   : > { %1782 = vst [vmem:[%s3365_s27 + $0x240] sm:$0xff] %v1211_v43  ;;  %1503 = vmatmul.bf16.gmra.mxu3 %v3306_v16 }
 0x184   : > { %v1259_v44 = vpop.f32.mrf.mxu2 }
 0x185   : > { %v1260_v45 = vadd.f32 %v1259_v44, %v3362_v62  ;;  %v1308_v50 = vpop.f32.mrf.mxu3  ;;  %v1163_v51 = vpop.f32.mrf.mxu0 }
 0x186   : > { %v1164_v52 = vadd.f32 %v1163_v51, %v3351_v49  ;;  %v1212_v53 = vpop.f32.mrf.mxu1 }
 0x187   : > { %v1309_v54 = vadd.f32 %v1308_v50, %v1260_v45 }
 0x188   : > { %v1213_v55 = vadd.f32 %v1212_v53, %v1164_v52 }
 0x189   : > { %1783 = vst [vmem:[%s3365_s27 + $0x248] sm:$0xff] %v1309_v54 }
 0x18a   : > { %1788 = vst [vmem:[%s3365_s27 + $0x270] sm:$0xff] %v1213_v55 }
 0x18c   : > { %v1261_v56 = vpop.f32.mrf.mxu2 }
 0x18d   : > { %v1262_v57 = vadd.f32 %v1261_v56, %v3362_v62  ;;  %v1310_v60 = vpop.f32.mrf.mxu3  ;;  %v1166_v61 = vpop.f32.mrf.mxu0 }
 0x18e   : > { %v1167_v63 = vadd.f32 %v1166_v61, %v3351_v49  ;;  %v1215_v2 = vpop.f32.mrf.mxu1 }
 0x18f   : > { %v1311_v3 = vadd.f32 %v1310_v60, %v1262_v57 }
 0x190   : > { %v1216_v4 = vadd.f32 %v1215_v2, %v1167_v63  ;;  %1361 = vmatmul.bf16.gmra.mxu0 %v3333_v35 }
 0x191   : > { %1789 = vst [vmem:[%s3365_s27 + $0x278] sm:$0xff] %v1311_v3  ;;  %1410 = vmatmul.bf16.gmra.mxu1 %v3335_v37  ;;  %1459 = vmatmul.bf16.gmra.mxu2 %v3333_v35 }
 0x192   : > { %1794 = vst [vmem:[%s3365_s27 + $0x2a0] sm:$0xff] %v1216_v4  ;;  %1508 = vmatmul.bf16.gmra.mxu3 %v3335_v37 }
 0x194   : > { %v1264_v5 = vpop.f32.mrf.mxu2 }
 0x195   : > { %v1265_v6 = vadd.f32 %v1264_v5, %v3362_v62  ;;  %v1313_v7 = vpop.f32.mrf.mxu3  ;;  %v1168_v8 = vpop.f32.mrf.mxu0 }
 0x196   : > { %v1169_v9 = vadd.f32 %v1168_v8, %v3351_v49  ;;  %v1217_v10 = vpop.f32.mrf.mxu1 }
 0x197   : > { %v1314_v11 = vadd.f32 %v1313_v7, %v1265_v6 }
 0x198   : > { %v1218_v13 = vadd.f32 %v1217_v10, %v1169_v9 }
 0x199   : > { %1795 = vst [vmem:[%s3365_s27 + $0x2a8] sm:$0xff] %v1314_v11 }
 0x19a   : > { %1800 = vst [vmem:[%s3365_s27 + $0x2d0] sm:$0xff] %v1218_v13 }
 0x19c   : > { %v1266_v18 = vpop.f32.mrf.mxu2 }
 0x19d   : > { %v1267_v19 = vadd.f32 %v1266_v18, %v3362_v62  ;;  %v1315_v22 = vpop.f32.mrf.mxu3  ;;  %v1327_v23 = vpop.f32.mrf.mxu0 }
 0x19e   : > { %v1328_v24 = vadd.f32 %v1327_v23, %v3506_v14  ;;  %v1376_v25 = vpop.f32.mrf.mxu1 }
 0x19f   : > { %v1316_v26 = vadd.f32 %v1315_v22, %v1267_v19 }
 0x1a0   : > { %v1377_v49 = vadd.f32 %v1376_v25, %v1328_v24  ;;  %1522 = vmatmul.bf16.vlgmr.msra.gmra.mxu0 %v3127_v12 }
 0x1a1   : > { %1801 = vst [vmem:[%s3365_s27 + $0x2d8] sm:$0xff] %v1316_v26  ;;  %1571 = vmatmul.bf16.vlgmr.msra.gmra.mxu1 %v3132_v17  ;;  %1620 = vmatmul.bf16.vlgmr.msra.gmra.mxu2 %v3127_v12 }
 0x1a2   : > { %1712 = vst [vmem:[%s3365_s27 + $0x10] sm:$0xff] %v1377_v49  ;;  %1669 = vmatmul.bf16.vlgmr.msra.gmra.mxu3 %v3132_v17 }
 0x1a4   : > { %v1425_v62 = vpop.f32.mrf.mxu2 }
 0x1a5   : > { %v1426_v28 = vadd.f32 %v1425_v62, %v3515_v27  ;;  %v1474_v29 = vpop.f32.mrf.mxu3  ;;  %v1329_v30 = vpop.f32.mrf.mxu0 }
 0x1a6   : > { %v1330_v31 = vadd.f32 %v1329_v30, %v3506_v14  ;;  %v1378_v32 = vpop.f32.mrf.mxu1 }
 0x1a7   : > { %v1475_v33 = vadd.f32 %v1474_v29, %v1426_v28 }
 0x1a8   : > { %v1379_v34 = vadd.f32 %v1378_v32, %v1330_v31 }
 0x1a9   : > { %1713 = vst [vmem:[%s3365_s27 + $0x18] sm:$0xff] %v1475_v33 }
 0x1aa   : > { %1718 = vst [vmem:[%s3365_s27 + $0x40] sm:$0xff] %v1379_v34 }
 0x1ac   : > { %v1427_v12 = vpop.f32.mrf.mxu2 }
 0x1ad   : > { %v1428_v36 = vadd.f32 %v1427_v12, %v3515_v27  ;;  %v1476_v40 = vpop.f32.mrf.mxu3  ;;  %v1332_v41 = vpop.f32.mrf.mxu0 }
 0x1ae   : > { %v1333_v17 = vadd.f32 %v1332_v41, %v3506_v14  ;;  %v1381_v42 = vpop.f32.mrf.mxu1 }
 0x1af   : > { %v1477_v43 = vadd.f32 %v1476_v40, %v1428_v36 }
 0x1b0   : > { %v1382_v44 = vadd.f32 %v1381_v42, %v1333_v17  ;;  %1527 = vmatmul.bf16.gmra.mxu0 %v3164_v46 }
 0x1b1   : > { %1719 = vst [vmem:[%s3365_s27 + $0x48] sm:$0xff] %v1477_v43  ;;  %1576 = vmatmul.bf16.gmra.mxu1 %v3166_v47  ;;  %1625 = vmatmul.bf16.gmra.mxu2 %v3164_v46 }
 0x1b2   : > { %1724 = vst [vmem:[%s3365_s27 + $0x70] sm:$0xff] %v1382_v44  ;;  %1674 = vmatmul.bf16.gmra.mxu3 %v3166_v47 }
 0x1b4   : > { %v1430_v45 = vpop.f32.mrf.mxu2 }
 0x1b5   : > { %v1431_v50 = vadd.f32 %v1430_v45, %v3515_v27  ;;  %v1479_v51 = vpop.f32.mrf.mxu3  ;;  %v1334_v52 = vpop.f32.mrf.mxu0 }
 0x1b6   : > { %v1335_v53 = vadd.f32 %v1334_v52, %v3506_v14  ;;  %v1383_v54 = vpop.f32.mrf.mxu1 }
 0x1b7   : > { %v1480_v55 = vadd.f32 %v1479_v51, %v1431_v50 }
 0x1b8   : > { %v1384_v56 = vadd.f32 %v1383_v54, %v1335_v53 }
 0x1b9   : > { %1725 = vst [vmem:[%s3365_s27 + $0x78] sm:$0xff] %v1480_v55 }
 0x1ba   : > { %1730 = vst [vmem:[%s3365_s27 + $0xa0] sm:$0xff] %v1384_v56 }
 0x1bc   : > { %v1432_v57 = vpop.f32.mrf.mxu2 }
 0x1bd   : > { %v1433_v46 = vadd.f32 %v1432_v57, %v3515_v27  ;;  %v1481_v60 = vpop.f32.mrf.mxu3  ;;  %v1337_v61 = vpop.f32.mrf.mxu0 }
 0x1be   : > { %v1338_v47 = vadd.f32 %v1337_v61, %v3506_v14  ;;  %v1386_v63 = vpop.f32.mrf.mxu1 }
 0x1bf   : > { %v1482_v2 = vadd.f32 %v1481_v60, %v1433_v46 }
 0x1c0   : > { %v1387_v3 = vadd.f32 %v1386_v63, %v1338_v47  ;;  %1532 = vmatmul.bf16.gmra.mxu0 %v3192_v0 }
 0x1c1   : > { %1731 = vst [vmem:[%s3365_s27 + $0xa8] sm:$0xff] %v1482_v2  ;;  %1581 = vmatmul.bf16.gmra.mxu1 %v3194_v1  ;;  %1630 = vmatmul.bf16.gmra.mxu2 %v3192_v0 }
 0x1c2   : > { %1736 = vst [vmem:[%s3365_s27 + $0xd0] sm:$0xff] %v1387_v3  ;;  %1679 = vmatmul.bf16.gmra.mxu3 %v3194_v1 }
 0x1c4   : > { %v1435_v4 = vpop.f32.mrf.mxu2 }
 0x1c5   : > { %v1436_v5 = vadd.f32 %v1435_v4, %v3515_v27  ;;  %v1484_v6 = vpop.f32.mrf.mxu3  ;;  %v1339_v7 = vpop.f32.mrf.mxu0 }
 0x1c6   : > { %v1340_v8 = vadd.f32 %v1339_v7, %v3506_v14  ;;  %v1388_v9 = vpop.f32.mrf.mxu1 }
 0x1c7   : > { %v1485_v10 = vadd.f32 %v1484_v6, %v1436_v5 }
 0x1c8   : > { %v1389_v11 = vadd.f32 %v1388_v9, %v1340_v8 }
 0x1c9   : > { %1737 = vst [vmem:[%s3365_s27 + $0xd8] sm:$0xff] %v1485_v10 }
 0x1ca   : > { %1742 = vst [vmem:[%s3365_s27 + $0x100] sm:$0xff] %v1389_v11 }
 0x1cc   : > { %v1437_v13 = vpop.f32.mrf.mxu2 }
 0x1cd   : > { %v1438_v0 = vadd.f32 %v1437_v13, %v3515_v27  ;;  %v1486_v18 = vpop.f32.mrf.mxu3  ;;  %v1342_v19 = vpop.f32.mrf.mxu0 }
 0x1ce   : > { %v1343_v1 = vadd.f32 %v1342_v19, %v3506_v14  ;;  %v1391_v22 = vpop.f32.mrf.mxu1 }
 0x1cf   : > { %v1487_v23 = vadd.f32 %v1486_v18, %v1438_v0 }
 0x1d0   : > { %v1392_v24 = vadd.f32 %v1391_v22, %v1343_v1  ;;  %1537 = vmatmul.bf16.gmra.mxu0 %v3220_v20 }
 0x1d1   : > { %1743 = vst [vmem:[%s3365_s27 + $0x108] sm:$0xff] %v1487_v23  ;;  %1586 = vmatmul.bf16.gmra.mxu1 %v3222_v21  ;;  %1635 = vmatmul.bf16.gmra.mxu2 %v3220_v20 }
 0x1d2   : > { %1748 = vst [vmem:[%s3365_s27 + $0x130] sm:$0xff] %v1392_v24  ;;  %1684 = vmatmul.bf16.gmra.mxu3 %v3222_v21 }
 0x1d4   : > { %v1440_v25 = vpop.f32.mrf.mxu2 }
 0x1d5   : > { %v1441_v26 = vadd.f32 %v1440_v25, %v3515_v27  ;;  %v1489_v49 = vpop.f32.mrf.mxu3  ;;  %v1344_v62 = vpop.f32.mrf.mxu0 }
 0x1d6   : > { %v1345_v28 = vadd.f32 %v1344_v62, %v3506_v14  ;;  %v1393_v29 = vpop.f32.mrf.mxu1 }
 0x1d7   : > { %v1490_v30 = vadd.f32 %v1489_v49, %v1441_v26 }
 0x1d8   : > { %v1394_v31 = vadd.f32 %v1393_v29, %v1345_v28 }
 0x1d9   : > { %1749 = vst [vmem:[%s3365_s27 + $0x138] sm:$0xff] %v1490_v30 }
 0x1da   : > { %1754 = vst [vmem:[%s3365_s27 + $0x160] sm:$0xff] %v1394_v31 }
 0x1dc   : > { %v1442_v32 = vpop.f32.mrf.mxu2 }
 0x1dd   : > { %v1443_v20 = vadd.f32 %v1442_v32, %v3515_v27  ;;  %v1491_v33 = vpop.f32.mrf.mxu3  ;;  %v1347_v34 = vpop.f32.mrf.mxu0 }
 0x1de   : > { %v1348_v21 = vadd.f32 %v1347_v34, %v3506_v14  ;;  %v1396_v12 = vpop.f32.mrf.mxu1 }
 0x1df   : > { %v1492_v36 = vadd.f32 %v1491_v33, %v1443_v20 }
 0x1e0   : > { %v1397_v40 = vadd.f32 %v1396_v12, %v1348_v21  ;;  %1542 = vmatmul.bf16.gmra.mxu0 %v3248_v38  ;;  %v3608_v12 = vperm.slane %v3348_v48, 4 }
 0x1e1   : > { %1755 = vst [vmem:[%s3365_s27 + $0x168] sm:$0xff] %v1492_v36  ;;  %1591 = vmatmul.bf16.gmra.mxu1 %v3250_v39  ;;  %1640 = vmatmul.bf16.gmra.mxu2 %v3248_v38 }
 0x1e2   : > { %1760 = vst [vmem:[%s3365_s27 + $0x190] sm:$0xff] %v1397_v40  ;;  %1689 = vmatmul.bf16.gmra.mxu3 %v3250_v39 }
 0x1e4   : > { %v1445_v41 = vpop.f32.mrf.mxu2 }
 0x1e5   : > { %v1446_v17 = vadd.f32 %v1445_v41, %v3515_v27  ;;  %v1494_v42 = vpop.f32.mrf.mxu3  ;;  %v1349_v43 = vpop.f32.mrf.mxu0 }
 0x1e6   : > { %v1350_v44 = vadd.f32 %v1349_v43, %v3506_v14  ;;  %v1398_v45 = vpop.f32.mrf.mxu1  ;;  %v3614_v43 = vperm.slane %v3348_v48, 5 }
 0x1e7   : > { %v1495_v50 = vadd.f32 %v1494_v42, %v1446_v17 }
 0x1e8   : > { %v1399_v51 = vadd.f32 %v1398_v45, %v1350_v44 }
 0x1e9   : > { %1761 = vst [vmem:[%s3365_s27 + $0x198] sm:$0xff] %v1495_v50 }
 0x1ea   : > { %1766 = vst [vmem:[%s3365_s27 + $0x1c0] sm:$0xff] %v1399_v51 }
 0x1ec   : > { %v1447_v52 = vpop.f32.mrf.mxu2 }
 0x1ed   : > { %v1448_v38 = vadd.f32 %v1447_v52, %v3515_v27  ;;  %v1496_v53 = vpop.f32.mrf.mxu3  ;;  %v1352_v54 = vpop.f32.mrf.mxu0 }
 0x1ee   : > { %v1353_v39 = vadd.f32 %v1352_v54, %v3506_v14  ;;  %v1401_v55 = vpop.f32.mrf.mxu1 }
 0x1ef   : > { %v1497_v56 = vadd.f32 %v1496_v53, %v1448_v38 }
 0x1f0   : > { %v1402_v57 = vadd.f32 %v1401_v55, %v1353_v39  ;;  %1547 = vmatmul.bf16.gmra.mxu0 %v3276_v58 }
 0x1f1   : > { %1767 = vst [vmem:[%s3365_s27 + $0x1c8] sm:$0xff] %v1497_v56  ;;  %1596 = vmatmul.bf16.gmra.mxu1 %v3278_v59  ;;  %1645 = vmatmul.bf16.gmra.mxu2 %v3276_v58 }
 0x1f2   : > { %1772 = vst [vmem:[%s3365_s27 + $0x1f0] sm:$0xff] %v1402_v57  ;;  %1694 = vmatmul.bf16.gmra.mxu3 %v3278_v59 }
 0x1f4   : > { %v1450_v46 = vpop.f32.mrf.mxu2 }
 0x1f5   : > { %v1451_v60 = vadd.f32 %v1450_v46, %v3515_v27  ;;  %v1499_v61 = vpop.f32.mrf.mxu3  ;;  %v1354_v47 = vpop.f32.mrf.mxu0 }
 0x1f6   : > { %v1355_v63 = vadd.f32 %v1354_v47, %v3506_v14  ;;  %v1403_v2 = vpop.f32.mrf.mxu1 }
 0x1f7   : > { %v1500_v3 = vadd.f32 %v1499_v61, %v1451_v60 }
 0x1f8   : > { %v1404_v4 = vadd.f32 %v1403_v2, %v1355_v63 }
 0x1f9   : > { %1773 = vst [vmem:[%s3365_s27 + $0x1f8] sm:$0xff] %v1500_v3 }
 0x1fa   : > { %1778 = vst [vmem:[%s3365_s27 + $0x220] sm:$0xff] %v1404_v4 }
 0x1fc   : > { %v1452_v5 = vpop.f32.mrf.mxu2 }
 0x1fd   : > { %v1453_v58 = vadd.f32 %v1452_v5, %v3515_v27  ;;  %v1501_v6 = vpop.f32.mrf.mxu3  ;;  %v1357_v7 = vpop.f32.mrf.mxu0 }
 0x1fe   : > { %v1358_v59 = vadd.f32 %v1357_v7, %v3506_v14  ;;  %v1406_v8 = vpop.f32.mrf.mxu1 }
 0x1ff   : > { %v1502_v9 = vadd.f32 %v1501_v6, %v1453_v58 }
 0x200   : > { %v1407_v10 = vadd.f32 %v1406_v8, %v1358_v59  ;;  %1552 = vmatmul.bf16.gmra.mxu0 %v3304_v15 }
 0x201   : > { %1779 = vst [vmem:[%s3365_s27 + $0x228] sm:$0xff] %v1502_v9  ;;  %1601 = vmatmul.bf16.gmra.mxu1 %v3306_v16  ;;  %1650 = vmatmul.bf16.gmra.mxu2 %v3304_v15 }
 0x202   : > { %1784 = vst [vmem:[%s3365_s27 + $0x250] sm:$0xff] %v1407_v10  ;;  %1699 = vmatmul.bf16.gmra.mxu3 %v3306_v16 }
 0x204   : > { %v1455_v11 = vpop.f32.mrf.mxu2 }
 0x205   : > { %v1456_v13 = vadd.f32 %v1455_v11, %v3515_v27  ;;  %v1504_v0 = vpop.f32.mrf.mxu3  ;;  %v1359_v18 = vpop.f32.mrf.mxu0 }
 0x206   : > { %v1360_v19 = vadd.f32 %v1359_v18, %v3506_v14  ;;  %v1408_v1 = vpop.f32.mrf.mxu1 }
 0x207   : > { %v1505_v22 = vadd.f32 %v1504_v0, %v1456_v13 }
 0x208   : > { %v1409_v23 = vadd.f32 %v1408_v1, %v1360_v19 }
 0x209   : > { %1785 = vst [vmem:[%s3365_s27 + $0x258] sm:$0xff] %v1505_v22 }
 0x20a   : > { %1790 = vst [vmem:[%s3365_s27 + $0x280] sm:$0xff] %v1409_v23 }
 0x20c   : > { %v1457_v24 = vpop.f32.mrf.mxu2 }
 0x20d   : > { %v1458_v15 = vadd.f32 %v1457_v24, %v3515_v27  ;;  %v1506_v25 = vpop.f32.mrf.mxu3  ;;  %v1362_v26 = vpop.f32.mrf.mxu0 }
 0x20e   : > { %v1363_v16 = vadd.f32 %v1362_v26, %v3506_v14  ;;  %v1411_v49 = vpop.f32.mrf.mxu1 }
 0x20f   : > { %v1507_v62 = vadd.f32 %v1506_v25, %v1458_v15 }
 0x210   : > { %v1412_v28 = vadd.f32 %v1411_v49, %v1363_v16  ;;  %1557 = vmatmul.bf16.gmra.mxu0 %v3333_v35 }
 0x211   : > { %1791 = vst [vmem:[%s3365_s27 + $0x288] sm:$0xff] %v1507_v62  ;;  %1606 = vmatmul.bf16.gmra.mxu1 %v3335_v37  ;;  %1655 = vmatmul.bf16.gmra.mxu2 %v3333_v35 }
 0x212   : > { %1796 = vst [vmem:[%s3365_s27 + $0x2b0] sm:$0xff] %v1412_v28  ;;  %1704 = vmatmul.bf16.gmra.mxu3 %v3335_v37 }
 0x214   : > { %v1460_v29 = vpop.f32.mrf.mxu2 }
 0x215   : > { %v1461_v30 = vadd.f32 %v1460_v29, %v3515_v27  ;;  %v1509_v31 = vpop.f32.mrf.mxu3  ;;  %v1364_v32 = vpop.f32.mrf.mxu0 }
 0x216   : > { %v1365_v20 = vadd.f32 %v1364_v32, %v3506_v14  ;;  %v1413_v33 = vpop.f32.mrf.mxu1 }
 0x217   : > { %v1510_v34 = vadd.f32 %v1509_v31, %v1461_v30 }
 0x218   : > { %v1414_v21 = vadd.f32 %v1413_v33, %v1365_v20 }
 0x219   : > { %1797 = vst [vmem:[%s3365_s27 + $0x2b8] sm:$0xff] %v1510_v34 }
 0x21a   : > { %1802 = vst [vmem:[%s3365_s27 + $0x2e0] sm:$0xff] %v1414_v21 }
 0x21c   : > { %v1462_v35 = vpop.f32.mrf.mxu2 }
 0x21d   : > { %v1463_v37 = vadd.f32 %v1462_v35, %v3515_v27  ;;  %v1511_v36 = vpop.f32.mrf.mxu3  ;;  %v1523_v40 = vpop.f32.mrf.mxu0 }
 0x21e   : > { %v1524_v41 = vadd.f32 %v1523_v40, %v3608_v12  ;;  %v1572_v17 = vpop.f32.mrf.mxu1 }
 0x21f   : > { %v1512_v14 = vadd.f32 %v1511_v36, %v1463_v37 }
 0x220   : > { %v1573_v42 = vadd.f32 %v1572_v17, %v1524_v41 }
 0x221   : > { %1803 = vst [vmem:[%s3365_s27 + $0x2e8] sm:$0xff] %v1512_v14 }
 0x222   : > { %1714 = vst [vmem:[%s3365_s27 + $0x20] sm:$0xff] %v1573_v42 }
 0x224   : > { %v1621_v44 = vpop.f32.mrf.mxu2 }
 0x225   : > { %v1622_v45 = vadd.f32 %v1621_v44, %v3614_v43  ;;  %v1670_v50 = vpop.f32.mrf.mxu3  ;;  %v1525_v27 = vpop.f32.mrf.mxu0 }
 0x226   : > { %v1526_v51 = vadd.f32 %v1525_v27, %v3608_v12  ;;  %v1574_v52 = vpop.f32.mrf.mxu1 }
 0x227   : > { %v1671_v38 = vadd.f32 %v1670_v50, %v1622_v45 }
 0x228   : > { %v1575_v53 = vadd.f32 %v1574_v52, %v1526_v51 }
 0x229   : > { %1715 = vst [vmem:[%s3365_s27 + $0x28] sm:$0xff] %v1671_v38 }
 0x22a   : > { %1720 = vst [vmem:[%s3365_s27 + $0x50] sm:$0xff] %v1575_v53 }
 0x22c   : > { %v1623_v54 = vpop.f32.mrf.mxu2 }
 0x22d   : > { %v1624_v39 = vadd.f32 %v1623_v54, %v3614_v43  ;;  %v1672_v48 = vpop.f32.mrf.mxu3  ;;  %v1528_v55 = vpop.f32.mrf.mxu0 }
 0x22e   : > { %v1529_v56 = vadd.f32 %v1528_v55, %v3608_v12  ;;  %v1577_v57 = vpop.f32.mrf.mxu1 }
 0x22f   : > { %v1673_v46 = vadd.f32 %v1672_v48, %v1624_v39 }
 0x230   : > { %v1578_v60 = vadd.f32 %v1577_v57, %v1529_v56 }
 0x231   : > { %1721 = vst [vmem:[%s3365_s27 + $0x58] sm:$0xff] %v1673_v46 }
 0x232   : > { %1726 = vst [vmem:[%s3365_s27 + $0x80] sm:$0xff] %v1578_v60 }
 0x234   : > { %v1626_v61 = vpop.f32.mrf.mxu2 }
 0x235   : > { %v1627_v47 = vadd.f32 %v1626_v61, %v3614_v43  ;;  %v1675_v63 = vpop.f32.mrf.mxu3  ;;  %v1530_v2 = vpop.f32.mrf.mxu0 }
 0x236   : > { %v1531_v3 = vadd.f32 %v1530_v2, %v3608_v12  ;;  %v1579_v4 = vpop.f32.mrf.mxu1 }
 0x237   : > { %v1676_v5 = vadd.f32 %v1675_v63, %v1627_v47 }
 0x238   : > { %v1580_v58 = vadd.f32 %v1579_v4, %v1531_v3 }
 0x239   : > { %1727 = vst [vmem:[%s3365_s27 + $0x88] sm:$0xff] %v1676_v5 }
 0x23a   : > { %1732 = vst [vmem:[%s3365_s27 + $0xb0] sm:$0xff] %v1580_v58 }
 0x23c   : > { %v1628_v6 = vpop.f32.mrf.mxu2 }
 0x23d   : > { %v1629_v7 = vadd.f32 %v1628_v6, %v3614_v43  ;;  %v1677_v59 = vpop.f32.mrf.mxu3  ;;  %v1533_v8 = vpop.f32.mrf.mxu0 }
 0x23e   : > { %v1534_v9 = vadd.f32 %v1533_v8, %v3608_v12  ;;  %v1582_v10 = vpop.f32.mrf.mxu1 }
 0x23f   : > { %v1678_v11 = vadd.f32 %v1677_v59, %v1629_v7 }
 0x240   : > { %v1583_v13 = vadd.f32 %v1582_v10, %v1534_v9 }
 0x241   : > { %1733 = vst [vmem:[%s3365_s27 + $0xb8] sm:$0xff] %v1678_v11 }
 0x242   : > { %1738 = vst [vmem:[%s3365_s27 + $0xe0] sm:$0xff] %v1583_v13 }
 0x244   : > { %v1631_v0 = vpop.f32.mrf.mxu2 }
 0x245   : > { %v1632_v18 = vadd.f32 %v1631_v0, %v3614_v43  ;;  %v1680_v19 = vpop.f32.mrf.mxu3  ;;  %v1535_v1 = vpop.f32.mrf.mxu0 }
 0x246   : > { %v1536_v22 = vadd.f32 %v1535_v1, %v3608_v12  ;;  %v1584_v23 = vpop.f32.mrf.mxu1 }
 0x247   : > { %v1681_v24 = vadd.f32 %v1680_v19, %v1632_v18 }
 0x248   : > { %v1585_v15 = vadd.f32 %v1584_v23, %v1536_v22 }
 0x249   : > { %1739 = vst [vmem:[%s3365_s27 + $0xe8] sm:$0xff] %v1681_v24 }
 0x24a   : > { %1744 = vst [vmem:[%s3365_s27 + $0x110] sm:$0xff] %v1585_v15 }
 0x24c   : > { %v1633_v25 = vpop.f32.mrf.mxu2 }
 0x24d   : > { %v1634_v26 = vadd.f32 %v1633_v25, %v3614_v43  ;;  %v1682_v16 = vpop.f32.mrf.mxu3  ;;  %v1538_v49 = vpop.f32.mrf.mxu0 }
 0x24e   : > { %v1539_v62 = vadd.f32 %v1538_v49, %v3608_v12  ;;  %v1587_v28 = vpop.f32.mrf.mxu1 }
 0x24f   : > { %v1683_v29 = vadd.f32 %v1682_v16, %v1634_v26 }
 0x250   : > { %v1588_v30 = vadd.f32 %v1587_v28, %v1539_v62 }
 0x251   : > { %1745 = vst [vmem:[%s3365_s27 + $0x118] sm:$0xff] %v1683_v29 }
 0x252   : > { %1750 = vst [vmem:[%s3365_s27 + $0x140] sm:$0xff] %v1588_v30 }
 0x254   : > { %v1636_v31 = vpop.f32.mrf.mxu2 }
 0x255   : > { %v1637_v32 = vadd.f32 %v1636_v31, %v3614_v43  ;;  %v1685_v20 = vpop.f32.mrf.mxu3  ;;  %v1540_v33 = vpop.f32.mrf.mxu0 }
 0x256   : > { %v1541_v34 = vadd.f32 %v1540_v33, %v3608_v12  ;;  %v1589_v21 = vpop.f32.mrf.mxu1 }
 0x257   : > { %v1686_v35 = vadd.f32 %v1685_v20, %v1637_v32 }
 0x258   : > { %v1590_v37 = vadd.f32 %v1589_v21, %v1541_v34 }
 0x259   : > { %1751 = vst [vmem:[%s3365_s27 + $0x148] sm:$0xff] %v1686_v35 }
 0x25a   : > { %1756 = vst [vmem:[%s3365_s27 + $0x170] sm:$0xff] %v1590_v37 }
 0x25c   : > { %v1638_v36 = vpop.f32.mrf.mxu2 }
 0x25d   : > { %v1639_v40 = vadd.f32 %v1638_v36, %v3614_v43  ;;  %v1687_v41 = vpop.f32.mrf.mxu3  ;;  %v1543_v17 = vpop.f32.mrf.mxu0 }
 0x25e   : > { %v1544_v14 = vadd.f32 %v1543_v17, %v3608_v12  ;;  %v1592_v42 = vpop.f32.mrf.mxu1 }
 0x25f   : > { %v1688_v44 = vadd.f32 %v1687_v41, %v1639_v40 }
 0x260   : > { %v1593_v45 = vadd.f32 %v1592_v42, %v1544_v14 }
 0x261   : > { %1757 = vst [vmem:[%s3365_s27 + $0x178] sm:$0xff] %v1688_v44  ;;  %v1833_v44 = vld [vmem:[%s3365_s27 + $0x8] sm:$0xff] (%p2827_p6) }
 0x262   : > { %1762 = vst [vmem:[%s3365_s27 + $0x1a0] sm:$0xff] %v1593_v45  ;;  %v1837_v45 = vld [vmem:[%s3365_s27 + $0x18] sm:$0xff] (%p2827_p6) }
 0x263   : > { %1834 = vst [vmem:[%s3687_s29 + $0x8] sm:$0xff] (%p2827_p6), %v1833_v44 }
 0x264   : > { %v1641_v50 = vpop.f32.mrf.mxu2  ;;  %1838 = vst [vmem:[%s3687_s29 + $0x18] sm:$0xff] (%p2827_p6), %v1837_v45  ;;  %v1965_v45 = vld [vmem:[%s3365_s27 + $0x218] sm:$0xff] (%p2827_p6) }
 0x265   : > { %v1642_v27 = vadd.f32 %v1641_v50, %v3614_v43  ;;  %v1690_v51 = vpop.f32.mrf.mxu3  ;;  %v1545_v52 = vpop.f32.mrf.mxu0  ;;  %v1839_v50 = vld [vmem:[%s3365_s27 + $0x20] sm:$0xff] (%p2827_p6)  ;;  %1966 = vst [vmem:[%s3687_s29 + $0xc68] sm:$0xff] (%p2827_p6), %v1965_v45 }
 0x266   : > { %v1546_v38 = vadd.f32 %v1545_v52, %v3608_v12  ;;  %v1594_v53 = vpop.f32.mrf.mxu1  ;;  %1840 = vst [vmem:[%s3687_s29 + $0x20] sm:$0xff] (%p2827_p6), %v1839_v50  ;;  %v1845_v52 = vld [vmem:[%s3365_s27 + $0x38] sm:$0xff] (%p2827_p6)  ;;  %v1967_v50 = vld [vmem:[%s3365_s27 + $0x220] sm:$0xff] (%p2827_p6) }
 0x267   : > { %v1691_v54 = vadd.f32 %v1690_v51, %v1642_v27  ;;  %v1841_v27 = vld [vmem:[%s3365_s27 + $0x28] sm:$0xff] (%p2827_p6)  ;;  %v1843_v51 = vld [vmem:[%s3365_s27 + $0x30] sm:$0xff] (%p2827_p6)  ;;  %1846 = vst [vmem:[%s3687_s29 + $0x128] sm:$0xff] (%p2827_p6), %v1845_v52 }
 0x268   : > { %v1595_v39 = vadd.f32 %v1594_v53, %v1546_v38  ;;  %1842 = vst [vmem:[%s3687_s29 + $0x28] sm:$0xff] (%p2827_p6), %v1841_v27  ;;  %v1847_v38 = vld [vmem:[%s3365_s27 + $0x40] sm:$0xff] (%p2827_p6)  ;;  %v1849_v53 = vld [vmem:[%s3365_s27 + $0x48] sm:$0xff] (%p2827_p6) }
 0x269   : > { %1763 = vst [vmem:[%s3365_s27 + $0x1a8] sm:$0xff] %v1691_v54  ;;  %v1851_v54 = vld [vmem:[%s3365_s27 + $0x50] sm:$0xff] (%p2827_p6)  ;;  %v1969_v27 = vld [vmem:[%s3365_s27 + $0x228] sm:$0xff] (%p2827_p6) }
 0x26a   : > { %1768 = vst [vmem:[%s3365_s27 + $0x1d0] sm:$0xff] %v1595_v39  ;;  %v1853_v39 = vld [vmem:[%s3365_s27 + $0x58] sm:$0xff] (%p2827_p6) }
 0x26b   : > { %1844 = vst [vmem:[%s3687_s29 + $0x120] sm:$0xff] (%p2827_p6), %v1843_v51 }
 0x26c   : > { %v1643_v48 = vpop.f32.mrf.mxu2  ;;  %1848 = vst [vmem:[%s3687_s29 + $0x130] sm:$0xff] (%p2827_p6), %v1847_v38  ;;  %v1975_v38 = vld [vmem:[%s3365_s27 + $0x240] sm:$0xff] (%p2827_p6) }
 0x26d   : > { %v1644_v55 = vadd.f32 %v1643_v48, %v3614_v43  ;;  %v1692_v56 = vpop.f32.mrf.mxu3  ;;  %v1548_v57 = vpop.f32.mrf.mxu0  ;;  %1850 = vst [vmem:[%s3687_s29 + $0x138] sm:$0xff] (%p2827_p6), %v1849_v53  ;;  %v1855_v48 = vld [vmem:[%s3365_s27 + $0x60] sm:$0xff] (%p2827_p6)  ;;  %v1977_v53 = vld [vmem:[%s3365_s27 + $0x248] sm:$0xff] (%p2827_p6) }
 0x26e   : > { %v1549_v46 = vadd.f32 %v1548_v57, %v3608_v12  ;;  %v1597_v60 = vpop.f32.mrf.mxu1  ;;  %1852 = vst [vmem:[%s3687_s29 + $0x140] sm:$0xff] (%p2827_p6), %v1851_v54  ;;  %v1861_v57 = vld [vmem:[%s3365_s27 + $0x78] sm:$0xff] (%p2827_p6)  ;;  %v1979_v54 = vld [vmem:[%s3365_s27 + $0x250] sm:$0xff] (%p2827_p6) }
 0x26f   : > { %v1693_v61 = vadd.f32 %v1692_v56, %v1644_v55  ;;  %v1857_v55 = vld [vmem:[%s3365_s27 + $0x68] sm:$0xff] (%p2827_p6)  ;;  %1854 = vst [vmem:[%s3687_s29 + $0x148] sm:$0xff] (%p2827_p6), %v1853_v39  ;;  %v1859_v56 = vld [vmem:[%s3365_s27 + $0x70] sm:$0xff] (%p2827_p6)  ;;  %v1981_v39 = vld [vmem:[%s3365_s27 + $0x258] sm:$0xff] (%p2827_p6) }
 0x270   : > { %v1598_v47 = vadd.f32 %v1597_v60, %v1549_v46  ;;  %1856 = vst [vmem:[%s3687_s29 + $0x240] sm:$0xff] (%p2827_p6), %v1855_v48  ;;  %v1863_v46 = vld [vmem:[%s3365_s27 + $0x80] sm:$0xff] (%p2827_p6)  ;;  %v1865_v60 = vld [vmem:[%s3365_s27 + $0x88] sm:$0xff] (%p2827_p6) }
 0x271   : > { %1769 = vst [vmem:[%s3365_s27 + $0x1d8] sm:$0xff] %v1693_v61  ;;  %v1867_v61 = vld [vmem:[%s3365_s27 + $0x90] sm:$0xff] (%p2827_p6) }
 0x272   : > { %1774 = vst [vmem:[%s3365_s27 + $0x200] sm:$0xff] %v1598_v47  ;;  %v1869_v47 = vld [vmem:[%s3365_s27 + $0x98] sm:$0xff] (%p2827_p6) }
 0x273   : > { %1858 = vst [vmem:[%s3687_s29 + $0x248] sm:$0xff] (%p2827_p6), %v1857_v55 }
 0x274   : > { %v1646_v63 = vpop.f32.mrf.mxu2  ;;  %1860 = vst [vmem:[%s3687_s29 + $0x250] sm:$0xff] (%p2827_p6), %v1859_v56  ;;  %v1987_v56 = vld [vmem:[%s3365_s27 + $0x270] sm:$0xff] (%p2827_p6) }
 0x275   : > { %v1647_v2 = vadd.f32 %v1646_v63, %v3614_v43  ;;  %v1695_v3 = vpop.f32.mrf.mxu3  ;;  %v1550_v4 = vpop.f32.mrf.mxu0  ;;  %1862 = vst [vmem:[%s3687_s29 + $0x258] sm:$0xff] (%p2827_p6), %v1861_v57  ;;  %v1871_v63 = vld [vmem:[%s3365_s27 + $0xa0] sm:$0xff] (%p2827_p6)  ;;  %v1989_v57 = vld [vmem:[%s3365_s27 + $0x278] sm:$0xff] (%p2827_p6) }
 0x276   : > { %v1551_v5 = vadd.f32 %v1550_v4, %v3608_v12  ;;  %v1599_v58 = vpop.f32.mrf.mxu1  ;;  %1864 = vst [vmem:[%s3687_s29 + $0x260] sm:$0xff] (%p2827_p6), %v1863_v46  ;;  %v1877_v4 = vld [vmem:[%s3365_s27 + $0xb8] sm:$0xff] (%p2827_p6)  ;;  %v1991_v46 = vld [vmem:[%s3365_s27 + $0x280] sm:$0xff] (%p2827_p6) }
 0x277   : > { %v1696_v6 = vadd.f32 %v1695_v3, %v1647_v2  ;;  %1866 = vst [vmem:[%s3687_s29 + $0x268] sm:$0xff] (%p2827_p6), %v1865_v60  ;;  %v1873_v2 = vld [vmem:[%s3365_s27 + $0xa8] sm:$0xff] (%p2827_p6)  ;;  %v1875_v3 = vld [vmem:[%s3365_s27 + $0xb0] sm:$0xff] (%p2827_p6) }
 0x278   : > { %v1600_v7 = vadd.f32 %v1599_v58, %v1551_v5  ;;  %1868 = vst [vmem:[%s3687_s29 + $0x360] sm:$0xff] (%p2827_p6), %v1867_v61  ;;  %v1879_v5 = vld [vmem:[%s3365_s27 + $0xc0] sm:$0xff] (%p2827_p6)  ;;  %v1881_v58 = vld [vmem:[%s3365_s27 + $0xc8] sm:$0xff] (%p2827_p6) }
 0x279   : > { %1775 = vst [vmem:[%s3365_s27 + $0x208] sm:$0xff] %v1696_v6  ;;  %v1883_v6 = vld [vmem:[%s3365_s27 + $0xd0] sm:$0xff] (%p2827_p6)  ;;  %v1993_v60 = vld [vmem:[%s3365_s27 + $0x288] sm:$0xff] (%p2827_p6) }
 0x27a   : > { %1780 = vst [vmem:[%s3365_s27 + $0x230] sm:$0xff] %v1600_v7  ;;  %v1885_v7 = vld [vmem:[%s3365_s27 + $0xd8] sm:$0xff] (%p2827_p6) }
 0x27b   : > { %1870 = vst [vmem:[%s3687_s29 + $0x368] sm:$0xff] (%p2827_p6), %v1869_v47 }
 0x27c   : > { %v1648_v59 = vpop.f32.mrf.mxu2  ;;  %1872 = vst [vmem:[%s3687_s29 + $0x370] sm:$0xff] (%p2827_p6), %v1871_v63  ;;  %v1999_v63 = vld [vmem:[%s3365_s27 + $0x2a0] sm:$0xff] (%p2827_p6) }
 0x27d   : > { %v1649_v8 = vadd.f32 %v1648_v59, %v3614_v43  ;;  %v1697_v9 = vpop.f32.mrf.mxu3  ;;  %v1553_v10 = vpop.f32.mrf.mxu0  ;;  %1874 = vst [vmem:[%s3687_s29 + $0x378] sm:$0xff] (%p2827_p6), %v1873_v2  ;;  %v1887_v59 = vld [vmem:[%s3365_s27 + $0xe0] sm:$0xff] (%p2827_p6)  ;;  %v2001_v2 = vld [vmem:[%s3365_s27 + $0x2a8] sm:$0xff] (%p2827_p6) }
 0x27e   : > { %v1554_v11 = vadd.f32 %v1553_v10, %v3608_v12  ;;  %v1602_v13 = vpop.f32.mrf.mxu1  ;;  %1876 = vst [vmem:[%s3687_s29 + $0x380] sm:$0xff] (%p2827_p6), %v1875_v3  ;;  %v1893_v10 = vld [vmem:[%s3365_s27 + $0xf8] sm:$0xff] (%p2827_p6)  ;;  %v2003_v3 = vld [vmem:[%s3365_s27 + $0x2b0] sm:$0xff] (%p2827_p6) }
 0x27f   : > { %v1698_v0 = vadd.f32 %v1697_v9, %v1649_v8  ;;  %1878 = vst [vmem:[%s3687_s29 + $0x388] sm:$0xff] (%p2827_p6), %v1877_v4  ;;  %v1889_v8 = vld [vmem:[%s3365_s27 + $0xe8] sm:$0xff] (%p2827_p6)  ;;  %v1891_v9 = vld [vmem:[%s3365_s27 + $0xf0] sm:$0xff] (%p2827_p6)  ;;  %v2005_v4 = vld [vmem:[%s3365_s27 + $0x2b8] sm:$0xff] (%p2827_p6) }
 0x280   : > { %v1603_v18 = vadd.f32 %v1602_v13, %v1554_v11  ;;  %1880 = vst [vmem:[%s3687_s29 + $0x480] sm:$0xff] (%p2827_p6), %v1879_v5  ;;  %v1895_v11 = vld [vmem:[%s3365_s27 + $0x100] sm:$0xff] (%p2827_p6)  ;;  %v1897_v13 = vld [vmem:[%s3365_s27 + $0x108] sm:$0xff] (%p2827_p6) }
 0x281   : > { %1781 = vst [vmem:[%s3365_s27 + $0x238] sm:$0xff] %v1698_v0  ;;  %v1899_v0 = vld [vmem:[%s3365_s27 + $0x110] sm:$0xff] (%p2827_p6)  ;;  %v1961_v44 = vld [vmem:[%s3365_s27 + $0x208] sm:$0xff] (%p2827_p6) }
 0x282   : > { %1786 = vst [vmem:[%s3365_s27 + $0x260] sm:$0xff] %v1603_v18  ;;  %v1901_v18 = vld [vmem:[%s3365_s27 + $0x118] sm:$0xff] (%p2827_p6)  ;;  %v1971_v51 = vld [vmem:[%s3365_s27 + $0x230] sm:$0xff] (%p2827_p6) }
 0x283   : > { %1882 = vst [vmem:[%s3687_s29 + $0x488] sm:$0xff] (%p2827_p6), %v1881_v58 }
 0x284   : > { %v1651_v19 = vpop.f32.mrf.mxu2  ;;  %1884 = vst [vmem:[%s3687_s29 + $0x490] sm:$0xff] (%p2827_p6), %v1883_v6  ;;  %v2011_v6 = vld [vmem:[%s3365_s27 + $0x2d0] sm:$0xff] (%p2827_p6) }
 0x285   : > { %v1652_v1 = vadd.f32 %v1651_v19, %v3614_v43  ;;  %v1700_v22 = vpop.f32.mrf.mxu3  ;;  %v1555_v23 = vpop.f32.mrf.mxu0  ;;  %1886 = vst [vmem:[%s3687_s29 + $0x498] sm:$0xff] (%p2827_p6), %v1885_v7  ;;  %v1903_v19 = vld [vmem:[%s3365_s27 + $0x120] sm:$0xff] (%p2827_p6)  ;;  %v2013_v7 = vld [vmem:[%s3365_s27 + $0x2d8] sm:$0xff] (%p2827_p6) }
 0x286   : > { %v1556_v24 = vadd.f32 %v1555_v23, %v3608_v12  ;;  %v1604_v15 = vpop.f32.mrf.mxu1  ;;  %1888 = vst [vmem:[%s3687_s29 + $0x4a0] sm:$0xff] (%p2827_p6), %v1887_v59  ;;  %v1909_v23 = vld [vmem:[%s3365_s27 + $0x138] sm:$0xff] (%p2827_p6)  ;;  %v2015_v59 = vld [vmem:[%s3365_s27 + $0x2e0] sm:$0xff] (%p2827_p6) }
 0x287   : > { %v1701_v25 = vadd.f32 %v1700_v22, %v1652_v1  ;;  %1890 = vst [vmem:[%s3687_s29 + $0x4a8] sm:$0xff] (%p2827_p6), %v1889_v8  ;;  %v1905_v1 = vld [vmem:[%s3365_s27 + $0x128] sm:$0xff] (%p2827_p6)  ;;  %v1907_v22 = vld [vmem:[%s3365_s27 + $0x130] sm:$0xff] (%p2827_p6) }
 0x288   : > { %v1605_v26 = vadd.f32 %v1604_v15, %v1556_v24  ;;  %1892 = vst [vmem:[%s3687_s29 + $0x5a0] sm:$0xff] (%p2827_p6), %v1891_v9  ;;  %v1911_v24 = vld [vmem:[%s3365_s27 + $0x140] sm:$0xff] (%p2827_p6)  ;;  %v1913_v15 = vld [vmem:[%s3365_s27 + $0x148] sm:$0xff] (%p2827_p6)  ;;  %v1973_v52 = vld [vmem:[%s3365_s27 + $0x238] sm:$0xff] (%p2827_p6) }
 0x289   : > { %1787 = vst [vmem:[%s3365_s27 + $0x268] sm:$0xff] %v1701_v25  ;;  %v1915_v25 = vld [vmem:[%s3365_s27 + $0x150] sm:$0xff] (%p2827_p6)  ;;  %v1983_v48 = vld [vmem:[%s3365_s27 + $0x260] sm:$0xff] (%p2827_p6)  ;;  %v2017_v8 = vld [vmem:[%s3365_s27 + $0x2e8] sm:$0xff] (%p2827_p6) }
 0x28a   : > { %1792 = vst [vmem:[%s3365_s27 + $0x290] sm:$0xff] %v1605_v26  ;;  %v1917_v26 = vld [vmem:[%s3365_s27 + $0x158] sm:$0xff] (%p2827_p6) }
 0x28b   : > { %1894 = vst [vmem:[%s3687_s29 + $0x5a8] sm:$0xff] (%p2827_p6), %v1893_v10 }
 0x28c   : > { %v1653_v16 = vpop.f32.mrf.mxu2  ;;  %1896 = vst [vmem:[%s3687_s29 + $0x5b0] sm:$0xff] (%p2827_p6), %v1895_v11 }
 0x28d   : > { %v1654_v49 = vadd.f32 %v1653_v16, %v3614_v43  ;;  %v1702_v62 = vpop.f32.mrf.mxu3  ;;  %v1558_v28 = vpop.f32.mrf.mxu0  ;;  %1898 = vst [vmem:[%s3687_s29 + $0x5b8] sm:$0xff] (%p2827_p6), %v1897_v13  ;;  %v1919_v16 = vld [vmem:[%s3365_s27 + $0x160] sm:$0xff] (%p2827_p6) }
 0x28e   : > { %v1559_v29 = vadd.f32 %v1558_v28, %v3608_v12  ;;  %v1607_v30 = vpop.f32.mrf.mxu1  ;;  %1900 = vst [vmem:[%s3687_s29 + $0x5c0] sm:$0xff] (%p2827_p6), %v1899_v0  ;;  %v1925_v28 = vld [vmem:[%s3365_s27 + $0x178] sm:$0xff] (%p2827_p6) }
 0x28f   : > { %v1703_v31 = vadd.f32 %v1702_v62, %v1654_v49  ;;  %1902 = vst [vmem:[%s3687_s29 + $0x5c8] sm:$0xff] (%p2827_p6), %v1901_v18  ;;  %v1921_v49 = vld [vmem:[%s3365_s27 + $0x168] sm:$0xff] (%p2827_p6)  ;;  %v1923_v62 = vld [vmem:[%s3365_s27 + $0x170] sm:$0xff] (%p2827_p6) }
 0x290   : > { %v1608_v32 = vadd.f32 %v1607_v30, %v1559_v29  ;;  %1904 = vst [vmem:[%s3687_s29 + $0x6c0] sm:$0xff] (%p2827_p6), %v1903_v19  ;;  %v1927_v29 = vld [vmem:[%s3365_s27 + $0x180] sm:$0xff] (%p2827_p6)  ;;  %v1929_v30 = vld [vmem:[%s3365_s27 + $0x188] sm:$0xff] (%p2827_p6) }
 0x291   : > { %1793 = vst [vmem:[%s3365_s27 + $0x298] sm:$0xff] %v1703_v31  ;;  %v1931_v31 = vld [vmem:[%s3365_s27 + $0x190] sm:$0xff] (%p2827_p6)  ;;  %v1985_v55 = vld [vmem:[%s3365_s27 + $0x268] sm:$0xff] (%p2827_p6) }
 0x292   : > { %1798 = vst [vmem:[%s3365_s27 + $0x2c0] sm:$0xff] %v1608_v32  ;;  %v1933_v32 = vld [vmem:[%s3365_s27 + $0x198] sm:$0xff] (%p2827_p6)  ;;  %v1995_v61 = vld [vmem:[%s3365_s27 + $0x290] sm:$0xff] (%p2827_p6) }
 0x293   : > { %1906 = vst [vmem:[%s3687_s29 + $0x6c8] sm:$0xff] (%p2827_p6), %v1905_v1 }
 0x294   : > { %v1656_v20 = vpop.f32.mrf.mxu2  ;;  %1908 = vst [vmem:[%s3687_s29 + $0x6d0] sm:$0xff] (%p2827_p6), %v1907_v22 }
 0x295   : > { %v1657_v33 = vadd.f32 %v1656_v20, %v3614_v43  ;;  %v1705_v34 = vpop.f32.mrf.mxu3  ;;  %v1560_v21 = vpop.f32.mrf.mxu0  ;;  %1910 = vst [vmem:[%s3687_s29 + $0x6d8] sm:$0xff] (%p2827_p6), %v1909_v23  ;;  %v1935_v20 = vld [vmem:[%s3365_s27 + $0x1a0] sm:$0xff] (%p2827_p6) }
 0x296   : > { %v1561_v35 = vadd.f32 %v1560_v21, %v3608_v12  ;;  %v1609_v36 = vpop.f32.mrf.mxu1  ;;  %v1831_v12 = vld [vmem:[%s3365_s27] sm:$0xff] (%p2827_p6)  ;;  %1912 = vst [vmem:[%s3687_s29 + $0x6e0] sm:$0xff] (%p2827_p6), %v1911_v24  ;;  %v1941_v21 = vld [vmem:[%s3365_s27 + $0x1b8] sm:$0xff] (%p2827_p6) }
 0x297   : > { %v1706_v37 = vadd.f32 %v1705_v34, %v1657_v33  ;;  %1832 = vst [vmem:[%s3687_s29] sm:$0xff] (%p2827_p6), %v1831_v12  ;;  %v1937_v33 = vld [vmem:[%s3365_s27 + $0x1a8] sm:$0xff] (%p2827_p6)  ;;  %v1939_v34 = vld [vmem:[%s3365_s27 + $0x1b0] sm:$0xff] (%p2827_p6)  ;;  %v1959_v12 = vld [vmem:[%s3365_s27 + $0x200] sm:$0xff] (%p2827_p6) }
 0x298   : > { %v1610_v40 = vadd.f32 %v1609_v36, %v1561_v35  ;;  %1914 = vst [vmem:[%s3687_s29 + $0x6e8] sm:$0xff] (%p2827_p6), %v1913_v15  ;;  %v1943_v35 = vld [vmem:[%s3365_s27 + $0x1c0] sm:$0xff] (%p2827_p6)  ;;  %v1947_v36 = vld [vmem:[%s3365_s27 + $0x1d0] sm:$0xff] (%p2827_p6)  ;;  %v1997_v47 = vld [vmem:[%s3365_s27 + $0x298] sm:$0xff] (%p2827_p6) }
 0x299   : > { %1799 = vst [vmem:[%s3365_s27 + $0x2c8] sm:$0xff] %v1706_v37  ;;  %v1945_v37 = vld [vmem:[%s3365_s27 + $0x1c8] sm:$0xff] (%p2827_p6)  ;;  %v2007_v5 = vld [vmem:[%s3365_s27 + $0x2c0] sm:$0xff] (%p2827_p6) }
 0x29a   : > { %1804 = vst [vmem:[%s3365_s27 + $0x2f0] sm:$0xff] %v1610_v40  ;;  %v1949_v40 = vld [vmem:[%s3365_s27 + $0x1d8] sm:$0xff] (%p2827_p6) }
 0x29b   : > { %1916 = vst [vmem:[%s3687_s29 + $0x7e0] sm:$0xff] (%p2827_p6), %v1915_v25 }
 0x29c   : > { %v1658_v41 = vpop.f32.mrf.mxu2  ;;  %1918 = vst [vmem:[%s3687_s29 + $0x7e8] sm:$0xff] (%p2827_p6), %v1917_v26 }
 0x29d   : > { %v1659_v17 = vadd.f32 %v1658_v41, %v3614_v43  ;;  %v1707_v14 = vpop.f32.mrf.mxu3  ;;  %1812 = sbr.rel (!%p2827_p6) target bundleno = 722 (0x2d2), region = 59  ;;  %v1835_v43 = vld [vmem:[%s3365_s27 + $0x10] sm:$0xff] (%p2827_p6)  ;;  %1920 = vst [vmem:[%s3687_s29 + $0x7f0] sm:$0xff] (%p2827_p6), %v1919_v16  ;;  %v1951_v41 = vld [vmem:[%s3365_s27 + $0x1e0] sm:$0xff] (%p2827_p6) }
 0x29e   : > { %1836 = vst [vmem:[%s3687_s29 + $0x10] sm:$0xff] (%p2827_p6), %v1835_v43  ;;  %v1963_v43 = vld [vmem:[%s3365_s27 + $0x210] sm:$0xff] (%p2827_p6) }
 0x29f   : > { %v1708_v42 = vadd.f32 %v1707_v14, %v1659_v17  ;;  %1922 = vst [vmem:[%s3687_s29 + $0x7f8] sm:$0xff] (%p2827_p6), %v1921_v49  ;;  %v1953_v17 = vld [vmem:[%s3365_s27 + $0x1e8] sm:$0xff] (%p2827_p6)  ;;  %v1955_v14 = vld [vmem:[%s3365_s27 + $0x1f0] sm:$0xff] (%p2827_p6) }
 0x2a0   : > { %1924 = vst [vmem:[%s3687_s29 + $0x800] sm:$0xff] (%p2827_p6), %v1923_v62  ;;  %v2009_v58 = vld [vmem:[%s3365_s27 + $0x2c8] sm:$0xff] (%p2827_p6) }
 0x2a1   : > { %1805 = vst [vmem:[%s3365_s27 + $0x2f8] sm:$0xff] %v1708_v42  ;;  %v1957_v42 = vld [vmem:[%s3365_s27 + $0x1f8] sm:$0xff] (%p2827_p6)  ;;  %v2019_v9 = vld [vmem:[%s3365_s27 + $0x2f0] sm:$0xff] (%p2827_p6) }
 0x2a2   : > { %1926 = vst [vmem:[%s3687_s29 + $0x808] sm:$0xff] %v1925_v28 }
 0x2a3   : > { %1928 = vst [vmem:[%s3687_s29 + $0x900] sm:$0xff] %v1927_v29 }
 0x2a4   : > { %1930 = vst [vmem:[%s3687_s29 + $0x908] sm:$0xff] %v1929_v30 }
 0x2a5   : > { %1932 = vst [vmem:[%s3687_s29 + $0x910] sm:$0xff] %v1931_v31 }
 0x2a6   : > { %1934 = vst [vmem:[%s3687_s29 + $0x918] sm:$0xff] %v1933_v32 }
 0x2a7   : > { %1936 = vst [vmem:[%s3687_s29 + $0x920] sm:$0xff] %v1935_v20 }
 0x2a8   : > { %1938 = vst [vmem:[%s3687_s29 + $0x928] sm:$0xff] %v1937_v33  ;;  %v2021_v10 = vld [vmem:[%s3365_s27 + $0x2f8] sm:$0xff] }
 0x2a9   : > { %1940 = vst [vmem:[%s3687_s29 + $0xa20] sm:$0xff] %v1939_v34 }
 0x2aa   : > { %1942 = vst [vmem:[%s3687_s29 + $0xa28] sm:$0xff] %v1941_v21 }
 0x2ab   : > { %1944 = vst [vmem:[%s3687_s29 + $0xa30] sm:$0xff] %v1943_v35 }
 0x2ac   : > { %1946 = vst [vmem:[%s3687_s29 + $0xa38] sm:$0xff] %v1945_v37 }
 0x2ad   : > { %1948 = vst [vmem:[%s3687_s29 + $0xa40] sm:$0xff] %v1947_v36 }
 0x2ae   : > { %1950 = vst [vmem:[%s3687_s29 + $0xa48] sm:$0xff] %v1949_v40 }
 0x2af   : > { %1952 = vst [vmem:[%s3687_s29 + $0xb40] sm:$0xff] %v1951_v41 }
 0x2b0   : > { %1954 = vst [vmem:[%s3687_s29 + $0xb48] sm:$0xff] %v1953_v17 }
 0x2b1   : > { %1956 = vst [vmem:[%s3687_s29 + $0xb50] sm:$0xff] %v1955_v14 }
 0x2b2   : > { %1958 = vst [vmem:[%s3687_s29 + $0xb58] sm:$0xff] %v1957_v42 }
 0x2b3   : > { %1960 = vst [vmem:[%s3687_s29 + $0xb60] sm:$0xff] %v1959_v12 }
 0x2b4   : > { %1962 = vst [vmem:[%s3687_s29 + $0xb68] sm:$0xff] %v1961_v44 }
 0x2b5   : > { %1964 = vst [vmem:[%s3687_s29 + $0xc60] sm:$0xff] %v1963_v43 }
 0x2b6   : > { %1968 = vst [vmem:[%s3687_s29 + $0xc70] sm:$0xff] %v1967_v50 }
 0x2b7   : > { %1970 = vst [vmem:[%s3687_s29 + $0xc78] sm:$0xff] %v1969_v27 }
 0x2b8   : > { %1972 = vst [vmem:[%s3687_s29 + $0xc80] sm:$0xff] %v1971_v51 }
 0x2b9   : > { %1974 = vst [vmem:[%s3687_s29 + $0xc88] sm:$0xff] %v1973_v52 }
 0x2ba   : > { %1976 = vst [vmem:[%s3687_s29 + $0xd80] sm:$0xff] %v1975_v38 }
 0x2bb   : > { %1978 = vst [vmem:[%s3687_s29 + $0xd88] sm:$0xff] %v1977_v53 }
 0x2bc   : > { %1980 = vst [vmem:[%s3687_s29 + $0xd90] sm:$0xff] %v1979_v54 }
 0x2bd   : > { %1982 = vst [vmem:[%s3687_s29 + $0xd98] sm:$0xff] %v1981_v39 }
 0x2be   : > { %1984 = vst [vmem:[%s3687_s29 + $0xda0] sm:$0xff] %v1983_v48 }
 0x2bf   : > { %1986 = vst [vmem:[%s3687_s29 + $0xda8] sm:$0xff] %v1985_v55 }
 0x2c0   : > { %1988 = vst [vmem:[%s3687_s29 + $0xea0] sm:$0xff] %v1987_v56 }
 0x2c1   : > { %1990 = vst [vmem:[%s3687_s29 + $0xea8] sm:$0xff] %v1989_v57 }
 0x2c2   : > { %1992 = vst [vmem:[%s3687_s29 + $0xeb0] sm:$0xff] %v1991_v46 }
 0x2c3   : > { %1994 = vst [vmem:[%s3687_s29 + $0xeb8] sm:$0xff] %v1993_v60 }
 0x2c4   : > { %1996 = vst [vmem:[%s3687_s29 + $0xec0] sm:$0xff] %v1995_v61 }
 0x2c5   : > { %1998 = vst [vmem:[%s3687_s29 + $0xec8] sm:$0xff] %v1997_v47 }
 0x2c6   : > { %2000 = vst [vmem:[%s3687_s29 + $0xfc0] sm:$0xff] %v1999_v63 }
 0x2c7   : > { %2002 = vst [vmem:[%s3687_s29 + $0xfc8] sm:$0xff] %v2001_v2 }
 0x2c8   : > { %2004 = vst [vmem:[%s3687_s29 + $0xfd0] sm:$0xff] %v2003_v3 }
 0x2c9   : > { %2006 = vst [vmem:[%s3687_s29 + $0xfd8] sm:$0xff] %v2005_v4 }
 0x2ca   : > { %2008 = vst [vmem:[%s3687_s29 + $0xfe0] sm:$0xff] %v2007_v5 }
 0x2cb   : > { %2010 = vst [vmem:[%s3687_s29 + $0xfe8] sm:$0xff] %v2009_v58 }
 0x2cc   : > { %2012 = vst [vmem:[%s3687_s29 + $0x10e0] sm:$0xff] %v2011_v6 }
 0x2cd   : > { %2014 = vst [vmem:[%s3687_s29 + $0x10e8] sm:$0xff] %v2013_v7 }
 0x2ce   : > { %2016 = vst [vmem:[%s3687_s29 + $0x10f0] sm:$0xff] %v2015_v59 }
 0x2cf   : > { %2018 = vst [vmem:[%s3687_s29 + $0x10f8] sm:$0xff] %v2017_v8 }
 0x2d0   : > { %2020 = vst [vmem:[%s3687_s29 + $0x1100] sm:$0xff] %v2019_v9 }
 0x2d1   : > { %2022 = vst [vmem:[%s3687_s29 + $0x1108] sm:$0xff] %v2021_v10 }
 0x2d2 PF: > { %s13_s16 = sadd.s32 1, %s2770_s16   ;;  %s3899_s12 = smov %s2758_s13 }
 0x2d3   : > { %p10_p12 = scmp.ge.s32.totalorder %s13_s16, 8   ;;  %s3900_s13 = smov %s2832_s22 }
 0x2d4   : > { %s3901_s14 = smov %s2766_s15  ;;  %s3902_s15 = smov %s3904_s17 }
 0x2d5   :  { %12 = sbr.rel (!%p10_p12) target bundleno = 3 (0x3), region = 119 }

// kernel: gpt_forward.2
= control target key start
LH: loop header
LB: loop body
LE: loop exit
PB: predicated region body
PF: predicated region fallthrough
CT: control target
= control target key end

     0   :  { %s13739_s0 = inlined_call_operand.vmem [shape: f32[2,64,256], index: 0, kind: input, shape index: {}]   ;;  %s13740_s1 = inlined_call_operand.hbm [shape: f32[64,256], index: 1, kind: input, shape index: {}]   ;;  %s13741_s2 = inlined_call_operand.vmem [shape: f32[2,1,64], index: 2, kind: input, shape index: {}]   ;;  %s13742_s3 = inlined_call_operand.hbm [shape: bf16[2,256,768], index: 3, kind: input, shape index: {}]   ;;  %s13743_s4 = inlined_call_operand.vmem [shape: f32[2,1,768], index: 4, kind: input, shape index: {}]   ;;  %s13744_s5 = inlined_call_operand.vmem [shape: bf16[2,256,256], index: 5, kind: input, shape index: {}]   ;;  %s13745_s6 = inlined_call_operand.vmem [shape: f32[2,1,256], index: 6, kind: input, shape index: {}]   ;;  %s13746_s7 = inlined_call_operand.hbm [shape: f32[2,1,256], index: 7, kind: input, shape index: {}]   ;;  %s13747_s8 = inlined_call_operand.hbm [shape: f32[2,1,256], index: 8, kind: input, shape index: {}]   ;;  %s13748_s9 = inlined_call_operand.hbm [shape: bf16[2,256,1024], index: 9, kind: input, shape index: {}]   ;;  %s13749_s10 = inlined_call_operand.vmem [shape: f32[2,1,1024], index: 10, kind: input, shape index: {}]   ;;  %s13750_s11 = inlined_call_operand.hbm [shape: bf16[2,1024,256], index: 11, kind: input, shape index: {}]   ;;  %s13751_s12 = inlined_call_operand.hbm [shape: f32[2,1,256], index: 12, kind: input, shape index: {}]   ;;  %s13752_s13 = inlined_call_operand.hbm [shape: f32[2,1,256], index: 13, kind: input, shape index: {}]   ;;  %s13753_s14 = inlined_call_operand.hbm [shape: f32[2,1,256], index: 14, kind: input, shape index: {}]   ;;  %s13754_s15 = inlined_call_operand.vmem [shape: f32[2,64,256], index: 15, kind: input, shape index: {}]   ;;  %s13755_s16 = inlined_call_operand.vmem [shape: bf16[2,64,256], index: 16, kind: output, shape index: {0}]   ;;  %s13756_s17 = inlined_call_operand.vmem [shape: f32[2,1,128], index: 17, kind: output, shape index: {1}]  }
   0x1   :  { %13788 = sst [smem:[#allocation48_spill]] %s13739_s0 }
   0x2   :  { %13789 = sst [smem:[#allocation49_spill]] %s13740_s1 }
   0x3   :  { %13790 = sst [smem:[#allocation50_spill]] %s13741_s2 }
   0x4   :  { %13791 = sst [smem:[#allocation51_spill]] %s13742_s3 }
   0x5   :  { %13792 = sst [smem:[#allocation52_spill]] %s13743_s4 }
   0x6   :  { %13793 = sst [smem:[#allocation53_spill]] %s13744_s5 }
   0x7   :  { %13794 = sst [smem:[#allocation54_spill]] %s13745_s6 }
   0x8   :  { %13795 = sst [smem:[#allocation55_spill]] %s13746_s7 }
   0x9   :  { %13796 = sst [smem:[#allocation56_spill]] %s13747_s8 }
   0xa   :  { %13797 = sst [smem:[#allocation57_spill]] %s13748_s9 }
   0xb   :  { %13798 = sst [smem:[#allocation58_spill]] %s13749_s10 }
   0xc   :  { %13799 = sst [smem:[#allocation59_spill]] %s13750_s11 }
   0xd   :  { %13800 = sst [smem:[#allocation60_spill]] %s13751_s12 }
   0xe   :  { %13801 = sst [smem:[#allocation61_spill]] %s13752_s13 }
   0xf   :  { %13802 = sst [smem:[#allocation62_spill]] %s13753_s14 }
  0x10   :  { %13803 = sst [smem:[#allocation63_spill]] %s13754_s15 }
  0x11   :  { %13804 = sst [smem:[#allocation64_spill]] %s13755_s16 }
  0x12   :  { %13805 = sst [smem:[#allocation65_spill]] %s13756_s17 }
  0x13   :  { %23 = vsyncpa [#allocation4], 0 }
  0x14   :  { %24 = vsyncpa [#allocation6], 0 }
  0x15   :  { %26 = vsyncpa [#allocation6 + $0x1], 0 }
  0x16   :  { %27 = vsyncpa [#allocation9], 0 }
  0x17   :  { %29 = vsyncpa [#allocation9 + $0x1], 0 }
  0x18   :  { %30 = vsyncpa [#allocation12], 0 }
  0x19   :  { %32 = vsyncpa [#allocation12 + $0x1], 0 }
  0x1a   :  { %33 = vsyncpa [#allocation15], 0 }
  0x1b   :  { %35 = vsyncpa [#allocation15 + $0x1], 0  ;;  %s10199_s24 = smov 0   ;;  %s10201_s25 = smov 0  }
  0x1c   :  { %s10203_s26 = smov 0   ;;  %s10205_s27 = smov 0  }
  0x1d   :  { %s10207_s28 = smov 0   ;;  %s10209_s29 = smov 0  }
  0x1e   :  { %s10211_s0 = smov 0   ;;  %s10213_s30 = smov 0  }
  0x1f LB: > { %13806 = sst [smem:[#allocation22_spill]] %s10072_s25  ;;  %s50_s18 = sadd.s32 1, %s10088_s29  ;;  %s10096_s30 = sphi %s10213_s30, %s41_s30   ;;  %s10092_s0 = sphi %s10211_s0, %s13930_s0   ;;  %s10088_s29 = sphi %s10209_s29, %s13929_s29   ;;  %s10084_s28 = sphi %s10207_s28, %s13928_s28   ;;  %s10080_s27 = sphi %s10205_s27, %s13927_s27   ;;  %s10076_s26 = sphi %s10203_s26, %s13926_s26   ;;  %s10072_s25 = sphi %s10201_s25, %s13925_s25   ;;  %s10068_s24 = sphi %s10199_s24, %s13924_s24  }
  0x20   : > { %13807 = sst [smem:[#allocation23_spill]] %s10076_s26  ;;  %s53_s19 = sadd.s32 1, %s10092_s0 }
  0x21   : > { %13808 = sst [smem:[#allocation24_spill]] %s10080_s27  ;;  %p51_p0 = scmp.ge.s32.totalorder %s50_s18, 2 }
  0x22   : > { %13809 = sst [smem:[#allocation25_spill]] %s10088_s29  ;;  %s133_s1 = sadd.s32 1, %s10076_s26 }
  0x23   : > { %13810 = sst [smem:[#allocation26_spill]] %s10092_s0  ;;  %p140_p1 = scmp.ne.s32.totalorder %s10076_s26, %s10072_s25 }
  0x24   : > { %p141_p2 = scmp.eq.s32.totalorder %s10096_s30, 0  ;;  %s13932_s18 = smov (%p51_p0, %s50_s18), 0 }
  0x25   : > { %13811 = sst [smem:[#allocation27_spill]] %s13932_s18  ;;  %s13934_s19 = smov (!%p51_p0, %s53_s19), %s10092_s0 }
  0x26   : > { %s130_s20 = ssub.s32 %s10088_s29, %s13932_s18  ;;  %p142_p3 = por %p141_p2, %p140_p1 }
  0x27   : > { %p55_p4 = scmp.ge.s32.totalorder %s13934_s19, 2  ;;  %p131_p5 = scmp.eq.s32.totalorder %s130_s20, 0 }
  0x28   : > { %p9447_p6 = scmp.lt.s32.totalorder %s10096_s30, 4  ;;  %s10257_s22 = sand.u32 1, %s10096_s30  }
  0x29   : > { %s13936_s19 = smov (%p55_p4, %s13934_s19), 0  ;;  %s10260_s23 = sand.u32 1, %s10076_s26  }
  0x2a   : > { %13812 = sst [smem:[#allocation28_spill]] %s13936_s19  ;;  %s9389_s15 = smul.u32 768, %s10260_s23 }
  0x2b   : > { %s10254_s21 = scalar_select %p131_p5, %s10076_s26, %s133_s1  }
  0x2c   : > { %s9390_s0 = smul.u32 768, %s10088_s29  ;;  %p10264_p7 = pnand %p9447_p6, %p142_p3 }
  0x2d   : > { %13813 = sst [smem:[#allocation29_spill]] %s10254_s21  ;;  %s564_s19 = scalar_lea.vmem [#allocation5], %s9389_s15 }
  0x2e   : > { %s13815_s3 = sld [smem:[#allocation51_spill]]  ;;  %s572_s21 = sshll.u32 %s564_s19, 4  ;;  %s573_s21 = int_to_ptr.vmem [resolvable:$true] %s572_s21 }
  0x2f   : > { %s10272_s26 = sshll.u32 %s10260_s23, 1  ;;  %s13763_s10 = scalar_lea.sflag [#allocation6], %s10257_s22 }
  0x30   : > { %s10098_s6 = smov 384   ;;  %s10099_s5 = smov 24  }
  0x31   : > { %s10280_s17 = sshll.u32 %s10088_s29, 1  ;;  %s13816_s8 = sld [smem:[#allocation56_spill]] }
  0x32   : > { %s13762_s4 = scalar_lea.sflag [#allocation9], %s10257_s22  ;;  %s7383_s2 = sshll.u32 %s10260_s23, 10 }
  0x33   : > { %s9000_s27 = sshll.u32 %s10088_s29, 10  ;;  %s13817_s9 = sld [smem:[#allocation57_spill]] }
  0x34   : > { %s569_s1 = scalar_lea.hbm %s13815_s3, %s9390_s0  ;;  %s646_s15 = scalar_lea.vmem [#allocation10], %s7383_s2 }
  0x35   : > { %s570_s16 = sshll.u32 %s569_s1, 4  ;;  %s627_s1 = scalar_lea.vmem [#allocation8], %s10272_s26  ;;  %s571_s16 = int_to_ptr.hbm [resolvable:$true] %s570_s16 }
  0x36   : > { %9424 = dma.hbm_to_vmem [thread:$0]  (!%p10264_p7), %s571_s16, 12288, %s573_s21, %s13763_s10, %s10098_s6, %s10098_s6, %s10099_s5  }
  0x37   : > { %s631_s19 = scalar_lea.hbm %s13816_s8, %s10280_s17  ;;  %s635_s3 = sshll.u32 %s627_s1, 4  ;;  %s636_s3 = int_to_ptr.vmem [resolvable:$true] %s635_s3 }
  0x38   : > { %s633_s20 = sshll.u32 %s631_s19, 4  ;;  %s654_s0 = sshll.u32 %s646_s15, 4  ;;  %s634_s20 = int_to_ptr.hbm [resolvable:$true] %s633_s20  ;;  %s10299_s0 = int_to_ptr.vmem [resolvable:$true] %s654_s0 }
  0x39   : > { %9430 = dma.hbm_to_vmem [thread:$0]  (!%p10264_p7), %s634_s20, 32, %s636_s3, %s13762_s4  }
  0x3a   : > { %s651_s16 = scalar_lea.hbm %s13817_s9, %s9000_s27  ;;  %s13818_s11 = sld [smem:[#allocation59_spill]] }
  0x3b   : > { %s652_s21 = sshll.u32 %s651_s16, 4  ;;  %s675_s23 = scalar_lea.vmem [#allocation11], %s7383_s2  ;;  %s10297_s21 = int_to_ptr.hbm [resolvable:$true] %s652_s21 }
  0x3c   : > { %s683_s20 = sshll.u32 %s675_s23, 4  ;;  %s13766_s6 = scalar_lea.sflag [#allocation12], %s10257_s22  ;;  %s684_s20 = int_to_ptr.vmem [resolvable:$true] %s683_s20 }
  0x3d   : > { %s10100_s16 = smov 128   ;;  %s10101_s15 = smov 8  }
  0x3e   : > { %s13819_s13 = sld [smem:[#allocation61_spill]]  ;;  %s716_s23 = scalar_lea.vmem [#allocation14], %s10272_s26 }
  0x3f   : > { %s13765_s4 = scalar_lea.sflag [#allocation15], %s10257_s22  ;;  %s13764_s10 = sadd.s32 4294967295, %s10096_s30  }
  0x40   : > { %s680_s3 = scalar_lea.hbm %s13818_s11, %s9000_s27  ;;  %p146_p8 = scmp.ne.s32.totalorder %s10072_s25, %s10068_s24 }
  0x41   : > { %s681_s5 = sshll.u32 %s680_s3, 4  ;;  %s724_s3 = sshll.u32 %s716_s23, 4  ;;  %s682_s5 = int_to_ptr.hbm [resolvable:$true] %s681_s5  ;;  %s725_s3 = int_to_ptr.vmem [resolvable:$true] %s724_s3 }
  0x42   : > { %9436 = dma.hbm_to_vmem [thread:$0]  (!%p10264_p7), %s682_s5, 16384, %s684_s20, %s13766_s6, %s10100_s16, %s10100_s16, %s10101_s15  }
  0x43   : > { %p10324_p9 = scmp.eq.s32.totalorder %s13764_s10, 0  ;;  %p7375_p10 = scmp.ge.s32.totalorder %s10096_s30, 1 }
  0x44   : > { %s720_s19 = scalar_lea.hbm %s13819_s13, %s10280_s17  ;;  %p516_p11 = scmp.lt.s32.totalorder %s10096_s30, 5 }
  0x45   : > { %s722_s1 = sshll.u32 %s720_s19, 4  ;;  %p10332_p12 = por %p10324_p9, %p146_p8  ;;  %s723_s1 = int_to_ptr.hbm [resolvable:$true] %s722_s1 }
  0x46   : > { %9442 = dma.hbm_to_vmem [thread:$0]  (!%p10264_p7), %s723_s1, 32, %s725_s3, %s13765_s4  }
  0x47   : > { %s13822_s27 = sld [smem:[#allocation49_spill]]  ;;  %p10339_p13 = pnand %p7375_p10, %p516_p11 }
  0x48   : > { %s10102_s19 = smov [#allocation3]   ;;  %s13824_s7 = sld [smem:[#allocation55_spill]] }
  0x49   : > { %p9417_p0 = pneg %p10339_p13  ;;  %s529_s1 = sshll.u32 %s10102_s19, 4  ;;  %s530_s1 = int_to_ptr.vmem [resolvable:$true] %s529_s1 }
  0x4a   : > { %s608_s15 = scalar_lea.vmem [#allocation7], %s10272_s26  ;;  %s10103_s4 = smov 256  }
  0x4b   : > { %p9418_p1 = pnand %p9417_p0, %p10324_p9  ;;  %s10104_s6 = smov 16  }
  0x4c   : > { %s13825_s19 = scalar_lea.sflag [#allocation6], %s10257_s22  ;;  %s10105_s8 = smov 512  }
  0x4d   : > { %s527_s2 = sshll.u32 %s13822_s27, 4  ;;  %s616_s27 = sshll.u32 %s608_s15, 4  ;;  %s528_s2 = int_to_ptr.hbm [resolvable:$true] %s527_s2  ;;  %s617_s27 = int_to_ptr.vmem [resolvable:$true] %s616_s27 }
  0x4e   : > { %s612_s16 = scalar_lea.hbm %s13824_s7, %s10280_s17  ;;  %s10106_s23 = smov 32  }
  0x4f   : > { %s614_s10 = sshll.u32 %s612_s16, 4  ;;  %s13826_s3 = scalar_lea.sflag [#allocation9], %s10257_s22  ;;  %s615_s10 = int_to_ptr.hbm [resolvable:$true] %s614_s10 }
  0x50   : > { %9420 = dma.hbm_to_vmem [thread:$0]  (!%p9418_p1), %s528_s2, 2048, %s530_s1, [#allocation4], %s10103_s4, %s10103_s4, %s10104_s6  }
  0x51   : > { %9427 = dma.hbm_to_vmem [thread:$0]  (!%p10264_p7), %s615_s10, 32, %s617_s27, %s13825_s19  }
  0x52   : > { %9433 = dma.hbm_to_vmem [thread:$0]  (!%p10264_p7), %s10297_s21, 16384, %s10299_s0, %s13826_s3, %s10105_s8, %s10105_s8, %s10106_s23  }
  0x53   : > { %s13827_s12 = sld [smem:[#allocation60_spill]]  ;;  %s697_s11 = scalar_lea.vmem [#allocation13], %s10272_s26 }
  0x54   : > { %s705_s4 = sshll.u32 %s697_s11, 4  ;;  %s13828_s6 = scalar_lea.sflag [#allocation12], %s10257_s22  ;;  %s706_s4 = int_to_ptr.vmem [resolvable:$true] %s705_s4 }
  0x55   : > { %s13829_s14 = sld [smem:[#allocation62_spill]]  ;;  %s735_s19 = scalar_lea.vmem [#allocation16], %s10272_s26 }
  0x56   : > { %s743_s13 = sshll.u32 %s735_s19, 4  ;;  %s13830_s8 = scalar_lea.sflag [#allocation15], %s10257_s22  ;;  %s744_s13 = int_to_ptr.vmem [resolvable:$true] %s743_s13 }
  0x59   : > { %s701_s7 = scalar_lea.hbm %s13827_s12, %s10280_s17 }
  0x5a   : > { %s703_s9 = sshll.u32 %s701_s7, 4  ;;  %752 = sbr.rel (%p10339_p13) target bundleno = 2946 (0xb82), region = 84  ;;  %s704_s9 = int_to_ptr.hbm [resolvable:$true] %s703_s9 }
  0x5b   : > { %9439 = dma.hbm_to_vmem [thread:$0]  (!%p10264_p7), %s704_s9, 32, %s706_s4, %s13828_s6  }
  0x5c   : > { %s739_s1 = scalar_lea.hbm %s13829_s14, %s10280_s17 }
  0x5d   : > { %s741_s27 = sshll.u32 %s739_s1, 4  ;;  %s742_s27 = int_to_ptr.hbm [resolvable:$true] %s741_s27 }
  0x5e   : > { %9445 = dma.hbm_to_vmem [thread:$0]  (!%p10264_p7), %s742_s27, 32, %s744_s13, %s13830_s8  }
  0x5f   : > { %10047 = dma.done.wait (%p10324_p9), [#allocation4], 2048  }
  0x60   : > { %10049 = vsyncadd (%p10324_p9), [#allocation4], 4294965248  ;;  %s13831_s7 = sadd.s32 4294967295, %s10096_s30   ;;  %s761_s11 = sand.u32 1, %s10072_s25  }
  0x61   : > { %s759_s9 = sand.u32 1, %s13831_s7   ;;  %s9391_s26 = smul.u32 768, %s761_s11 }
  0x62   : > { %s760_s17 = scalar_lea.sflag [#allocation6], %s759_s9 }
  0x63   : > { %s10389_s18 = scalar_lea.vmem [#allocation5], %s9391_s26 }
  0x64   : > { %10051 = dma.done.wait (%p10332_p12), %s760_s17, 12320  }
  0x65   : > { %10053 = vsyncadd (%p10332_p12), %s760_s17, 4294954976  ;;  %s10395_s13 = sshll.u32 %s761_s11, 1  ;;  %s780_s21 = scalar_lea.sflag [#allocation9], %s759_s9 }
  0x66   : > { %10055 = dma.done.wait (%p10332_p12), %s780_s21, 16416  }
  0x67   : > { %10057 = vsyncadd (%p10332_p12), %s780_s21, 4294950880  ;;  %s7399_s20 = sshll.u32 %s761_s11, 10  ;;  %s800_s23 = scalar_lea.sflag [#allocation12], %s759_s9 }
  0x68   : > { %s10403_s24 = scalar_lea.vmem [#allocation10], %s7399_s20  ;;  %s10405_s3 = scalar_lea.vmem [#allocation11], %s7399_s20 }
  0x69   : > { %10059 = dma.done.wait (%p10332_p12), %s800_s23, 16416  }
  0x6a   : > { %10061 = vsyncadd (%p10332_p12), %s800_s23, 4294950880  ;;  %s820_s15 = scalar_lea.sflag [#allocation15], %s759_s9 }
  0x6b   : > { %10063 = dma.done.wait (%p10332_p12), %s820_s15, 64  }
  0x6c   : > { %10065 = vsyncadd (%p10332_p12), %s820_s15, 4294967232  ;;  %s13832_s6 = sld [smem:[#allocation24_spill]]  ;;  %p948_p2 = scmp.lt.s32.totalorder %s10084_s28, 1 }
  0x6d   : > { %s13834_s9 = sld [smem:[#allocation48_spill]]  ;;  %s833_s25 = scalar_lea.vmem [#allocation16], %s10395_s13 }
  0x6e   : > { %s13938_s28 = smov (!%p948_p2, %s10084_s28), 1  ;;  %s13835_s15 = sld [smem:[#allocation52_spill]] }
  0x6f   : > { %s9002_s2 = sshll.u32 %s13938_s28, 7  ;;  %s13836_s22 = sld [smem:[#allocation53_spill]] }
  0x70   : > { %s13837_s19 = sld [smem:[#allocation54_spill]]  ;;  %s9004_s29 = sshll.u32 %s13938_s28, 6 }
  0x71   : > { %s13839_s23 = sld [smem:[#allocation64_spill]] }
  0x72   : > { %p956_p3 = scmp.lt.s32.totalorder %s13832_s6, 1  ;;  %s13840_s16 = sld [smem:[#allocation65_spill]] }
  0x73   : > { %s10431_s11 = scalar_lea.vmem %s13834_s9, %s9002_s2  ;;  %s13838_s9 = sld [smem:[#allocation58_spill]] }
  0x74   : > { %s957_s10 = scalar_select %p956_p3, %s13832_s6, 1 }
  0x75   : > { %p7412_p4 = scmp.ne.s32.totalorder %s13832_s6, 0 }
  0x76   : > { %s9392_s26 = smul.u32 6, %s957_s10  ;;  %s9003_s17 = sshll.u32 %s957_s10, 8 }
  0x77   : > { %s7408_s21 = sshll.u32 %s957_s10, 1  ;;  %s10441_s12 = scalar_lea.vmem %s13836_s22, %s9003_s17 }
  0x78   : > { %s10436_s4 = scalar_lea.vmem %s13835_s15, %s9392_s26  ;;  %s10446_s5 = scalar_lea.vmem %s13837_s19, %s7408_s21 }
  0x79   : > { %s7409_s2 = sshll.u32 %s957_s10, 3  ;;  %s10457_s15 = scalar_lea.vmem %s13839_s23, %s9004_s29 }
  0x7a   : > { %s10451_s14 = scalar_lea.vmem %s13838_s9, %s7409_s2  ;;  %s980_s17 = scalar_lea.vmem %s13840_s16, %s13938_s28 }
  0x7b   : > { %985 = sbr.rel (%p7412_p4) target bundleno = 148 (0x94), region = 124 }
  0x80   : > { %v986_v0 = vld [vmem:[%s10431_s11] sm:$0xff]  ;;  %v987_v2 = vld [vmem:[%s10431_s11 + $0x8] sm:$0xff]  ;;  %v988_v5 = vld [vmem:[%s10431_s11 + $0x10] sm:$0xff] }
  0x81   : > { %v1002_v1 = vld [vmem:[#allocation3] sm:$0xff]  ;;  %v1003_v4 = vld [vmem:[#allocation3 + $0x8] sm:$0xff]  ;;  %v1004_v6 = vld [vmem:[#allocation3 + $0x10] sm:$0xff] }
  0x82   : > { %v1018_v3 = vadd.f32 %v1002_v1, %v986_v0  ;;  %v1019_v7 = vadd.f32 %v1003_v4, %v987_v2  ;;  %v1020_v8 = vadd.f32 %v1004_v6, %v988_v5  ;;  %v989_v9 = vld [vmem:[%s10431_s11 + $0x18] sm:$0xff]  ;;  %v990_v11 = vld [vmem:[%s10431_s11 + $0x20] sm:$0xff]  ;;  %v991_v14 = vld [vmem:[%s10431_s11 + $0x28] sm:$0xff] }
  0x83   : > { %v1005_v10 = vld [vmem:[#allocation3 + $0x18] sm:$0xff]  ;;  %v1006_v13 = vld [vmem:[#allocation3 + $0x20] sm:$0xff]  ;;  %v1007_v15 = vld [vmem:[#allocation3 + $0x28] sm:$0xff] }
  0x84   : > { %1034 = vst [vmem:[#allocation2 + $0x30] sm:$0xff] %v1018_v3  ;;  %v1021_v12 = vadd.f32 %v1005_v10, %v989_v9  ;;  %v1022_v16 = vadd.f32 %v1006_v13, %v990_v11  ;;  %v1023_v17 = vadd.f32 %v1007_v15, %v991_v14  ;;  %v992_v18 = vld [vmem:[%s10431_s11 + $0x30] sm:$0xff]  ;;  %v993_v20 = vld [vmem:[%s10431_s11 + $0x38] sm:$0xff]  ;;  %v994_v23 = vld [vmem:[%s10431_s11 + $0x40] sm:$0xff] }
  0x85   : > { %1035 = vst [vmem:[#allocation2] sm:$0xff] %v1019_v7  ;;  %v1008_v19 = vld [vmem:[#allocation3 + $0x30] sm:$0xff]  ;;  %v1009_v22 = vld [vmem:[#allocation3 + $0x38] sm:$0xff]  ;;  %v1010_v24 = vld [vmem:[#allocation3 + $0x40] sm:$0xff] }
  0x86   : > { %1036 = vst [vmem:[#allocation2 + $0x58] sm:$0xff] %v1020_v8  ;;  %v1024_v21 = vadd.f32 %v1008_v19, %v992_v18  ;;  %v1025_v25 = vadd.f32 %v1009_v22, %v993_v20  ;;  %v995_v26 = vld [vmem:[%s10431_s11 + $0x48] sm:$0xff]  ;;  %v996_v28 = vld [vmem:[%s10431_s11 + $0x50] sm:$0xff]  ;;  %v1026_v29 = vadd.f32 %v1010_v24, %v994_v23  ;;  %v997_v31 = vld [vmem:[%s10431_s11 + $0x58] sm:$0xff] }
  0x87   : > { %1037 = vst [vmem:[#allocation2 + $0x18] sm:$0xff] %v1021_v12  ;;  %v1011_v27 = vld [vmem:[#allocation3 + $0x48] sm:$0xff]  ;;  %v1012_v30 = vld [vmem:[#allocation3 + $0x50] sm:$0xff]  ;;  %v1013_v32 = vld [vmem:[#allocation3 + $0x58] sm:$0xff] }
  0x88   : > { %1038 = vst [vmem:[#allocation2 + $0x50] sm:$0xff] %v1022_v16  ;;  %v1027_v33 = vadd.f32 %v1011_v27, %v995_v26  ;;  %v998_v34 = vld [vmem:[%s10431_s11 + $0x60] sm:$0xff]  ;;  %v1028_v36 = vadd.f32 %v1012_v30, %v996_v28  ;;  %v999_v37 = vld [vmem:[%s10431_s11 + $0x68] sm:$0xff]  ;;  %v1029_v39 = vadd.f32 %v1013_v32, %v997_v31  ;;  %v1000_v40 = vld [vmem:[%s10431_s11 + $0x70] sm:$0xff] }
  0x89   : > { %1039 = vst [vmem:[#allocation2 + $0x68] sm:$0xff] %v1023_v17  ;;  %v1014_v35 = vld [vmem:[#allocation3 + $0x60] sm:$0xff]  ;;  %v1015_v38 = vld [vmem:[#allocation3 + $0x68] sm:$0xff]  ;;  %v1016_v41 = vld [vmem:[#allocation3 + $0x70] sm:$0xff] }
  0x8a   : > { %1040 = vst [vmem:[#allocation2 + $0x8] sm:$0xff] %v1024_v21  ;;  %v1030_v42 = vadd.f32 %v1014_v35, %v998_v34  ;;  %v1001_v43 = vld [vmem:[%s10431_s11 + $0x78] sm:$0xff]  ;;  %v1031_v45 = vadd.f32 %v1015_v38, %v999_v37  ;;  %v1032_v46 = vadd.f32 %v1016_v41, %v1000_v40 }
  0x8b   : > { %1041 = vst [vmem:[#allocation2 + $0x48] sm:$0xff] %v1025_v25  ;;  %v1017_v44 = vld [vmem:[#allocation3 + $0x78] sm:$0xff] }
  0x8c   : > { %1042 = vst [vmem:[#allocation2 + $0x40] sm:$0xff] %v1026_v29  ;;  %v1033_v47 = vadd.f32 %v1017_v44, %v1001_v43 }
  0x8d   : > { %1043 = vst [vmem:[#allocation2 + $0x20] sm:$0xff] %v1027_v33 }
  0x8e   : > { %1044 = vst [vmem:[#allocation2 + $0x10] sm:$0xff] %v1028_v36 }
  0x8f   : > { %1045 = vst [vmem:[#allocation2 + $0x38] sm:$0xff] %v1029_v39 }
  0x90   : > { %1046 = vst [vmem:[#allocation2 + $0x60] sm:$0xff] %v1030_v42 }
  0x91   : > { %1047 = vst [vmem:[#allocation2 + $0x70] sm:$0xff] %v1031_v45 }
  0x92   : > { %1048 = vst [vmem:[#allocation2 + $0x78] sm:$0xff] %v1032_v46 }
  0x93   : > { %1049 = vst [vmem:[#allocation2 + $0x28] sm:$0xff] %v1033_v47 }
  0x94 PF: > { %v7583_v48 = vld [vmem:[%s10389_s18 + $0x150] sm:$0xf]  ;;  %v9050_v49 = vld [vmem:[%s10389_s18 + $0x164] sm:$0xf0]  ;;  %v9047_v53 = vld [vmem:[%s10389_s18 + $0x154] sm:$0xf] }
  0x95   : > { %v7775_v50 = vld [vmem:[%s10389_s18 + $0x2d0] sm:$0xf]  ;;  %v7584_v51 = vor.u32 %v9050_v49, %v7583_v48  ;;  %v9098_v52 = vld [vmem:[%s10389_s18 + $0x2e4] sm:$0xf0]  ;;  %v7585_v54 = vld [vmem:[%s10389_s18 + $0x168] sm:$0xf0] }
  0x96   : > { %v7776_v55 = vor.u32 %v9098_v52, %v7775_v50  ;;  %v7588_v56 = vor.u32 %v9047_v53, %v7585_v54  ;;  %v9095_v57 = vld [vmem:[%s10389_s18 + $0x2d4] sm:$0xf]  ;;  %v7777_v58 = vld [vmem:[%s10389_s18 + $0x2e8] sm:$0xf0]  ;;  %v7559_v59 = vld [vmem:[%s10389_s18 + $0x120] sm:$0xf] }
  0x97   : > { %1668 = vmatpush.bf16.msra.mxu0 %v7584_v51  ;;  %v7780_v60 = vor.u32 %v9095_v57, %v7777_v58  ;;  %v9044_v61 = vld [vmem:[%s10389_s18 + $0x134] sm:$0xf0]  ;;  %v7751_v62 = vld [vmem:[%s10389_s18 + $0x2a0] sm:$0xf]  ;;  %v9041_v2 = vld [vmem:[%s10389_s18 + $0x124] sm:$0xf] }
  0x98   : > { %v9092_v63 = vld [vmem:[%s10389_s18 + $0x2b4] sm:$0xf0]  ;;  %1697 = vmatpush.bf16.msra.mxu1 %v7776_v55  ;;  %1726 = vmatpush.bf16.msra.mxu2 %v7588_v56  ;;  %v7560_v0 = vor.u32 %v9044_v61, %v7559_v59  ;;  %v7561_v3 = vld [vmem:[%s10389_s18 + $0x138] sm:$0xf0]  ;;  %v9089_v4 = vld [vmem:[%s10389_s18 + $0x2a4] sm:$0xf] }
  0x99   : > { %v7752_v1 = vor.u32 %v9092_v63, %v7751_v62  ;;  %1755 = vmatpush.bf16.msra.mxu3 %v7780_v60  ;;  %v7564_v5 = vor.u32 %v9041_v2, %v7561_v3  ;;  %v7753_v6 = vld [vmem:[%s10389_s18 + $0x2b8] sm:$0xf0]  ;;  %v7535_v7 = vld [vmem:[%s10389_s18 + $0xf0] sm:$0xf]  ;;  %v9038_v8 = vld [vmem:[%s10389_s18 + $0x104] sm:$0xf0] }
  0x9a   : > { %v7756_v9 = vor.u32 %v9089_v4, %v7753_v6  ;;  %v7727_v10 = vld [vmem:[%s10389_s18 + $0x270] sm:$0xf]  ;;  %v9086_v11 = vld [vmem:[%s10389_s18 + $0x284] sm:$0xf0]  ;;  %v9035_v12 = vld [vmem:[%s10389_s18 + $0xf4] sm:$0xf]  ;;  %v7536_v13 = vor.u32 %v9038_v8, %v7535_v7 }
  0x9b   : > { %1669 = vmatpush.bf16.msra.mxu0 %v7560_v0  ;;  %v7537_v14 = vld [vmem:[%s10389_s18 + $0x108] sm:$0xf0]  ;;  %v9083_v15 = vld [vmem:[%s10389_s18 + $0x274] sm:$0xf]  ;;  %v7728_v17 = vor.u32 %v9086_v11, %v7727_v10  ;;  %v7511_v19 = vld [vmem:[%s10389_s18 + $0xc0] sm:$0xf] }
  0x9c   : > { %v7729_v16 = vld [vmem:[%s10389_s18 + $0x288] sm:$0xf0]  ;;  %1698 = vmatpush.bf16.msra.mxu1 %v7752_v1  ;;  %1727 = vmatpush.bf16.msra.mxu2 %v7564_v5  ;;  %v7540_v18 = vor.u32 %v9035_v12, %v7537_v14  ;;  %v9032_v20 = vld [vmem:[%s10389_s18 + $0xd4] sm:$0xf0]  ;;  %v7703_v21 = vld [vmem:[%s10389_s18 + $0x240] sm:$0xf] }
  0x9d   : > { %1756 = vmatpush.bf16.msra.mxu3 %v7756_v9  ;;  %v7732_v22 = vor.u32 %v9083_v15, %v7729_v16  ;;  %v9080_v23 = vld [vmem:[%s10389_s18 + $0x254] sm:$0xf0]  ;;  %v9029_v24 = vld [vmem:[%s10389_s18 + $0xc4] sm:$0xf]  ;;  %v7513_v25 = vld [vmem:[%s10389_s18 + $0xd8] sm:$0xf0]  ;;  %v7512_v28 = vor.u32 %v9032_v20, %v7511_v19 }
  0x9e   : > { %v9077_v26 = vld [vmem:[%s10389_s18 + $0x244] sm:$0xf]  ;;  %v7705_v27 = vld [vmem:[%s10389_s18 + $0x258] sm:$0xf0]  ;;  %v7704_v29 = vor.u32 %v9080_v23, %v7703_v21  ;;  %v7516_v30 = vor.u32 %v9029_v24, %v7513_v25  ;;  %v7487_v31 = vld [vmem:[%s10389_s18 + $0x90] sm:$0xf] }
  0x9f   : > { %1670 = vmatpush.bf16.msra.mxu0 %v7536_v13  ;;  %v9026_v32 = vld [vmem:[%s10389_s18 + $0xa4] sm:$0xf0]  ;;  %v7679_v33 = vld [vmem:[%s10389_s18 + $0x210] sm:$0xf]  ;;  %v7708_v34 = vor.u32 %v9077_v26, %v7705_v27  ;;  %v9023_v36 = vld [vmem:[%s10389_s18 + $0x94] sm:$0xf] }
  0xa0   : > { %1699 = vmatpush.bf16.msra.mxu1 %v7728_v17  ;;  %1728 = vmatpush.bf16.msra.mxu2 %v7540_v18  ;;  %v9074_v35 = vld [vmem:[%s10389_s18 + $0x224] sm:$0xf0]  ;;  %v7489_v37 = vld [vmem:[%s10389_s18 + $0xa8] sm:$0xf0]  ;;  %v9071_v38 = vld [vmem:[%s10389_s18 + $0x214] sm:$0xf]  ;;  %v7488_v40 = vor.u32 %v9026_v32, %v7487_v31 }
  0xa1   : > { %1757 = vmatpush.bf16.msra.mxu3 %v7732_v22  ;;  %v7681_v39 = vld [vmem:[%s10389_s18 + $0x228] sm:$0xf0]  ;;  %v7680_v41 = vor.u32 %v9074_v35, %v7679_v33  ;;  %v7492_v42 = vor.u32 %v9023_v36, %v7489_v37  ;;  %v7463_v43 = vld [vmem:[%s10389_s18 + $0x60] sm:$0xf]  ;;  %v9020_v44 = vld [vmem:[%s10389_s18 + $0x74] sm:$0xf0] }
  0xa2   : > { %v7655_v45 = vld [vmem:[%s10389_s18 + $0x1e0] sm:$0xf]  ;;  %v7684_v46 = vor.u32 %v9071_v38, %v7681_v39  ;;  %v9068_v47 = vld [vmem:[%s10389_s18 + $0x1f4] sm:$0xf0]  ;;  %v9017_v48 = vld [vmem:[%s10389_s18 + $0x64] sm:$0xf]  ;;  %v7464_v52 = vor.u32 %v9020_v44, %v7463_v43 }
  0xa3   : > { %1671 = vmatpush.bf16.msra.mxu0 %v7512_v28  ;;  %v7465_v49 = vld [vmem:[%s10389_s18 + $0x78] sm:$0xf0]  ;;  %v9065_v50 = vld [vmem:[%s10389_s18 + $0x1e4] sm:$0xf]  ;;  %v7656_v53 = vor.u32 %v9068_v47, %v7655_v45  ;;  %v7439_v55 = vld [vmem:[%s10389_s18 + $0x30] sm:$0xf] }
  0xa4   : > { %1700 = vmatpush.bf16.msra.mxu1 %v7704_v29  ;;  %1729 = vmatpush.bf16.msra.mxu2 %v7516_v30  ;;  %v7657_v51 = vld [vmem:[%s10389_s18 + $0x1f8] sm:$0xf0]  ;;  %v7468_v54 = vor.u32 %v9017_v48, %v7465_v49  ;;  %v9014_v56 = vld [vmem:[%s10389_s18 + $0x44] sm:$0xf0]  ;;  %v7631_v57 = vld [vmem:[%s10389_s18 + $0x1b0] sm:$0xf] }
  0xa5   : > { %1758 = vmatpush.bf16.msra.mxu3 %v7708_v34  ;;  %v7660_v58 = vor.u32 %v9065_v50, %v7657_v51  ;;  %v9062_v59 = vld [vmem:[%s10389_s18 + $0x1c4] sm:$0xf0]  ;;  %v9011_v60 = vld [vmem:[%s10389_s18 + $0x34] sm:$0xf]  ;;  %v7441_v61 = vld [vmem:[%s10389_s18 + $0x48] sm:$0xf0]  ;;  %v7440_v0 = vor.u32 %v9014_v56, %v7439_v55 }
  0xa6   : > { %v9059_v62 = vld [vmem:[%s10389_s18 + $0x1b4] sm:$0xf]  ;;  %v7633_v63 = vld [vmem:[%s10389_s18 + $0x1c8] sm:$0xf0]  ;;  %v7415_v1 = vld [vmem:[%s10389_s18] sm:$0xf]  ;;  %v7632_v2 = vor.u32 %v9062_v59, %v7631_v57  ;;  %v7444_v3 = vor.u32 %v9011_v60, %v7441_v61 }
  0xa7   : > { %1672 = vmatpush.bf16.msra.mxu0 %v7488_v40  ;;  %v9008_v4 = vld [vmem:[%s10389_s18 + $0x14] sm:$0xf0]  ;;  %v7607_v5 = vld [vmem:[%s10389_s18 + $0x180] sm:$0xf]  ;;  %v7636_v6 = vor.u32 %v9059_v62, %v7633_v63  ;;  %v9005_v8 = vld [vmem:[%s10389_s18 + $0x4] sm:$0xf] }
  0xa8   : > { %1701 = vmatpush.bf16.msra.mxu1 %v7680_v41  ;;  %1730 = vmatpush.bf16.msra.mxu2 %v7492_v42  ;;  %v9056_v7 = vld [vmem:[%s10389_s18 + $0x194] sm:$0xf0]  ;;  %v7417_v9 = vld [vmem:[%s10389_s18 + $0x18] sm:$0xf0]  ;;  %v9053_v10 = vld [vmem:[%s10389_s18 + $0x184] sm:$0xf]  ;;  %v7416_v12 = vor.u32 %v9008_v4, %v7415_v1 }
  0xa9   : > { %1759 = vmatpush.bf16.msra.mxu3 %v7684_v46  ;;  %v7609_v11 = vld [vmem:[%s10389_s18 + $0x198] sm:$0xf0]  ;;  %v1050_v13 = vld [vmem:[#allocation2 + $0x30] sm:$0xff]  ;;  %v7608_v15 = vor.u32 %v9056_v7, %v7607_v5  ;;  %v7420_v16 = vor.u32 %v9005_v8, %v7417_v9  ;;  %v1051_v17 = vld [vmem:[#allocation2] sm:$0xff]  ;;  %s10107_s29 = smov 64   ;;  %vm2080_vm0 = vcmask 523264  }
  0xaa   : > { %v1052_v14 = vld [vmem:[#allocation2 + $0x58] sm:$0xff]  ;;  %v7612_v19 = vor.u32 %v9053_v10, %v7609_v11  ;;  %v9051_v23 = vld [vmem:[%s10389_s18 + $0x16c] sm:$0xf0]  ;;  %v7593_v28 = vld [vmem:[%s10389_s18 + $0x170] sm:$0xf0]  ;;  %s13841_s6 = sld [smem:[#allocation50_spill]] }
  0xab   : > { %1673 = vmatpush.bf16.msra.mxu0 %v7464_v52  ;;  %v1053_v18 = vld [vmem:[#allocation2 + $0x18] sm:$0xff]  ;;  %v10545_v20 = vpack.c.bf16 %v1052_v14, %v1050_v13  ;;  %v9099_v26 = vld [vmem:[%s10389_s18 + $0x2ec] sm:$0xf0]  ;;  %v7785_v32 = vld [vmem:[%s10389_s18 + $0x2f0] sm:$0xf0] }
  0xac   : > { %1702 = vmatpush.bf16.msra.mxu1 %v7656_v53  ;;  %1731 = vmatpush.bf16.msra.mxu2 %v7468_v54  ;;  %v10547_v21 = vpack.c.bf16 %v1053_v18, %v1051_v17  ;;  %v7591_v22 = vld [vmem:[%s10389_s18 + $0x158] sm:$0xf]  ;;  %v9048_v27 = vld [vmem:[%s10389_s18 + $0x15c] sm:$0xf]  ;;  %v7567_v33 = vld [vmem:[%s10389_s18 + $0x128] sm:$0xf] }
  0xad   : > { %1760 = vmatpush.bf16.msra.mxu3 %v7660_v58  ;;  %v7783_v24 = vld [vmem:[%s10389_s18 + $0x2d8] sm:$0xf]  ;;  %v7592_v25 = vor.u32 %v9051_v23, %v7591_v22  ;;  %v7596_v30 = vor.u32 %v9048_v27, %v7593_v28  ;;  %v9096_v31 = vld [vmem:[%s10389_s18 + $0x2dc] sm:$0xf]  ;;  %v9045_v35 = vld [vmem:[%s10389_s18 + $0x13c] sm:$0xf0] }
  0xae   : > { %v7784_v29 = vor.u32 %v9099_v26, %v7783_v24  ;;  %v7788_v34 = vor.u32 %v9096_v31, %v7785_v32  ;;  %v7759_v36 = vld [vmem:[%s10389_s18 + $0x2a8] sm:$0xf]  ;;  %v9093_v37 = vld [vmem:[%s10389_s18 + $0x2bc] sm:$0xf0]  ;;  %v7568_v38 = vor.u32 %v9045_v35, %v7567_v33  ;;  %v9042_v40 = vld [vmem:[%s10389_s18 + $0x12c] sm:$0xf] }
  0xaf   : > { %1674 = vmatpush.bf16.msra.mxu0 %v7440_v0  ;;  %v7760_v39 = vor.u32 %v9093_v37, %v7759_v36  ;;  %v7569_v41 = vld [vmem:[%s10389_s18 + $0x140] sm:$0xf0]  ;;  %v9090_v42 = vld [vmem:[%s10389_s18 + $0x2ac] sm:$0xf]  ;;  %v7543_v45 = vld [vmem:[%s10389_s18 + $0xf8] sm:$0xf] }
  0xb0   : > { %1703 = vmatpush.bf16.msra.mxu1 %v7632_v2  ;;  %1732 = vmatpush.bf16.msra.mxu2 %v7444_v3  ;;  %v7572_v43 = vor.u32 %v9042_v40, %v7569_v41  ;;  %v7761_v44 = vld [vmem:[%s10389_s18 + $0x2c0] sm:$0xf0]  ;;  %v9039_v46 = vld [vmem:[%s10389_s18 + $0x10c] sm:$0xf0]  ;;  %v7735_v48 = vld [vmem:[%s10389_s18 + $0x278] sm:$0xf]  ;;  %s13842_s10 = scalar_lea.vmem %s13841_s6, %s13938_s28 }
  0xb1   : > { %1761 = vmatpush.bf16.msra.mxu3 %v7636_v6  ;;  %v7764_v47 = vor.u32 %v9090_v42, %v7761_v44  ;;  %v9087_v49 = vld [vmem:[%s10389_s18 + $0x28c] sm:$0xf0]  ;;  %v9036_v50 = vld [vmem:[%s10389_s18 + $0xfc] sm:$0xf]  ;;  %v7544_v51 = vor.u32 %v9039_v46, %v7543_v45  ;;  %v7545_v52 = vld [vmem:[%s10389_s18 + $0x110] sm:$0xf0] }
  0xb2   : > { %v9084_v53 = vld [vmem:[%s10389_s18 + $0x27c] sm:$0xf]  ;;  %v7737_v54 = vld [vmem:[%s10389_s18 + $0x290] sm:$0xf0]  ;;  %v7736_v56 = vor.u32 %v9087_v49, %v7735_v48  ;;  %v7548_v57 = vor.u32 %v9036_v50, %v7545_v52  ;;  %v7519_v58 = vld [vmem:[%s10389_s18 + $0xc8] sm:$0xf] }
  0xb3   : > { %1675 = vmatpush.bf16.msra.mxu0 %v7416_v12  ;;  %v1054_v55 = vld [vmem:[#allocation2 + $0x50] sm:$0xff]  ;;  %v9033_v59 = vld [vmem:[%s10389_s18 + $0xdc] sm:$0xf0]  ;;  %v1056_v60 = vld [vmem:[#allocation2 + $0x8] sm:$0xff]  ;;  %v7740_v61 = vor.u32 %v9084_v53, %v7737_v54 }
  0xb4   : > { %1704 = vmatpush.bf16.msra.mxu1 %v7608_v15  ;;  %1733 = vmatpush.bf16.msra.mxu2 %v7420_v16  ;;  %v7711_v62 = vld [vmem:[%s10389_s18 + $0x248] sm:$0xf]  ;;  %v9081_v63 = vld [vmem:[%s10389_s18 + $0x25c] sm:$0xf0]  ;;  %v7520_v2 = vor.u32 %v9033_v59, %v7519_v58  ;;  %v9030_v3 = vld [vmem:[%s10389_s18 + $0xcc] sm:$0xf]  ;;  %v10583_v5 = vpack.c.bf16 %v1056_v60, %v1054_v55 }
  0xb5   : > { %1762 = vmatpush.bf16.msra.mxu3 %v7612_v19  ;;  %v1055_v0 = vld [vmem:[#allocation2 + $0x68] sm:$0xff]  ;;  %v7521_v4 = vld [vmem:[%s10389_s18 + $0xe0] sm:$0xf0]  ;;  %v7712_v6 = vor.u32 %v9081_v63, %v7711_v62  ;;  %v7495_v12 = vld [vmem:[%s10389_s18 + $0x98] sm:$0xf] }
  0xb6   : > { %1676 = vmatmul.bf16.vlgmr.msra.gmra.mxu0 %v10545_v20  ;;  %v1057_v1 = vld [vmem:[#allocation2 + $0x48] sm:$0xff]  ;;  %v7713_v8 = vld [vmem:[%s10389_s18 + $0x260] sm:$0xf0]  ;;  %v7524_v10 = vor.u32 %v9030_v3, %v7521_v4  ;;  %v9027_v13 = vld [vmem:[%s10389_s18 + $0xac] sm:$0xf0] }
  0xb7   : > { %1705 = vmatmul.bf16.vlgmr.msra.gmra.mxu1 %v10547_v21  ;;  %1734 = vmatmul.bf16.vlgmr.msra.gmra.mxu2 %v10545_v20  ;;  %v9078_v7 = vld [vmem:[%s10389_s18 + $0x24c] sm:$0xf]  ;;  %v10587_v9 = vpack.c.bf16 %v1057_v1, %v1055_v0  ;;  %v7687_v14 = vld [vmem:[%s10389_s18 + $0x218] sm:$0xf]  ;;  %v7496_v15 = vor.u32 %v9027_v13, %v7495_v12  ;;  %v9075_v16 = vld [vmem:[%s10389_s18 + $0x22c] sm:$0xf0] }
  0xb8   : > { %1763 = vmatmul.bf16.vlgmr.msra.gmra.mxu3 %v10547_v21  ;;  %1784 = vmatpush.bf16.msrb.mxu0 %v7592_v25  ;;  %v7716_v11 = vor.u32 %v9078_v7, %v7713_v8  ;;  %v9024_v17 = vld [vmem:[%s10389_s18 + $0x9c] sm:$0xf]  ;;  %v7497_v18 = vld [vmem:[%s10389_s18 + $0xb0] sm:$0xf0]  ;;  %v7688_v19 = vor.u32 %v9075_v16, %v7687_v14  ;;  %v7471_v25 = vld [vmem:[%s10389_s18 + $0x68] sm:$0xf] }
  0xb9   : > { %1813 = vmatpush.bf16.msrb.mxu1 %v7784_v29  ;;  %1842 = vmatpush.bf16.msrb.mxu2 %v7596_v30  ;;  %v7500_v22 = vor.u32 %v9024_v17, %v7497_v18  ;;  %v9072_v23 = vld [vmem:[%s10389_s18 + $0x21c] sm:$0xf]  ;;  %v7689_v24 = vld [vmem:[%s10389_s18 + $0x230] sm:$0xf0]  ;;  %v9021_v27 = vld [vmem:[%s10389_s18 + $0x7c] sm:$0xf0] }
  0xba   : > { %1871 = vmatpush.bf16.msrb.mxu3 %v7788_v34  ;;  %v7692_v26 = vor.u32 %v9072_v23, %v7689_v24  ;;  %v7663_v28 = vld [vmem:[%s10389_s18 + $0x1e8] sm:$0xf]  ;;  %v9069_v29 = vld [vmem:[%s10389_s18 + $0x1fc] sm:$0xf0]  ;;  %v7472_v30 = vor.u32 %v9021_v27, %v7471_v25  ;;  %v9018_v32 = vld [vmem:[%s10389_s18 + $0x6c] sm:$0xf] }
  0xbb   : > { %v7664_v31 = vor.u32 %v9069_v29, %v7663_v28  ;;  %v7473_v33 = vld [vmem:[%s10389_s18 + $0x80] sm:$0xf0]  ;;  %v9066_v34 = vld [vmem:[%s10389_s18 + $0x1ec] sm:$0xf]  ;;  %v7447_v36 = vld [vmem:[%s10389_s18 + $0x38] sm:$0xf] }
  0xbc   : > { %1785 = vmatpush.bf16.msrb.mxu0 %v7568_v38  ;;  %v7665_v35 = vld [vmem:[%s10389_s18 + $0x200] sm:$0xf0]  ;;  %v9015_v37 = vld [vmem:[%s10389_s18 + $0x4c] sm:$0xf0]  ;;  %v7476_v38 = vor.u32 %v9018_v32, %v7473_v33  ;;  %v9012_v44 = vld [vmem:[%s10389_s18 + $0x3c] sm:$0xf] }
  0xbd   : > { %1814 = vmatpush.bf16.msrb.mxu1 %v7760_v39  ;;  %1843 = vmatpush.bf16.msrb.mxu2 %v7572_v43  ;;  %v7639_v39 = vld [vmem:[%s10389_s18 + $0x1b8] sm:$0xf]  ;;  %v9063_v40 = vld [vmem:[%s10389_s18 + $0x1cc] sm:$0xf0]  ;;  %v1058_v41 = vld [vmem:[#allocation2 + $0x40] sm:$0xff]  ;;  %v7668_v42 = vor.u32 %v9066_v34, %v7665_v35  ;;  %v7448_v43 = vor.u32 %v9015_v37, %v7447_v36 }
  0xbe   : > { %1872 = vmatpush.bf16.msrb.mxu3 %v7764_v47  ;;  %v7449_v45 = vld [vmem:[%s10389_s18 + $0x50] sm:$0xf0]  ;;  %v9060_v46 = vld [vmem:[%s10389_s18 + $0x1bc] sm:$0xf]  ;;  %v7640_v47 = vor.u32 %v9063_v40, %v7639_v39  ;;  %v7423_v49 = vld [vmem:[%s10389_s18 + $0x8] sm:$0xf] }
  0xbf   : > { %v7641_v48 = vld [vmem:[%s10389_s18 + $0x1d0] sm:$0xf0]  ;;  %v9009_v50 = vld [vmem:[%s10389_s18 + $0x1c] sm:$0xf0]  ;;  %v7615_v52 = vld [vmem:[%s10389_s18 + $0x188] sm:$0xf] }
  0xc0   : > { %1786 = vmatpush.bf16.msrb.mxu0 %v7544_v51  ;;  %v1060_v51 = vld [vmem:[#allocation2 + $0x10] sm:$0xff]  ;;  %v9057_v53 = vld [vmem:[%s10389_s18 + $0x19c] sm:$0xf0]  ;;  %v1061_v55 = vld [vmem:[#allocation2 + $0x38] sm:$0xff]  ;;  %v7424_v58 = vor.u32 %v9009_v50, %v7423_v49 }
  0xc1   : > { %1815 = vmatpush.bf16.msrb.mxu1 %v7736_v56  ;;  %1844 = vmatpush.bf16.msrb.mxu2 %v7548_v57  ;;  %v1059_v54 = vld [vmem:[#allocation2 + $0x20] sm:$0xff]  ;;  %v7452_v56 = vor.u32 %v9012_v44, %v7449_v45  ;;  %v7644_v57 = vor.u32 %v9060_v46, %v7641_v48  ;;  %v9006_v59 = vld [vmem:[%s10389_s18 + $0xc] sm:$0xf]  ;;  %v7616_v62 = vor.u32 %v9057_v53, %v7615_v52  ;;  %v1063_v7 = vld [vmem:[#allocation2 + $0x70] sm:$0xff] }
  0xc2   : > { %1873 = vmatpush.bf16.msrb.mxu3 %v7740_v61  ;;  %v7425_v60 = vld [vmem:[%s10389_s18 + $0x20] sm:$0xf0]  ;;  %v10623_v61 = vpack.c.bf16 %v1060_v51, %v1058_v41  ;;  %v9054_v63 = vld [vmem:[%s10389_s18 + $0x18c] sm:$0xf]  ;;  %v10627_v1 = vpack.c.bf16 %v1061_v55, %v1059_v54  ;;  %v7601_v13 = vld [vmem:[%s10389_s18 + $0x178] sm:$0xf0] }
  0xc3   : > { %v7617_v0 = vld [vmem:[%s10389_s18 + $0x1a0] sm:$0xf0]  ;;  %v1065_v8 = vld [vmem:[#allocation2 + $0x28] sm:$0xff]  ;;  %v7793_v16 = vld [vmem:[%s10389_s18 + $0x2f8] sm:$0xf0] }
  0xc4   : > { %1787 = vmatpush.bf16.msrb.mxu0 %v7520_v2  ;;  %v7428_v2 = vor.u32 %v9006_v59, %v7425_v60  ;;  %v7620_v3 = vor.u32 %v9054_v63, %v7617_v0  ;;  %v1062_v4 = vld [vmem:[#allocation2 + $0x60] sm:$0xff]  ;;  %v9043_v18 = vld [vmem:[%s10389_s18 + $0x134] sm:$0xf]  ;;  %v9052_v24 = vld [vmem:[%s10389_s18 + $0x174] sm:$0xf0] }
  0xc5   : > { %1816 = vmatpush.bf16.msrb.mxu1 %v7712_v6  ;;  %1845 = vmatpush.bf16.msrb.mxu2 %v7524_v10  ;;  %v1064_v6 = vld [vmem:[#allocation2 + $0x78] sm:$0xff]  ;;  %v9049_v12 = vld [vmem:[%s10389_s18 + $0x164] sm:$0xf]  ;;  %v7599_v23 = vld [vmem:[%s10389_s18 + $0x160] sm:$0xf] }
  0xc6   : > { %1681 = vmatmul.bf16.gmra.mxu0 %v10583_v5  ;;  %1874 = vmatpush.bf16.msrb.mxu3 %v7716_v11  ;;  %v10633_v10 = vpack.c.bf16 %v1064_v6, %v1062_v4  ;;  %v10635_v11 = vpack.c.bf16 %v1065_v8, %v1063_v7  ;;  %v7604_v14 = vor.u32 %v9049_v12, %v7601_v13  ;;  %v9091_v25 = vld [vmem:[%s10389_s18 + $0x2b4] sm:$0xf]  ;;  %v7769_v27 = vld [vmem:[%s10389_s18 + $0x2c8] sm:$0xf0]  ;;  %v7791_v29 = vld [vmem:[%s10389_s18 + $0x2e0] sm:$0xf] }
  0xc7   : > { %1710 = vmatmul.bf16.gmra.mxu1 %v10587_v9  ;;  %1739 = vmatmul.bf16.gmra.mxu2 %v10583_v5  ;;  %v7772_v28 = vor.u32 %v9091_v25, %v7769_v27  ;;  %v7553_v33 = vld [vmem:[%s10389_s18 + $0x118] sm:$0xf0]  ;;  %v7575_v35 = vld [vmem:[%s10389_s18 + $0x130] sm:$0xf]  ;;  %v9046_v36 = vld [vmem:[%s10389_s18 + $0x144] sm:$0xf0] }
  0xc8   : > { %1768 = vmatmul.bf16.gmra.mxu3 %v10587_v9  ;;  %1788 = vmatpush.bf16.msrb.mxu0 %v7496_v15  ;;  %v9097_v15 = vld [vmem:[%s10389_s18 + $0x2e4] sm:$0xf]  ;;  %v7745_v39 = vld [vmem:[%s10389_s18 + $0x298] sm:$0xf0]  ;;  %v7767_v41 = vld [vmem:[%s10389_s18 + $0x2b0] sm:$0xf] }
  0xc9   : > { %1817 = vmatpush.bf16.msrb.mxu1 %v7688_v19  ;;  %1846 = vmatpush.bf16.msrb.mxu2 %v7500_v22  ;;  %v7796_v17 = vor.u32 %v9097_v15, %v7793_v16  ;;  %v7577_v19 = vld [vmem:[%s10389_s18 + $0x148] sm:$0xf0]  ;;  %v9085_v37 = vld [vmem:[%s10389_s18 + $0x284] sm:$0xf]  ;;  %v9040_v48 = vld [vmem:[%s10389_s18 + $0x114] sm:$0xf0] }
  0xca   : > { %1875 = vmatpush.bf16.msrb.mxu3 %v7692_v26  ;;  %v7580_v22 = vor.u32 %v9043_v18, %v7577_v19  ;;  %v7600_v26 = vor.u32 %v9052_v24, %v7599_v23  ;;  %v7748_v40 = vor.u32 %v9085_v37, %v7745_v39  ;;  %v7529_v45 = vld [vmem:[%s10389_s18 + $0xe8] sm:$0xf0]  ;;  %v9079_v49 = vld [vmem:[%s10389_s18 + $0x254] sm:$0xf]  ;;  %v7743_v53 = vld [vmem:[%s10389_s18 + $0x280] sm:$0xf] }
  0xcb   : > { %v7721_v51 = vld [vmem:[%s10389_s18 + $0x268] sm:$0xf0]  ;;  %v9088_v54 = vld [vmem:[%s10389_s18 + $0x294] sm:$0xf0]  ;;  %v9025_v55 = vld [vmem:[%s10389_s18 + $0xa4] sm:$0xf] }
  0xcc   : > { %1789 = vmatpush.bf16.msrb.mxu0 %v7472_v30  ;;  %v9100_v30 = vld [vmem:[%s10389_s18 + $0x2f4] sm:$0xf0]  ;;  %v7724_v52 = vor.u32 %v9079_v49, %v7721_v51  ;;  %v7527_v59 = vld [vmem:[%s10389_s18 + $0xd0] sm:$0xf]  ;;  %v9034_v60 = vld [vmem:[%s10389_s18 + $0xe4] sm:$0xf0] }
  0xcd   : > { %1818 = vmatpush.bf16.msrb.mxu1 %v7664_v31  ;;  %1847 = vmatpush.bf16.msrb.mxu2 %v7476_v38  ;;  %v9037_v31 = vld [vmem:[%s10389_s18 + $0x104] sm:$0xf]  ;;  %v7792_v32 = vor.u32 %v9100_v30, %v7791_v29  ;;  %v7576_v38 = vor.u32 %v9046_v36, %v7575_v35  ;;  %v7697_v0 = vld [vmem:[%s10389_s18 + $0x238] sm:$0xf0]  ;;  %v9082_v4 = vld [vmem:[%s10389_s18 + $0x264] sm:$0xf0] }
  0xce   : > { %1876 = vmatpush.bf16.msrb.mxu3 %v7668_v42  ;;  %v7556_v34 = vor.u32 %v9037_v31, %v7553_v33  ;;  %v9094_v42 = vld [vmem:[%s10389_s18 + $0x2c4] sm:$0xf0]  ;;  %v9073_v63 = vld [vmem:[%s10389_s18 + $0x224] sm:$0xf]  ;;  %v9019_v6 = vld [vmem:[%s10389_s18 + $0x74] sm:$0xf] }
  0xcf   : > { %v7768_v44 = vor.u32 %v9094_v42, %v7767_v41  ;;  %v7481_v8 = vld [vmem:[%s10389_s18 + $0x88] sm:$0xf0]  ;;  %v7503_v13 = vld [vmem:[%s10389_s18 + $0xa0] sm:$0xf]  ;;  %v9067_v15 = vld [vmem:[%s10389_s18 + $0x1f4] sm:$0xf] }
  0xd0   : > { %1790 = vmatpush.bf16.msrb.mxu0 %v7448_v43  ;;  %v9031_v43 = vld [vmem:[%s10389_s18 + $0xd4] sm:$0xf]  ;;  %v7484_v12 = vor.u32 %v9019_v6, %v7481_v8  ;;  %v7695_v19 = vld [vmem:[%s10389_s18 + $0x220] sm:$0xf]  ;;  %v9013_v23 = vld [vmem:[%s10389_s18 + $0x44] sm:$0xf] }
  0xd1   : > { %1819 = vmatpush.bf16.msrb.mxu1 %v7640_v47  ;;  %1848 = vmatpush.bf16.msrb.mxu2 %v7452_v56  ;;  %v7532_v46 = vor.u32 %v9031_v43, %v7529_v45  ;;  %v7551_v47 = vld [vmem:[%s10389_s18 + $0x100] sm:$0xf]  ;;  %v7744_v56 = vor.u32 %v9088_v54, %v7743_v53  ;;  %v7457_v25 = vld [vmem:[%s10389_s18 + $0x58] sm:$0xf0]  ;;  %v7479_v27 = vld [vmem:[%s10389_s18 + $0x70] sm:$0xf] }
  0xd2   : > { %1877 = vmatpush.bf16.msrb.mxu3 %v7644_v57  ;;  %v7552_v50 = vor.u32 %v9040_v48, %v7551_v47  ;;  %v7505_v57 = vld [vmem:[%s10389_s18 + $0xb8] sm:$0xf0]  ;;  %v9061_v29 = vld [vmem:[%s10389_s18 + $0x1c4] sm:$0xf]  ;;  %v7671_v33 = vld [vmem:[%s10389_s18 + $0x1f0] sm:$0xf] }
  0xd3   : > { %v7649_v31 = vld [vmem:[%s10389_s18 + $0x1d8] sm:$0xf0]  ;;  %v9007_v35 = vld [vmem:[%s10389_s18 + $0x14] sm:$0xf]  ;;  %v7433_v37 = vld [vmem:[%s10389_s18 + $0x28] sm:$0xf0] }
  0xd4   : > { %1791 = vmatpush.bf16.msrb.mxu0 %v7424_v58  ;;  %v7508_v58 = vor.u32 %v9025_v55, %v7505_v57  ;;  %v7455_v39 = vld [vmem:[%s10389_s18 + $0x40] sm:$0xf]  ;;  %v9055_v41 = vld [vmem:[%s10389_s18 + $0x194] sm:$0xf]  ;;  %v7625_v43 = vld [vmem:[%s10389_s18 + $0x1a8] sm:$0xf0] }
  0xd5   : > { %1820 = vmatpush.bf16.msrb.mxu1 %v7616_v62  ;;  %1849 = vmatpush.bf16.msrb.mxu2 %v7428_v2  ;;  %v7528_v62 = vor.u32 %v9034_v60, %v7527_v59  ;;  %v7700_v2 = vor.u32 %v9073_v63, %v7697_v0  ;;  %v7647_v45 = vld [vmem:[%s10389_s18 + $0x1c0] sm:$0xf]  ;;  %v7431_v48 = vld [vmem:[%s10389_s18 + $0x10] sm:$0xf]  ;;  %v9010_v49 = vld [vmem:[%s10389_s18 + $0x24] sm:$0xf0] }
  0xd6   : > { %1686 = vmatmul.bf16.gmra.mxu0 %v10623_v61  ;;  %1878 = vmatpush.bf16.msrb.mxu3 %v7620_v3  ;;  %v7719_v3 = vld [vmem:[%s10389_s18 + $0x250] sm:$0xf] }
  0xd7   : > { %1715 = vmatmul.bf16.gmra.mxu1 %v10627_v1  ;;  %1744 = vmatmul.bf16.gmra.mxu2 %v10623_v61  ;;  %v7720_v7 = vor.u32 %v9082_v4, %v7719_v3  ;;  %v7623_v51 = vld [vmem:[%s10389_s18 + $0x190] sm:$0xf] }
  0xd8   : > { %1773 = vmatmul.bf16.gmra.mxu3 %v10627_v1  ;;  %1900 = vmatpush.bf16.msra.mxu0 %v7600_v26  ;;  %v7460_v26 = vor.u32 %v9013_v23, %v7457_v25 }
  0xd9   : > { %1958 = vmatpush.bf16.msra.mxu2 %v7604_v14  ;;  %1929 = vmatpush.bf16.msra.mxu1 %v7792_v32  ;;  %v9028_v14 = vld [vmem:[%s10389_s18 + $0xb4] sm:$0xf0]  ;;  %v7652_v32 = vor.u32 %v9061_v29, %v7649_v31 }
  0xda   : > { %1987 = vmatpush.bf16.msra.mxu3 %v7796_v17  ;;  %v7504_v16 = vor.u32 %v9028_v14, %v7503_v13  ;;  %v7673_v17 = vld [vmem:[%s10389_s18 + $0x208] sm:$0xf0] }
  0xdb   : > { %v7676_v18 = vor.u32 %v9067_v15, %v7673_v17 }
  0xdc   : > { %1901 = vmatpush.bf16.msra.mxu0 %v7576_v38  ;;  %v7436_v38 = vor.u32 %v9007_v35, %v7433_v37 }
  0xdd   : > { %1959 = vmatpush.bf16.msra.mxu2 %v7580_v22  ;;  %1930 = vmatpush.bf16.msra.mxu1 %v7768_v44  ;;  %v9076_v22 = vld [vmem:[%s10389_s18 + $0x234] sm:$0xf0]  ;;  %v7628_v44 = vor.u32 %v9055_v41, %v7625_v43 }
  0xde   : > { %1988 = vmatpush.bf16.msra.mxu3 %v7772_v28  ;;  %v7696_v24 = vor.u32 %v9076_v22, %v7695_v19  ;;  %v9022_v28 = vld [vmem:[%s10389_s18 + $0x84] sm:$0xf0] }
  0xdf   : > { %v7480_v30 = vor.u32 %v9022_v28, %v7479_v27 }
  0xe0   : > { %1902 = vmatpush.bf16.msra.mxu0 %v7552_v50  ;;  %v7432_v50 = vor.u32 %v9010_v49, %v7431_v48 }
  0xe1   : > { %1960 = vmatpush.bf16.msra.mxu2 %v7556_v34  ;;  %1931 = vmatpush.bf16.msra.mxu1 %v7744_v56  ;;  %v9070_v34 = vld [vmem:[%s10389_s18 + $0x204] sm:$0xf0]  ;;  %v10722_v56 = vld [vmem:[%s10436_s4] sm:$0x3f] }
  0xe2   : > { %1989 = vmatpush.bf16.msra.mxu3 %v7748_v40  ;;  %v7672_v36 = vor.u32 %v9070_v34, %v7671_v33  ;;  %v9016_v40 = vld [vmem:[%s10389_s18 + $0x54] sm:$0xf0]  ;;  %v10729_v57 = vperm.slane %v10722_v56, 0 }
  0xe3   : > { %v7456_v42 = vor.u32 %v9016_v40, %v7455_v39 }
  0xe4   : > { %1903 = vmatpush.bf16.msra.mxu0 %v7528_v62 }
  0xe5   : > { %1961 = vmatpush.bf16.msra.mxu2 %v7532_v46  ;;  %1932 = vmatpush.bf16.msra.mxu1 %v7720_v7  ;;  %v9064_v46 = vld [vmem:[%s10389_s18 + $0x1d4] sm:$0xf0] }
  0xe6   : > { %1691 = vmatmul.bf16.gmra.mxu0 %v10633_v10  ;;  %1990 = vmatpush.bf16.msra.mxu3 %v7724_v52  ;;  %v7648_v47 = vor.u32 %v9064_v46, %v7647_v45  ;;  %v9058_v52 = vld [vmem:[%s10389_s18 + $0x1a4] sm:$0xf0] }
  0xe7   : > { %1720 = vmatmul.bf16.gmra.mxu1 %v10635_v11  ;;  %1749 = vmatmul.bf16.gmra.mxu2 %v10633_v10  ;;  %v7624_v53 = vor.u32 %v9058_v52, %v7623_v51 }
  0xe8   : > { %1778 = vmatmul.bf16.gmra.mxu3 %v10635_v11  ;;  %1904 = vmatpush.bf16.msra.mxu0 %v7504_v16 }
  0xe9   : > { %1962 = vmatpush.bf16.msra.mxu2 %v7508_v58  ;;  %1933 = vmatpush.bf16.msra.mxu1 %v7696_v24  ;;  %v10732_v58 = vperm.slane %v10722_v56, 1 }
  0xea   : > { %1991 = vmatpush.bf16.msra.mxu3 %v7700_v2 }
  0xec   : > { %1905 = vmatpush.bf16.msra.mxu0 %v7480_v30 }
  0xed   : > { %1963 = vmatpush.bf16.msra.mxu2 %v7484_v12  ;;  %1934 = vmatpush.bf16.msra.mxu1 %v7672_v36 }
  0xee   : > { %1992 = vmatpush.bf16.msra.mxu3 %v7676_v18 }
  0xf0   : > { %1906 = vmatpush.bf16.msra.mxu0 %v7456_v42 }
  0xf1   : > { %1964 = vmatpush.bf16.msra.mxu2 %v7460_v26  ;;  %1935 = vmatpush.bf16.msra.mxu1 %v7648_v47 }
  0xf2   : > { %1993 = vmatpush.bf16.msra.mxu3 %v7652_v32 }
  0xf4   : > { %1907 = vmatpush.bf16.msra.mxu0 %v7432_v50 }
  0xf5   : > { %1965 = vmatpush.bf16.msra.mxu2 %v7436_v38  ;;  %1936 = vmatpush.bf16.msra.mxu1 %v7624_v53 }
  0xf6   : > { %1792 = vmatmul.bf16.vlgmr.msrb.gmra.mxu0 %v10545_v20  ;;  %1994 = vmatpush.bf16.msra.mxu3 %v7628_v44 }
  0xf7   : > { %1821 = vmatmul.bf16.vlgmr.msrb.gmra.mxu1 %v10547_v21  ;;  %1850 = vmatmul.bf16.vlgmr.msrb.gmra.mxu2 %v10545_v20 }
  0xf8   : > { %1879 = vmatmul.bf16.vlgmr.msrb.gmra.mxu3 %v10547_v21 }
 0x106   : > { %1797 = vmatmul.bf16.gmra.mxu0 %v10583_v5 }
 0x107   : > { %1826 = vmatmul.bf16.gmra.mxu1 %v10587_v9  ;;  %1855 = vmatmul.bf16.gmra.mxu2 %v10583_v5 }
 0x108   : > { %1884 = vmatmul.bf16.gmra.mxu3 %v10587_v9 }
 0x116   : > { %1802 = vmatmul.bf16.gmra.mxu0 %v10623_v61 }
 0x117   : > { %1831 = vmatmul.bf16.gmra.mxu1 %v10627_v1  ;;  %1860 = vmatmul.bf16.gmra.mxu2 %v10623_v61 }
 0x118   : > { %1889 = vmatmul.bf16.gmra.mxu3 %v10627_v1 }
 0x126   : > { %1807 = vmatmul.bf16.gmra.mxu0 %v10633_v10 }
 0x127   : > { %1836 = vmatmul.bf16.gmra.mxu1 %v10635_v11  ;;  %1865 = vmatmul.bf16.gmra.mxu2 %v10633_v10 }
 0x128   : > { %1894 = vmatmul.bf16.gmra.mxu3 %v10635_v11 }
 0x133   : > { %v1677_v54 = vpop.f32.mrf.mxu0 }
 0x134   : > { %v1706_v55 = vpop.f32.mrf.mxu1  ;;  %v1678_v0 = vadd.f32 %v1677_v54, %v10729_v57 }
 0x136   : > { %1908 = vmatmul.bf16.vlgmr.msra.gmra.mxu0 %v10545_v20  ;;  %v1707_v3 = vadd.f32 %v1706_v55, %v1678_v0 }
 0x137   : > { %1966 = vmatmul.bf16.vlgmr.msra.gmra.mxu2 %v10545_v20  ;;  %1937 = vmatmul.bf16.vlgmr.msra.gmra.mxu1 %v10547_v21 }
 0x138   : > { %1995 = vmatmul.bf16.vlgmr.msra.gmra.mxu3 %v10547_v21 }
 0x13a   : > { %v1735_v59 = vpop.f32.mrf.mxu2 }
 0x13b   : > { %v1764_v60 = vpop.f32.mrf.mxu3  ;;  %v1679_v62 = vpop.f32.mrf.mxu0  ;;  %v1736_v2 = vadd.f32 %v1735_v59, %v10732_v58 }
 0x13c   : > { %v1708_v63 = vpop.f32.mrf.mxu1  ;;  %v1680_v4 = vadd.f32 %v1679_v62, %v10729_v57 }
 0x13d   : > { %v1765_v20 = vadd.f32 %v1764_v60, %v1736_v2 }
 0x13e   : > { %v1709_v14 = vadd.f32 %v1708_v63, %v1680_v4 }
 0x13f   : > { %v2016_v13 = vpack.c.bf16 %v1765_v20, %v1707_v3 }
 0x141   : > { %v2713_v17 = vunpack.c.h.b16 %v2016_v13  ;;  %v2048_v19 = vunpack.c.l.b16 %v2016_v13 }
 0x142   : > { %v1737_v6 = vpop.f32.mrf.mxu2 }
 0x143   : > { %v1738_v21 = vadd.f32 %v1737_v6, %v10732_v58  ;;  %v1766_v7 = vpop.f32.mrf.mxu3  ;;  %v1682_v8 = vpop.f32.mrf.mxu0 }
 0x144   : > { %v1711_v12 = vpop.f32.mrf.mxu1  ;;  %v1683_v29 = vadd.f32 %v1682_v8, %v10729_v57 }
 0x145   : > { %v1767_v15 = vadd.f32 %v1766_v7, %v1738_v21 }
 0x146   : > { %1913 = vmatmul.bf16.gmra.mxu0 %v10583_v5 }
 0x147   : > { %v2019_v16 = vpack.c.bf16 %v1767_v15, %v1709_v14  ;;  %1971 = vmatmul.bf16.gmra.mxu2 %v10583_v5  ;;  %1942 = vmatmul.bf16.gmra.mxu1 %v10587_v9 }
 0x148   : > { %2000 = vmatmul.bf16.gmra.mxu3 %v10587_v9  ;;  %v1712_v9 = vadd.f32 %v1711_v12, %v1683_v29 }
 0x149   : > { %v2714_v18 = vunpack.c.h.b16 %v2019_v16  ;;  %v2049_v22 = vunpack.c.l.b16 %v2019_v16 }
 0x14a   : > { %v1740_v23 = vpop.f32.mrf.mxu2 }
 0x14b   : > { %v1769_v24 = vpop.f32.mrf.mxu3  ;;  %v1684_v25 = vpop.f32.mrf.mxu0  ;;  %v10742_v26 = vpack.c.b16 %v2049_v22, %v2048_v19  ;;  %v10744_v27 = vpack.c.b16 %v2714_v18, %v2713_v17  ;;  %v1741_v5 = vadd.f32 %v1740_v23, %v10732_v58 }
 0x14c   : > { %v1713_v28 = vpop.f32.mrf.mxu1  ;;  %v1685_v31 = vadd.f32 %v1684_v25, %v10729_v57 }
 0x14d   : > { %2395 = vrot.lane.b32.xlu2 %v10742_v26, %s10107_s29  ;;  %v1770_v30 = vadd.f32 %v1769_v24, %v1741_v5 }
 0x14e   : > { %v1714_v39 = vadd.f32 %v1713_v28, %v1685_v31 }
 0x14f   : > { %v2022_v38 = vpack.c.bf16 %v1770_v30, %v1712_v9 }
 0x151   : > { %v2050_v43 = vunpack.c.l.b16 %v2022_v38  ;;  %v2715_v44 = vunpack.c.h.b16 %v2022_v38 }
 0x152   : > { %v1742_v32 = vpop.f32.mrf.mxu2 }
 0x153   : > { %v1743_v33 = vadd.f32 %v1742_v32, %v10732_v58  ;;  %v1771_v34 = vpop.f32.mrf.mxu3  ;;  %v1687_v35 = vpop.f32.mrf.mxu0 }
 0x154   : > { %v1688_v36 = vadd.f32 %v1687_v35, %v10729_v57  ;;  %v1716_v37 = vpop.f32.mrf.mxu1 }
 0x155   : > { %v1772_v40 = vadd.f32 %v1771_v34, %v1743_v33 }
 0x156   : > { %v1717_v41 = vadd.f32 %v1716_v37, %v1688_v36  ;;  %1918 = vmatmul.bf16.gmra.mxu0 %v10623_v61 }
 0x157   : > { %v2025_v42 = vpack.c.bf16 %v1772_v40, %v1714_v39  ;;  %1976 = vmatmul.bf16.gmra.mxu2 %v10623_v61  ;;  %1947 = vmatmul.bf16.gmra.mxu1 %v10627_v1 }
 0x158   : > { %2005 = vmatmul.bf16.gmra.mxu3 %v10627_v1 }
 0x159   : > { %v2051_v45 = vunpack.c.l.b16 %v2025_v42  ;;  %v2716_v46 = vunpack.c.h.b16 %v2025_v42 }
 0x15a   : > { %v1745_v47 = vpop.f32.mrf.mxu2 }
 0x15b   : > { %v1746_v48 = vadd.f32 %v1745_v47, %v10732_v58  ;;  %v1774_v49 = vpop.f32.mrf.mxu3  ;;  %v1689_v50 = vpop.f32.mrf.mxu0  ;;  %v10758_v51 = vpack.c.b16 %v2051_v45, %v2050_v43  ;;  %v10760_v52 = vpack.c.b16 %v2716_v46, %v2715_v44  ;;  %v10783_v43 = vperm.slane %v10722_v56, 2 }
 0x15c   : > { %v1718_v53 = vpop.f32.mrf.mxu1  ;;  %v1690_v1 = vadd.f32 %v1689_v50, %v10729_v57  ;;  %v10786_v44 = vperm.slane %v10722_v56, 3 }
 0x15d   : > { %v1775_v54 = vadd.f32 %v1774_v49, %v1746_v48  ;;  %2397 = vrot.lane.b32.xlu2 %v10758_v51, %s10107_s29 }
 0x15e   : > { %v1719_v2 = vadd.f32 %v1718_v53, %v1690_v1 }
 0x15f   : > { %v2028_v61 = vpack.c.bf16 %v1775_v54, %v1717_v41 }
 0x161   : > { %v2052_v6 = vunpack.c.l.b16 %v2028_v61  ;;  %v2717_v21 = vunpack.c.h.b16 %v2028_v61 }
 0x162   : > { %v1747_v55 = vpop.f32.mrf.mxu2 }
 0x163   : > { %v1748_v59 = vadd.f32 %v1747_v55, %v10732_v58  ;;  %v1776_v60 = vpop.f32.mrf.mxu3  ;;  %v1692_v62 = vpop.f32.mrf.mxu0 }
 0x164   : > { %v1693_v63 = vadd.f32 %v1692_v62, %v10729_v57  ;;  %v1721_v0 = vpop.f32.mrf.mxu1 }
 0x165   : > { %v1777_v3 = vadd.f32 %v1776_v60, %v1748_v59 }
 0x166   : > { %v1722_v20 = vadd.f32 %v1721_v0, %v1693_v63  ;;  %1923 = vmatmul.bf16.gmra.mxu0 %v10633_v10 }
 0x167   : > { %v2031_v4 = vpack.c.bf16 %v1777_v3, %v1719_v2  ;;  %1981 = vmatmul.bf16.gmra.mxu2 %v10633_v10  ;;  %1952 = vmatmul.bf16.gmra.mxu1 %v10635_v11 }
 0x168   : > { %2010 = vmatmul.bf16.gmra.mxu3 %v10635_v11 }
 0x169   : > { %v2053_v7 = vunpack.c.l.b16 %v2031_v4  ;;  %v2718_v8 = vunpack.c.h.b16 %v2031_v4 }
 0x16a   : > { %v1750_v12 = vpop.f32.mrf.mxu2 }
 0x16b   : > { %v1751_v13 = vadd.f32 %v1750_v12, %v10732_v58  ;;  %v1779_v14 = vpop.f32.mrf.mxu3  ;;  %v1694_v15 = vpop.f32.mrf.mxu0  ;;  %v10772_v16 = vpack.c.b16 %v2718_v8, %v2717_v21  ;;  %v10774_v17 = vpack.c.b16 %v2053_v7, %v2052_v6 }
 0x16c   : > { %v1723_v18 = vpop.f32.mrf.mxu1  ;;  %v1695_v22 = vadd.f32 %v1694_v15, %v10729_v57 }
 0x16d   : > { %v1780_v19 = vadd.f32 %v1779_v14, %v1751_v13 }
 0x16e   : > { %v1724_v29 = vadd.f32 %v1723_v18, %v1695_v22 }
 0x16f   : > { %v2034_v10 = vpack.c.bf16 %v1780_v19, %v1722_v20 }
 0x171   : > { %v2054_v30 = vunpack.c.l.b16 %v2034_v10  ;;  %v2719_v31 = vunpack.c.h.b16 %v2034_v10 }
 0x172   : > { %v1752_v23 = vpop.f32.mrf.mxu2 }
 0x173   : > { %v1753_v11 = vadd.f32 %v1752_v23, %v10732_v58  ;;  %v1781_v24 = vpop.f32.mrf.mxu3  ;;  %v1793_v25 = vpop.f32.mrf.mxu0 }
 0x174   : > { %v1822_v28 = vpop.f32.mrf.mxu1  ;;  %v1794_v62 = vadd.f32 %v1793_v25, %v10783_v43 }
 0x175   : > { %v1782_v5 = vadd.f32 %v1781_v24, %v1753_v11 }
 0x176   : > { %v1823_v7 = vadd.f32 %v1822_v28, %v1794_v62 }
 0x177   : > { %v2037_v9 = vpack.c.bf16 %v1782_v5, %v1724_v29 }
 0x179   : > { %v2055_v32 = vunpack.c.l.b16 %v2037_v9  ;;  %v2720_v33 = vunpack.c.h.b16 %v2037_v9 }
 0x17a   : > { %v1851_v34 = vpop.f32.mrf.mxu2 }
 0x17b   : > { %v1880_v35 = vpop.f32.mrf.mxu3  ;;  %v1795_v36 = vpop.f32.mrf.mxu0  ;;  %v10778_v37 = vpack.c.b16 %v2055_v32, %v2054_v30  ;;  %v10780_v38 = vpack.c.b16 %v2720_v33, %v2719_v31  ;;  %v1852_v63 = vadd.f32 %v1851_v34, %v10786_v44 }
 0x17c   : > { %v1824_v57 = vpop.f32.mrf.mxu1  ;;  %v1796_v2 = vadd.f32 %v1795_v36, %v10783_v43 }
 0x17d   : > { %v1881_v8 = vadd.f32 %v1880_v35, %v1852_v63 }
 0x17e   : > { %v1825_v12 = vadd.f32 %v1824_v57, %v1796_v2 }
 0x17f   : > { %v2017_v11 = vpack.c.bf16 %v1881_v8, %v1823_v7 }
 0x181   : > { %v2068_v29 = vunpack.c.l.b16 %v2017_v11 }
 0x182   : > { %v1853_v39 = vpop.f32.mrf.mxu2 }
 0x183   : > { %v1882_v58 = vpop.f32.mrf.mxu3  ;;  %v1798_v40 = vpop.f32.mrf.mxu0  ;;  %v1854_v1 = vadd.f32 %v1853_v39, %v10786_v44 }
 0x184   : > { %v1827_v41 = vpop.f32.mrf.mxu1  ;;  %v1799_v48 = vadd.f32 %v1798_v40, %v10783_v43 }
 0x185   : > { %v1883_v6 = vadd.f32 %v1882_v58, %v1854_v1 }
 0x186   : > { %v1828_v50 = vadd.f32 %v1827_v41, %v1799_v48 }
 0x187   : > { %v2020_v18 = vpack.c.bf16 %v1883_v6, %v1825_v12 }
 0x189   : > { %v2069_v28 = vunpack.c.l.b16 %v2020_v18 }
 0x18a   : > { %v1856_v42 = vpop.f32.mrf.mxu2 }
 0x18b   : > { %v1885_v45 = vpop.f32.mrf.mxu3  ;;  %v1800_v46 = vpop.f32.mrf.mxu0  ;;  %v1857_v49 = vadd.f32 %v1856_v42, %v10786_v44  ;;  %v10810_v35 = vpack.c.b16 %v2069_v28, %v2068_v29 }
 0x18c   : > { %v1829_v47 = vpop.f32.mrf.mxu1  ;;  %v1801_v54 = vadd.f32 %v1800_v46, %v10783_v43 }
 0x18d   : > { %v1886_v53 = vadd.f32 %v1885_v45, %v1857_v49 }
 0x18e   : > { %v1830_v20 = vadd.f32 %v1829_v47, %v1801_v54  ;;  %v2726_v54 = vunpack.c.h.b16 %v2020_v18 }
 0x18f   : > { %v10796_v3 = vpack.c.bf16 %v1886_v53, %v1828_v50 }
 0x191   : > { %v2070_v13 = vunpack.c.l.b16 %v10796_v3  ;;  %v2727_v29 = vunpack.c.h.b16 %v10796_v3 }
 0x192   : > { %v1858_v61 = vpop.f32.mrf.mxu2 }
 0x193   : > { %v1859_v55 = vadd.f32 %v1858_v61, %v10786_v44  ;;  %v1887_v59 = vpop.f32.mrf.mxu3  ;;  %v1803_v60 = vpop.f32.mrf.mxu0  ;;  %v2725_v61 = vunpack.c.h.b16 %v2017_v11 }
 0x194   : > { %v1832_v0 = vpop.f32.mrf.mxu1  ;;  %v1804_v24 = vadd.f32 %v1803_v60, %v10783_v43 }
 0x195   : > { %v1888_v4 = vadd.f32 %v1887_v59, %v1859_v55 }
 0x196   : > { %v1833_v5 = vadd.f32 %v1832_v0, %v1804_v24  ;;  %v10822_v0 = vpack.c.b16 %v2726_v54, %v2725_v61 }
 0x197   : > { %v10798_v21 = vpack.c.bf16 %v1888_v4, %v1830_v20 }
 0x199   : > { %v2071_v14 = vunpack.c.l.b16 %v10798_v21 }
 0x19a   : > { %v1861_v15 = vpop.f32.mrf.mxu2 }
 0x19b   : > { %v1890_v19 = vpop.f32.mrf.mxu3  ;;  %v1805_v10 = vpop.f32.mrf.mxu0  ;;  %v10802_v22 = vpack.c.b16 %v2071_v14, %v2070_v13  ;;  %v1862_v25 = vadd.f32 %v1861_v15, %v10786_v44 }
 0x19c   : > { %v1834_v23 = vpop.f32.mrf.mxu1  ;;  %v1806_v30 = vadd.f32 %v1805_v10, %v10783_v43 }
 0x19d   : > { %2405 = vrot.lane.b32.xlu1 %v10802_v22, %s10107_s29  ;;  %v1891_v9 = vadd.f32 %v1890_v19, %v1862_v25  ;;  %v2728_v25 = vunpack.c.h.b16 %v10798_v21  ;;  %v2097_v3 = vsel %vm2080_vm0, %v10802_v22, 0  ;;  %v2094_v22 = vsel %vm2080_vm0, %v10810_v35, 0 }
 0x19e   : > { %v1835_v39 = vadd.f32 %v1834_v23, %v1806_v30 }
 0x19f   : > { %v2029_v57 = vpack.c.bf16 %v1891_v9, %v1833_v5  ;;  %v10837_v30 = vpack.c.b16 %v2728_v25, %v2727_v29 }
 0x1a1   : > { %v2729_v41 = vunpack.c.h.b16 %v2029_v57  ;;  %v2072_v28 = vunpack.c.l.b16 %v2029_v57 }
 0x1a2   : > { %v1863_v31 = vpop.f32.mrf.mxu2 }
 0x1a3   : > { %v1864_v32 = vadd.f32 %v1863_v31, %v10786_v44  ;;  %v1892_v33 = vpop.f32.mrf.mxu3  ;;  %v1808_v34 = vpop.f32.mrf.mxu0 }
 0x1a4   : > { %v1837_v36 = vpop.f32.mrf.mxu1  ;;  %v1809_v50 = vadd.f32 %v1808_v34, %v10783_v43 }
 0x1a5   : > { %v1893_v58 = vadd.f32 %v1892_v33, %v1864_v32  ;;  %2403 = vrot.lane.b32.xlu1 %v10810_v35, %s10107_s29 }
 0x1a6   : > { %v1838_v1 = vadd.f32 %v1837_v36, %v1809_v50 }
 0x1a7   : > { %v2032_v40 = vpack.c.bf16 %v1893_v58, %v1835_v39  ;;  %v10850_v58 = vperm.slane %v10722_v56, 4 }
 0x1a9   : > { %v2730_v42 = vunpack.c.h.b16 %v2032_v40  ;;  %v2073_v11 = vunpack.c.l.b16 %v2032_v40  ;;  %v10853_v40 = vperm.slane %v10722_v56, 5 }
 0x1aa   : > { %v1866_v45 = vpop.f32.mrf.mxu2 }
 0x1ab   : > { %v1895_v46 = vpop.f32.mrf.mxu3  ;;  %v1810_v47 = vpop.f32.mrf.mxu0  ;;  %v10814_v48 = vpack.c.b16 %v2730_v42, %v2729_v41  ;;  %v1867_v53 = vadd.f32 %v1866_v45, %v10786_v44  ;;  %v2078_v5 = vpack.c.b16 %v2073_v11, %v2072_v28 }
 0x1ac   : > { %v1839_v49 = vpop.f32.mrf.mxu1  ;;  %v1811_v59 = vadd.f32 %v1810_v47, %v10783_v43 }
 0x1ad   : > { %3055 = vrot.lane.b32.xlu2 %v10814_v48, %s10107_s29  ;;  %v1896_v55 = vadd.f32 %v1895_v46, %v1867_v53  ;;  %v2100_v34 = vsel %vm2080_vm0, %v2078_v5, 0 }
 0x1ae   : > { %v1840_v6 = vadd.f32 %v1839_v49, %v1811_v59 }
 0x1af   : > { %v2035_v4 = vpack.c.bf16 %v1896_v55, %v1838_v1 }
 0x1b1   : > { %v2731_v12 = vunpack.c.h.b16 %v2035_v4  ;;  %v2074_v14 = vunpack.c.l.b16 %v2035_v4 }
 0x1b2   : > { %v1868_v60 = vpop.f32.mrf.mxu2 }
 0x1b3   : > { %v1869_v62 = vadd.f32 %v1868_v60, %v10786_v44  ;;  %v1897_v63 = vpop.f32.mrf.mxu3  ;;  %v1909_v2 = vpop.f32.mrf.mxu0 }
 0x1b4   : > { %v10824_v20 = vpop.f32.mrf.mxu1  ;;  %v1910_v54 = vadd.f32 %v1909_v2, %v10850_v58 }
 0x1b5   : > { %v1898_v7 = vadd.f32 %v1897_v63, %v1869_v62  ;;  %3051 = vrot.lane.b32.xlu2 %v10822_v0, %s10107_s29 }
 0x1b6   : > { %v1939_v2 = vadd.f32 %v10824_v20, %v1910_v54 }
 0x1b7   : > { %v2038_v8 = vpack.c.bf16 %v1898_v7, %v1840_v6 }
 0x1b9   : > { %v2732_v13 = vunpack.c.h.b16 %v2038_v8  ;;  %v2075_v43 = vunpack.c.l.b16 %v2038_v8 }
 0x1ba   : > { %v1967_v15 = vpop.f32.mrf.mxu2 }
 0x1bb   : > { %v2079_v18 = vpack.c.b16 %v2075_v43, %v2074_v14  ;;  %v2736_v44 = vpack.c.b16 %v2732_v13, %v2731_v12  ;;  %v10828_v19 = vpop.f32.mrf.mxu3  ;;  %v1911_v10 = vpop.f32.mrf.mxu0  ;;  %v1968_v60 = vadd.f32 %v1967_v15, %v10853_v40 }
 0x1bc   : > { %v1940_v23 = vpop.f32.mrf.mxu1  ;;  %v1912_v62 = vadd.f32 %v1911_v10, %v10850_v58 }
 0x1bd   : > { %2409 = vrot.lane.b32.xlu0 %v2079_v18, %s10107_s29  ;;  %3057 = vrot.lane.b32.xlu1 %v2736_v44, %s10107_s29  ;;  %v2103_v24 = vsel %vm2080_vm0, %v2079_v18, 0  ;;  %v2759_v56 = vsel %vm2080_vm0, %v2736_v44, 0  ;;  %v1997_v43 = vadd.f32 %v10828_v19, %v1968_v60  ;;  %v2756_v44 = vsel %vm2080_vm0, %v10814_v48, 0 }
 0x1be   : > { %3047 = vrot.lane.b32.xlu2 %v10772_v16, %s10107_s29  ;;  %2109 = vmatpush.bf16.xpose.msrb.mxu0 %v2103_v24  ;;  %v1941_v15 = vadd.f32 %v1940_v23, %v1912_v62 }
 0x1bf   : > { %v10885_v23 = vpack.c.bf16 %v1997_v43, %v1939_v2 }
 0x1c1   : > { %v2986_v43 = vunpack.c.h.b16 %v10885_v23 }
 0x1c2   : > { %v1969_v9 = vpop.f32.mrf.mxu2 }
 0x1c3   : > { %v1998_v31 = vpop.f32.mrf.mxu3  ;;  %v1914_v32 = vpop.f32.mrf.mxu0  ;;  %v1970_v63 = vadd.f32 %v1969_v9, %v10853_v40 }
 0x1c4   : > { %v1943_v33 = vpop.f32.mrf.mxu1  ;;  %v1915_v46 = vadd.f32 %v1914_v32, %v10850_v58  ;;  %v2338_v32 = vunpack.c.l.b16 %v10885_v23 }
 0x1c5   : > { %2407 = vrot.lane.b32.xlu0 %v2078_v5, %s10107_s29  ;;  %3053 = vrot.lane.b32.xlu1 %v10837_v30, %s10107_s29  ;;  %v1999_v18 = vadd.f32 %v1998_v31, %v1970_v63 }
 0x1c6   : > { %2110 = vmatpush.bf16.xpose.msrb.mxu0 %v2100_v34  ;;  %v1944_v61 = vadd.f32 %v1943_v33, %v1915_v46 }
 0x1c7   : > { %v10887_v25 = vpack.c.bf16 %v1999_v18, %v1941_v15 }
 0x1c9   : > { %v2339_v33 = vunpack.c.l.b16 %v10887_v25  ;;  %v2987_v15 = vunpack.c.h.b16 %v10887_v25 }
 0x1ca   : > { %v1972_v36 = vpop.f32.mrf.mxu2 }
 0x1cb   : > { %v2001_v21 = vpop.f32.mrf.mxu3  ;;  %v1916_v57 = vpop.f32.mrf.mxu0  ;;  %v1973_v47 = vadd.f32 %v1972_v36, %v10853_v40  ;;  %v2753_v36 = vsel %vm2080_vm0, %v10837_v30, 0  ;;  %v2750_v30 = vsel %vm2080_vm0, %v10822_v0, 0 }
 0x1cc   : > { %v1945_v39 = vpop.f32.mrf.mxu1  ;;  %v1917_v49 = vadd.f32 %v1916_v57, %v10850_v58 }
 0x1cd   : > { %2399 = vrot.lane.b32.xlu0 %v10774_v17, %s10107_s29  ;;  %3045 = vrot.lane.b32.xlu1 %v10760_v52, %s10107_s29  ;;  %v2002_v1 = vadd.f32 %v2001_v21, %v1973_v47 }
 0x1ce   : > { %2111 = vmatpush.bf16.xpose.msrb.mxu0 %v2097_v3  ;;  %v1946_v55 = vadd.f32 %v1945_v39, %v1917_v49 }
 0x1cf   : > { %v10871_v12 = vpack.c.bf16 %v2002_v1, %v1944_v61 }
 0x1d1   : > { %v2340_v24 = vunpack.c.l.b16 %v10871_v12 }
 0x1d2   : > { %v1974_v41 = vpop.f32.mrf.mxu2 }
 0x1d3   : > { %v2003_v42 = vpop.f32.mrf.mxu3  ;;  %v1919_v45 = vpop.f32.mrf.mxu0  ;;  %v1975_v50 = vadd.f32 %v1974_v41, %v10853_v40  ;;  %v2346_v41 = vpack.c.b16 %v2339_v33, %v2338_v32 }
 0x1d4   : > { %v1948_v53 = vpop.f32.mrf.mxu1  ;;  %v1920_v6 = vadd.f32 %v1919_v45, %v10850_v58 }
 0x1d5   : > { %2401 = vrot.lane.b32.xlu0 %v10778_v37, %s10107_s29  ;;  %v2004_v59 = vadd.f32 %v2003_v42, %v1975_v50 }
 0x1d6   : > { %2112 = vmatpush.bf16.xpose.msrb.mxu0 %v2094_v22  ;;  %v1949_v20 = vadd.f32 %v1948_v53, %v1920_v6 }
 0x1d7   : > { %v10873_v13 = vpack.c.bf16 %v2004_v59, %v1946_v55 }
 0x1d9   : > { %v2341_v19 = vunpack.c.l.b16 %v10873_v13  ;;  %v2989_v2 = vunpack.c.h.b16 %v10873_v13 }
 0x1da   : > { %v1977_v4 = vpop.f32.mrf.mxu2 }
 0x1db   : > { %v1978_v35 = vadd.f32 %v1977_v4, %v10853_v40  ;;  %v2006_v7 = vpop.f32.mrf.mxu3  ;;  %v1921_v8 = vpop.f32.mrf.mxu0  ;;  %v2347_v31 = vpack.c.b16 %v2341_v19, %v2340_v24 }
 0x1dc   : > { %v1950_v14 = vpop.f32.mrf.mxu1  ;;  %v1922_v11 = vadd.f32 %v1921_v8, %v10850_v58  ;;  %v2988_v8 = vunpack.c.h.b16 %v10871_v12  ;;  %v10925_v12 = vpack.c.b16 %v2987_v15, %v2986_v43 }
 0x1dd   : > { %3043 = vrot.lane.b32.xlu0 %v10744_v27, %s10107_s29  ;;  %7797 = vmatmul.msk.bf16.vlgmr.msrb.gmra.mxu0 %vm2080_vm0, %v10742_v26  ;;  %v2007_v10 = vadd.f32 %v2006_v7, %v1978_v35 }
 0x1de   : > { %2765 = vmatpush.bf16.xpose.msra.mxu0 %v2759_v56  ;;  %v1951_v5 = vadd.f32 %v1950_v14, %v1922_v11  ;;  %2662 = vrot.lane.b32.xlu2 %v2347_v31, %s10107_s29 }
 0x1df   : > { %v2030_v29 = vpack.c.bf16 %v2007_v10, %v1949_v20  ;;  %v2396_v10 = vpop.permute.xlu2 %2395 }
 0x1e1   : > { %v2342_v57 = vunpack.c.l.b16 %v2030_v29  ;;  %v2990_v35 = vunpack.c.h.b16 %v2030_v29 }
 0x1e2   : > { %v1979_v28 = vpop.f32.mrf.mxu2 }
 0x1e3   : > { %v1980_v26 = vadd.f32 %v1979_v28, %v10853_v40  ;;  %v2008_v9 = vpop.f32.mrf.mxu3  ;;  %v1924_v48 = vpop.f32.mrf.mxu0 }
 0x1e4   : > { %v1953_v21 = vpop.f32.mrf.mxu1  ;;  %v1925_v45 = vadd.f32 %v1924_v48, %v10850_v58 }
 0x1e5   : > { %3049 = vrot.lane.b32.xlu0 %v10780_v38, %s10107_s29  ;;  %v2009_v34 = vadd.f32 %v2008_v9, %v1980_v26  ;;  %v10948_v9 = vld [vmem:[%s13842_s10] ss:$0 sm:$0xff] }
 0x1e6   : > { %2766 = vmatpush.bf16.xpose.msra.mxu0 %v2756_v44  ;;  %v1954_v53 = vadd.f32 %v1953_v21, %v1925_v45 }
 0x1e7   : > { %v2033_v39 = vpack.c.bf16 %v2009_v34, %v1951_v5 }
 0x1e9   : > { %v2343_v3 = vunpack.c.l.b16 %v2033_v39  ;;  %v2991_v7 = vunpack.c.h.b16 %v2033_v39 }
 0x1ea   : > { %v1982_v42 = vpop.f32.mrf.mxu2 }
 0x1eb   : > { %v1983_v46 = vadd.f32 %v1982_v42, %v10853_v40  ;;  %v2011_v47 = vpop.f32.mrf.mxu3  ;;  %v2348_v49 = vpack.c.b16 %v2343_v3, %v2342_v57  ;;  %v1926_v50 = vpop.f32.mrf.mxu0  ;;  %v10915_v14 = vpack.c.b16 %v2991_v7, %v2990_v35 }
 0x1ec   : > { %v1927_v56 = vadd.f32 %v1926_v50, %v10850_v58  ;;  %v1955_v54 = vpop.f32.mrf.mxu1 }
 0x1ed   : > { %7798 = vmatmul.msk.bf16.gmra.mxu0 %vm2080_vm0, %v10758_v51  ;;  %2660 = vrot.lane.b32.xlu0 %v2346_v41, %s10107_s29  ;;  %v2012_v22 = vadd.f32 %v2011_v47, %v1983_v46 }
 0x1ee   : > { %2767 = vmatpush.bf16.xpose.msra.mxu0 %v2753_v36  ;;  %2664 = vrot.lane.b32.xlu1 %v2348_v49, %s10107_s29  ;;  %v1956_v59 = vadd.f32 %v1955_v54, %v1927_v56 }
 0x1ef   : > { %v2036_v1 = vpack.c.bf16 %v2012_v22, %v1954_v53 }
 0x1f1   : > { %v2344_v62 = vunpack.c.l.b16 %v2036_v1  ;;  %v2992_v0 = vunpack.c.h.b16 %v2036_v1 }
 0x1f2   : > { %v1984_v61 = vpop.f32.mrf.mxu2 }
 0x1f3   : > { %v1985_v55 = vadd.f32 %v1984_v61, %v10853_v40  ;;  %v2013_v60 = vpop.f32.mrf.mxu3 }
 0x1f5   : > { %v2014_v51 = vadd.f32 %v2013_v60, %v1985_v55 }
 0x1f6   : > { %2768 = vmatpush.bf16.xpose.msra.mxu0 %v2750_v30 }
 0x1f7   : > { %v2039_v63 = vpack.c.bf16 %v2014_v51, %v1956_v59 }
 0x1f9   : > { %v2345_v4 = vunpack.c.l.b16 %v2039_v63  ;;  %v2993_v58 = vunpack.c.h.b16 %v2039_v63 }
 0x1fb   : > { %v2349_v6 = vpack.c.b16 %v2345_v4, %v2344_v62  ;;  %v10910_v40 = vpack.c.b16 %v2993_v58, %v2992_v0 }
 0x1fd   : > { %7799 = vmatmul.msk.bf16.gmra.mxu0 %vm2080_vm0, %v10774_v17  ;;  %2370 = vmatpush.bf16.msrb.mxu1 %v2349_v6  ;;  %v10920_v17 = vpack.c.b16 %v2989_v2, %v2988_v8 }
 0x1fe   : > { %2666 = vrot.lane.b32.xlu0 %v2349_v6, %s10107_s29 }
 0x201   : > { %2371 = vmatpush.bf16.msrb.mxu1 %v2348_v49 }
 0x205   : > { %2372 = vmatpush.bf16.msrb.mxu1 %v2347_v31 }
 0x209   : > { %2373 = vmatpush.bf16.msrb.mxu1 %v2346_v41 }
 0x20d   : > { %3018 = vmatpush.bf16.msra.mxu1 %v10910_v40  ;;  %7800 = vmatmul.msk.bf16.gmra.mxu0 %vm2080_vm0, %v10778_v37 }
 0x20f   : > { %v2406_v18 = vpop.permute.xlu1 %2405 }
 0x210   : > { %v2427_v24 = vsel %vm2080_vm0, %v2406_v18, 0 }
 0x211   : > { %3019 = vmatpush.bf16.msra.mxu1 %v10915_v14 }
 0x215   : > { %3020 = vmatpush.bf16.msra.mxu1 %v10920_v17 }
 0x217   : > { %v2404_v11 = vpop.permute.xlu1 %2403 }
 0x218   : > { %v2424_v23 = vsel %vm2080_vm0, %v2404_v11, 0 }
 0x219   : > { %3021 = vmatpush.bf16.msra.mxu1 %v10925_v12 }
 0x21d   : > { %7813 = vmatmul.msk.bf16.vlgmr.msra.gmra.mxu0 %vm2080_vm0, %v10744_v27 }
 0x22d   : > { %7814 = vmatmul.msk.bf16.gmra.mxu0 %vm2080_vm0, %v10760_v52  ;;  %v2398_v52 = vpop.permute.xlu2 %2397 }
 0x22f   : > { %v2410_v37 = vpop.permute.xlu0 %2409  ;;  %v3058_v19 = vpop.permute.xlu1 %3057 }
 0x230   : > { %v2433_v13 = vsel %vm2080_vm0, %v2410_v37, 0  ;;  %v3081_v25 = vsel %vm2080_vm0, %v3058_v19, 0 }
 0x231   : > { %2439 = vmatpush.bf16.xpose.msrb.mxu2 %v2433_v13 }
 0x237   : > { %v2408_v44 = vpop.permute.xlu0 %2407  ;;  %v3054_v5 = vpop.permute.xlu1 %3053 }
 0x238   : > { %v2430_v20 = vsel %vm2080_vm0, %v2408_v44, 0  ;;  %v3075_v48 = vsel %vm2080_vm0, %v3054_v5, 0 }
 0x239   : > { %2440 = vmatpush.bf16.xpose.msrb.mxu2 %v2430_v20 }
 0x23d   : > { %7815 = vmatmul.msk.bf16.gmra.mxu0 %vm2080_vm0, %v10772_v16  ;;  %v3056_v16 = vpop.permute.xlu2 %3055 }
 0x23e   : > { %v3078_v29 = vsel %vm2080_vm0, %v3056_v16, 0 }
 0x23f   : > { %v2400_v27 = vpop.permute.xlu0 %2399  ;;  %v3046_v41 = vpop.permute.xlu1 %3045 }
 0x241   : > { %2441 = vmatpush.bf16.xpose.msrb.mxu2 %v2427_v24 }
 0x245   : > { %v3052_v33 = vpop.permute.xlu2 %3051 }
 0x246   : > { %v3072_v36 = vsel %vm2080_vm0, %v3052_v33, 0 }
 0x247   : > { %v2402_v28 = vpop.permute.xlu0 %2401 }
 0x249   : > { %2442 = vmatpush.bf16.xpose.msrb.mxu2 %v2424_v23 }
 0x24d   : > { %7816 = vmatmul.msk.bf16.gmra.mxu0 %vm2080_vm0, %v10780_v38  ;;  %v3048_v47 = vpop.permute.xlu2 %3047 }
 0x24f   : > { %v3044_v26 = vpop.permute.xlu0 %3043 }
 0x250   : > { %7805 = vmatmul.msk.bf16.vlgmr.msrb.gmra.mxu2 %vm2080_vm0, %v2396_v10 }
 0x251   : > { %3087 = vmatpush.bf16.xpose.msra.mxu2 %v3081_v25 }
 0x255   : > { %v2663_v56 = vpop.permute.xlu2 %2662 }
 0x257   : > { %v3050_v34 = vpop.permute.xlu0 %3049 }
 0x259   : > { %3088 = vmatpush.bf16.xpose.msra.mxu2 %v3078_v29 }
 0x25a   : > { %v2114_v31 = vpop.f32.mrf.mxu0 }
 0x25b   : > { %v10952_v38 = vadd.f32 %v10948_v9, %v2114_v31 }
 0x25d   : > { %v2134_v32 = vsel %vm2080_vm0, %v10952_v38, -inf }
 0x25e   : > { %2135 = vmax.xlane.f32.xlu0 %v2134_v32 }
 0x25f   : > { %v2661_v3 = vpop.permute.xlu0 %2660 }
 0x260   : > { %7806 = vmatmul.msk.bf16.gmra.mxu2 %vm2080_vm0, %v2398_v52  ;;  %v2665_v30 = vpop.permute.xlu1 %2664 }
 0x261   : > { %3089 = vmatpush.bf16.xpose.msra.mxu2 %v3075_v48 }
 0x262   : > { %v2116_v21 = vpop.f32.mrf.mxu0 }
 0x263   : > { %v10959_v57 = vadd.f32 %v10948_v9, %v2116_v21 }
 0x265   : > { %v2137_v39 = vsel %vm2080_vm0, %v10959_v57, -inf }
 0x266   : > { %2138 = vmax.xlane.f32.xlu1 %v2137_v39 }
 0x269   : > { %3090 = vmatpush.bf16.xpose.msra.mxu2 %v3072_v36 }
 0x26a   : > { %v2119_v42 = vpop.f32.mrf.mxu0 }
 0x26b   : > { %v10964_v45 = vadd.f32 %v10948_v9, %v2119_v42 }
 0x26d   : > { %v2140_v46 = vsel %vm2080_vm0, %v10964_v45, -inf }
 0x26e   : > { %2141 = vmax.xlane.f32.xlu1 %v2140_v46 }
 0x270   : > { %7807 = vmatmul.msk.bf16.gmra.mxu2 %vm2080_vm0, %v2400_v27  ;;  %v2667_v49 = vpop.permute.xlu0 %2666 }
 0x271   : > { %2688 = vmatpush.bf16.msrb.mxu3 %v2667_v49 }
 0x272   : > { %v2121_v50 = vpop.f32.mrf.mxu0 }
 0x273   : > { %v10970_v53 = vadd.f32 %v10948_v9, %v2121_v50 }
 0x275   : > { %v2143_v22 = vsel %vm2080_vm0, %v10970_v53, -inf  ;;  %2689 = vmatpush.bf16.msrb.mxu3 %v2665_v30 }
 0x276   : > { %2144 = vmax.xlane.f32.xlu2 %v2143_v22 }
 0x279   : > { %2690 = vmatpush.bf16.msrb.mxu3 %v2663_v56 }
 0x27a   : > { %v2124_v54 = vpop.f32.mrf.mxu0 }
 0x27b   : > { %v10975_v61 = vadd.f32 %v10948_v9, %v2124_v54 }
 0x27d   : > { %v2146_v1 = vsel %vm2080_vm0, %v10975_v61, -inf  ;;  %2691 = vmatpush.bf16.msrb.mxu3 %v2661_v3 }
 0x27e   : > { %2147 = vmax.xlane.f32.xlu1 %v2146_v1 }
 0x280   : > { %7808 = vmatmul.msk.bf16.gmra.mxu2 %vm2080_vm0, %v2402_v28 }
 0x282   : > { %v2126_v55 = vpop.f32.mrf.mxu0 }
 0x283   : > { %v10981_v59 = vadd.f32 %v10948_v9, %v2126_v55 }
 0x285   : > { %v2149_v60 = vsel %vm2080_vm0, %v10981_v59, -inf }
 0x286   : > { %2150 = vmax.xlane.f32.xlu0 %v2149_v60 }
 0x28a   : > { %v2129_v51 = vpop.f32.mrf.mxu0 }
 0x28b   : > { %v10986_v62 = vadd.f32 %v10948_v9, %v2129_v51 }
 0x28d   : > { %v2152_v63 = vsel %vm2080_vm0, %v10986_v62, -inf }
 0x28e   : > { %2153 = vmax.xlane.f32.xlu1 %v2152_v63 }
 0x290   : > { %7821 = vmatmul.msk.bf16.vlgmr.msra.gmra.mxu2 %vm2080_vm0, %v3044_v26 }
 0x292   : > { %v2131_v4 = vpop.f32.mrf.mxu0 }
 0x293   : > { %v10992_v6 = vadd.f32 %v10948_v9, %v2131_v4 }
 0x295   : > { %v2155_v0 = vsel %vm2080_vm0, %v10992_v6, -inf }
 0x296   : > { %2156 = vmax.xlane.f32.xlu2 %v2155_v0 }
 0x29a   : > { %v2770_v58 = vpop.f32.mrf.mxu0 }
 0x29b   : > { %v10997_v35 = vadd.f32 %v10948_v9, %v2770_v58 }
 0x29d   : > { %v2790_v7 = vsel %vm2080_vm0, %v10997_v35, -inf }
 0x29e   : > { %2791 = vmax.xlane.f32.xlu2 %v2790_v7 }
 0x2a0   : > { %7822 = vmatmul.msk.bf16.gmra.mxu2 %vm2080_vm0, %v3046_v41 }
 0x2a2   : > { %v2772_v8 = vpop.f32.mrf.mxu0 }
 0x2a3   : > { %v11003_v2 = vadd.f32 %v10948_v9, %v2772_v8 }
 0x2a5   : > { %v2793_v43 = vsel %vm2080_vm0, %v11003_v2, -inf }
 0x2a6   : > { %2794 = vmax.xlane.f32.xlu1 %v2793_v43 }
 0x2aa   : > { %v2775_v20 = vpop.f32.mrf.mxu0 }
 0x2ab   : > { %v11041_v21 = vadd.f32 %v10948_v9, %v2775_v20 }
 0x2ad   : > { %v2796_v41 = vsel %vm2080_vm0, %v11041_v21, -inf }
 0x2b0   : > { %7823 = vmatmul.msk.bf16.gmra.mxu2 %vm2080_vm0, %v3048_v47 }
 0x2b2   : > { %v2777_v16 = vpop.f32.mrf.mxu0 }
 0x2b3   : > { %v11027_v5 = vadd.f32 %v10948_v9, %v2777_v16 }
 0x2b5   : > { %v2799_v36 = vsel %vm2080_vm0, %v11027_v5, -inf }
 0x2c0   : > { %7824 = vmatmul.msk.bf16.gmra.mxu2 %vm2080_vm0, %v3050_v34 }
 0x2d1   : > { %v2136_v15 = vpop.xlane.xlu0 %2135 }
 0x2d2   : > { %v2158_v37 = vsub.f32 %v10952_v38, %v2136_v15 }
 0x2d3   : > { %v2444_v13 = vpop.f32.mrf.mxu2 }
 0x2d4   : > { %v2166_v18 = vmul.f32 1.442695, %v2158_v37  ;;  %v11011_v44 = vadd.f32 %v10948_v9, %v2444_v13 }
 0x2d6   : > { %9565 = vpow2.f32 %v2166_v18  ;;  %v2464_v10 = vsel %vm2080_vm0, %v11011_v44, -inf }
 0x2d7   : > { %2465 = vmax.xlane.f32.xlu1 %v2464_v10 }
 0x2d9   : > { %v2139_v11 = vpop.xlane.xlu1 %2138 }
 0x2da   : > { %v2159_v24 = vsub.f32 %v10959_v57, %v2139_v11 }
 0x2db   : > { %v2446_v27 = vpop.f32.mrf.mxu2 }
 0x2dc   : > { %v11016_v52 = vpop.eup %9565  ;;  %v2168_v19 = vmul.f32 1.442695, %v2159_v24  ;;  %v11019_v23 = vadd.f32 %v10948_v9, %v2446_v27 }
 0x2dd   : > { %v2182_v25 = vsel %vm2080_vm0, %v11016_v52, 0.0 }
 0x2de   : > { %9567 = vpow2.f32 %v2168_v19  ;;  %v2467_v28 = vsel %vm2080_vm0, %v11019_v23, -inf }
 0x2df   : > { %2468 = vmax.xlane.f32.xlu2 %v2467_v28  ;;  %2183 = vadd.xlane.f32.xlu1 %v2182_v25 }
 0x2e1   : > { %v2142_v29 = vpop.xlane.xlu1 %2141 }
 0x2e2   : > { %v2160_v26 = vsub.f32 %v10964_v45, %v2142_v29 }
 0x2e3   : > { %v2449_v48 = vpop.f32.mrf.mxu2 }
 0x2e4   : > { %v11029_v31 = vpop.eup %9567  ;;  %v2170_v38 = vmul.f32 1.442695, %v2160_v26  ;;  %v11032_v32 = vadd.f32 %v10948_v9, %v2449_v48 }
 0x2e5   : > { %v2185_v33 = vsel %vm2080_vm0, %v11029_v31, 0.0 }
 0x2e6   : > { %9569 = vpow2.f32 %v2170_v38  ;;  %v2470_v34 = vsel %vm2080_vm0, %v11032_v32, -inf }
 0x2e7   : > { %2186 = vadd.xlane.f32.xlu2 %v2185_v33  ;;  %2471 = vmax.xlane.f32.xlu0 %v2470_v34 }
 0x2e8   : > { %2800 = vmax.xlane.f32.xlu1 %v2799_v36 }
 0x2e9   : > { %v2145_v60 = vpop.xlane.xlu2 %2144 }
 0x2ea   : > { %v2161_v51 = vsub.f32 %v10970_v53, %v2145_v60 }
 0x2eb   : > { %v2451_v57 = vpop.f32.mrf.mxu2 }
 0x2ec   : > { %v11043_v39 = vpop.eup %9569  ;;  %v11050_v42 = vadd.f32 %v10948_v9, %v2451_v57  ;;  %v2172_v0 = vmul.f32 1.442695, %v2161_v51 }
 0x2ed   : > { %v2188_v3 = vsel %vm2080_vm0, %v11043_v39, 0.0 }
 0x2ee   : > { %v2473_v47 = vsel %vm2080_vm0, %v11050_v42, -inf  ;;  %9571 = vpow2.f32 %v2172_v0 }
 0x2ef   : > { %2797 = vmax.xlane.f32.xlu2 %v2796_v41 }
 0x2f0   : > { %2189 = vadd.xlane.f32.xlu1 %v2188_v3 }
 0x2f1   : > { %v11099_v24 = vpop.xlane.xlu1 %2147 }
 0x2f3   : > { %v2454_v45 = vpop.f32.mrf.mxu2 }
 0x2f4   : > { %v11053_v46 = vadd.f32 %v10948_v9, %v2454_v45  ;;  %v11077_v7 = vpop.eup %9571 }
 0x2f5   : > { %v2191_v53 = vsel %vm2080_vm0, %v11077_v7, 0.0 }
 0x2f6   : > { %v2476_v49 = vsel %vm2080_vm0, %v11053_v46, -inf }
 0x2f7   : > { %2474 = vmax.xlane.f32.xlu2 %v2473_v47 }
 0x2f8   : > { %2477 = vmax.xlane.f32.xlu1 %v2476_v49 }
 0x2f9   : > { %v2151_v16 = vpop.xlane.xlu0 %2150 }
 0x2fa   : > { %v2163_v38 = vsub.f32 %v10981_v59, %v2151_v16 }
 0x2fb   : > { %v2456_v50 = vpop.f32.mrf.mxu2  ;;  %3314 = vrot.lane.b32.xlu0 %v10910_v40, %s10107_s29 }
 0x2fc   : > { %v11062_v30 = vadd.f32 %v10948_v9, %v2456_v50  ;;  %v2176_v36 = vmul.f32 1.442695, %v2163_v38 }
 0x2fe   : > { %v2479_v22 = vsel %vm2080_vm0, %v11062_v30, -inf  ;;  %9573 = vpow2.f32 %v2176_v36 }
 0x2ff   : > { %2480 = vmax.xlane.f32.xlu2 %v2479_v22 }
 0x301   : > { %v11108_v29 = vpop.xlane.xlu1 %2153 }
 0x303   : > { %v2459_v56 = vpop.f32.mrf.mxu2 }
 0x304   : > { %v11067_v54 = vadd.f32 %v10948_v9, %v2459_v56  ;;  %v11127_v49 = vpop.eup %9573 }
 0x305   : > { %v2197_v60 = vsel %vm2080_vm0, %v11127_v49, 0.0 }
 0x306   : > { %v2482_v1 = vsel %vm2080_vm0, %v11067_v54, -inf }
 0x307   : > { %2483 = vmax.xlane.f32.xlu2 %v2482_v1 }
 0x309   : > { %v11116_v34 = vpop.xlane.xlu2 %2156 }
 0x30b   : > { %v2461_v55 = vpop.f32.mrf.mxu2 }
 0x30c   : > { %v11087_v37 = vadd.f32 %v10948_v9, %v2461_v55 }
 0x30e   : > { %v2485_v20 = vsel %vm2080_vm0, %v11087_v37, -inf }
 0x311   : > { %v11125_v47 = vpop.xlane.xlu2 %2791 }
 0x313   : > { %v3092_v40 = vpop.f32.mrf.mxu2 }
 0x314   : > { %v11073_v63 = vadd.f32 %v10948_v9, %v3092_v40 }
 0x316   : > { %v3112_v4 = vsel %vm2080_vm0, %v11073_v63, -inf }
 0x317   : > { %3113 = vmax.xlane.f32.xlu2 %v3112_v4 }
 0x319   : > { %v11118_v57 = vpop.xlane.xlu1 %2794 }
 0x31b   : > { %v3094_v58 = vpop.f32.mrf.mxu2 }
 0x31c   : > { %v11097_v11 = vadd.f32 %v10948_v9, %v3094_v58 }
 0x31e   : > { %v3115_v25 = vsel %vm2080_vm0, %v11097_v11, -inf }
 0x323   : > { %v3097_v8 = vpop.f32.mrf.mxu2 }
 0x324   : > { %v11080_v43 = vadd.f32 %v10948_v9, %v3097_v8 }
 0x325   : > { %2192 = vadd.xlane.f32.xlu0 %v2191_v53 }
 0x326   : > { %v3118_v15 = vsel %vm2080_vm0, %v11080_v43, -inf }
 0x327   : > { %3119 = vmax.xlane.f32.xlu1 %v3118_v15 }
 0x32b   : > { %v3099_v13 = vpop.f32.mrf.mxu2 }
 0x32c   : > { %v11090_v18 = vadd.f32 %v10948_v9, %v3099_v13 }
 0x32d   : > { %2486 = vmax.xlane.f32.xlu0 %v2485_v20 }
 0x32e   : > { %v3121_v10 = vsel %vm2080_vm0, %v11090_v18, -inf }
 0x32f   : > { %3122 = vmax.xlane.f32.xlu2 %v3121_v10 }
 0x333   : > { %v3102_v27 = vpop.f32.mrf.mxu2 }
 0x334   : > { %v11102_v19 = vadd.f32 %v10948_v9, %v3102_v27 }
 0x335   : > { %3116 = vmax.xlane.f32.xlu0 %v3115_v25 }
 0x336   : > { %v3124_v28 = vsel %vm2080_vm0, %v11102_v19, -inf }
 0x337   : > { %3125 = vmax.xlane.f32.xlu1 %v3124_v28 }
 0x33b   : > { %v3104_v26 = vpop.f32.mrf.mxu2 }
 0x33c   : > { %v11111_v48 = vadd.f32 %v10948_v9, %v3104_v26 }
 0x33e   : > { %v3127_v33 = vsel %vm2080_vm0, %v11111_v48, -inf }
 0x33f   : > { %3128 = vmax.xlane.f32.xlu2 %v3127_v33 }
 0x343   : > { %v3107_v3 = vpop.f32.mrf.mxu2 }
 0x344   : > { %v11121_v41 = vadd.f32 %v10948_v9, %v3107_v3 }
 0x346   : > { %v3130_v45 = vsel %vm2080_vm0, %v11121_v41, -inf }
 0x347   : > { %3131 = vmax.xlane.f32.xlu0 %v3130_v45 }
 0x34a   : > { %v2466_v59 = vpop.xlane.xlu1 %2465 }
 0x34b   : > { %v2488_v50 = vsub.f32 %v11011_v44, %v2466_v59  ;;  %v3109_v22 = vpop.f32.mrf.mxu2 }
 0x34c   : > { %v11131_v56 = vadd.f32 %v10948_v9, %v3109_v22 }
 0x34d   : > { %v2496_v1 = vmul.f32 1.442695, %v2488_v50 }
 0x34e   : > { %v3133_v55 = vsel %vm2080_vm0, %v11131_v56, -inf }
 0x34f   : > { %9575 = vpow2.f32 %v2496_v1  ;;  %3134 = vmax.xlane.f32.xlu2 %v3133_v55  ;;  %2198 = vadd.xlane.f32.xlu0 %v2197_v60 }
 0x352   : > { %v2469_v51 = vpop.xlane.xlu2 %2468  ;;  %v2184_v40 = vpop.xlane.xlu1 %2183 }
 0x353   : > { %v2489_v4 = vsub.f32 %v11019_v23, %v2469_v51  ;;  %9577 = vrcp.f32 %v2184_v40  ;;  %v2217_v3 = vand.u32 2147483648, %v2184_v40  ;;  %vm2211_vm2 = vweird.f32 %v2184_v40 }
 0x355   : > { %v11138_v44 = vpop.eup %9575  ;;  %v2498_v0 = vmul.f32 1.442695, %v2489_v4  ;;  %v2218_v51 = vor.u32 1.1754944e-38, %v2217_v3 }
 0x356   : > { %v2512_v58 = vsel %vm2080_vm0, %v11138_v44, 0.0 }
 0x357   : > { %9579 = vpow2.f32 %v2498_v0  ;;  %2513 = vadd.xlane.f32.xlu1 %v2512_v58 }
 0x359   : > { %v9578_v8 = vpop.eup %9577 }
 0x35a   : > { %v2207_v53 = vmul.f32 %v9578_v8, %v2184_v40  ;;  %v2187_v15 = vpop.xlane.xlu2 %2186  ;;  %v2472_v13 = vpop.xlane.xlu0 %2471  ;;  %vm2212_vm1 = vweird.f32 %v9578_v8 }
 0x35b   : > { %9581 = vrcp.f32 %v2187_v15  ;;  %v11142_v20 = vpop.xlane.xlu1 %2800  ;;  %v2490_v27 = vsub.f32 %v11032_v32, %v2472_v13  ;;  %v2215_v32 = vand.u32 2147483647, %v2184_v40  ;;  %vm2213_vm3 = vmor %vm2211_vm2, %vm2212_vm1  ;;  %v2232_v50 = vand.u32 2147483648, %v2187_v15 }
 0x35c   : > { %v2208_v10 = vsub.f32 1.0, %v2207_v53  ;;  %v2230_v55 = vand.u32 2147483647, %v2187_v15  ;;  %vm2226_vm6 = vweird.f32 %v2187_v15 }
 0x35d   : > { %v11145_v23 = vpop.eup %9579  ;;  %v2500_v28 = vmul.f32 1.442695, %v2490_v27  ;;  %vm2216_vm5 = vcmp.eq.f32.partialorder %v2215_v32, 8.507059e+37  ;;  %v2233_v53 = vor.u32 1.1754944e-38, %v2232_v50 }
 0x35e   : > { %v2209_v25 = vmul.f32 %v9578_v8, %v2208_v10  ;;  %v2515_v16 = vsel %vm2080_vm0, %v11145_v23, 0.0  ;;  %vm2231_vm8 = vcmp.eq.f32.partialorder %v2230_v55, 8.507059e+37 }
 0x35f   : > { %2516 = vadd.xlane.f32.xlu2 %v2515_v16  ;;  %9583 = vpow2.f32 %v2500_v28 }
 0x360   : > { %v2210_v38 = vadd.f32 %v9578_v8, %v2209_v25 }
 0x361   : > { %v9582_v26 = vpop.eup %9581 }
 0x362   : > { %v2222_v33 = vmul.f32 %v9582_v26, %v2187_v15  ;;  %v11149_v36 = vpop.xlane.xlu2 %2797  ;;  %v2214_v22 = vsel %vm2213_vm3, %v9578_v8, %v2210_v38  ;;  %vm2227_vm4 = vweird.f32 %v9582_v26 }
 0x363   : > { %v11151_v45 = vpop.xlane.xlu1 %2189  ;;  %v2219_v58 = vsel %vm2216_vm5, %v2218_v51, %v2214_v22  ;;  %vm2228_vm7 = vmor %vm2226_vm6, %vm2227_vm4 }
 0x364   : > { %v2223_v59 = vsub.f32 1.0, %v2222_v33  ;;  %v2220_v25 = vmul.f32 %v11016_v52, %v2219_v58  ;;  %v2162_v33 = vsub.f32 %v10975_v61, %v11099_v24  ;;  %vm2241_vm10 = vweird.f32 %v11151_v45 }
 0x365   : > { %v11153_v60 = vpop.eup %9583 }
 0x366   : > { %v2224_v1 = vmul.f32 %v9582_v26, %v2223_v59  ;;  %v2518_v0 = vsel %vm2080_vm0, %v11153_v60, 0.0 }
 0x367   : > { %2519 = vadd.xlane.f32.xlu1 %v2518_v0 }
 0x368   : > { %v2225_v4 = vadd.f32 %v9582_v26, %v2224_v1 }
 0x36a   : > { %v2229_v40 = vsel %vm2228_vm7, %v9582_v26, %v2225_v4  ;;  %v2475_v13 = vpop.xlane.xlu2 %2474 }
 0x36b   : > { %v2234_v8 = vsel %vm2231_vm8, %v2233_v53, %v2229_v40  ;;  %v2491_v10 = vsub.f32 %v11050_v42, %v2475_v13  ;;  %v2478_v27 = vpop.xlane.xlu1 %2477  ;;  %v2174_v42 = vmul.f32 1.442695, %v2162_v33 }
 0x36c   : > { %v2235_v28 = vmul.f32 %v11029_v31, %v2234_v8  ;;  %v2492_v15 = vsub.f32 %v11053_v46, %v2478_v27 }
 0x36d   : > { %v2502_v16 = vmul.f32 1.442695, %v2491_v10  ;;  %v3315_v38 = vpop.permute.xlu0 %3314 }
 0x36e   : > { %v2326_v3 = vpack.c.bf16 %v2235_v28, %v2220_v25  ;;  %v2504_v32 = vmul.f32 1.442695, %v2492_v15  ;;  %3336 = vmatpush.bf16.msra.mxu3 %v3315_v38  ;;  %v2247_v15 = vand.u32 2147483648, %v11151_v45 }
 0x36f   : > { %9585 = vpow2.f32 %v2502_v16 }
 0x370   : > { %9587 = vpow2.f32 %v2504_v32  ;;  %7801 = vmatmul.msk.bf16.vlgmr.msrb.gmra.mxu1 %vm2080_vm0, %v2326_v3 }
 0x371   : > { %9589 = vpow2.f32 %v2174_v42 }
 0x372   : > { %v2481_v26 = vpop.xlane.xlu2 %2480 }
 0x373   : > { %v2493_v52 = vsub.f32 %v11062_v30, %v2481_v26 }
 0x375   : > { %v11165_v59 = vpop.eup %9585  ;;  %v2506_v31 = vmul.f32 1.442695, %v2493_v52  ;;  %v2248_v52 = vor.u32 1.1754944e-38, %v2247_v15 }
 0x376   : > { %v11167_v46 = vpop.eup %9587  ;;  %v2521_v61 = vsel %vm2080_vm0, %v11165_v59, 0.0 }
 0x377   : > { %9591 = vpow2.f32 %v2506_v31  ;;  %2522 = vadd.xlane.f32.xlu2 %v2521_v61  ;;  %v2524_v24 = vsel %vm2080_vm0, %v11167_v46, 0.0  ;;  %v11174_v1 = vpop.eup %9589 }
 0x378   : > { %2525 = vadd.xlane.f32.xlu1 %v2524_v24  ;;  %v2194_v4 = vsel %vm2080_vm0, %v11174_v1, 0.0 }
 0x37a   : > { %v2484_v50 = vpop.xlane.xlu2 %2483 }
 0x37b   : > { %v2494_v22 = vsub.f32 %v11067_v54, %v2484_v50 }
 0x37d   : > { %v11176_v30 = vpop.eup %9591  ;;  %v2508_v55 = vmul.f32 1.442695, %v2494_v22 }
 0x37e   : > { %v2527_v51 = vsel %vm2080_vm0, %v11176_v30, 0.0 }
 0x37f   : > { %9593 = vpow2.f32 %v2508_v55  ;;  %2528 = vadd.xlane.f32.xlu2 %v2527_v51 }
 0x380   : > { %2195 = vadd.xlane.f32.xlu1 %v2194_v4  ;;  %9595 = vrcp.f32 %v11151_v45 }
 0x385   : > { %v11182_v0 = vpop.eup %9593 }
 0x386   : > { %v2530_v58 = vsel %vm2080_vm0, %v11182_v0, 0.0  ;;  %v9596_v54 = vpop.eup %9595 }
 0x387   : > { %v2237_v53 = vmul.f32 %v9596_v54, %v11151_v45  ;;  %vm2242_vm9 = vweird.f32 %v9596_v54 }
 0x388   : > { %2531 = vadd.xlane.f32.xlu1 %v2530_v58  ;;  %vm2243_vm11 = vmor %vm2241_vm10, %vm2242_vm9 }
 0x389   : > { %v2238_v40 = vsub.f32 1.0, %v2237_v53  ;;  %v2780_v53 = vpop.f32.mrf.mxu0 }
 0x38a   : > { %v3114_v4 = vpop.xlane.xlu2 %3113 }
 0x38b   : > { %v2239_v8 = vmul.f32 %v9596_v54, %v2238_v40  ;;  %v3136_v58 = vsub.f32 %v11073_v63, %v3114_v4  ;;  %v2165_v63 = vsub.f32 %v10992_v6, %v11116_v34 }
 0x38d   : > { %v2240_v27 = vadd.f32 %v9596_v54, %v2239_v8 }
 0x38f   : > { %v2244_v32 = vsel %vm2243_vm11, %v9596_v54, %v2240_v27  ;;  %v2164_v27 = vsub.f32 %v10986_v62, %v11108_v29  ;;  %v2180_v62 = vmul.f32 1.442695, %v2165_v63  ;;  %v2814_v63 = vsub.f32 %v10997_v35, %v11125_v47 }
 0x397   : > { %3312 = vrot.lane.b32.xlu2 %v10915_v14, %s10107_s29  ;;  %v2245_v14 = vand.u32 2147483647, %v11151_v45 }
 0x398   : > { %v2193_v13 = vpop.xlane.xlu0 %2192 }
 0x399   : > { %9597 = vrcp.f32 %v2193_v13  ;;  %v2262_v33 = vand.u32 2147483648, %v2193_v13  ;;  %v2260_v26 = vand.u32 2147483647, %v2193_v13  ;;  %vm2246_vm13 = vcmp.eq.f32.partialorder %v2245_v14, 8.507059e+37  ;;  %v11218_v14 = vpop.f32.mrf.mxu0 }
 0x39a   : > { %vm2256_vm14 = vweird.f32 %v2193_v13 }
 0x39b   : > { %vm2261_vm1 = vcmp.eq.f32.partialorder %v2260_v26, 8.507059e+37 }
 0x39f   : > { %v9598_v10 = vpop.eup %9597 }
 0x3a0   : > { %v2252_v25 = vmul.f32 %v9598_v10, %v2193_v13  ;;  %v2487_v28 = vpop.xlane.xlu0 %2486  ;;  %vm2257_vm12 = vweird.f32 %v9598_v10  ;;  %v3144_v13 = vmul.f32 1.442695, %v3136_v58 }
 0x3a1   : > { %3310 = vrot.lane.b32.xlu1 %v10920_v17, %s10107_s29  ;;  %v2495_v16 = vsub.f32 %v11087_v37, %v2487_v28  ;;  %vm2258_vm15 = vmor %vm2256_vm14, %vm2257_vm12  ;;  %v2263_v17 = vor.u32 1.1754944e-38, %v2262_v33  ;;  %v2249_v37 = vsel %vm2246_vm13, %v2248_v52, %v2244_v32  ;;  %v2785_v26 = vpop.f32.mrf.mxu0 }
 0x3a2   : > { %v2253_v38 = vsub.f32 1.0, %v2252_v25  ;;  %v2250_v45 = vmul.f32 %v11043_v39, %v2249_v37  ;;  %v3120_v39 = vpop.xlane.xlu1 %3119  ;;  %v3123_v8 = vpop.xlane.xlu2 %3122 }
 0x3a3   : > { %v2510_v3 = vmul.f32 1.442695, %v2495_v16  ;;  %v3138_v29 = vsub.f32 %v11080_v43, %v3120_v39 }
 0x3a4   : > { %v2254_v42 = vmul.f32 %v9598_v10, %v2253_v38 }
 0x3a5   : > { %9599 = vpow2.f32 %v2510_v3  ;;  %v3148_v34 = vmul.f32 1.442695, %v3138_v29 }
 0x3a6   : > { %v2255_v31 = vadd.f32 %v9598_v10, %v2254_v42  ;;  %9601 = vpow2.f32 %v3144_v13 }
 0x3a8   : > { %v2259_v61 = vsel %vm2258_vm15, %v9598_v10, %v2255_v31  ;;  %v3117_v54 = vpop.xlane.xlu0 %3116 }
 0x3a9   : > { %v2264_v24 = vsel %vm2261_vm1, %v2263_v17, %v2259_v61  ;;  %v3137_v40 = vsub.f32 %v11097_v11, %v3117_v54  ;;  %v2178_v11 = vmul.f32 1.442695, %v2164_v27  ;;  %v2787_v54 = vpop.f32.mrf.mxu0 }
 0x3aa   : > { %v2265_v50 = vmul.f32 %v11077_v7, %v2264_v24  ;;  %v11206_v7 = vadd.f32 %v10948_v9, %v2780_v53  ;;  %v3126_v28 = vpop.xlane.xlu1 %3125  ;;  %v11254_v27 = vadd.f32 %v10948_v9, %v2787_v54  ;;  %v11288_v54 = vadd.f32 %v10948_v9, %v11218_v14 }
 0x3ab   : > { %v11198_v22 = vpop.eup %9599  ;;  %v3146_v10 = vmul.f32 1.442695, %v3137_v40  ;;  %v2817_v14 = vsub.f32 %v11027_v5, %v11142_v20 }
 0x3ac   : > { %v2533_v55 = vsel %vm2080_vm0, %v11198_v22, 0.0  ;;  %v2327_v51 = vpack.c.bf16 %v2265_v50, %v2250_v45  ;;  %v2802_v25 = vsel %vm2080_vm0, %v11206_v7, -inf  ;;  %v11216_v16 = vpop.eup %9601  ;;  %v3140_v50 = vsub.f32 %v11102_v19, %v3126_v28 }
 0x3ad   : > { %2534 = vadd.xlane.f32.xlu0 %v2533_v55  ;;  %9603 = vpow2.f32 %v3146_v10  ;;  %v3160_v6 = vsel %vm2080_vm0, %v11216_v16, 0.0  ;;  %v11251_v10 = vadd.f32 %v10948_v9, %v2785_v26 }
 0x3ae   : > { %7802 = vmatmul.msk.bf16.gmra.mxu1 %vm2080_vm0, %v2327_v51  ;;  %9605 = vpow2.f32 %v2178_v11  ;;  %v3152_v40 = vmul.f32 1.442695, %v3140_v50 }
 0x3af   : > { %9607 = vpow2.f32 %v2180_v62  ;;  %v2808_v47 = vsel %vm2080_vm0, %v11251_v10, -inf }
 0x3b2   : > { %v3129_v15 = vpop.xlane.xlu2 %3128 }
 0x3b3   : > { %v11221_v38 = vpop.eup %9603  ;;  %v3141_v13 = vsub.f32 %v11111_v48, %v3129_v15 }
 0x3b4   : > { %v3163_v32 = vsel %vm2080_vm0, %v11221_v38, 0.0  ;;  %v11230_v42 = vpop.eup %9605 }
 0x3b5   : > { %v11232_v52 = vpop.eup %9607  ;;  %v2200_v31 = vsel %vm2080_vm0, %v11230_v42, 0.0  ;;  %v3154_v15 = vmul.f32 1.442695, %v3141_v13 }
 0x3b6   : > { %v2203_v61 = vsel %vm2080_vm0, %v11232_v52, 0.0 }
 0x3ba   : > { %v11243_v4 = vpop.xlane.xlu0 %3131 }
 0x3c0   : > { %2803 = vmax.xlane.f32.xlu2 %v2802_v25 }
 0x3c1   : > { %3308 = vrot.lane.b32.xlu0 %v10925_v12, %s10107_s29  ;;  %v3139_v12 = vsub.f32 %v11090_v18, %v3123_v8 }
 0x3c2   : > { %v11226_v33 = vpop.xlane.xlu2 %3134  ;;  %v11273_v26 = vpop.xlane.xlu0 %2198 }
 0x3c3   : > { %v3150_v43 = vmul.f32 1.442695, %v3139_v12 }
 0x3c8   : > { %3161 = vadd.xlane.f32.xlu2 %v3160_v6 }
 0x3ca   : > { %v2514_v3 = vpop.xlane.xlu1 %2513 }
 0x3cb   : > { %9609 = vrcp.f32 %v2514_v3  ;;  %3164 = vadd.xlane.f32.xlu1 %v3163_v32  ;;  %v2547_v25 = vand.u32 2147483648, %v2514_v3  ;;  %vm2541_vm3 = vweird.f32 %v2514_v3  ;;  %v2545_v11 = vand.u32 2147483647, %v2514_v3 }
 0x3cc   : > { %9611 = vpow2.f32 %v3148_v34 }
 0x3cd   : > { %9613 = vpow2.f32 %v3150_v43  ;;  %v2548_v35 = vor.u32 1.1754944e-38, %v2547_v25  ;;  %vm2546_vm6 = vcmp.eq.f32.partialorder %v2545_v11, 8.507059e+37  ;;  %v2816_v43 = vsub.f32 %v11041_v21, %v11149_v36 }
 0x3d0   : > { %2201 = vadd.xlane.f32.xlu2 %v2200_v31 }
 0x3d1   : > { %v9610_v18 = vpop.eup %9609 }
 0x3d2   : > { %v2537_v17 = vmul.f32 %v9610_v18, %v2514_v3  ;;  %v2517_v37 = vpop.xlane.xlu2 %2516  ;;  %v11238_v24 = vpop.eup %9611  ;;  %vm2542_vm2 = vweird.f32 %v9610_v18  ;;  %v2815_v3 = vsub.f32 %v11003_v2, %v11118_v57 }
 0x3d3   : > { %9615 = vrcp.f32 %v2517_v37  ;;  %2204 = vadd.xlane.f32.xlu1 %v2203_v61  ;;  %v11241_v51 = vpop.eup %9613  ;;  %v3166_v58 = vsel %vm2080_vm0, %v11238_v24, 0.0  ;;  %vm11260_vm4 = vmor %vm2541_vm3, %vm2542_vm2  ;;  %v2560_v29 = vand.u32 2147483647, %v2517_v37  ;;  %v2562_v6 = vand.u32 2147483648, %v2517_v37 }
 0x3d4   : > { %v2538_v45 = vsub.f32 1.0, %v2537_v17  ;;  %v3169_v19 = vsel %vm2080_vm0, %v11241_v51, 0.0  ;;  %9617 = vpow2.f32 %v3152_v40  ;;  %vm2556_vm7 = vweird.f32 %v2517_v37 }
 0x3d5   : > { %v2822_v17 = vmul.f32 1.442695, %v2814_v63  ;;  %vm2561_vm9 = vcmp.eq.f32.partialorder %v2560_v29, 8.507059e+37  ;;  %v2824_v50 = vmul.f32 1.442695, %v2815_v3 }
 0x3d6   : > { %v2539_v55 = vmul.f32 %v9610_v18, %v2538_v45  ;;  %v2811_v45 = vsel %vm2080_vm0, %v11254_v27, -inf  ;;  %v2828_v63 = vmul.f32 1.442695, %v2817_v14 }
 0x3d8   : > { %3167 = vadd.xlane.f32.xlu2 %v3166_v58  ;;  %v2540_v39 = vadd.f32 %v9610_v18, %v2539_v55  ;;  %v2826_v55 = vmul.f32 1.442695, %v2816_v43  ;;  %v3142_v58 = vsub.f32 %v11121_v41, %v11243_v4 }
 0x3d9   : > { %v9616_v53 = vpop.eup %9615 }
 0x3da   : > { %v2552_v8 = vmul.f32 %v9616_v53, %v2517_v37  ;;  %v11258_v28 = vpop.xlane.xlu1 %2519  ;;  %v2544_v12 = vsel %vm11260_vm4, %v9610_v18, %v2540_v39  ;;  %vm2557_vm5 = vweird.f32 %v9616_v53  ;;  %v2563_v18 = vor.u32 1.1754944e-38, %v2562_v6  ;;  %v11277_v2 = vpop.eup %9617 }
 0x3db   : > { %3170 = vadd.xlane.f32.xlu1 %v3169_v19  ;;  %9619 = vrcp.f32 %v11258_v28  ;;  %v2549_v31 = vsel %vm2546_vm6, %v2548_v35, %v2544_v12  ;;  %vm2558_vm8 = vmor %vm2556_vm7, %vm2557_vm5  ;;  %v3156_v9 = vmul.f32 1.442695, %v3142_v58  ;;  %vm2571_vm11 = vweird.f32 %v11258_v28 }
 0x3dc   : > { %v2553_v48 = vsub.f32 1.0, %v2552_v8  ;;  %9621 = vpow2.f32 %v3154_v15  ;;  %v2550_v21 = vmul.f32 %v11138_v44, %v2549_v31  ;;  %v3172_v44 = vsel %vm2080_vm0, %v11277_v2, 0.0 }
 0x3dd   : > { %9623 = vrcp.f32 %v11273_v26  ;;  %v2805_v8 = vsel %vm2080_vm0, %v11288_v54, -inf  ;;  %v2577_v31 = vand.u32 2147483648, %v11258_v28  ;;  %v2292_v58 = vand.u32 2147483648, %v11273_v26 }
 0x3de   : > { %v2554_v34 = vmul.f32 %v9616_v53, %v2553_v48  ;;  %9625 = vpow2.f32 %v2822_v17  ;;  %vm2286_vm4 = vweird.f32 %v11273_v26 }
 0x3df   : > { %9627 = vpow2.f32 %v2824_v50  ;;  %v2290_v50 = vand.u32 2147483647, %v11273_v26 }
 0x3e0   : > { %v2555_v32 = vadd.f32 %v9616_v53, %v2554_v34  ;;  %2809 = vmax.xlane.f32.xlu2 %v2808_v47  ;;  %9629 = vpow2.f32 %v2826_v55 }
 0x3e1   : > { %v11279_v37 = vpop.eup %9619  ;;  %vm11384_vm6 = vcmp.eq.f32.partialorder %v2290_v50, 8.507059e+37 }
 0x3e2   : > { %v2559_v61 = vsel %vm2558_vm8, %v9616_v53, %v2555_v32  ;;  %v11290_v40 = vpop.eup %9621  ;;  %v2567_v13 = vmul.f32 %v11279_v37, %v11258_v28  ;;  %vm2572_vm10 = vweird.f32 %v11279_v37 }
 0x3e3   : > { %v2564_v57 = vsel %vm2561_vm9, %v2563_v18, %v2559_v61  ;;  %2812 = vmax.xlane.f32.xlu1 %v2811_v45  ;;  %v11299_v41 = vpop.eup %9623  ;;  %v3175_v39 = vsel %vm2080_vm0, %v11290_v40, 0.0  ;;  %v2575_v61 = vand.u32 2147483647, %v11258_v28  ;;  %vm11351_vm12 = vmor %vm2571_vm11, %vm2572_vm10 }
 0x3e4   : > { %v2565_v36 = vmul.f32 %v11145_v23, %v2564_v57  ;;  %v3143_v23 = vsub.f32 %v11131_v56, %v11226_v33  ;;  %v2568_v19 = vsub.f32 1.0, %v2567_v13  ;;  %v11312_v33 = vpop.eup %9625  ;;  %v2282_v5 = vmul.f32 %v11299_v41, %v11273_v26 }
 0x3e5   : > { %v11316_v20 = vpop.eup %9627  ;;  %v2838_v15 = vsel %vm2080_vm0, %v11312_v33, 0.0  ;;  %vm2287_vm14 = vweird.f32 %v11299_v41  ;;  %vm2576_vm1 = vcmp.eq.f32.partialorder %v2575_v61, 8.507059e+37 }
 0x3e6   : > { %v2656_v53 = vpack.c.bf16 %v2565_v36, %v2550_v21  ;;  %v3158_v25 = vmul.f32 1.442695, %v3143_v23  ;;  %v11319_v11 = vpop.eup %9629  ;;  %v2569_v48 = vmul.f32 %v11279_v37, %v2568_v19  ;;  %v2283_v29 = vsub.f32 1.0, %v2282_v5  ;;  %vm11380_vm5 = vmor %vm2286_vm4, %vm2287_vm14 }
 0x3e7   : > { %v2841_v34 = vsel %vm2080_vm0, %v11316_v20, 0.0  ;;  %v2844_v35 = vsel %vm2080_vm0, %v11319_v11, 0.0  ;;  %v2578_v23 = vor.u32 1.1754944e-38, %v2577_v31 }
 0x3e8   : > { %3173 = vadd.xlane.f32.xlu2 %v3172_v44  ;;  %7809 = vmatmul.msk.bf16.vlgmr.msrb.gmra.mxu3 %vm2080_vm0, %v2656_v53  ;;  %v2570_v3 = vadd.f32 %v11279_v37, %v2569_v48  ;;  %v2284_v17 = vmul.f32 %v11299_v41, %v2283_v29 }
 0x3ea   : > { %v11303_v4 = vpop.xlane.xlu2 %2522  ;;  %v2574_v28 = vsel %vm11351_vm12, %v11279_v37, %v2570_v3 }
 0x3eb   : > { %9631 = vrcp.f32 %v11303_v4  ;;  %v11310_v56 = vpop.xlane.xlu1 %2525  ;;  %3176 = vadd.xlane.f32.xlu1 %v3175_v39  ;;  %2806 = vmax.xlane.f32.xlu0 %v2805_v8  ;;  %v2592_v45 = vand.u32 2147483648, %v11303_v4  ;;  %v2590_v55 = vand.u32 2147483647, %v11303_v4  ;;  %vm2586_vm15 = vweird.f32 %v11303_v4 }
 0x3ec   : > { %9633 = vpow2.f32 %v3156_v9  ;;  %v2285_v39 = vadd.f32 %v11299_v41, %v2284_v17  ;;  %v2293_v17 = vor.u32 1.1754944e-38, %v2292_v58 }
 0x3ed   : > { %9635 = vrcp.f32 %v11310_v56  ;;  %v2593_v37 = vor.u32 1.1754944e-38, %v2592_v45  ;;  %vm2591_vm3 = vcmp.eq.f32.partialorder %v2590_v55, 8.507059e+37 }
 0x3ee   : > { %9637 = vpow2.f32 %v3158_v25 }
 0x3ef   : > { %9639 = vpow2.f32 %v2828_v63 }
 0x3f0   : > { %2839 = vadd.xlane.f32.xlu2 %v2838_v15 }
 0x3f1   : > { %v9632_v62 = vpop.eup %9631 }
 0x3f2   : > { %v2582_v6 = vmul.f32 %v9632_v62, %v11303_v4  ;;  %v11325_v12 = vpop.xlane.xlu2 %2528  ;;  %v11331_v47 = vpop.eup %9633  ;;  %vm2587_vm13 = vweird.f32 %v9632_v62  ;;  %v2579_v4 = vsel %vm2576_vm1, %v2578_v23, %v2574_v28 }
 0x3f3   : > { %9641 = vrcp.f32 %v11325_v12  ;;  %v11336_v32 = vpop.xlane.xlu1 %2195  ;;  %2842 = vadd.xlane.f32.xlu1 %v2841_v34  ;;  %2845 = vadd.xlane.f32.xlu0 %v2844_v35  ;;  %v11338_v43 = vpop.eup %9635  ;;  %v3178_v13 = vsel %vm2080_vm0, %v11331_v47, 0.0  ;;  %vm2588_vm2 = vmor %vm2586_vm15, %vm2587_vm13  ;;  %v2289_v35 = vsel %vm11380_vm5, %v11299_v41, %v2285_v39  ;;  %v2580_v31 = vmul.f32 %v11153_v60, %v2579_v4 }
 0x3f4   : > { %v2583_v18 = vsub.f32 1.0, %v2582_v6  ;;  %9643 = vrcp.f32 %v11336_v32  ;;  %v11346_v57 = vpop.eup %9637  ;;  %v2597_v53 = vmul.f32 %v11338_v43, %v11310_v56  ;;  %v2275_v45 = vand.u32 2147483647, %v11336_v32 }
 0x3f5   : > { %v11364_v44 = vpop.eup %9639  ;;  %v3181_v8 = vsel %vm2080_vm0, %v11346_v57, 0.0  ;;  %v2277_v50 = vand.u32 2147483648, %v11336_v32  ;;  %v2294_v41 = vsel %vm11384_vm6, %v2293_v17, %v2289_v35  ;;  %vm2271_vm9 = vweird.f32 %v11336_v32 }
 0x3f6   : > { %v2584_v36 = vmul.f32 %v9632_v62, %v2583_v18  ;;  %v2598_v48 = vsub.f32 1.0, %v2597_v53  ;;  %v2847_v26 = vsel %vm2080_vm0, %v11364_v44, 0.0  ;;  %vm2602_vm10 = vweird.f32 %v11338_v43 }
 0x3f7   : > { %vm2616_vm11 = vweird.f32 %v11325_v12  ;;  %v2622_v58 = vand.u32 2147483648, %v11325_v12  ;;  %v2278_v28 = vor.u32 1.1754944e-38, %v2277_v50  ;;  %vm2276_vm13 = vcmp.eq.f32.partialorder %v2275_v45, 8.507059e+37 }
 0x3f8   : > { %v2585_v9 = vadd.f32 %v9632_v62, %v2584_v36  ;;  %3179 = vadd.xlane.f32.xlu2 %v3178_v13  ;;  %v2599_v21 = vmul.f32 %v11338_v43, %v2598_v48  ;;  %v2620_v13 = vand.u32 2147483647, %v11325_v12  ;;  %v2295_v39 = vmul.f32 %v11127_v49, %v2294_v41 }
 0x3f9   : > { %v11368_v14 = vpop.eup %9641  ;;  %vm2601_vm15 = vweird.f32 %v11310_v56 }
 0x3fa   : > { %v9644_v19 = vpop.eup %9643  ;;  %v2589_v25 = vsel %vm2588_vm2, %v9632_v62, %v2585_v9  ;;  %v2612_v5 = vmul.f32 %v11368_v14, %v11325_v12  ;;  %v3313_v63 = vpop.permute.xlu2 %3312  ;;  %vm2617_vm8 = vweird.f32 %v11368_v14  ;;  %v2600_v53 = vadd.f32 %v11338_v43, %v2599_v21  ;;  %vm2603_vm1 = vmor %vm2601_vm15, %vm2602_vm10 }
 0x3fb   : > { %v2267_v15 = vmul.f32 %v9644_v19, %v11336_v32  ;;  %3182 = vadd.xlane.f32.xlu1 %v3181_v8  ;;  %3337 = vmatpush.bf16.msra.mxu3 %v3313_v63  ;;  %v2594_v29 = vsel %vm2591_vm3, %v2593_v37, %v2589_v25  ;;  %vm2272_vm7 = vweird.f32 %v9644_v19  ;;  %v2607_v9 = vand.u32 2147483648, %v11310_v56  ;;  %vm2618_vm14 = vmor %vm2616_vm11, %vm2617_vm8  ;;  %v2532_v48 = vpop.xlane.xlu1 %2531 }
 0x3fc   : > { %v2613_v34 = vsub.f32 1.0, %v2612_v5  ;;  %v2595_v18 = vmul.f32 %v11165_v59, %v2594_v29  ;;  %vm2273_vm12 = vmor %vm2271_vm9, %vm2272_vm7  ;;  %v2605_v37 = vand.u32 2147483647, %v11310_v56  ;;  %v2623_v12 = vor.u32 1.1754944e-38, %v2622_v58 }
 0x3fd   : > { %v2268_v3 = vsub.f32 1.0, %v2267_v15  ;;  %vm2621_vm2 = vcmp.eq.f32.partialorder %v2620_v13, 8.507059e+37  ;;  %v2608_v63 = vor.u32 1.1754944e-38, %v2607_v9  ;;  %9645 = vrcp.f32 %v2532_v48 }
 0x3fe   : > { %v2614_v61 = vmul.f32 %v11368_v14, %v2613_v34  ;;  %v2657_v55 = vpack.c.bf16 %v2595_v18, %v2580_v31  ;;  %vm2606_vm3 = vcmp.eq.f32.partialorder %v2605_v37, 8.507059e+37  ;;  %v2637_v31 = vand.u32 2147483648, %v2532_v48 }
 0x3ff   : > { %v2269_v36 = vmul.f32 %v9644_v19, %v2268_v3  ;;  %vm2631_vm5 = vweird.f32 %v2532_v48 }
 0x400   : > { %2848 = vadd.xlane.f32.xlu2 %v2847_v26  ;;  %v2615_v60 = vadd.f32 %v11368_v14, %v2614_v61  ;;  %7810 = vmatmul.msk.bf16.gmra.mxu3 %vm2080_vm0, %v2657_v55  ;;  %v2638_v50 = vor.u32 1.1754944e-38, %v2637_v31 }
 0x401   : > { %v2270_v59 = vadd.f32 %v9644_v19, %v2269_v36 }
 0x402   : > { %v2619_v8 = vsel %vm2618_vm14, %v11368_v14, %v2615_v60 }
 0x403   : > { %v2274_v23 = vsel %vm2273_vm12, %v9644_v19, %v2270_v59  ;;  %v2604_v19 = vsel %vm2603_vm1, %v11338_v43, %v2600_v53  ;;  %v2624_v4 = vsel %vm2621_vm2, %v2623_v12, %v2619_v8  ;;  %v9646_v43 = vpop.eup %9645 }
 0x404   : > { %v2279_v32 = vsel %vm2276_vm13, %v2278_v28, %v2274_v23  ;;  %v2609_v49 = vsel %vm2606_vm3, %v2608_v63, %v2604_v19  ;;  %v2625_v56 = vmul.f32 %v11176_v30, %v2624_v4  ;;  %v2627_v29 = vmul.f32 %v9646_v43, %v2532_v48 }
 0x405   : > { %v2280_v25 = vmul.f32 %v11174_v1, %v2279_v32  ;;  %v2610_v14 = vmul.f32 %v11167_v46, %v2609_v49  ;;  %vm2632_vm4 = vweird.f32 %v9646_v43  ;;  %v2635_v30 = vand.u32 2147483647, %v2532_v48 }
 0x406   : > { %v2628_v6 = vsub.f32 1.0, %v2627_v29  ;;  %vm2633_vm6 = vmor %vm2631_vm5, %vm2632_vm4 }
 0x407   : > { %v2328_v5 = vpack.c.bf16 %v2295_v39, %v2280_v25  ;;  %v2658_v1 = vpack.c.bf16 %v2625_v56, %v2610_v14  ;;  %vm2636_vm8 = vcmp.eq.f32.partialorder %v2635_v30, 8.507059e+37 }
 0x408   : > { %v2629_v34 = vmul.f32 %v9646_v43, %v2628_v6 }
 0x409   : > { %7803 = vmatmul.msk.bf16.gmra.mxu1 %vm2080_vm0, %v2328_v5 }
 0x40a   : > { %v2630_v35 = vadd.f32 %v9646_v43, %v2629_v34 }
 0x40c   : > { %v2634_v17 = vsel %vm2633_vm6, %v9646_v43, %v2630_v35 }
 0x40d   : > { %v2639_v55 = vsel %vm2636_vm8, %v2638_v50, %v2634_v17 }
 0x40e   : > { %v2640_v59 = vmul.f32 %v11182_v0, %v2639_v55 }
 0x410   : > { %7811 = vmatmul.msk.bf16.gmra.mxu3 %vm2080_vm0, %v2658_v1 }
 0x413   : > { %v3311_v15 = vpop.permute.xlu1 %3310 }
 0x414   : > { %3338 = vmatpush.bf16.msra.mxu3 %v3311_v15 }
 0x420   : > { %v2535_v62 = vpop.xlane.xlu0 %2534 }
 0x421   : > { %9647 = vrcp.f32 %v2535_v62  ;;  %v2652_v18 = vand.u32 2147483648, %v2535_v62  ;;  %v2650_v45 = vand.u32 2147483647, %v2535_v62  ;;  %vm2646_vm9 = vweird.f32 %v2535_v62 }
 0x423   : > { %v2653_v36 = vor.u32 1.1754944e-38, %v2652_v18  ;;  %vm2651_vm11 = vcmp.eq.f32.partialorder %v2650_v45, 8.507059e+37 }
 0x427   : > { %v9648_v26 = vpop.eup %9647 }
 0x428   : > { %v2642_v3 = vmul.f32 %v9648_v26, %v2535_v62  ;;  %vm2647_vm7 = vweird.f32 %v9648_v26 }
 0x429   : > { %vm2648_vm10 = vmor %vm2646_vm9, %vm2647_vm7 }
 0x42a   : > { %v2643_v46 = vsub.f32 1.0, %v2642_v3 }
 0x42c   : > { %v2644_v61 = vmul.f32 %v9648_v26, %v2643_v46 }
 0x42e   : > { %v2645_v21 = vadd.f32 %v9648_v26, %v2644_v61 }
 0x430   : > { %v2649_v41 = vsel %vm2648_vm10, %v9648_v26, %v2645_v21 }
 0x431   : > { %v2654_v60 = vsel %vm2651_vm11, %v2653_v36, %v2649_v41 }
 0x432   : > { %v2655_v58 = vmul.f32 %v11198_v22, %v2654_v60 }
 0x433   : > { %v2804_v28 = vpop.xlane.xlu2 %2803  ;;  %v3309_v13 = vpop.permute.xlu0 %3308 }
 0x434   : > { %v2818_v53 = vsub.f32 %v11206_v7, %v2804_v28  ;;  %v2659_v23 = vpack.c.bf16 %v2655_v58, %v2640_v59  ;;  %3339 = vmatpush.bf16.msra.mxu3 %v3309_v13 }
 0x436   : > { %v2830_v9 = vmul.f32 1.442695, %v2818_v53  ;;  %7812 = vmatmul.msk.bf16.gmra.mxu3 %vm2080_vm0, %v2659_v23 }
 0x438   : > { %9649 = vpow2.f32 %v2830_v9 }
 0x43b   : > { %v3162_v32 = vpop.xlane.xlu2 %3161 }
 0x43c   : > { %9651 = vrcp.f32 %v3162_v32  ;;  %v3195_v4 = vand.u32 2147483648, %v3162_v32  ;;  %v3193_v49 = vand.u32 2147483647, %v3162_v32  ;;  %vm3189_vm13 = vweird.f32 %v3162_v32 }
 0x43e   : > { %v11427_v39 = vpop.eup %9649  ;;  %v3165_v37 = vpop.xlane.xlu1 %3164  ;;  %v3196_v6 = vor.u32 1.1754944e-38, %v3195_v4  ;;  %vm3194_vm1 = vcmp.eq.f32.partialorder %v3193_v49, 8.507059e+37 }
 0x43f   : > { %9653 = vrcp.f32 %v3165_v37  ;;  %v2850_v0 = vsel %vm2080_vm0, %v11427_v39, 0.0  ;;  %v3210_v14 = vand.u32 2147483648, %v3165_v37  ;;  %v3208_v43 = vand.u32 2147483647, %v3165_v37 }
 0x440   : > { %2851 = vadd.xlane.f32.xlu1 %v2850_v0  ;;  %vm3204_vm2 = vweird.f32 %v3165_v37 }
 0x441   : > { %v3211_v31 = vor.u32 1.1754944e-38, %v3210_v14  ;;  %vm3209_vm4 = vcmp.eq.f32.partialorder %v3208_v43, 8.507059e+37 }
 0x442   : > { %v9652_v22 = vpop.eup %9651 }
 0x443   : > { %v3185_v8 = vmul.f32 %v9652_v22, %v3162_v32  ;;  %v2202_v7 = vpop.xlane.xlu2 %2201  ;;  %vm3190_vm12 = vweird.f32 %v9652_v22 }
 0x444   : > { %9655 = vrcp.f32 %v2202_v7  ;;  %vm3191_vm14 = vmor %vm3189_vm13, %vm3190_vm12  ;;  %v2305_v18 = vand.u32 2147483647, %v2202_v7  ;;  %v2307_v21 = vand.u32 2147483648, %v2202_v7  ;;  %vm2301_vm6 = vweird.f32 %v2202_v7 }
 0x445   : > { %v9654_v25 = vpop.eup %9653  ;;  %v3186_v12 = vsub.f32 1.0, %v3185_v8 }
 0x446   : > { %v3200_v19 = vmul.f32 %v9654_v25, %v3165_v37  ;;  %v2205_v5 = vpop.xlane.xlu1 %2204  ;;  %vm3205_vm15 = vweird.f32 %v9654_v25  ;;  %v2308_v9 = vor.u32 1.1754944e-38, %v2307_v21  ;;  %vm2306_vm9 = vcmp.eq.f32.partialorder %v2305_v18, 8.507059e+37 }
 0x447   : > { %v3187_v63 = vmul.f32 %v9652_v22, %v3186_v12  ;;  %9657 = vrcp.f32 %v2205_v5  ;;  %vm3206_vm3 = vmor %vm3204_vm2, %vm3205_vm15  ;;  %v2320_v59 = vand.u32 2147483647, %v2205_v5  ;;  %v2322_v58 = vand.u32 2147483648, %v2205_v5 }
 0x448   : > { %v3201_v48 = vsub.f32 1.0, %v3200_v19  ;;  %vm2316_vm10 = vweird.f32 %v2205_v5 }
 0x449   : > { %v3188_v56 = vadd.f32 %v9652_v22, %v3187_v63  ;;  %vm11452_vm12 = vcmp.eq.f32.partialorder %v2320_v59, 8.507059e+37 }
 0x44a   : > { %v9656_v1 = vpop.eup %9655  ;;  %v3202_v15 = vmul.f32 %v9654_v25, %v3201_v48 }
 0x44b   : > { %v3192_v29 = vsel %vm3191_vm14, %v9652_v22, %v3188_v56  ;;  %v2297_v62 = vmul.f32 %v9656_v1, %v2202_v7  ;;  %v11431_v34 = vpop.xlane.xlu2 %3167  ;;  %vm2302_vm5 = vweird.f32 %v9656_v1  ;;  %v2323_v7 = vor.u32 1.1754944e-38, %v2322_v58 }
 0x44c   : > { %v3203_v26 = vadd.f32 %v9654_v25, %v3202_v15  ;;  %9659 = vrcp.f32 %v11431_v34  ;;  %v3197_v3 = vsel %vm3194_vm1, %v3196_v6, %v3192_v29  ;;  %vm11439_vm7 = vmor %vm2301_vm6, %vm2302_vm5  ;;  %vm3219_vm13 = vweird.f32 %v11431_v34 }
 0x44d   : > { %v9658_v35 = vpop.eup %9657  ;;  %v2298_v30 = vsub.f32 1.0, %v2297_v62  ;;  %v3198_v36 = vmul.f32 %v11216_v16, %v3197_v3  ;;  %v3225_v14 = vand.u32 2147483648, %v11431_v34 }
 0x44e   : > { %v3207_v46 = vsel %vm3206_vm3, %v9654_v25, %v3203_v26  ;;  %v2312_v17 = vmul.f32 %v9658_v35, %v2205_v5  ;;  %v11434_v61 = vpop.xlane.xlu1 %3170  ;;  %vm2317_vm8 = vweird.f32 %v9658_v35 }
 0x44f   : > { %v3212_v45 = vsel %vm3209_vm4, %v3211_v31, %v3207_v46  ;;  %v2299_v50 = vmul.f32 %v9656_v1, %v2298_v30  ;;  %9661 = vrcp.f32 %v11434_v61  ;;  %vm11448_vm11 = vmor %vm2316_vm10, %vm2317_vm8  ;;  %vm3234_vm3 = vweird.f32 %v11434_v61 }
 0x450   : > { %v3213_v55 = vmul.f32 %v11221_v38, %v3212_v45  ;;  %v2313_v41 = vsub.f32 1.0, %v2312_v17 }
 0x451   : > { %v2300_v60 = vadd.f32 %v9656_v1, %v2299_v50 }
 0x452   : > { %v9660_v28 = vpop.eup %9659  ;;  %v3304_v53 = vpack.c.bf16 %v3213_v55, %v3198_v36  ;;  %v2314_v23 = vmul.f32 %v9658_v35, %v2313_v41 }
 0x453   : > { %v2304_v16 = vsel %vm11439_vm7, %v9656_v1, %v2300_v60  ;;  %v3215_v38 = vmul.f32 %v9660_v28, %v11431_v34  ;;  %v2810_v32 = vpop.xlane.xlu2 %2809  ;;  %vm3220_vm14 = vweird.f32 %v9660_v28 }
 0x454   : > { %v2315_v37 = vadd.f32 %v9658_v35, %v2314_v23  ;;  %v2820_v0 = vsub.f32 %v11251_v10, %v2810_v32  ;;  %7825 = vmatmul.msk.bf16.vlgmr.msra.gmra.mxu3 %vm2080_vm0, %v3304_v53  ;;  %v2309_v12 = vsel %vm2306_vm9, %v2308_v9, %v2304_v16  ;;  %v3223_v10 = vand.u32 2147483647, %v11431_v34  ;;  %vm11469_vm15 = vmor %vm3219_vm13, %vm3220_vm14 }
 0x455   : > { %v3216_v25 = vsub.f32 1.0, %v3215_v38  ;;  %v9662_v19 = vpop.eup %9661  ;;  %v2310_v1 = vmul.f32 %v11230_v42, %v2309_v12 }
 0x456   : > { %v2319_v63 = vsel %vm11448_vm11, %v9658_v35, %v2315_v37  ;;  %v2834_v5 = vmul.f32 1.442695, %v2820_v0  ;;  %v2813_v4 = vpop.xlane.xlu1 %2812  ;;  %v3230_v48 = vmul.f32 %v9662_v19, %v11434_v61  ;;  %vm3235_vm1 = vweird.f32 %v9662_v19 }
 0x457   : > { %v3217_v49 = vmul.f32 %v9660_v28, %v3216_v25  ;;  %v2821_v56 = vsub.f32 %v11254_v27, %v2813_v4  ;;  %v2324_v15 = vsel %vm11452_vm12, %v2323_v7, %v2319_v63  ;;  %v3238_v27 = vand.u32 2147483647, %v11434_v61  ;;  %vm3236_vm4 = vmor %vm3234_vm3, %vm3235_vm1 }
 0x458   : > { %9663 = vpow2.f32 %v2834_v5  ;;  %v3231_v29 = vsub.f32 1.0, %v3230_v48  ;;  %v2325_v62 = vmul.f32 %v11232_v52, %v2324_v15  ;;  %v3240_v35 = vand.u32 2147483648, %v11434_v61 }
 0x459   : > { %v3218_v43 = vadd.f32 %v9660_v28, %v3217_v49  ;;  %v2836_v6 = vmul.f32 1.442695, %v2821_v56  ;;  %v3226_v52 = vor.u32 1.1754944e-38, %v3225_v14  ;;  %vm3224_vm2 = vcmp.eq.f32.partialorder %v3223_v10, 8.507059e+37 }
 0x45a   : > { %v3232_v3 = vmul.f32 %v9662_v19, %v3231_v29  ;;  %v2329_v30 = vpack.c.bf16 %v2325_v62, %v2310_v1  ;;  %v3241_v18 = vor.u32 1.1754944e-38, %v3240_v35  ;;  %vm3239_vm5 = vcmp.eq.f32.partialorder %v3238_v27, 8.507059e+37 }
 0x45b   : > { %v3222_v42 = vsel %vm11469_vm15, %v9660_v28, %v3218_v43  ;;  %9665 = vpow2.f32 %v2836_v6  ;;  %v11477_v31 = vpop.xlane.xlu2 %3173 }
 0x45c   : > { %9667 = vrcp.f32 %v11477_v31  ;;  %v3233_v34 = vadd.f32 %v9662_v19, %v3232_v3  ;;  %7804 = vmatmul.msk.bf16.gmra.mxu1 %vm2080_vm0, %v2329_v30  ;;  %v3227_v50 = vsel %vm3224_vm2, %v3226_v52, %v3222_v42  ;;  %v3255_v32 = vand.u32 2147483648, %v11477_v31 }
 0x45d   : > { %v3228_v60 = vmul.f32 %v11238_v24, %v3227_v50  ;;  %v3253_v0 = vand.u32 2147483647, %v11477_v31  ;;  %vm3249_vm6 = vweird.f32 %v11477_v31 }
 0x45e   : > { %v11482_v46 = vpop.eup %9663  ;;  %v11485_v17 = vpop.xlane.xlu1 %3176  ;;  %v3237_v21 = vsel %vm3236_vm4, %v9662_v19, %v3233_v34  ;;  %v3256_v10 = vor.u32 1.1754944e-38, %v3255_v32 }
 0x45f   : > { %v2807_v45 = vpop.xlane.xlu0 %2806  ;;  %9669 = vrcp.f32 %v11485_v17  ;;  %v2856_v61 = vsel %vm2080_vm0, %v11482_v46, 0.0  ;;  %v3242_v55 = vsel %vm3239_vm5, %v3241_v18, %v3237_v21  ;;  %v3268_v22 = vand.u32 2147483647, %v11485_v17 }
 0x460   : > { %v2819_v36 = vsub.f32 %v11288_v54, %v2807_v45  ;;  %2857 = vadd.xlane.f32.xlu2 %v2856_v61  ;;  %v3243_v59 = vmul.f32 %v11241_v51, %v3242_v55  ;;  %vm11525_vm7 = vcmp.eq.f32.partialorder %v3253_v0, 8.507059e+37  ;;  %vm3264_vm8 = vweird.f32 %v11485_v17 }
 0x461   : > { %v11491_v41 = vpop.eup %9665  ;;  %vm11530_vm9 = vcmp.eq.f32.partialorder %v3268_v22, 8.507059e+37  ;;  %v3270_v56 = vand.u32 2147483648, %v11485_v17 }
 0x462   : > { %v11495_v58 = vpop.eup %9667  ;;  %v2832_v28 = vmul.f32 1.442695, %v2819_v36  ;;  %v2859_v53 = vsel %vm2080_vm0, %v11491_v41, 0.0  ;;  %v3305_v23 = vpack.c.bf16 %v3243_v59, %v3228_v60 }
 0x463   : > { %v3245_v54 = vmul.f32 %v11495_v58, %v11477_v31  ;;  %2860 = vadd.xlane.f32.xlu1 %v2859_v53  ;;  %v2840_v13 = vpop.xlane.xlu2 %2839  ;;  %vm3250_vm10 = vweird.f32 %v11495_v58  ;;  %v3271_v30 = vor.u32 1.1754944e-38, %v3270_v56 }
 0x464   : > { %9671 = vpow2.f32 %v2832_v28  ;;  %7826 = vmatmul.msk.bf16.gmra.mxu3 %vm2080_vm0, %v3305_v23  ;;  %v2871_v14 = vand.u32 2147483647, %v2840_v13  ;;  %v2873_v15 = vand.u32 2147483648, %v2840_v13  ;;  %vm11548_vm13 = vmor %vm3249_vm6, %vm3250_vm10  ;;  %vm2867_vm14 = vweird.f32 %v2840_v13 }
 0x465   : > { %v11501_v16 = vpop.eup %9669  ;;  %9673 = vrcp.f32 %v2840_v13  ;;  %v3246_v38 = vsub.f32 1.0, %v3245_v54 }
 0x466   : > { %v3260_v24 = vmul.f32 %v11501_v16, %v11485_v17  ;;  %v11506_v51 = vpop.xlane.xlu1 %2842  ;;  %vm3265_vm11 = vweird.f32 %v11501_v16  ;;  %vm11552_vm15 = vcmp.eq.f32.partialorder %v2871_v14, 8.507059e+37  ;;  %v2874_v17 = vor.u32 1.1754944e-38, %v2873_v15 }
 0x467   : > { %v11508_v9 = vpop.xlane.xlu0 %2845  ;;  %9675 = vrcp.f32 %v11506_v51  ;;  %v3247_v25 = vmul.f32 %v11495_v58, %v3246_v38  ;;  %v2886_v27 = vand.u32 2147483647, %v11506_v51  ;;  %v2888_v34 = vand.u32 2147483648, %v11506_v51  ;;  %vm11563_vm1 = vmor %vm3264_vm8, %vm3265_vm11 }
 0x468   : > { %v3261_v37 = vsub.f32 1.0, %v3260_v24  ;;  %9677 = vrcp.f32 %v11508_v9  ;;  %vm2882_vm4 = vweird.f32 %v11506_v51  ;;  %v2903_v48 = vand.u32 2147483648, %v11508_v9 }
 0x469   : > { %v3248_v62 = vadd.f32 %v11495_v58, %v3247_v25  ;;  %vm2887_vm5 = vcmp.eq.f32.partialorder %v2886_v27, 8.507059e+37  ;;  %v2889_v54 = vor.u32 1.1754944e-38, %v2888_v34 }
 0x46a   : > { %v11515_v8 = vpop.eup %9671  ;;  %v3262_v12 = vmul.f32 %v11501_v16, %v3261_v37 }
 0x46b   : > { %v9674_v7 = vpop.eup %9673  ;;  %v11519_v19 = vpop.xlane.xlu2 %3179  ;;  %v2853_v63 = vsel %vm2080_vm0, %v11515_v8, 0.0  ;;  %v3252_v61 = vsel %vm11548_vm13, %v11495_v58, %v3248_v62 }
 0x46c   : > { %v2863_v5 = vmul.f32 %v9674_v7, %v2840_v13  ;;  %9679 = vrcp.f32 %v11519_v19  ;;  %2854 = vadd.xlane.f32.xlu0 %v2853_v63  ;;  %v3263_v26 = vadd.f32 %v11501_v16, %v3262_v12  ;;  %vm2868_vm12 = vweird.f32 %v9674_v7  ;;  %v11557_v18 = vpop.f32.mrf.mxu3 }
 0x46d   : > { %v9676_v4 = vpop.eup %9675  ;;  %vm2869_vm3 = vmor %vm2867_vm14, %vm2868_vm12  ;;  %v3257_v38 = vsel %vm11525_vm7, %v3256_v10, %v3252_v61  ;;  %vm2897_vm7 = vweird.f32 %v11508_v9  ;;  %v3285_v14 = vand.u32 2147483648, %v11519_v19  ;;  %vm3279_vm13 = vweird.f32 %v11519_v19 }
 0x46e   : > { %v2864_v1 = vsub.f32 1.0, %v2863_v5  ;;  %v2878_v43 = vmul.f32 %v9676_v4, %v11506_v51  ;;  %v11537_v29 = vpop.xlane.xlu1 %3182  ;;  %v11539_v6 = vpop.eup %9677  ;;  %vm2883_vm2 = vweird.f32 %v9676_v4  ;;  %v3267_v55 = vsel %vm11563_vm1, %v11501_v16, %v3263_v26 }
 0x46f   : > { %9681 = vrcp.f32 %v11537_v29  ;;  %v2893_v36 = vmul.f32 %v11539_v6, %v11508_v9  ;;  %vm2884_vm6 = vmor %vm2882_vm4, %vm2883_vm2  ;;  %v3272_v32 = vsel %vm11530_vm9, %v3271_v30, %v3267_v55  ;;  %v3258_v12 = vmul.f32 %v11277_v2, %v3257_v38  ;;  %v9116_v38 = vld [vmem:[%s10441_s12 + $0x74] sm:$0xf0]  ;;  %v7847_v30 = vld [vmem:[%s10441_s12 + $0x20] sm:$0xf] }
 0x470   : > { %v2865_v35 = vmul.f32 %v9674_v7, %v2864_v1  ;;  %v2879_v42 = vsub.f32 1.0, %v2878_v43  ;;  %v3273_v63 = vmul.f32 %v11290_v40, %v3272_v32  ;;  %vm3294_vm9 = vweird.f32 %v11537_v29  ;;  %v9115_v32 = vld [vmem:[%s10441_s12 + $0x74] sm:$0xf] }
 0x471   : > { %v2894_v24 = vsub.f32 1.0, %v2893_v36  ;;  %v3300_v2 = vand.u32 2147483648, %v11537_v29  ;;  %v3298_v43 = vand.u32 2147483647, %v11537_v29  ;;  %vm2898_vm11 = vweird.f32 %v11539_v6 }
 0x472   : > { %v11559_v45 = vpop.eup %9679  ;;  %v2866_v50 = vadd.f32 %v9674_v7, %v2865_v35  ;;  %v2880_v21 = vmul.f32 %v9676_v4, %v2879_v42  ;;  %v3306_v56 = vpack.c.bf16 %v3273_v63, %v3258_v12  ;;  %v3283_v42 = vand.u32 2147483647, %v11519_v19  ;;  %vm11628_vm1 = vmor %vm2897_vm7, %vm2898_vm11  ;;  %v9114_v12 = vld [vmem:[%s10441_s12 + $0x64] sm:$0xf0]  ;;  %v9113_v63 = vld [vmem:[%s10441_s12 + $0x64] sm:$0xf] }
 0x473   : > { %v3275_v60 = vmul.f32 %v11559_v45, %v11519_v19  ;;  %v11578_v59 = vpop.xlane.xlu2 %2848  ;;  %v2895_v10 = vmul.f32 %v11539_v6, %v2894_v24  ;;  %vm3280_vm10 = vweird.f32 %v11559_v45  ;;  %v3301_v52 = vor.u32 1.1754944e-38, %v3300_v2  ;;  %v7863_v2 = vld [vmem:[%s10441_s12 + $0x40] sm:$0xf]  ;;  %v7849_v19 = vld [vmem:[%s10441_s12 + $0x28] sm:$0xf0] }
 0x474   : > { %v2870_v28 = vsel %vm2869_vm3, %v9674_v7, %v2866_v50  ;;  %v2881_v53 = vadd.f32 %v9676_v4, %v2880_v21  ;;  %9683 = vrcp.f32 %v11578_v59  ;;  %7827 = vmatmul.msk.bf16.gmra.mxu3 %vm2080_vm0, %v3306_v56  ;;  %v2918_v3 = vand.u32 2147483648, %v11578_v59  ;;  %vm11620_vm14 = vmor %vm3279_vm13, %vm3280_vm10  ;;  %v7873_v56 = vld [vmem:[%s10441_s12 + $0x58] sm:$0xf0] }
 0x475   : > { %v2875_v58 = vsel %vm11552_vm15, %v2874_v17, %v2870_v28  ;;  %v3276_v13 = vsub.f32 1.0, %v3275_v60  ;;  %v9682_v23 = vpop.eup %9681  ;;  %v2896_v62 = vadd.f32 %v11539_v6, %v2895_v10  ;;  %v2916_v31 = vand.u32 2147483647, %v11578_v59  ;;  %v7881_v10 = vld [vmem:[%s10441_s12 + $0x68] sm:$0xf0] }
 0x476   : > { %v2885_v16 = vsel %vm2884_vm6, %v9676_v4, %v2881_v53  ;;  %v3290_v51 = vmul.f32 %v9682_v23, %v11537_v29  ;;  %v2876_v0 = vmul.f32 %v11312_v33, %v2875_v58  ;;  %v2901_v4 = vand.u32 2147483647, %v11508_v9 }
 0x477   : > { %v2890_v37 = vsel %vm2887_vm5, %v2889_v54, %v2885_v16  ;;  %v3277_v7 = vmul.f32 %v11559_v45, %v3276_v13  ;;  %vm3295_vm8 = vweird.f32 %v9682_v23  ;;  %v3286_v50 = vor.u32 1.1754944e-38, %v3285_v14 }
 0x478   : > { %v2891_v22 = vmul.f32 %v11316_v20, %v2890_v37  ;;  %v3291_v25 = vsub.f32 1.0, %v3290_v51  ;;  %v2695_v20 = vpop.f32.mrf.mxu3  ;;  %vm11610_vm12 = vmor %vm3294_vm9, %vm3295_vm8  ;;  %vm3299_vm2 = vcmp.eq.f32.partialorder %v3298_v43, 8.507059e+37  ;;  %v2900_v21 = vsel %vm11628_vm1, %v11539_v6, %v2896_v62  ;;  %v7889_v51 = vld [vmem:[%s10441_s12 + $0x78] sm:$0xf0]  ;;  %v7865_v43 = vld [vmem:[%s10441_s12 + $0x48] sm:$0xf0] }
 0x479   : > { %v3278_v1 = vadd.f32 %v11559_v45, %v3277_v7  ;;  %v9524_v27 = vpack.i.bf16 %v2695_v20, %v11557_v18  ;;  %vm2912_vm3 = vweird.f32 %v11578_v59  ;;  %v2904_v55 = vor.u32 1.1754944e-38, %v2903_v48  ;;  %v9112_v48 = vld [vmem:[%s10441_s12 + $0x54] sm:$0xf0] }
 0x47a   : > { %v2982_v5 = vpack.c.bf16 %v2891_v22, %v2876_v0  ;;  %v9684_v49 = vpop.eup %9683  ;;  %v3292_v33 = vmul.f32 %v9682_v23, %v3291_v25  ;;  %vm3284_vm4 = vcmp.eq.f32.partialorder %v3283_v42, 8.507059e+37  ;;  %v2919_v9 = vor.u32 1.1754944e-38, %v2918_v3  ;;  %v7879_v25 = vld [vmem:[%s10441_s12 + $0x60] sm:$0xf]  ;;  %v9107_v42 = vld [vmem:[%s10441_s12 + $0x34] sm:$0xf] }
 0x47b   : > { %v2908_v40 = vmul.f32 %v9684_v49, %v11578_v59  ;;  %vm2913_vm15 = vweird.f32 %v9684_v49  ;;  %v3282_v18 = vsel %vm11620_vm14, %v11559_v45, %v3278_v1  ;;  %vm2902_vm6 = vcmp.eq.f32.partialorder %v2901_v4, 8.507059e+37  ;;  %v9109_v1 = vld [vmem:[%s10441_s12 + $0x44] sm:$0xf]  ;;  %v7857_v3 = vld [vmem:[%s10441_s12 + $0x38] sm:$0xf0] }
 0x47c   : > { %7817 = vmatmul.msk.bf16.vlgmr.msra.gmra.mxu1 %vm2080_vm0, %v2982_v5  ;;  %v3293_v15 = vadd.f32 %v9682_v23, %v3292_v33  ;;  %vm2914_vm5 = vmor %vm2912_vm3, %vm2913_vm15  ;;  %vm2917_vm7 = vcmp.eq.f32.partialorder %v2916_v31, 8.507059e+37  ;;  %v3287_v28 = vsel %vm3284_vm4, %v3286_v50, %v3282_v18  ;;  %v2905_v53 = vsel %vm2902_vm6, %v2904_v55, %v2900_v21  ;;  %v9111_v33 = vld [vmem:[%s10441_s12 + $0x54] sm:$0xf]  ;;  %v9105_v31 = vld [vmem:[%s10441_s12 + $0x24] sm:$0xf] }
 0x47d   : > { %v2909_v35 = vsub.f32 1.0, %v2908_v40  ;;  %v3288_v59 = vmul.f32 %v11331_v47, %v3287_v28  ;;  %v2906_v54 = vmul.f32 %v11319_v11, %v2905_v53  ;;  %v7887_v11 = vld [vmem:[%s10441_s12 + $0x70] sm:$0xf]  ;;  %v7892_v22 = vor.u32 %v9115_v32, %v7889_v51  ;;  %v9110_v40 = vld [vmem:[%s10441_s12 + $0x44] sm:$0xf0] }
 0x47e   : > { %v3297_v29 = vsel %vm11610_vm12, %v9682_v23, %v3293_v15  ;;  %v7888_v37 = vor.u32 %v9116_v38, %v7887_v11  ;;  %v7880_v5 = vor.u32 %v9114_v12, %v7879_v25  ;;  %v7884_v4 = vor.u32 %v9113_v63, %v7881_v10  ;;  %v7839_v21 = vld [vmem:[%s10441_s12 + $0x10] sm:$0xf]  ;;  %v7841_v55 = vld [vmem:[%s10441_s12 + $0x18] sm:$0xf0]  ;;  %v9102_v53 = vld [vmem:[%s10441_s12 + $0x4] sm:$0xf0] }
 0x47f   : > { %v2910_v34 = vmul.f32 %v9684_v49, %v2909_v35  ;;  %v3302_v61 = vsel %vm3299_vm2, %v3301_v52, %v3297_v29  ;;  %3705 = vmatpush.bf16.msrb.mxu2 %v7892_v22  ;;  %v7876_v14 = vor.u32 %v9111_v33, %v7873_v56  ;;  %v7864_v15 = vor.u32 %v9110_v40, %v7863_v2  ;;  %v9108_v35 = vld [vmem:[%s10441_s12 + $0x34] sm:$0xf0]  ;;  %v9106_v52 = vld [vmem:[%s10441_s12 + $0x24] sm:$0xf0]  ;;  %v2375_v22 = vpop.f32.mrf.mxu1  ;;  %v9127_v10 = vld [vmem:[%s10441_s12 + $0xd4] sm:$0xf] }
 0x480   : > { %9525 = vrot.lane.b32.xlu0 %v9524_v27, %s10107_s29  ;;  %v3303_v45 = vmul.f32 %v11346_v57, %v3302_v61  ;;  %3647 = vmatpush.bf16.msrb.mxu0 %v7888_v37  ;;  %v7868_v62 = vor.u32 %v9109_v1, %v7865_v43  ;;  %v7855_v27 = vld [vmem:[%s10441_s12 + $0x30] sm:$0xf]  ;;  %v7848_v18 = vor.u32 %v9106_v52, %v7847_v30  ;;  %v9103_v61 = vld [vmem:[%s10441_s12 + $0x14] sm:$0xf] }
 0x481   : > { %v2911_v36 = vadd.f32 %v9684_v49, %v2910_v34  ;;  %v7856_v29 = vor.u32 %v9108_v35, %v7855_v27  ;;  %v7860_v34 = vor.u32 %v9107_v42, %v7857_v3  ;;  %v7852_v50 = vor.u32 %v9105_v31, %v7849_v19 }
 0x482   : > { %v3307_v13 = vpack.c.bf16 %v3303_v45, %v3288_v59  ;;  %v7844_v28 = vor.u32 %v9103_v61, %v7841_v55  ;;  %v7831_v45 = vld [vmem:[%s10441_s12] sm:$0xf] }
 0x483   : > { %v2915_v17 = vsel %vm2914_vm5, %v9684_v49, %v2911_v36  ;;  %v2698_v60 = vpop.f32.mrf.mxu3  ;;  %3706 = vmatpush.bf16.msrb.mxu2 %v7884_v4  ;;  %v7871_v49 = vld [vmem:[%s10441_s12 + $0x50] sm:$0xf]  ;;  %v9104_v36 = vld [vmem:[%s10441_s12 + $0x14] sm:$0xf0] }
 0x484   : > { %v2920_v58 = vsel %vm2917_vm7, %v2919_v9, %v2915_v17  ;;  %7828 = vmatmul.msk.bf16.gmra.mxu3 %vm2080_vm0, %v3307_v13  ;;  %3648 = vmatpush.bf16.msrb.mxu0 %v7880_v5  ;;  %v7872_v20 = vor.u32 %v9112_v48, %v7871_v49  ;;  %v7840_v9 = vor.u32 %v9104_v36, %v7839_v21 }
 0x485   : > { %v2921_v6 = vmul.f32 %v11364_v44, %v2920_v58  ;;  %v9101_v58 = vld [vmem:[%s10441_s12 + $0x4] sm:$0xf] }
 0x487   : > { %v2983_v23 = vpack.c.bf16 %v2921_v6, %v2906_v54  ;;  %3707 = vmatpush.bf16.msrb.mxu2 %v7876_v14  ;;  %v7833_v6 = vld [vmem:[%s10441_s12 + $0x8] sm:$0xf0]  ;;  %v7832_v54 = vor.u32 %v9102_v53, %v7831_v45  ;;  %v2377_v35 = vpop.f32.mrf.mxu1 }
 0x488   : > { %3649 = vmatpush.bf16.msrb.mxu0 %v7872_v20  ;;  %v7836_v13 = vor.u32 %v9101_v58, %v7833_v6 }
 0x48b   : > { %v2700_v16 = vpop.f32.mrf.mxu3  ;;  %3708 = vmatpush.bf16.msrb.mxu2 %v7868_v62 }
 0x48c   : > { %7818 = vmatmul.msk.bf16.gmra.mxu1 %vm2080_vm0, %v2983_v23  ;;  %v9534_v57 = vpack.i.bf16 %v2700_v16, %v2698_v60  ;;  %3650 = vmatpush.bf16.msrb.mxu0 %v7864_v15 }
 0x48e   : > { %9535 = vrot.lane.b32.xlu1 %v9534_v57, %s10107_s29 }
 0x48f   : > { %3709 = vmatpush.bf16.msrb.mxu2 %v7860_v34 }
 0x490   : > { %3651 = vmatpush.bf16.msrb.mxu0 %v7856_v29 }
 0x493   : > { %v11646_v24 = vpop.f32.mrf.mxu3  ;;  %3710 = vmatpush.bf16.msrb.mxu2 %v7852_v50 }
 0x494   : > { %3652 = vmatpush.bf16.msrb.mxu0 %v7848_v18 }
 0x497   : > { %3711 = vmatpush.bf16.msrb.mxu2 %v7844_v28 }
 0x498   : > { %3653 = vmatpush.bf16.msrb.mxu0 %v7840_v9 }
 0x49b   : > { %v11648_v44 = vpop.f32.mrf.mxu3  ;;  %3712 = vmatpush.bf16.msrb.mxu2 %v7836_v13  ;;  %v9132_v13 = vld [vmem:[%s10441_s12 + $0xf4] sm:$0xf0] }
 0x49c   : > { %3654 = vmatpush.bf16.msrb.mxu0 %v7832_v54  ;;  %v9544_v12 = vpack.i.bf16 %v11648_v44, %v11646_v24  ;;  %v7951_v54 = vld [vmem:[%s10441_s12 + $0xf0] sm:$0xf] }
 0x4b3   : > { %v11667_v26 = vpop.xlane.xlu1 %2851 }
 0x4b4   : > { %9685 = vrcp.f32 %v11667_v26  ;;  %vm2927_vm9 = vweird.f32 %v11667_v26  ;;  %v2933_v63 = vand.u32 2147483648, %v11667_v26  ;;  %v2931_v4 = vand.u32 2147483647, %v11667_v26 }
 0x4b6   : > { %v2934_v14 = vor.u32 1.1754944e-38, %v2933_v63  ;;  %vm2932_vm12 = vcmp.eq.f32.partialorder %v2931_v4, 8.507059e+37  ;;  %v9128_v63 = vld [vmem:[%s10441_s12 + $0xd4] sm:$0xf0]  ;;  %v7937_v4 = vld [vmem:[%s10441_s12 + $0xd8] sm:$0xf0] }
 0x4b9   : > { %v2708_v47 = vpop.f32.mrf.mxu3 }
 0x4ba   : > { %v9686_v17 = vpop.eup %9685 }
 0x4bb   : > { %v2923_v59 = vmul.f32 %v9686_v17, %v11667_v26  ;;  %vm2928_vm8 = vweird.f32 %v9686_v17 }
 0x4bc   : > { %vm11702_vm10 = vmor %vm2927_vm9, %vm2928_vm8 }
 0x4bd   : > { %v2924_v16 = vsub.f32 1.0, %v2923_v59 }
 0x4bf   : > { %v2925_v32 = vmul.f32 %v9686_v17, %v2924_v16 }
 0x4c1   : > { %v2710_v0 = vpop.f32.mrf.mxu3 }
 0x4c2   : > { %v9554_v7 = vpack.i.bf16 %v2710_v0, %v2708_v47  ;;  %v2926_v0 = vadd.f32 %v9686_v17, %v2925_v32 }
 0x4c4   : > { %9555 = vrot.lane.b32.xlu1 %v9554_v7, %s10107_s29  ;;  %v2930_v33 = vsel %vm11702_vm10, %v9686_v17, %v2926_v0  ;;  %v9119_v17 = vld [vmem:[%s10441_s12 + $0x94] sm:$0xf] }
 0x4c5   : > { %v2935_v15 = vsel %vm2932_vm12, %v2934_v14, %v2930_v33  ;;  %v7927_v14 = vld [vmem:[%s10441_s12 + $0xc0] sm:$0xf] }
 0x4c6   : > { %v2936_v3 = vmul.f32 %v11427_v39, %v2935_v15  ;;  %v9125_v15 = vld [vmem:[%s10441_s12 + $0xc4] sm:$0xf] }
 0x4d3   : > { %v11689_v57 = vpop.xlane.xlu2 %2857 }
 0x4d4   : > { %v2963_v39 = vand.u32 2147483648, %v11689_v57  ;;  %vm2957_vm5 = vweird.f32 %v11689_v57  ;;  %v2961_v28 = vand.u32 2147483647, %v11689_v57 }
 0x4d6   : > { %v11687_v23 = vpop.xlane.xlu1 %2860  ;;  %v2964_v58 = vor.u32 1.1754944e-38, %v2963_v39  ;;  %vm2962_vm8 = vcmp.eq.f32.partialorder %v2961_v28, 8.507059e+37  ;;  %v7913_v39 = vld [vmem:[%s10441_s12 + $0xa8] sm:$0xf0] }
 0x4d7   : > { %v3341_v60 = vpop.f32.mrf.mxu3  ;;  %9687 = vrcp.f32 %v11687_v23  ;;  %v2978_v61 = vand.u32 2147483648, %v11687_v23  ;;  %vm2972_vm3 = vweird.f32 %v11687_v23 }
 0x4d9   : > { %v2979_v6 = vor.u32 1.1754944e-38, %v2978_v61 }
 0x4dd   : > { %v11694_v37 = vpop.eup %9687 }
 0x4de   : > { %v2968_v49 = vmul.f32 %v11694_v37, %v11687_v23  ;;  %vm2973_vm1 = vweird.f32 %v11694_v37 }
 0x4df   : > { %v3343_v47 = vpop.f32.mrf.mxu3  ;;  %v2855_v11 = vpop.xlane.xlu0 %2854  ;;  %vm11730_vm4 = vmor %vm2972_vm3, %vm2973_vm1 }
 0x4e0   : > { %v9529_v38 = vpack.i.bf16 %v3343_v47, %v3341_v60  ;;  %9689 = vrcp.f32 %v2855_v11  ;;  %v2948_v20 = vand.u32 2147483648, %v2855_v11  ;;  %v2946_v56 = vand.u32 2147483647, %v2855_v11  ;;  %v2380_v60 = vpop.f32.mrf.mxu1  ;;  %v7953_v47 = vld [vmem:[%s10441_s12 + $0xf8] sm:$0xf0] }
 0x4e1   : > { %9691 = vrcp.f32 %v11689_v57  ;;  %v2969_v2 = vsub.f32 1.0, %v2968_v49  ;;  %vm2942_vm13 = vweird.f32 %v2855_v11 }
 0x4e2   : > { %9530 = vrot.lane.b32.xlu2 %v9529_v38, %s10107_s29  ;;  %v2949_v1 = vor.u32 1.1754944e-38, %v2948_v20  ;;  %vm2947_vm15 = vcmp.eq.f32.partialorder %v2946_v56, 8.507059e+37  ;;  %v9130_v38 = vld [vmem:[%s10441_s12 + $0xe4] sm:$0xf0]  ;;  %v7940_v56 = vor.u32 %v9127_v10, %v7937_v4 }
 0x4e3   : > { %v2970_v42 = vmul.f32 %v11694_v37, %v2969_v2  ;;  %v9126_v2 = vld [vmem:[%s10441_s12 + $0xc4] sm:$0xf0] }
 0x4e5   : > { %v2971_v50 = vadd.f32 %v11694_v37, %v2970_v42 }
 0x4e6   : > { %v9690_v51 = vpop.eup %9689 }
 0x4e7   : > { %v2938_v7 = vmul.f32 %v9690_v51, %v2855_v11  ;;  %v11696_v25 = vpop.eup %9691  ;;  %v3346_v5 = vpop.f32.mrf.mxu3  ;;  %vm2943_vm11 = vweird.f32 %v9690_v51  ;;  %v2975_v45 = vsel %vm11730_vm4, %v11694_v37, %v2971_v50  ;;  %v7943_v11 = vld [vmem:[%s10441_s12 + $0xe0] sm:$0xf]  ;;  %v9129_v37 = vld [vmem:[%s10441_s12 + $0xe4] sm:$0xf] }
 0x4e8   : > { %v2953_v24 = vmul.f32 %v11696_v25, %v11689_v57  ;;  %vm2944_vm14 = vmor %vm2942_vm13, %vm2943_vm11  ;;  %vm2958_vm2 = vweird.f32 %v11696_v25  ;;  %v7952_v57 = vor.u32 %v9132_v13, %v7951_v54  ;;  %v9117_v54 = vld [vmem:[%s10441_s12 + $0x84] sm:$0xf] }
 0x4e9   : > { %v2939_v48 = vsub.f32 1.0, %v2938_v7  ;;  %vm11739_vm6 = vmor %vm2957_vm5, %vm2958_vm2 }
 0x4ea   : > { %9545 = vrot.lane.b32.xlu2 %v9544_v12, %s10107_s29  ;;  %v2954_v43 = vsub.f32 1.0, %v2953_v24  ;;  %3676 = vmatpush.bf16.msrb.mxu1 %v7952_v57  ;;  %v7935_v12 = vld [vmem:[%s10441_s12 + $0xd0] sm:$0xf] }
 0x4eb   : > { %v2940_v44 = vmul.f32 %v9690_v51, %v2939_v48  ;;  %v7936_v24 = vor.u32 %v9128_v63, %v7935_v12 }
 0x4ec   : > { %v2955_v34 = vmul.f32 %v11696_v25, %v2954_v43 }
 0x4ed   : > { %v2941_v40 = vadd.f32 %v9690_v51, %v2940_v44  ;;  %v2382_v44 = vpop.f32.mrf.mxu1 }
 0x4ee   : > { %v2956_v9 = vadd.f32 %v11696_v25, %v2955_v34 }
 0x4ef   : > { %v2945_v62 = vsel %vm2944_vm14, %v9690_v51, %v2941_v40  ;;  %v3348_v26 = vpop.f32.mrf.mxu3  ;;  %v7945_v51 = vld [vmem:[%s10441_s12 + $0xe8] sm:$0xf0] }
 0x4f0   : > { %v2950_v27 = vsel %vm2947_vm15, %v2949_v1, %v2945_v62  ;;  %v9539_v29 = vpack.i.bf16 %v3348_v26, %v3346_v5  ;;  %v2960_v59 = vsel %vm11739_vm6, %v11696_v25, %v2956_v9  ;;  %v7948_v25 = vor.u32 %v9129_v37, %v7945_v51  ;;  %v9120_v9 = vld [vmem:[%s10441_s12 + $0x94] sm:$0xf0] }
 0x4f1   : > { %v2951_v30 = vmul.f32 %v11515_v8, %v2950_v27  ;;  %v2976_v8 = vand.u32 2147483647, %v11687_v23  ;;  %v9131_v23 = vld [vmem:[%s10441_s12 + $0xf4] sm:$0xf]  ;;  %v2965_v0 = vsel %vm2962_vm8, %v2964_v58, %v2960_v59  ;;  %v7928_v62 = vor.u32 %v9126_v2, %v7927_v14  ;;  %v7919_v27 = vld [vmem:[%s10441_s12 + $0xb0] sm:$0xf] }
 0x4f2   : > { %v9526_v52 = vpop.permute.xlu0 %9525  ;;  %9540 = vrot.lane.b32.xlu0 %v9539_v29, %s10107_s29  ;;  %v7956_v32 = vor.u32 %v9131_v23, %v7953_v47  ;;  %v2966_v48 = vmul.f32 %v11482_v46, %v2965_v0  ;;  %v7929_v46 = vld [vmem:[%s10441_s12 + $0xc8] sm:$0xf0]  ;;  %v9123_v29 = vld [vmem:[%s10441_s12 + $0xb4] sm:$0xf]  ;;  %v9118_v59 = vld [vmem:[%s10441_s12 + $0x84] sm:$0xf0] }
 0x4f3   : > { %v9528_v31 = vunpack.i.h.bf16 %v9526_v52  ;;  %v9527_v19 = vunpack.i.l.bf16 %v9526_v52  ;;  %v2984_v18 = vpack.c.bf16 %v2951_v30, %v2936_v3  ;;  %vm2977_vm7 = vcmp.eq.f32.partialorder %v2976_v8, 8.507059e+37  ;;  %v7921_v3 = vld [vmem:[%s10441_s12 + $0xb8] sm:$0xf0]  ;;  %v7903_v8 = vld [vmem:[%s10441_s12 + $0x90] sm:$0xf] }
 0x4f4   : > { %v2980_v16 = vsel %vm2977_vm7, %v2979_v6, %v2975_v45  ;;  %3734 = vmatpush.bf16.msrb.mxu3 %v7956_v32  ;;  %v7932_v26 = vor.u32 %v9125_v15, %v7929_v46  ;;  %v7924_v34 = vor.u32 %v9123_v29, %v7921_v3  ;;  %v7904_v45 = vor.u32 %v9120_v9, %v7903_v8  ;;  %v7895_v6 = vld [vmem:[%s10441_s12 + $0x80] sm:$0xf]  ;;  %v7897_v23 = vld [vmem:[%s10441_s12 + $0x88] sm:$0xf0] }
 0x4f5   : > { %v3426_v21 = vsel %vm2080_vm0, %v2377_v35, %v9528_v31  ;;  %v3425_v36 = vsel %vm2080_vm0, %v2375_v22, %v9527_v19  ;;  %7819 = vmatmul.msk.bf16.gmra.mxu1 %vm2080_vm0, %v2984_v18  ;;  %v7944_v22 = vor.u32 %v9130_v38, %v7943_v11  ;;  %v2981_v7 = vmul.f32 %v11491_v41, %v2980_v16  ;;  %v9124_v35 = vld [vmem:[%s10441_s12 + $0xb4] sm:$0xf0]  ;;  %v7911_v31 = vld [vmem:[%s10441_s12 + $0xa0] sm:$0xf]  ;;  %v9122_v19 = vld [vmem:[%s10441_s12 + $0xa4] sm:$0xf0]  ;;  %v2385_v50 = vpop.f32.mrf.mxu1 }
 0x4f6   : > { %v3441_v55 = vpack.c.bf16 %v3426_v21, %v3425_v36  ;;  %v7920_v52 = vor.u32 %v9124_v35, %v7919_v27  ;;  %v7912_v18 = vor.u32 %v9122_v19, %v7911_v31  ;;  %v9121_v36 = vld [vmem:[%s10441_s12 + $0xa4] sm:$0xf]  ;;  %v7896_v13 = vor.u32 %v9118_v59, %v7895_v6  ;;  %v9727_v6 = vld [vmem:[#allocation2 + $0x30] sm:$0xff] }
 0x4f7   : > { %v3351_v5 = vpop.f32.mrf.mxu3  ;;  %3677 = vmatpush.bf16.msrb.mxu1 %v7944_v22  ;;  %v2985_v41 = vpack.c.bf16 %v2981_v7, %v2966_v48  ;;  %v7900_v57 = vor.u32 %v9117_v54, %v7897_v23  ;;  %v9728_v54 = vld [vmem:[#allocation2] sm:$0xff] }
 0x4f8   : > { %3655 = vmatmul.bf16.vlgmr.msrb.gmra.mxu0 %v3441_v55  ;;  %3713 = vmatmul.bf16.vlgmr.msrb.gmra.mxu2 %v3441_v55  ;;  %v7916_v55 = vor.u32 %v9121_v36, %v7913_v39  ;;  %v3481_v36 = vld [vmem:[%s10446_s5] sm:$0x3]  ;;  %s13883_s5 = scalar_lea.vmem [#allocation8], %s10395_s13 }
 0x4f9   : > { %3735 = vmatpush.bf16.msrb.mxu3 %v7948_v25  ;;  %v11798_v8 = vperm.slane %v3481_v36, 0  ;;  %v11800_v9 = vperm.slane %v3481_v36, 1 }
 0x4fb   : > { %3678 = vmatpush.bf16.msrb.mxu1 %v7936_v24 }
 0x4fd   : > { %3736 = vmatpush.bf16.msrb.mxu3 %v7940_v56  ;;  %v2387_v53 = vpop.f32.mrf.mxu1 }
 0x4ff   : > { %v3353_v42 = vpop.f32.mrf.mxu3  ;;  %3679 = vmatpush.bf16.msrb.mxu1 %v7928_v62 }
 0x500   : > { %v9536_v49 = vpop.permute.xlu1 %9535  ;;  %v9549_v30 = vpack.i.bf16 %v3353_v42, %v3351_v5 }
 0x501   : > { %v9538_v33 = vunpack.i.h.bf16 %v9536_v49  ;;  %v9537_v20 = vunpack.i.l.bf16 %v9536_v49  ;;  %3737 = vmatpush.bf16.msrb.mxu3 %v7932_v26 }
 0x502   : > { %9550 = vrot.lane.b32.xlu0 %v9549_v30, %s10107_s29 }
 0x503   : > { %v3427_v40 = vsel %vm2080_vm0, %v2380_v60, %v9537_v20  ;;  %v3428_v1 = vsel %vm2080_vm0, %v2382_v44, %v9538_v33  ;;  %3680 = vmatpush.bf16.msrb.mxu1 %v7920_v52  ;;  %v7905_v60 = vld [vmem:[%s10441_s12 + $0x98] sm:$0xf0]  ;;  %s13882_s12 = scalar_lea.vmem [#allocation7], %s10395_s13 }
 0x504   : > { %v3443_v43 = vpack.c.bf16 %v3428_v1, %v3427_v40  ;;  %v7908_v58 = vor.u32 %v9119_v17, %v7905_v60 }
 0x505   : > { %7820 = vmatmul.msk.bf16.gmra.mxu1 %vm2080_vm0, %v2985_v41  ;;  %3738 = vmatpush.bf16.msrb.mxu3 %v7924_v34  ;;  %v2390_v16 = vpop.f32.mrf.mxu1 }
 0x507   : > { %v3356_v21 = vpop.f32.mrf.mxu3  ;;  %3681 = vmatpush.bf16.msrb.mxu1 %v7912_v18 }
 0x508   : > { %3660 = vmatmul.bf16.gmra.mxu0 %v3443_v43  ;;  %3718 = vmatmul.bf16.gmra.mxu2 %v3443_v43 }
 0x509   : > { %3739 = vmatpush.bf16.msrb.mxu3 %v7916_v55 }
 0x50b   : > { %3682 = vmatpush.bf16.msrb.mxu1 %v7904_v45 }
 0x50d   : > { %3740 = vmatpush.bf16.msrb.mxu3 %v7908_v58  ;;  %v2392_v47 = vpop.f32.mrf.mxu1 }
 0x50f   : > { %v3358_v61 = vpop.f32.mrf.mxu3  ;;  %3683 = vmatpush.bf16.msrb.mxu1 %v7896_v13 }
 0x510   : > { %v9559_v28 = vpack.i.bf16 %v3358_v61, %v3356_v21 }
 0x511   : > { %3741 = vmatpush.bf16.msrb.mxu3 %v7900_v57 }
 0x512   : > { %9560 = vrot.lane.b32.xlu2 %v9559_v28, %s10107_s29 }
 0x515   : > { %v3023_v11 = vpop.f32.mrf.mxu1 }
 0x51d   : > { %v3025_v51 = vpop.f32.mrf.mxu1 }
 0x525   : > { %v3028_v41 = vpop.f32.mrf.mxu1 }
 0x52d   : > { %v3030_v40 = vpop.f32.mrf.mxu1 }
 0x536   : > { %v9556_v49 = vpop.permute.xlu1 %9555 }
 0x537   : > { %v9558_v48 = vunpack.i.h.bf16 %v9556_v49  ;;  %v9557_v33 = vunpack.i.l.bf16 %v9556_v49 }
 0x539   : > { %v3431_v20 = vsel %vm2080_vm0, %v2390_v16, %v9557_v33  ;;  %v3432_v24 = vsel %vm2080_vm0, %v2392_v47, %v9558_v48 }
 0x53a   : > { %v3447_v44 = vpack.c.bf16 %v3432_v24, %v3431_v20  ;;  %v9731_v24 = vld [vmem:[#allocation2 + $0x50] sm:$0xff] }
 0x53c   : > { %v9531_v38 = vpop.permute.xlu2 %9530 }
 0x53d   : > { %v9533_v32 = vunpack.i.h.bf16 %v9531_v38  ;;  %v9532_v37 = vunpack.i.l.bf16 %v9531_v38 }
 0x53f   : > { %v3434_v0 = vsel %vm2080_vm0, %v3025_v51, %v9533_v32  ;;  %v3433_v22 = vsel %vm2080_vm0, %v3023_v11, %v9532_v37  ;;  %v9729_v51 = vld [vmem:[#allocation2 + $0x58] sm:$0xff] }
 0x540   : > { %v3442_v7 = vpack.c.bf16 %v3434_v0, %v3433_v22  ;;  %v9730_v22 = vld [vmem:[#allocation2 + $0x18] sm:$0xff] }
 0x542   : > { %3684 = vmatmul.bf16.vlgmr.msrb.gmra.mxu1 %v3442_v7  ;;  %3742 = vmatmul.bf16.vlgmr.msrb.gmra.mxu3 %v3442_v7 }
 0x544   : > { %v9546_v25 = vpop.permute.xlu2 %9545 }
 0x545   : > { %v9548_v12 = vunpack.i.h.bf16 %v9546_v25  ;;  %v9547_v63 = vunpack.i.l.bf16 %v9546_v25 }
 0x547   : > { %v3429_v5 = vsel %vm2080_vm0, %v2385_v50, %v9547_v63  ;;  %v3430_v10 = vsel %vm2080_vm0, %v2387_v53, %v9548_v12 }
 0x548   : > { %v3445_v4 = vpack.c.bf16 %v3430_v10, %v3429_v5 }
 0x54a   : > { %3665 = vmatmul.bf16.gmra.mxu0 %v3445_v4  ;;  %3723 = vmatmul.bf16.gmra.mxu2 %v3445_v4 }
 0x55a   : > { %3670 = vmatmul.bf16.gmra.mxu0 %v3447_v44  ;;  %3728 = vmatmul.bf16.gmra.mxu2 %v3447_v44 }
 0x564   : > { %v9541_v56 = vpop.permute.xlu0 %9540 }
 0x565   : > { %v9543_v14 = vunpack.i.h.bf16 %v9541_v56  ;;  %v9542_v2 = vunpack.i.l.bf16 %v9541_v56 }
 0x567   : > { %v3435_v1 = vsel %vm2080_vm0, %v3028_v41, %v9542_v2  ;;  %v3436_v15 = vsel %vm2080_vm0, %v3030_v40, %v9543_v14  ;;  %v9732_v41 = vld [vmem:[#allocation2 + $0x68] sm:$0xff] }
 0x568   : > { %v3444_v46 = vpack.c.bf16 %v3436_v15, %v3435_v1 }
 0x56a   : > { %3689 = vmatmul.bf16.gmra.mxu1 %v3444_v46  ;;  %3747 = vmatmul.bf16.gmra.mxu3 %v3444_v46 }
 0x56c   : > { %v9561_v52 = vpop.permute.xlu2 %9560 }
 0x56d   : > { %v9563_v34 = vunpack.i.h.bf16 %v9561_v52  ;;  %v9562_v19 = vunpack.i.l.bf16 %v9561_v52 }
 0x572   : > { %v3033_v43 = vpop.f32.mrf.mxu1 }
 0x574   : > { %v9551_v26 = vpop.permute.xlu0 %9550 }
 0x575   : > { %v9553_v27 = vunpack.i.h.bf16 %v9551_v26  ;;  %v9552_v35 = vunpack.i.l.bf16 %v9551_v26  ;;  %v3656_v39 = vpop.f32.mrf.mxu0  ;;  %v9733_v26 = vld [vmem:[#allocation2 + $0x8] sm:$0xff] }
 0x576   : > { %v3657_v17 = vadd.f32 %v3656_v39, %v11798_v8 }
 0x577   : > { %v3437_v42 = vsel %vm2080_vm0, %v3033_v43, %v9552_v35  ;;  %v9734_v35 = vld [vmem:[#allocation2 + $0x48] sm:$0xff] }
 0x57a   : > { %v3035_v62 = vpop.f32.mrf.mxu1 }
 0x57b   : > { %v3438_v29 = vsel %vm2080_vm0, %v3035_v62, %v9553_v27  ;;  %v3714_v61 = vpop.f32.mrf.mxu2 }
 0x57c   : > { %v3446_v3 = vpack.c.bf16 %v3438_v29, %v3437_v42  ;;  %v3715_v60 = vadd.f32 %v3714_v61, %v11800_v9  ;;  %v9735_v61 = vld [vmem:[#allocation2 + $0x40] sm:$0xff] }
 0x57d   : > { %v3658_v58 = vpop.f32.mrf.mxu0 }
 0x57e   : > { %3694 = vmatmul.bf16.gmra.mxu1 %v3446_v3  ;;  %3752 = vmatmul.bf16.gmra.mxu3 %v3446_v3  ;;  %v3659_v57 = vadd.f32 %v3658_v58, %v11798_v8 }
 0x582   : > { %v3038_v30 = vpop.f32.mrf.mxu1 }
 0x583   : > { %v3439_v50 = vsel %vm2080_vm0, %v3038_v30, %v9562_v19  ;;  %v3716_v23 = vpop.f32.mrf.mxu2 }
 0x584   : > { %v3717_v11 = vadd.f32 %v3716_v23, %v11800_v9 }
 0x585   : > { %v3661_v12 = vpop.f32.mrf.mxu0 }
 0x586   : > { %v3662_v10 = vadd.f32 %v3661_v12, %v11798_v8 }
 0x58a   : > { %v3040_v31 = vpop.f32.mrf.mxu1 }
 0x58b   : > { %v3440_v18 = vsel %vm2080_vm0, %v3040_v31, %v9563_v34  ;;  %v3719_v63 = vpop.f32.mrf.mxu2 }
 0x58c   : > { %v3448_v21 = vpack.c.bf16 %v3440_v18, %v3439_v50  ;;  %v3720_v4 = vadd.f32 %v3719_v63, %v11800_v9 }
 0x58d   : > { %v3663_v20 = vpop.f32.mrf.mxu0 }
 0x58e   : > { %3699 = vmatmul.bf16.gmra.mxu1 %v3448_v21  ;;  %3757 = vmatmul.bf16.gmra.mxu3 %v3448_v21  ;;  %v3664_v40 = vadd.f32 %v3663_v20, %v11798_v8 }
 0x593   : > { %v3721_v14 = vpop.f32.mrf.mxu2 }
 0x594   : > { %v3722_v15 = vadd.f32 %v3721_v14, %v11800_v9 }
 0x5bf   : > { %v3685_v55 = vpop.f32.mrf.mxu1 }
 0x5c0   : > { %v3686_v28 = vadd.f32 %v3685_v55, %v3657_v17  ;;  %v9736_v17 = vld [vmem:[#allocation2 + $0x20] sm:$0xff] }
 0x5c2   : > { %v11804_v59 = vadd.f32 %v9727_v6, %v3686_v28 }
 0x5c5   : > { %v3743_v45 = vpop.f32.mrf.mxu3 }
 0x5c6   : > { %v3744_v53 = vadd.f32 %v3743_v45, %v3715_v60 }
 0x5c7   : > { %v3687_v16 = vpop.f32.mrf.mxu1  ;;  %v3666_v29 = vpop.f32.mrf.mxu0 }
 0x5c8   : > { %v11806_v13 = vadd.f32 %v9728_v54, %v3744_v53  ;;  %v3688_v38 = vadd.f32 %v3687_v16, %v3659_v57  ;;  %v3667_v34 = vadd.f32 %v3666_v29, %v11798_v8 }
 0x5ca   : > { %v3781_v47 = vadd.f32 %v11806_v13, %v11804_v59  ;;  %v11812_v0 = vadd.f32 %v9729_v51, %v3688_v38  ;;  %v9738_v38 = vld [vmem:[#allocation2 + $0x38] sm:$0xff] }
 0x5cc   : > { %3782 = vadd.xlane.f32.xlu0 %v3781_v47  ;;  %v9737_v47 = vld [vmem:[#allocation2 + $0x10] sm:$0xff] }
 0x5cd   : > { %v3745_v32 = vpop.f32.mrf.mxu3  ;;  %v3724_v30 = vpop.f32.mrf.mxu2 }
 0x5ce   : > { %v3746_v37 = vadd.f32 %v3745_v32, %v3717_v11  ;;  %v3725_v19 = vadd.f32 %v3724_v30, %v11800_v9 }
 0x5cf   : > { %v3668_v31 = vpop.f32.mrf.mxu0 }
 0x5d0   : > { %v11814_v7 = vadd.f32 %v9730_v22, %v3746_v37  ;;  %v3669_v28 = vadd.f32 %v3668_v31, %v11798_v8 }
 0x5d2   : > { %v3784_v25 = vadd.f32 %v11814_v7, %v11812_v0 }
 0x5d4   : > { %3785 = vadd.xlane.f32.xlu1 %v3784_v25 }
 0x5d5   : > { %v3726_v50 = vpop.f32.mrf.mxu2 }
 0x5d6   : > { %v3727_v53 = vadd.f32 %v3726_v50, %v11800_v9 }
 0x5d7   : > { %v3671_v6 = vpop.f32.mrf.mxu0 }
 0x5d8   : > { %v3672_v37 = vadd.f32 %v3671_v6, %v11798_v8 }
 0x5dd   : > { %v3729_v16 = vpop.f32.mrf.mxu2 }
 0x5de   : > { %v3730_v22 = vadd.f32 %v3729_v16, %v11800_v9 }
 0x5e7   : > { %v3690_v5 = vpop.f32.mrf.mxu1 }
 0x5e8   : > { %v3691_v49 = vadd.f32 %v3690_v5, %v3662_v10  ;;  %v3673_v5 = vpop.f32.mrf.mxu0  ;;  %v9739_v10 = vld [vmem:[#allocation2 + $0x60] sm:$0xff] }
 0x5ea   : > { %v11820_v44 = vadd.f32 %v9731_v24, %v3691_v49  ;;  %v9740_v49 = vld [vmem:[#allocation2 + $0x70] sm:$0xff]  ;;  %v3674_v24 = vadd.f32 %v3673_v5, %v11798_v8 }
 0x5ed   : > { %v3748_v48 = vpop.f32.mrf.mxu3 }
 0x5ee   : > { %v3749_v33 = vadd.f32 %v3748_v48, %v3720_v4 }
 0x5ef   : > { %v3692_v2 = vpop.f32.mrf.mxu1 }
 0x5f0   : > { %v11822_v56 = vadd.f32 %v9732_v41, %v3749_v33  ;;  %v3693_v46 = vadd.f32 %v3692_v2, %v3664_v40  ;;  %v3731_v33 = vpop.f32.mrf.mxu2 }
 0x5f1   : > { %v3732_v14 = vadd.f32 %v3731_v33, %v11800_v9 }
 0x5f2   : > { %v3787_v1 = vadd.f32 %v11822_v56, %v11820_v44  ;;  %v11828_v27 = vadd.f32 %v9733_v26, %v3693_v46 }
 0x5f4   : > { %3788 = vadd.xlane.f32.xlu2 %v3787_v1 }
 0x5f5   : > { %v3750_v43 = vpop.f32.mrf.mxu3 }
 0x5f6   : > { %v3751_v62 = vadd.f32 %v3750_v43, %v3722_v15  ;;  %v9741_v15 = vld [vmem:[#allocation2 + $0x78] sm:$0xff]  ;;  %v9742_v43 = vld [vmem:[#allocation2 + $0x28] sm:$0xff] }
 0x5f8   : > { %v11830_v42 = vadd.f32 %v9734_v35, %v3751_v62  ;;  %v10108_v35 = vmov 256.0  }
 0x5f9   : > { %9693 = vrcp.f32 %v10108_v35 }
 0x5fa   : > { %v3790_v3 = vadd.f32 %v11830_v42, %v11828_v27 }
 0x5fb   : > { %v3695_v52 = vpop.f32.mrf.mxu1 }
 0x5fc   : > { %3791 = vadd.xlane.f32.xlu0 %v3790_v3  ;;  %v3696_v18 = vadd.f32 %v3695_v52, %v3667_v34 }
 0x5fe   : > { %v11836_v55 = vadd.f32 %v9735_v61, %v3696_v18 }
 0x5ff   : > { %v9694_v8 = vpop.eup %9693 }
 0x600   : > { %v3806_v29 = vmul.f32 256.0, %v9694_v8  ;;  %vm3810_vm0 = vweird.f32 %v9694_v8 }
 0x601   : > { %v3753_v21 = vpop.f32.mrf.mxu3 }
 0x602   : > { %v3754_v36 = vadd.f32 %v3753_v21, %v3725_v19  ;;  %v3807_v3 = vsub.f32 1.0, %v3806_v29  ;;  %v9193_v29 = vld [vmem:[%s10403_s24 + $0x1dc] sm:$0xf0] }
 0x603   : > { %v3697_v39 = vpop.f32.mrf.mxu1 }
 0x604   : > { %v11838_v60 = vadd.f32 %v9736_v17, %v3754_v36  ;;  %v3698_v58 = vadd.f32 %v3697_v39, %v3669_v28  ;;  %v3808_v9 = vmul.f32 %v9694_v8, %v3807_v3  ;;  %v8439_v3 = vld [vmem:[%s10403_s24 + $0x3c0] sm:$0xf] }
 0x606   : > { %v3793_v45 = vadd.f32 %v11838_v60, %v11836_v55  ;;  %v11844_v11 = vadd.f32 %v9737_v47, %v3698_v58  ;;  %v3809_v30 = vadd.f32 %v9694_v8, %v3808_v9  ;;  %v9257_v9 = vld [vmem:[%s10403_s24 + $0x3dc] sm:$0xf0] }
 0x608   : > { %3794 = vadd.xlane.f32.xlu1 %v3793_v45  ;;  %v11866_v52 = vsel %vm3810_vm0, %v9694_v8, %v3809_v30  ;;  %v8183_v8 = vld [vmem:[%s10403_s24 + $0x1c0] sm:$0xf]  ;;  %v9189_v30 = vld [vmem:[%s10403_s24 + $0x1c4] sm:$0xf] }
 0x609   : > { %v3755_v54 = vpop.f32.mrf.mxu3  ;;  %13881 = vst [vmem:[#allocation30_spill] sm:$0xff] %v11866_v52 }
 0x60a   : > { %v3756_v23 = vadd.f32 %v3755_v54, %v3727_v53 }
 0x60b   : > { %v3700_v57 = vpop.f32.mrf.mxu1 }
 0x60c   : > { %v11846_v32 = vadd.f32 %v9738_v38, %v3756_v23  ;;  %v3701_v25 = vadd.f32 %v3700_v57, %v3672_v37 }
 0x60e   : > { %v3796_v51 = vadd.f32 %v11846_v32, %v11844_v11  ;;  %v11852_v4 = vadd.f32 %v9739_v10, %v3701_v25 }
 0x610   : > { %3797 = vadd.xlane.f32.xlu2 %v3796_v51 }
 0x611   : > { %v3758_v12 = vpop.f32.mrf.mxu3 }
 0x612   : > { %v3759_v63 = vadd.f32 %v3758_v12, %v3730_v22 }
 0x613   : > { %v3702_v20 = vpop.f32.mrf.mxu1 }
 0x614   : > { %v11854_v48 = vadd.f32 %v9740_v49, %v3759_v63  ;;  %v3703_v2 = vadd.f32 %v3702_v20, %v3674_v24 }
 0x616   : > { %v3799_v41 = vadd.f32 %v11854_v48, %v11852_v4  ;;  %v11860_v46 = vadd.f32 %v9741_v15, %v3703_v2 }
 0x618   : > { %3800 = vadd.xlane.f32.xlu0 %v3799_v41 }
 0x619   : > { %v3760_v40 = vpop.f32.mrf.mxu3 }
 0x61a   : > { %v3761_v1 = vadd.f32 %v3760_v40, %v3732_v14 }
 0x61c   : > { %v11862_v62 = vadd.f32 %v9742_v43, %v3761_v1 }
 0x61e   : > { %v3802_v26 = vadd.f32 %v11862_v62, %v11860_v46 }
 0x620   : > { %3803 = vadd.xlane.f32.xlu1 %v3802_v26 }
 0x63f   : > { %v3783_v34 = vpop.xlane.xlu0 %3782 }
 0x640   : > { %v3812_v31 = vmul.f32 %v11866_v52, %v3783_v34  ;;  %v8440_v34 = vor.u32 %v9257_v9, %v8439_v3  ;;  %v9161_v3 = vld [vmem:[%s10403_s24 + $0xdc] sm:$0xf0] }
 0x642   : > { %v11870_v19 = vsub.f32 %v11804_v59, %v3812_v31  ;;  %v11873_v18 = vsub.f32 %v11806_v13, %v3812_v31  ;;  %4853 = vmatpush.bf16.msra.mxu1 %v8440_v34  ;;  %v8057_v34 = vld [vmem:[%s10403_s24 + $0xe0] sm:$0xf0] }
 0x644   : > { %v3836_v50 = vmul.f32 %v11870_v19, %v11870_v19  ;;  %v3837_v21 = vmul.f32 %v11873_v18, %v11873_v18 }
 0x646   : > { %v3852_v36 = vadd.f32 %v3837_v21, %v3836_v50  ;;  %v9253_v50 = vld [vmem:[%s10403_s24 + $0x3c4] sm:$0xf] }
 0x647   : > { %v3786_v39 = vpop.xlane.xlu1 %3785  ;;  %v8441_v21 = vld [vmem:[%s10403_s24 + $0x3e0] sm:$0xf0] }
 0x648   : > { %v3813_v61 = vmul.f32 %v11866_v52, %v3786_v39  ;;  %3853 = vadd.xlane.f32.xlu2 %v3852_v36  ;;  %v8444_v36 = vor.u32 %v9253_v50, %v8441_v21  ;;  %v8151_v39 = vld [vmem:[%s10403_s24 + $0x180] sm:$0xf] }
 0x64a   : > { %v11881_v17 = vsub.f32 %v11812_v0, %v3813_v61  ;;  %v11884_v59 = vsub.f32 %v11814_v7, %v3813_v61  ;;  %v9185_v61 = vld [vmem:[%s10403_s24 + $0x19c] sm:$0xf0]  ;;  %4911 = vmatpush.bf16.msra.mxu3 %v8444_v36  ;;  %v9221_v36 = vld [vmem:[%s10403_s24 + $0x2c4] sm:$0xf] }
 0x64c   : > { %v3838_v13 = vmul.f32 %v11881_v17, %v11881_v17  ;;  %v3839_v28 = vmul.f32 %v11884_v59, %v11884_v59 }
 0x64e   : > { %v3855_v45 = vadd.f32 %v3839_v28, %v3838_v13  ;;  %v8407_v13 = vld [vmem:[%s10403_s24 + $0x380] sm:$0xf]  ;;  %v8152_v28 = vor.u32 %v9185_v61, %v8151_v39  ;;  %v8313_v39 = vld [vmem:[%s10403_s24 + $0x2e0] sm:$0xf0] }
 0x650   : > { %3856 = vadd.xlane.f32.xlu0 %v3855_v45  ;;  %v9249_v45 = vld [vmem:[%s10403_s24 + $0x39c] sm:$0xf0] }
 0x667   : > { %v3789_v53 = vpop.xlane.xlu2 %3788 }
 0x668   : > { %v3814_v58 = vmul.f32 %v11866_v52, %v3789_v53  ;;  %v9181_v53 = vld [vmem:[%s10403_s24 + $0x184] sm:$0xf] }
 0x66a   : > { %v11892_v6 = vsub.f32 %v11820_v44, %v3814_v58  ;;  %v11895_v0 = vsub.f32 %v11822_v56, %v3814_v58  ;;  %v8153_v58 = vld [vmem:[%s10403_s24 + $0x1a0] sm:$0xf0] }
 0x66c   : > { %v3840_v7 = vmul.f32 %v11892_v6, %v11892_v6  ;;  %v3841_v54 = vmul.f32 %v11895_v0, %v11895_v0 }
 0x66e   : > { %v3858_v23 = vadd.f32 %v3841_v54, %v3840_v7  ;;  %v8408_v7 = vor.u32 %v9249_v45, %v8407_v13  ;;  %v8156_v54 = vor.u32 %v9181_v53, %v8153_v58  ;;  %v8316_v13 = vor.u32 %v9221_v36, %v8313_v39  ;;  %v9153_v45 = vld [vmem:[%s10403_s24 + $0x9c] sm:$0xf0] }
 0x66f   : > { %v3792_v16 = vpop.xlane.xlu0 %3791  ;;  %v8279_v53 = vld [vmem:[%s10403_s24 + $0x280] sm:$0xf] }
 0x670   : > { %v3815_v57 = vmul.f32 %v11866_v52, %v3792_v16  ;;  %3859 = vadd.xlane.f32.xlu1 %v3858_v23  ;;  %v9245_v23 = vld [vmem:[%s10403_s24 + $0x384] sm:$0xf]  ;;  %4854 = vmatpush.bf16.msra.mxu1 %v8408_v7 }
 0x671   : > { %v8409_v16 = vld [vmem:[%s10403_s24 + $0x3a0] sm:$0xf0] }
 0x672   : > { %v11903_v47 = vsub.f32 %v11828_v27, %v3815_v57  ;;  %v11906_v44 = vsub.f32 %v11830_v42, %v3815_v57  ;;  %v8412_v57 = vor.u32 %v9245_v23, %v8409_v16  ;;  %v9149_v23 = vld [vmem:[%s10403_s24 + $0x84] sm:$0xf] }
 0x674   : > { %v3842_v56 = vmul.f32 %v11903_v47, %v11903_v47  ;;  %v3843_v38 = vmul.f32 %v11906_v44, %v11906_v44  ;;  %4912 = vmatpush.bf16.msra.mxu3 %v8412_v57  ;;  %v8025_v57 = vld [vmem:[%s10403_s24 + $0xa0] sm:$0xf0] }
 0x676   : > { %v3861_v37 = vadd.f32 %v3843_v38, %v3842_v56  ;;  %v8119_v56 = vld [vmem:[%s10403_s24 + $0x140] sm:$0xf] }
 0x677   : > { %v9177_v38 = vld [vmem:[%s10403_s24 + $0x15c] sm:$0xf0] }
 0x678   : > { %3862 = vadd.xlane.f32.xlu2 %v3861_v37  ;;  %v8375_v37 = vld [vmem:[%s10403_s24 + $0x340] sm:$0xf] }
 0x67b   : > { %v3795_v51 = vpop.xlane.xlu1 %3794 }
 0x67c   : > { %v3816_v22 = vmul.f32 %v11866_v52, %v3795_v51  ;;  %v8120_v51 = vor.u32 %v9177_v38, %v8119_v56  ;;  %v9213_v56 = vld [vmem:[%s10403_s24 + $0x284] sm:$0xf] }
 0x67d   : > { %v8281_v38 = vld [vmem:[%s10403_s24 + $0x2a0] sm:$0xf0] }
 0x67e   : > { %v11914_v25 = vsub.f32 %v11836_v55, %v3816_v22  ;;  %v11917_v27 = vsub.f32 %v11838_v60, %v3816_v22  ;;  %v9241_v22 = vld [vmem:[%s10403_s24 + $0x35c] sm:$0xf0] }
 0x680   : > { %v3844_v42 = vmul.f32 %v11914_v25, %v11914_v25  ;;  %v3845_v12 = vmul.f32 %v11917_v27, %v11917_v27 }
 0x682   : > { %v3864_v63 = vadd.f32 %v3845_v12, %v3844_v42  ;;  %v9173_v42 = vld [vmem:[%s10403_s24 + $0x144] sm:$0xf] }
 0x683   : > { %v3798_v5 = vpop.xlane.xlu2 %3797  ;;  %v8121_v12 = vld [vmem:[%s10403_s24 + $0x160] sm:$0xf0] }
 0x684   : > { %v3817_v10 = vmul.f32 %v11866_v52, %v3798_v5  ;;  %3865 = vadd.xlane.f32.xlu0 %v3864_v63  ;;  %v8376_v63 = vor.u32 %v9241_v22, %v8375_v37  ;;  %v8124_v5 = vor.u32 %v9173_v42, %v8121_v12  ;;  %v8028_v37 = vor.u32 %v9149_v23, %v8025_v57  ;;  %v7991_v22 = vld [vmem:[%s10403_s24 + $0x40] sm:$0xf] }
 0x685   : > { %v9145_v42 = vld [vmem:[%s10403_s24 + $0x5c] sm:$0xf0] }
 0x686   : > { %v11925_v49 = vsub.f32 %v11844_v11, %v3817_v10  ;;  %v11928_v55 = vsub.f32 %v11846_v32, %v3817_v10  ;;  %v9237_v10 = vld [vmem:[%s10403_s24 + $0x344] sm:$0xf]  ;;  %4855 = vmatpush.bf16.msra.mxu1 %v8376_v63  ;;  %v8247_v12 = vld [vmem:[%s10403_s24 + $0x240] sm:$0xf]  ;;  %v7992_v63 = vor.u32 %v9145_v42, %v7991_v22 }
 0x688   : > { %v3846_v60 = vmul.f32 %v11925_v49, %v11925_v49  ;;  %v3847_v33 = vmul.f32 %v11928_v55, %v11928_v55 }
 0x68a   : > { %v3867_v20 = vadd.f32 %v3847_v33, %v3846_v60  ;;  %v8377_v60 = vld [vmem:[%s10403_s24 + $0x360] sm:$0xf0] }
 0x68b   : > { %v3801_v24 = vpop.xlane.xlu0 %3800  ;;  %v8380_v33 = vor.u32 %v9237_v10, %v8377_v60  ;;  %v9141_v10 = vld [vmem:[%s10403_s24 + $0x44] sm:$0xf] }
 0x68c   : > { %v3818_v41 = vmul.f32 %v11866_v52, %v3801_v24  ;;  %3868 = vadd.xlane.f32.xlu1 %v3867_v20  ;;  %v8087_v20 = vld [vmem:[%s10403_s24 + $0x100] sm:$0xf]  ;;  %v7993_v60 = vld [vmem:[%s10403_s24 + $0x60] sm:$0xf0] }
 0x68d   : > { %v9169_v24 = vld [vmem:[%s10403_s24 + $0x11c] sm:$0xf0]  ;;  %4913 = vmatpush.bf16.msra.mxu3 %v8380_v33 }
 0x68e   : > { %v11936_v14 = vsub.f32 %v11852_v4, %v3818_v41  ;;  %v11939_v11 = vsub.f32 %v11854_v48, %v3818_v41  ;;  %v8343_v41 = vld [vmem:[%s10403_s24 + $0x300] sm:$0xf] }
 0x690   : > { %v3848_v32 = vmul.f32 %v11936_v14, %v11936_v14  ;;  %v3849_v2 = vmul.f32 %v11939_v11, %v11939_v11 }
 0x692   : > { %v3870_v40 = vadd.f32 %v3849_v2, %v3848_v32  ;;  %v8088_v32 = vor.u32 %v9169_v24, %v8087_v20  ;;  %v9233_v2 = vld [vmem:[%s10403_s24 + $0x31c] sm:$0xf0]  ;;  %v7996_v20 = vor.u32 %v9141_v10, %v7993_v60  ;;  %v9205_v24 = vld [vmem:[%s10403_s24 + $0x244] sm:$0xf] }
 0x693   : > { %v3804_v1 = vpop.xlane.xlu1 %3803 }
 0x694   : > { %v3819_v15 = vmul.f32 %v11866_v52, %v3804_v1  ;;  %3871 = vadd.xlane.f32.xlu2 %v3870_v40  ;;  %v9165_v40 = vld [vmem:[%s10403_s24 + $0x104] sm:$0xf] }
 0x695   : > { %v8089_v1 = vld [vmem:[%s10403_s24 + $0x120] sm:$0xf0] }
 0x696   : > { %v11947_v4 = vsub.f32 %v11860_v46, %v3819_v15  ;;  %v11950_v48 = vsub.f32 %v11862_v62, %v3819_v15  ;;  %v8184_v46 = vor.u32 %v9193_v29, %v8183_v8  ;;  %v8185_v62 = vld [vmem:[%s10403_s24 + $0x1e0] sm:$0xf0]  ;;  %v8344_v15 = vor.u32 %v9233_v2, %v8343_v41  ;;  %v8055_v29 = vld [vmem:[%s10403_s24 + $0xc0] sm:$0xf] }
 0x697   : > { %v8188_v31 = vor.u32 %v9189_v30, %v8185_v62  ;;  %v8056_v9 = vor.u32 %v9161_v3, %v8055_v29  ;;  %v9225_v30 = vld [vmem:[%s10403_s24 + $0x2dc] sm:$0xf0]  ;;  %v9157_v62 = vld [vmem:[%s10403_s24 + $0xc4] sm:$0xf] }
 0x698   : > { %v3850_v43 = vmul.f32 %v11947_v4, %v11947_v4  ;;  %v3851_v26 = vmul.f32 %v11950_v48, %v11950_v48  ;;  %4824 = vmatpush.bf16.msra.mxu0 %v8184_v46  ;;  %4856 = vmatpush.bf16.msra.mxu1 %v8344_v15  ;;  %v8311_v46 = vld [vmem:[%s10403_s24 + $0x2c0] sm:$0xf]  ;;  %v8060_v21 = vor.u32 %v9157_v62, %v8057_v34  ;;  %v8249_v41 = vld [vmem:[%s10403_s24 + $0x260] sm:$0xf0] }
 0x699   : > { %4882 = vmatpush.bf16.msra.mxu2 %v8188_v31  ;;  %v8312_v50 = vor.u32 %v9225_v30, %v8311_v46  ;;  %v8215_v15 = vld [vmem:[%s10403_s24 + $0x200] sm:$0xf]  ;;  %v7961_v29 = vld [vmem:[%s10403_s24 + $0x20] sm:$0xf0] }
 0x69a   : > { %v3873_v35 = vadd.f32 %v3851_v26, %v3850_v43  ;;  %v8092_v43 = vor.u32 %v9165_v40, %v8089_v1  ;;  %v9229_v26 = vld [vmem:[%s10403_s24 + $0x304] sm:$0xf]  ;;  %v8252_v40 = vor.u32 %v9205_v24, %v8249_v41  ;;  %v9137_v1 = vld [vmem:[%s10403_s24 + $0x1c] sm:$0xf0] }
 0x69b   : > { %v9197_v3 = vld [vmem:[%s10403_s24 + $0x204] sm:$0xf] }
 0x69c   : > { %3874 = vadd.xlane.f32.xlu0 %v3873_v35  ;;  %4825 = vmatpush.bf16.msra.mxu0 %v8152_v28  ;;  %v8345_v35 = vld [vmem:[%s10403_s24 + $0x320] sm:$0xf0]  ;;  %v8023_v28 = vld [vmem:[%s10403_s24 + $0x80] sm:$0xf] }
 0x69d   : > { %4883 = vmatpush.bf16.msra.mxu2 %v8156_v54  ;;  %v8348_v8 = vor.u32 %v9229_v26, %v8345_v35  ;;  %4857 = vmatpush.bf16.msra.mxu1 %v8312_v50  ;;  %v8024_v7 = vor.u32 %v9153_v45, %v8023_v28  ;;  %v9217_v54 = vld [vmem:[%s10403_s24 + $0x29c] sm:$0xf0] }
 0x69e   : > { %v8280_v16 = vor.u32 %v9217_v54, %v8279_v53  ;;  %v3779_v53 = vld [vmem:[%s13882_s12] sm:$0x3] }
 0x69f   : > { %4914 = vmatpush.bf16.msra.mxu3 %v8348_v8  ;;  %v9133_v8 = vld [vmem:[%s10403_s24 + $0x4] sm:$0xf]  ;;  %v12031_v57 = vperm.slane %v3779_v53, 0 }
 0x6a0   : > { %4826 = vmatpush.bf16.msra.mxu0 %v8120_v51  ;;  %v8284_v51 = vor.u32 %v9213_v56, %v8281_v38  ;;  %v7964_v34 = vor.u32 %v9133_v8, %v7961_v29  ;;  %v12033_v56 = vperm.slane %v3779_v53, 1 }
 0x6a1   : > { %4884 = vmatpush.bf16.msra.mxu2 %v8124_v5  ;;  %4858 = vmatpush.bf16.msra.mxu1 %v8280_v16  ;;  %v9209_v5 = vld [vmem:[%s10403_s24 + $0x25c] sm:$0xf0]  ;;  %v3780_v16 = vld [vmem:[%s13883_s5] sm:$0x3] }
 0x6a2   : > { %v8248_v33 = vor.u32 %v9209_v5, %v8247_v12  ;;  %v12039_v22 = vperm.slane %v3780_v16, 1 }
 0x6a3   : > { %4915 = vmatpush.bf16.msra.mxu3 %v8316_v13 }
 0x6a4   : > { %4827 = vmatpush.bf16.msra.mxu0 %v8088_v32  ;;  %v7959_v32 = vld [vmem:[%s10403_s24] sm:$0xf] }
 0x6a5   : > { %4885 = vmatpush.bf16.msra.mxu2 %v8092_v43  ;;  %v9201_v43 = vld [vmem:[%s10403_s24 + $0x21c] sm:$0xf0]  ;;  %v7960_v35 = vor.u32 %v9137_v1, %v7959_v32  ;;  %4859 = vmatpush.bf16.msra.mxu1 %v8248_v33 }
 0x6a6   : > { %v8216_v46 = vor.u32 %v9201_v43, %v8215_v15 }
 0x6a7   : > { %4916 = vmatpush.bf16.msra.mxu3 %v8284_v51 }
 0x6a8   : > { %4828 = vmatpush.bf16.msra.mxu0 %v8056_v9  ;;  %v8217_v9 = vld [vmem:[%s10403_s24 + $0x220] sm:$0xf0] }
 0x6a9   : > { %4886 = vmatpush.bf16.msra.mxu2 %v8060_v21  ;;  %4860 = vmatpush.bf16.msra.mxu1 %v8216_v46 }
 0x6ab   : > { %4917 = vmatpush.bf16.msra.mxu3 %v8252_v40 }
 0x6ac   : > { %4829 = vmatpush.bf16.msra.mxu0 %v8024_v7 }
 0x6ad   : > { %4887 = vmatpush.bf16.msra.mxu2 %v8028_v37 }
 0x6b0   : > { %4830 = vmatpush.bf16.msra.mxu0 %v7992_v63 }
 0x6b1   : > { %4888 = vmatpush.bf16.msra.mxu2 %v7996_v20 }
 0x6b4   : > { %4831 = vmatpush.bf16.msra.mxu0 %v7960_v35 }
 0x6b5   : > { %4889 = vmatpush.bf16.msra.mxu2 %v7964_v34 }
 0x6bb   : > { %v3854_v31 = vpop.xlane.xlu2 %3853 }
 0x6bc   : > { %v3876_v61 = vmul.f32 %v3854_v31, %v11866_v52  ;;  %v8220_v31 = vor.u32 %v9197_v3, %v8217_v9 }
 0x6be   : > { %v12000_v58 = vadd.f32 1e-05, %v3876_v61  ;;  %4918 = vmatpush.bf16.msra.mxu3 %v8220_v31 }
 0x6c0   : > { %9695 = vrsqrt.f32 %v12000_v58  ;;  %vm3898_vm10 = vweird.f32 %v12000_v58 }
 0x6c3   : > { %v3857_v2 = vpop.xlane.xlu0 %3856 }
 0x6c4   : > { %v3877_v26 = vmul.f32 %v3857_v2, %v11866_v52 }
 0x6c6   : > { %v9696_v30 = vpop.eup %9695  ;;  %v3885_v62 = vadd.f32 1e-05, %v3877_v26 }
 0x6c7   : > { %v3893_v50 = vmul.f32 %v9696_v30, %v12000_v58  ;;  %vm3899_vm9 = vweird.f32 %v9696_v30  ;;  %v12037_v58 = vperm.slane %v3780_v16, 0 }
 0x6c8   : > { %9697 = vrsqrt.f32 %v3885_v62  ;;  %vm3900_vm11 = vmor %vm3898_vm10, %vm3899_vm9  ;;  %vm3908_vm13 = vweird.f32 %v3885_v62 }
 0x6c9   : > { %v3894_v21 = vmul.f32 %v9696_v30, %v3893_v50 }
 0x6cb   : > { %v3895_v36 = vmul.f32 0.5, %v3894_v21 }
 0x6cd   : > { %v3896_v39 = vsub.f32 1.5, %v3895_v36 }
 0x6ce   : > { %v9698_v61 = vpop.eup %9697 }
 0x6cf   : > { %v3897_v13 = vmul.f32 %v9696_v30, %v3896_v39  ;;  %v3903_v28 = vmul.f32 %v9698_v61, %v3885_v62  ;;  %vm3909_vm12 = vweird.f32 %v9698_v61 }
 0x6d0   : > { %vm3910_vm14 = vmor %vm3908_vm13, %vm3909_vm12 }
 0x6d1   : > { %v3904_v45 = vmul.f32 %v9698_v61, %v3903_v28  ;;  %v3901_v7 = vsel %vm3900_vm11, %v9696_v30, %v3897_v13 }
 0x6d2   : > { %v3972_v38 = vmul.f32 %v3901_v7, %v11870_v19  ;;  %v3973_v37 = vmul.f32 %v3901_v7, %v11873_v18 }
 0x6d3   : > { %v3905_v54 = vmul.f32 0.5, %v3904_v45 }
 0x6d4   : > { %v3993_v12 = vmul.f32 %v12031_v57, %v3972_v38  ;;  %v3994_v63 = vmul.f32 %v12033_v56, %v3973_v37  ;;  %v8191_v38 = vld [vmem:[%s10403_s24 + $0x1c8] sm:$0xf] }
 0x6d5   : > { %v3906_v23 = vsub.f32 1.5, %v3905_v54  ;;  %v9194_v37 = vld [vmem:[%s10403_s24 + $0x1e4] sm:$0xf0] }
 0x6d6   : > { %v12048_v60 = vadd.f32 %v12037_v58, %v3993_v12  ;;  %v12051_v33 = vadd.f32 %v12039_v22, %v3994_v63  ;;  %v9190_v63 = vld [vmem:[%s10403_s24 + $0x1cc] sm:$0xf] }
 0x6d7   : > { %v3907_v51 = vmul.f32 %v9698_v61, %v3906_v23 }
 0x6d8   : > { %13884 = vst [vmem:[#allocation31_spill] sm:$0xff] %v12048_v60 }
 0x6d9   : > { %v3911_v42 = vsel %vm3910_vm14, %v9698_v61, %v3907_v51  ;;  %13885 = vst [vmem:[#allocation32_spill] sm:$0xff] %v12051_v33  ;;  %v8447_v51 = vld [vmem:[%s10403_s24 + $0x3c8] sm:$0xf] }
 0x6da   : > { %v3974_v5 = vmul.f32 %v3911_v42, %v11881_v17  ;;  %v3975_v10 = vmul.f32 %v3911_v42, %v11884_v59 }
 0x6dc   : > { %v3995_v19 = vmul.f32 %v12031_v57, %v3974_v5  ;;  %v3996_v18 = vmul.f32 %v12033_v56, %v3975_v10  ;;  %v8193_v5 = vld [vmem:[%s10403_s24 + $0x1e8] sm:$0xf0] }
 0x6de   : > { %v12054_v20 = vadd.f32 %v12037_v58, %v3995_v19  ;;  %v12057_v24 = vadd.f32 %v12039_v22, %v3996_v18 }
 0x6e0   : > { %13886 = vst [vmem:[#allocation33_spill] sm:$0xff] %v12054_v20  ;;  %v12061_v17 = vpack.c.bf16 %v12054_v20, %v12048_v60  ;;  %v12065_v59 = vpack.c.bf16 %v12057_v24, %v12051_v33  ;;  %v9273_v33 = vld [vmem:[%s10405_s3 + $0x64] sm:$0xf] }
 0x6e1   : > { %13887 = vst [vmem:[#allocation34_spill] sm:$0xff] %v12057_v24  ;;  %v9289_v60 = vld [vmem:[%s10405_s3 + $0xe4] sm:$0xf] }
 0x6e2   : > { %4832 = vmatmul.bf16.vlgmr.msra.gmra.mxu0 %v12061_v17  ;;  %4861 = vmatmul.bf16.vlgmr.msra.gmra.mxu1 %v12065_v59 }
 0x6e3   : > { %4890 = vmatmul.bf16.vlgmr.msra.gmra.mxu2 %v12061_v17  ;;  %4919 = vmatmul.bf16.vlgmr.msra.gmra.mxu3 %v12065_v59  ;;  %v3860_v41 = vpop.xlane.xlu1 %3859 }
 0x6e4   : > { %v3878_v32 = vmul.f32 %v3860_v41, %v11866_v52 }
 0x6e6   : > { %v3886_v2 = vadd.f32 1e-05, %v3878_v32 }
 0x6e8   : > { %9699 = vrsqrt.f32 %v3886_v2  ;;  %vm3918_vm1 = vweird.f32 %v3886_v2 }
 0x6eb   : > { %v3863_v40 = vpop.xlane.xlu2 %3862 }
 0x6ec   : > { %v3879_v1 = vmul.f32 %v3863_v40, %v11866_v52  ;;  %v8449_v40 = vld [vmem:[%s10403_s24 + $0x3e8] sm:$0xf0] }
 0x6ee   : > { %v9700_v15 = vpop.eup %9699  ;;  %v3887_v43 = vadd.f32 1e-05, %v3879_v1 }
 0x6ef   : > { %v3913_v26 = vmul.f32 %v9700_v15, %v3886_v2  ;;  %vm3919_vm15 = vweird.f32 %v9700_v15  ;;  %v9254_v2 = vld [vmem:[%s10403_s24 + $0x3cc] sm:$0xf] }
 0x6f0   : > { %9701 = vrsqrt.f32 %v3887_v43  ;;  %vm3920_vm2 = vmor %vm3918_vm1, %vm3919_vm15  ;;  %vm3928_vm4 = vweird.f32 %v3887_v43 }
 0x6f1   : > { %v3914_v35 = vmul.f32 %v9700_v15, %v3913_v26 }
 0x6f3   : > { %v3915_v8 = vmul.f32 0.5, %v3914_v35 }
 0x6f5   : > { %v3916_v29 = vsub.f32 1.5, %v3915_v8  ;;  %v8159_v8 = vld [vmem:[%s10403_s24 + $0x188] sm:$0xf] }
 0x6f6   : > { %v9702_v3 = vpop.eup %9701 }
 0x6f7   : > { %v3917_v46 = vmul.f32 %v9700_v15, %v3916_v29  ;;  %v3923_v9 = vmul.f32 %v9702_v3, %v3887_v43  ;;  %v3866_v31 = vpop.xlane.xlu0 %3865  ;;  %vm3929_vm3 = vweird.f32 %v9702_v3  ;;  %v8452_v43 = vor.u32 %v9254_v2, %v8449_v40  ;;  %v9186_v29 = vld [vmem:[%s10403_s24 + $0x1a4] sm:$0xf0]  ;;  %v8385_v2 = vld [vmem:[%s10403_s24 + $0x368] sm:$0xf0] }
 0x6f8   : > { %v3880_v50 = vmul.f32 %v3866_v31, %v11866_v52  ;;  %vm3930_vm5 = vmor %vm3928_vm4, %vm3929_vm3  ;;  %v8161_v31 = vld [vmem:[%s10403_s24 + $0x1a8] sm:$0xf0] }
 0x6f9   : > { %v3924_v30 = vmul.f32 %v9702_v3, %v3923_v9  ;;  %v3921_v62 = vsel %vm3920_vm2, %v9700_v15, %v3917_v46  ;;  %v8196_v15 = vor.u32 %v9190_v63, %v8193_v5  ;;  %5027 = vmatpush.bf16.msrb.mxu3 %v8452_v43  ;;  %v8160_v46 = vor.u32 %v9186_v29, %v8159_v8  ;;  %v8415_v9 = vld [vmem:[%s10403_s24 + $0x388] sm:$0xf] }
 0x6fa   : > { %v3976_v21 = vmul.f32 %v3921_v62, %v11892_v6  ;;  %v3977_v36 = vmul.f32 %v3921_v62, %v11895_v0  ;;  %v12076_v61 = vadd.f32 1e-05, %v3880_v50  ;;  %v9182_v62 = vld [vmem:[%s10403_s24 + $0x18c] sm:$0xf]  ;;  %v8351_v8 = vld [vmem:[%s10403_s24 + $0x308] sm:$0xf] }
 0x6fb   : > { %v3925_v34 = vmul.f32 0.5, %v3924_v30  ;;  %4998 = vmatpush.bf16.msrb.mxu2 %v8196_v15  ;;  %v9250_v30 = vld [vmem:[%s10403_s24 + $0x3a4] sm:$0xf0]  ;;  %v9246_v50 = vld [vmem:[%s10403_s24 + $0x38c] sm:$0xf] }
 0x6fc   : > { %9703 = vrsqrt.f32 %v12076_v61  ;;  %v3997_v28 = vmul.f32 %v12031_v57, %v3976_v21  ;;  %v3998_v6 = vmul.f32 %v12033_v56, %v3977_v36  ;;  %v8417_v21 = vld [vmem:[%s10403_s24 + $0x3a8] sm:$0xf0]  ;;  %vm3938_vm7 = vweird.f32 %v12076_v61  ;;  %v9170_v15 = vld [vmem:[%s10403_s24 + $0x124] sm:$0xf0] }
 0x6fd   : > { %v3926_v39 = vsub.f32 1.5, %v3925_v34  ;;  %v8416_v34 = vor.u32 %v9250_v30, %v8415_v9  ;;  %v9234_v29 = vld [vmem:[%s10403_s24 + $0x324] sm:$0xf0]  ;;  %v8097_v30 = vld [vmem:[%s10403_s24 + $0x128] sm:$0xf0] }
 0x6fe   : > { %v12090_v42 = vadd.f32 %v12037_v58, %v3997_v28  ;;  %v12093_v12 = vadd.f32 %v12039_v22, %v3998_v6  ;;  %v8420_v28 = vor.u32 %v9246_v50, %v8417_v21  ;;  %v8352_v9 = vor.u32 %v9234_v29, %v8351_v8  ;;  %v8033_v8 = vld [vmem:[%s10403_s24 + $0xa8] sm:$0xf0] }
 0x6ff   : > { %v3927_v13 = vmul.f32 %v9702_v3, %v3926_v39  ;;  %v3869_v7 = vpop.xlane.xlu1 %3868 }
 0x700   : > { %v3881_v16 = vmul.f32 %v3869_v7, %v11866_v52  ;;  %13888 = vst [vmem:[#allocation35_spill] sm:$0xff] %v12090_v42  ;;  %5028 = vmatpush.bf16.msrb.mxu3 %v8420_v28  ;;  %v8319_v28 = vld [vmem:[%s10403_s24 + $0x2c8] sm:$0xf] }
 0x701   : > { %v3931_v0 = vsel %vm3930_vm5, %v9702_v3, %v3927_v13  ;;  %13889 = vst [vmem:[#allocation36_spill] sm:$0xff] %v12093_v12  ;;  %v8164_v13 = vor.u32 %v9182_v62, %v8161_v31  ;;  %v9230_v62 = vld [vmem:[%s10403_s24 + $0x30c] sm:$0xf] }
 0x702   : > { %v3978_v45 = vmul.f32 %v3931_v0, %v11903_v47  ;;  %v3979_v53 = vmul.f32 %v3931_v0, %v11906_v44  ;;  %v8192_v47 = vor.u32 %v9194_v37, %v8191_v38  ;;  %v9258_v44 = vld [vmem:[%s10403_s24 + $0x3e4] sm:$0xf0]  ;;  %v12098_v10 = vpop.eup %9703  ;;  %v12106_v41 = vadd.f32 1e-05, %v3881_v16  ;;  %v9174_v16 = vld [vmem:[%s10403_s24 + $0x14c] sm:$0xf] }
 0x703   : > { %v8448_v32 = vor.u32 %v9258_v44, %v8447_v51  ;;  %v3933_v1 = vmul.f32 %v12098_v10, %v12076_v61  ;;  %v8127_v0 = vld [vmem:[%s10403_s24 + $0x148] sm:$0xf]  ;;  %vm3939_vm6 = vweird.f32 %v12098_v10  ;;  %4999 = vmatpush.bf16.msrb.mxu2 %v8164_v13  ;;  %v9238_v44 = vld [vmem:[%s10403_s24 + $0x34c] sm:$0xf] }
 0x704   : > { %v3999_v54 = vmul.f32 %v12031_v57, %v3978_v45  ;;  %v4000_v23 = vmul.f32 %v12033_v56, %v3979_v53  ;;  %4940 = vmatpush.bf16.msrb.mxu0 %v8192_v47  ;;  %9705 = vrsqrt.f32 %v12106_v41  ;;  %v9178_v45 = vld [vmem:[%s10403_s24 + $0x164] sm:$0xf0]  ;;  %v8129_v47 = vld [vmem:[%s10403_s24 + $0x168] sm:$0xf0]  ;;  %vm3940_vm8 = vmor %vm3938_vm7, %vm3939_vm6  ;;  %v8388_v40 = vor.u32 %v9238_v44, %v8385_v2 }
 0x705   : > { %4969 = vmatpush.bf16.msrb.mxu1 %v8448_v32  ;;  %v3934_v3 = vmul.f32 %v12098_v10, %v3933_v1  ;;  %v8383_v53 = vld [vmem:[%s10403_s24 + $0x348] sm:$0xf]  ;;  %v8132_v32 = vor.u32 %v9174_v16, %v8129_v47  ;;  %v9222_v16 = vld [vmem:[%s10403_s24 + $0x2cc] sm:$0xf]  ;;  %vm3948_vm9 = vweird.f32 %v12106_v41 }
 0x706   : > { %v12101_v19 = vadd.f32 %v12037_v58, %v3999_v54  ;;  %v12104_v18 = vadd.f32 %v12039_v22, %v4000_v23  ;;  %v8128_v54 = vor.u32 %v9178_v45, %v8127_v0  ;;  %v9242_v23 = vld [vmem:[%s10403_s24 + $0x364] sm:$0xf0]  ;;  %5029 = vmatpush.bf16.msrb.mxu3 %v8388_v40  ;;  %v9158_v0 = vld [vmem:[%s10403_s24 + $0xcc] sm:$0xf] }
 0x707   : > { %v3935_v36 = vmul.f32 0.5, %v3934_v3  ;;  %v3872_v39 = vpop.xlane.xlu2 %3871  ;;  %v8384_v51 = vor.u32 %v9242_v23, %v8383_v53  ;;  %v8095_v1 = vld [vmem:[%s10403_s24 + $0x108] sm:$0xf]  ;;  %5000 = vmatpush.bf16.msrb.mxu2 %v8132_v32  ;;  %v9166_v3 = vld [vmem:[%s10403_s24 + $0x10c] sm:$0xf] }
 0x708   : > { %13890 = vst [vmem:[#allocation37_spill] sm:$0xff] %v12101_v19  ;;  %v12114_v26 = vpack.c.bf16 %v12101_v19, %v12090_v42  ;;  %v12118_v35 = vpack.c.bf16 %v12104_v18, %v12093_v12  ;;  %v3882_v6 = vmul.f32 %v3872_v39, %v11866_v52  ;;  %4941 = vmatpush.bf16.msrb.mxu0 %v8160_v46  ;;  %v8063_v39 = vld [vmem:[%s10403_s24 + $0xc8] sm:$0xf]  ;;  %v8065_v23 = vld [vmem:[%s10403_s24 + $0xe8] sm:$0xf0] }
 0x709   : > { %13891 = vst [vmem:[#allocation38_spill] sm:$0xff] %v12104_v18  ;;  %4970 = vmatpush.bf16.msrb.mxu1 %v8416_v34  ;;  %v3936_v7 = vsub.f32 1.5, %v3935_v36  ;;  %v8096_v43 = vor.u32 %v9170_v15, %v8095_v1  ;;  %v8353_v34 = vld [vmem:[%s10403_s24 + $0x328] sm:$0xf0]  ;;  %v8100_v21 = vor.u32 %v9166_v3, %v8097_v30  ;;  %v9162_v13 = vld [vmem:[%s10403_s24 + $0xe4] sm:$0xf0] }
 0x70a   : > { %4837 = vmatmul.bf16.gmra.mxu0 %v12114_v26  ;;  %4866 = vmatmul.bf16.gmra.mxu1 %v12118_v35  ;;  %v12141_v38 = vpop.eup %9705  ;;  %v12143_v37 = vadd.f32 1e-05, %v3882_v6  ;;  %v8356_v36 = vor.u32 %v9230_v62, %v8353_v34  ;;  %v9226_v6 = vld [vmem:[%s10403_s24 + $0x2e4] sm:$0xf0]  ;;  %v9214_v30 = vld [vmem:[%s10403_s24 + $0x28c] sm:$0xf] }
 0x70b   : > { %4895 = vmatmul.bf16.gmra.mxu2 %v12114_v26  ;;  %4924 = vmatmul.bf16.gmra.mxu3 %v12118_v35  ;;  %v3937_v63 = vmul.f32 %v12098_v10, %v3936_v7  ;;  %v3943_v5 = vmul.f32 %v12141_v38, %v12106_v41  ;;  %vm3949_vm0 = vweird.f32 %v12141_v38  ;;  %v8064_v7 = vor.u32 %v9162_v13, %v8063_v39  ;;  %v9154_v1 = vld [vmem:[%s10403_s24 + $0xa4] sm:$0xf0]  ;;  %v9150_v41 = vld [vmem:[%s10403_s24 + $0x8c] sm:$0xf]  ;;  %v9388_v19 = vld [vmem:[%s10405_s3 + $0x3f4] sm:$0xf0] }
 0x70c   : > { %9707 = vrsqrt.f32 %v12143_v37  ;;  %4942 = vmatpush.bf16.msrb.mxu0 %v8128_v54  ;;  %5001 = vmatpush.bf16.msrb.mxu2 %v8100_v21  ;;  %v8320_v54 = vor.u32 %v9226_v6, %v8319_v28  ;;  %v8287_v15 = vld [vmem:[%s10403_s24 + $0x288] sm:$0xf]  ;;  %vm3950_vm10 = vmor %vm3948_vm9, %vm3949_vm0  ;;  %v8289_v62 = vld [vmem:[%s10403_s24 + $0x2a8] sm:$0xf0]  ;;  %vm3958_vm12 = vweird.f32 %v12143_v37 }
 0x70d   : > { %4971 = vmatpush.bf16.msrb.mxu1 %v8384_v51  ;;  %v3944_v61 = vmul.f32 %v12141_v38, %v3943_v5  ;;  %v3941_v46 = vsel %vm3940_vm8, %v12098_v10, %v3937_v63  ;;  %5030 = vmatpush.bf16.msrb.mxu3 %v8356_v36  ;;  %v8068_v63 = vor.u32 %v9158_v0, %v8065_v23  ;;  %v8321_v5 = vld [vmem:[%s10403_s24 + $0x2e8] sm:$0xf0]  ;;  %v7999_v34 = vld [vmem:[%s10403_s24 + $0x48] sm:$0xf]  ;;  %v8959_v42 = vld [vmem:[%s10405_s3 + $0x3d0] sm:$0xf] }
 0x70e   : > { %v3980_v45 = vmul.f32 %v3941_v46, %v11914_v25  ;;  %v3981_v47 = vmul.f32 %v3941_v46, %v11917_v27  ;;  %v8031_v25 = vld [vmem:[%s10403_s24 + $0x88] sm:$0xf]  ;;  %v8324_v40 = vor.u32 %v9222_v16, %v8321_v5  ;;  %v9142_v6 = vld [vmem:[%s10403_s24 + $0x4c] sm:$0xf] }
 0x70f   : > { %v3945_v31 = vmul.f32 0.5, %v3944_v61  ;;  %v3875_v50 = vpop.xlane.xlu0 %3874  ;;  %v9218_v27 = vld [vmem:[%s10403_s24 + $0x2a4] sm:$0xf0]  ;;  %v8032_v61 = vor.u32 %v9154_v1, %v8031_v25  ;;  %v8001_v0 = vld [vmem:[%s10403_s24 + $0x68] sm:$0xf0] }
 0x710   : > { %v3883_v10 = vmul.f32 %v3875_v50, %v11866_v52  ;;  %4943 = vmatpush.bf16.msrb.mxu0 %v8096_v43  ;;  %v8288_v43 = vor.u32 %v9218_v27, %v8287_v15  ;;  %v4001_v29 = vmul.f32 %v12031_v57, %v3980_v45  ;;  %5002 = vmatpush.bf16.msrb.mxu2 %v8068_v63  ;;  %v9146_v36 = vld [vmem:[%s10403_s24 + $0x64] sm:$0xf0]  ;;  %v9134_v15 = vld [vmem:[%s10403_s24 + $0xc] sm:$0xf] }
 0x711   : > { %4972 = vmatpush.bf16.msrb.mxu1 %v8352_v9  ;;  %v3946_v53 = vsub.f32 1.5, %v3945_v31  ;;  %v8036_v9 = vor.u32 %v9150_v41, %v8033_v8  ;;  %v4002_v31 = vmul.f32 %v12033_v56, %v3981_v47  ;;  %5031 = vmatpush.bf16.msrb.mxu3 %v8324_v40  ;;  %v8255_v39 = vld [vmem:[%s10403_s24 + $0x248] sm:$0xf]  ;;  %v8000_v28 = vor.u32 %v9146_v36, %v7999_v34  ;;  %v7969_v27 = vld [vmem:[%s10403_s24 + $0x28] sm:$0xf0] }
 0x712   : > { %v12175_v51 = vpop.eup %9707  ;;  %v12178_v44 = vadd.f32 1e-05, %v3883_v10  ;;  %v9210_v13 = vld [vmem:[%s10403_s24 + $0x264] sm:$0xf0]  ;;  %v8004_v16 = vor.u32 %v9142_v6, %v8001_v0  ;;  %v12216_v25 = vadd.f32 %v12037_v58, %v4001_v29  ;;  %v8225_v34 = vld [vmem:[%s10403_s24 + $0x228] sm:$0xf0] }
 0x713   : > { %v3947_v32 = vmul.f32 %v12141_v38, %v3946_v53  ;;  %v3953_v2 = vmul.f32 %v12175_v51, %v12143_v37  ;;  %v9206_v53 = vld [vmem:[%s10403_s24 + $0x24c] sm:$0xf]  ;;  %v9138_v47 = vld [vmem:[%s10403_s24 + $0x24] sm:$0xf0]  ;;  %vm3959_vm11 = vweird.f32 %v12175_v51 }
 0x714   : > { %9709 = vrsqrt.f32 %v12178_v44  ;;  %4944 = vmatpush.bf16.msrb.mxu0 %v8064_v7  ;;  %v8257_v7 = vld [vmem:[%s10403_s24 + $0x268] sm:$0xf0]  ;;  %5003 = vmatpush.bf16.msrb.mxu2 %v8036_v9  ;;  %v8223_v63 = vld [vmem:[%s10403_s24 + $0x208] sm:$0xf]  ;;  %13892 = vst [vmem:[#allocation39_spill] sm:$0xff] %v12216_v25  ;;  %vm3960_vm13 = vmor %vm3958_vm12, %vm3959_vm11  ;;  %vm3968_vm15 = vweird.f32 %v12178_v44 }
 0x715   : > { %4973 = vmatpush.bf16.msrb.mxu1 %v8320_v54  ;;  %v3951_v3 = vsel %vm3950_vm10, %v12141_v38, %v3947_v32  ;;  %v3954_v46 = vmul.f32 %v12175_v51, %v3953_v2  ;;  %v8292_v38 = vor.u32 %v9214_v30, %v8289_v62  ;;  %v7967_v54 = vld [vmem:[%s10403_s24 + $0x8] sm:$0xf]  ;;  %v12219_v32 = vadd.f32 %v12039_v22, %v4002_v31  ;;  %v9198_v62 = vld [vmem:[%s10403_s24 + $0x20c] sm:$0xf] }
 0x716   : > { %v3982_v50 = vmul.f32 %v3951_v3, %v11925_v49  ;;  %v3983_v21 = vmul.f32 %v3951_v3, %v11928_v55  ;;  %v8256_v55 = vor.u32 %v9210_v13, %v8255_v39  ;;  %v9202_v1 = vld [vmem:[%s10403_s24 + $0x224] sm:$0xf0]  ;;  %v8260_v41 = vor.u32 %v9206_v53, %v8257_v7  ;;  %v9191_v7 = vld [vmem:[%s10403_s24 + $0x1d4] sm:$0xf] }
 0x717   : > { %v3955_v10 = vmul.f32 0.5, %v3954_v46  ;;  %13893 = vst [vmem:[#allocation40_spill] sm:$0xff] %v12219_v32  ;;  %5032 = vmatpush.bf16.msrb.mxu3 %v8292_v38  ;;  %v7968_v3 = vor.u32 %v9138_v47, %v7967_v54  ;;  %v8224_v9 = vor.u32 %v9202_v1, %v8223_v63  ;;  %v7972_v30 = vor.u32 %v9134_v15, %v7969_v27  ;;  %v8201_v54 = vld [vmem:[%s10403_s24 + $0x1f0] sm:$0xf0]  ;;  %v8167_v63 = vld [vmem:[%s10403_s24 + $0x190] sm:$0xf] }
 0x718   : > { %v4003_v45 = vmul.f32 %v12031_v57, %v3982_v50  ;;  %v4004_v49 = vmul.f32 %v12033_v56, %v3983_v21  ;;  %4945 = vmatpush.bf16.msrb.mxu0 %v8032_v61  ;;  %5004 = vmatpush.bf16.msrb.mxu2 %v8004_v16  ;;  %v8228_v37 = vor.u32 %v9198_v62, %v8225_v34  ;;  %v8457_v47 = vld [vmem:[%s10403_s24 + $0x3f0] sm:$0xf0]  ;;  %v8423_v27 = vld [vmem:[%s10403_s24 + $0x390] sm:$0xf]  ;;  %v9298_v52 = vld [vmem:[%s10405_s3 + $0x124] sm:$0xf0] }
 0x719   : > { %4974 = vmatpush.bf16.msrb.mxu1 %v8288_v43  ;;  %v3956_v23 = vsub.f32 1.5, %v3955_v10  ;;  %v8204_v16 = vor.u32 %v9191_v7, %v8201_v54  ;;  %v8135_v34 = vld [vmem:[%s10403_s24 + $0x150] sm:$0xf]  ;;  %v9231_v7 = vld [vmem:[%s10403_s24 + $0x314] sm:$0xf] }
 0x71a   : > { %v9710_v5 = vpop.eup %9709  ;;  %v12222_v2 = vadd.f32 %v12037_v58, %v4003_v45  ;;  %v12225_v40 = vadd.f32 %v12039_v22, %v4004_v49  ;;  %v8455_v49 = vld [vmem:[%s10403_s24 + $0x3d0] sm:$0xf] }
 0x71b   : > { %v3957_v61 = vmul.f32 %v12175_v51, %v3956_v23  ;;  %v3963_v43 = vmul.f32 %v9710_v5, %v12178_v44  ;;  %5033 = vmatpush.bf16.msrb.mxu3 %v8260_v41  ;;  %vm3969_vm14 = vweird.f32 %v9710_v5  ;;  %v9255_v23 = vld [vmem:[%s10403_s24 + $0x3d4] sm:$0xf] }
 0x71c   : > { %13894 = vst [vmem:[#allocation41_spill] sm:$0xff] %v12222_v2  ;;  %v12235_v8 = vpack.c.bf16 %v12222_v2, %v12216_v25  ;;  %v12239_v29 = vpack.c.bf16 %v12225_v40, %v12219_v32  ;;  %4946 = vmatpush.bf16.msrb.mxu0 %v8000_v28  ;;  %5005 = vmatpush.bf16.msrb.mxu2 %v7972_v30  ;;  %vm3970_vm1 = vmor %vm3968_vm15, %vm3969_vm14 }
 0x71d   : > { %13895 = vst [vmem:[#allocation42_spill] sm:$0xff] %v12225_v40  ;;  %4975 = vmatpush.bf16.msrb.mxu1 %v8256_v55  ;;  %v3964_v46 = vmul.f32 %v9710_v5, %v3963_v43  ;;  %v3961_v31 = vsel %vm3960_vm13, %v12175_v51, %v3957_v61  ;;  %v9259_v55 = vld [vmem:[%s10403_s24 + $0x3ec] sm:$0xf0]  ;;  %v8460_v1 = vor.u32 %v9255_v23, %v8457_v47  ;;  %v9183_v43 = vld [vmem:[%s10403_s24 + $0x194] sm:$0xf] }
 0x71e   : > { %4842 = vmatmul.bf16.gmra.mxu0 %v12235_v8  ;;  %4871 = vmatmul.bf16.gmra.mxu1 %v12239_v29  ;;  %v3984_v38 = vmul.f32 %v3961_v31, %v11936_v14  ;;  %v3985_v36 = vmul.f32 %v3961_v31, %v11939_v11  ;;  %v8456_v53 = vor.u32 %v9259_v55, %v8455_v49  ;;  %v9251_v61 = vld [vmem:[%s10403_s24 + $0x3ac] sm:$0xf0]  ;;  %v9167_v55 = vld [vmem:[%s10403_s24 + $0x114] sm:$0xf] }
 0x71f   : > { %v3965_v50 = vmul.f32 0.5, %v3964_v46  ;;  %4900 = vmatmul.bf16.gmra.mxu2 %v12235_v8  ;;  %4929 = vmatmul.bf16.gmra.mxu3 %v12239_v29  ;;  %v8424_v41 = vor.u32 %v9251_v61, %v8423_v27  ;;  %v9247_v46 = vld [vmem:[%s10403_s24 + $0x394] sm:$0xf]  ;;  %v9179_v31 = vld [vmem:[%s10403_s24 + $0x16c] sm:$0xf0] }
 0x720   : > { %4947 = vmatpush.bf16.msrb.mxu0 %v7968_v3  ;;  %5034 = vmatpush.bf16.msrb.mxu3 %v8228_v37  ;;  %v4005_v13 = vmul.f32 %v12031_v57, %v3984_v38  ;;  %v4006_v10 = vmul.f32 %v12033_v56, %v3985_v36  ;;  %v8169_v3 = vld [vmem:[%s10403_s24 + $0x1b0] sm:$0xf0]  ;;  %v8136_v37 = vor.u32 %v9179_v31, %v8135_v34  ;;  %v9227_v27 = vld [vmem:[%s10403_s24 + $0x2ec] sm:$0xf0] }
 0x721   : > { %v3966_v21 = vsub.f32 1.5, %v3965_v50  ;;  %4976 = vmatpush.bf16.msrb.mxu1 %v8224_v9  ;;  %5114 = vmatpush.bf16.msra.mxu2 %v8204_v16  ;;  %v8425_v9 = vld [vmem:[%s10403_s24 + $0x3b0] sm:$0xf0]  ;;  %v8172_v30 = vor.u32 %v9183_v43, %v8169_v3  ;;  %v8391_v50 = vld [vmem:[%s10403_s24 + $0x350] sm:$0xf] }
 0x722   : > { %v12261_v11 = vadd.f32 %v12037_v58, %v4005_v13  ;;  %v12264_v44 = vadd.f32 %v12039_v22, %v4006_v10  ;;  %v8428_v62 = vor.u32 %v9247_v46, %v8425_v9  ;;  %v9175_v38 = vld [vmem:[%s10403_s24 + $0x154] sm:$0xf]  ;;  %v9155_v34 = vld [vmem:[%s10403_s24 + $0xac] sm:$0xf0] }
 0x723   : > { %v3967_v39 = vmul.f32 %v9710_v5, %v3966_v21  ;;  %v9243_v21 = vld [vmem:[%s10403_s24 + $0x36c] sm:$0xf0]  ;;  %v8137_v36 = vld [vmem:[%s10403_s24 + $0x170] sm:$0xf0] }
 0x724   : > { %13896 = vst [vmem:[#allocation43_spill] sm:$0xff] %v12261_v11  ;;  %5143 = vmatpush.bf16.msra.mxu3 %v8460_v1  ;;  %v8140_v13 = vor.u32 %v9175_v38, %v8137_v36  ;;  %v9239_v10 = vld [vmem:[%s10403_s24 + $0x354] sm:$0xf]  ;;  %v8327_v1 = vld [vmem:[%s10403_s24 + $0x2d0] sm:$0xf] }
 0x725   : > { %v3971_v51 = vsel %vm3970_vm1, %v9710_v5, %v3967_v39  ;;  %13897 = vst [vmem:[#allocation44_spill] sm:$0xff] %v12264_v44  ;;  %v9187_v5 = vld [vmem:[%s10403_s24 + $0x1ac] sm:$0xf0]  ;;  %5085 = vmatpush.bf16.msra.mxu1 %v8456_v53  ;;  %5115 = vmatpush.bf16.msra.mxu2 %v8172_v30  ;;  %v12311_v39 = vld [vmem:[%s10451_s14] sm:$0xff]  ;;  %v8105_v53 = vld [vmem:[%s10403_s24 + $0x130] sm:$0xf0] }
 0x726   : > { %v3986_v28 = vmul.f32 %v3971_v51, %v11947_v4  ;;  %v3987_v6 = vmul.f32 %v3971_v51, %v11950_v48  ;;  %v8168_v15 = vor.u32 %v9187_v5, %v8167_v63  ;;  %v8392_v51 = vor.u32 %v9243_v21, %v8391_v50  ;;  %v8361_v23 = vld [vmem:[%s10403_s24 + $0x330] sm:$0xf0]  ;;  %v8071_v63 = vld [vmem:[%s10403_s24 + $0xd0] sm:$0xf] }
 0x727   : > { %v8108_v54 = vor.u32 %v9167_v55, %v8105_v53  ;;  %v8364_v16 = vor.u32 %v9231_v7, %v8361_v23  ;;  %v12328_v47 = vperm.slane %v12311_v39, 0  ;;  %v9163_v5 = vld [vmem:[%s10403_s24 + $0xec] sm:$0xf0]  ;;  %v9159_v61 = vld [vmem:[%s10403_s24 + $0xd4] sm:$0xf] }
 0x728   : > { %v4007_v0 = vmul.f32 %v12031_v57, %v3986_v28  ;;  %v4008_v14 = vmul.f32 %v12033_v56, %v3987_v6  ;;  %v8199_v56 = vld [vmem:[%s10403_s24 + $0x1d0] sm:$0xf]  ;;  %5144 = vmatpush.bf16.msra.mxu3 %v8428_v62  ;;  %v8393_v28 = vld [vmem:[%s10403_s24 + $0x370] sm:$0xf0] }
 0x729   : > { %5086 = vmatpush.bf16.msra.mxu1 %v8424_v41  ;;  %v8103_v6 = vld [vmem:[%s10403_s24 + $0x110] sm:$0xf]  ;;  %5116 = vmatpush.bf16.msra.mxu2 %v8140_v13  ;;  %v8073_v43 = vld [vmem:[%s10403_s24 + $0xf0] sm:$0xf0]  ;;  %v8328_v41 = vor.u32 %v9227_v27, %v8327_v1 }
 0x72a   : > { %v12267_v45 = vadd.f32 %v12037_v58, %v4007_v0  ;;  %v12270_v4 = vadd.f32 %v12039_v22, %v4008_v14  ;;  %v9195_v58 = vld [vmem:[%s10403_s24 + $0x1ec] sm:$0xf0]  ;;  %v8396_v0 = vor.u32 %v9239_v10, %v8393_v28  ;;  %v8076_v3 = vor.u32 %v9159_v61, %v8073_v43  ;;  %v9223_v46 = vld [vmem:[%s10403_s24 + $0x2d4] sm:$0xf] }
 0x72b   : > { %v8200_v22 = vor.u32 %v9195_v58, %v8199_v56  ;;  %v9171_v14 = vld [vmem:[%s10403_s24 + $0x12c] sm:$0xf0]  ;;  %v8329_v9 = vld [vmem:[%s10403_s24 + $0x2f0] sm:$0xf0] }
 0x72c   : > { %13898 = vst [vmem:[#allocation45_spill] sm:$0xff] %v12267_v45  ;;  %v12274_v48 = vpack.c.bf16 %v12267_v45, %v12261_v11  ;;  %v12278_v57 = vpack.c.bf16 %v12270_v4, %v12264_v44  ;;  %v8359_v56 = vld [vmem:[%s10403_s24 + $0x310] sm:$0xf]  ;;  %5145 = vmatpush.bf16.msra.mxu3 %v8396_v0  ;;  %v8332_v62 = vor.u32 %v9223_v46, %v8329_v9  ;;  %v9151_v38 = vld [vmem:[%s10403_s24 + $0x94] sm:$0xf] }
 0x72d   : > { %13899 = vst [vmem:[#allocation46_spill] sm:$0xff] %v12270_v4  ;;  %5056 = vmatpush.bf16.msra.mxu0 %v8200_v22  ;;  %v9235_v58 = vld [vmem:[%s10403_s24 + $0x32c] sm:$0xf0]  ;;  %5087 = vmatpush.bf16.msra.mxu1 %v8392_v51  ;;  %v8104_v22 = vor.u32 %v9171_v14, %v8103_v6  ;;  %v8041_v36 = vld [vmem:[%s10403_s24 + $0xb0] sm:$0xf0] }
 0x72e   : > { %4847 = vmatmul.bf16.gmra.mxu0 %v12274_v48  ;;  %4876 = vmatmul.bf16.gmra.mxu1 %v12278_v57  ;;  %v8360_v49 = vor.u32 %v9235_v58, %v8359_v56  ;;  %v8039_v30 = vld [vmem:[%s10403_s24 + $0x90] sm:$0xf]  ;;  %v9215_v51 = vld [vmem:[%s10403_s24 + $0x294] sm:$0xf]  ;;  %v8044_v13 = vor.u32 %v9151_v38, %v8041_v36  ;;  %v8535_v45 = vld [vmem:[%s10405_s3 + $0x80] sm:$0xf] }
 0x72f   : > { %4905 = vmatmul.bf16.gmra.mxu2 %v12274_v48  ;;  %4934 = vmatmul.bf16.gmra.mxu3 %v12278_v57  ;;  %v8295_v31 = vld [vmem:[%s10403_s24 + $0x290] sm:$0xf]  ;;  %v8297_v10 = vld [vmem:[%s10403_s24 + $0x2b0] sm:$0xf0]  ;;  %v8599_v44 = vld [vmem:[%s10405_s3 + $0x100] sm:$0xf] }
 0x730   : > { %5117 = vmatpush.bf16.msra.mxu2 %v8108_v54  ;;  %5146 = vmatpush.bf16.msra.mxu3 %v8364_v16  ;;  %v9219_v50 = vld [vmem:[%s10403_s24 + $0x2ac] sm:$0xf0]  ;;  %v8300_v0 = vor.u32 %v9215_v51, %v8297_v10  ;;  %v9143_v58 = vld [vmem:[%s10403_s24 + $0x54] sm:$0xf]  ;;  %v8207_v10 = vld [vmem:[%s10403_s24 + $0x1d8] sm:$0xf] }
 0x731   : > { %5057 = vmatpush.bf16.msra.mxu0 %v8168_v15  ;;  %5088 = vmatpush.bf16.msra.mxu1 %v8360_v49  ;;  %v8072_v15 = vor.u32 %v9163_v5, %v8071_v63  ;;  %v8296_v21 = vor.u32 %v9219_v50, %v8295_v31  ;;  %v8007_v28 = vld [vmem:[%s10403_s24 + $0x50] sm:$0xf]  ;;  %v9207_v49 = vld [vmem:[%s10403_s24 + $0x254] sm:$0xf]  ;;  %v12368_v50 = vperm.slane %v12311_v39, 1 }
 0x732   : > { %v9147_v6 = vld [vmem:[%s10403_s24 + $0x6c] sm:$0xf0]  ;;  %v8265_v55 = vld [vmem:[%s10403_s24 + $0x270] sm:$0xf0]  ;;  %v9294_v11 = vld [vmem:[%s10405_s3 + $0x104] sm:$0xf0] }
 0x733   : > { %v8263_v14 = vld [vmem:[%s10403_s24 + $0x250] sm:$0xf]  ;;  %v8008_v53 = vor.u32 %v9147_v6, %v8007_v28  ;;  %v8268_v63 = vor.u32 %v9207_v49, %v8265_v55  ;;  %v7977_v61 = vld [vmem:[%s10403_s24 + $0x30] sm:$0xf0]  ;;  %v9196_v28 = vld [vmem:[%s10403_s24 + $0x1f4] sm:$0xf0] }
 0x734   : > { %5118 = vmatpush.bf16.msra.mxu2 %v8076_v3  ;;  %5147 = vmatpush.bf16.msra.mxu3 %v8332_v62  ;;  %v9211_v56 = vld [vmem:[%s10403_s24 + $0x26c] sm:$0xf0]  ;;  %v9199_v43 = vld [vmem:[%s10403_s24 + $0x214] sm:$0xf]  ;;  %v8463_v6 = vld [vmem:[%s10403_s24 + $0x3d8] sm:$0xf] }
 0x735   : > { %5058 = vmatpush.bf16.msra.mxu0 %v8136_v37  ;;  %5089 = vmatpush.bf16.msra.mxu1 %v8328_v41  ;;  %v8040_v37 = vor.u32 %v9155_v34, %v8039_v30  ;;  %v8264_v7 = vor.u32 %v9211_v56, %v8263_v14  ;;  %v7975_v54 = vld [vmem:[%s10403_s24 + $0x10] sm:$0xf]  ;;  %v8233_v41 = vld [vmem:[%s10403_s24 + $0x230] sm:$0xf0]  ;;  %v9260_v14 = vld [vmem:[%s10403_s24 + $0x3f4] sm:$0xf0] }
 0x736   : > { %v9139_v23 = vld [vmem:[%s10403_s24 + $0x2c] sm:$0xf0]  ;;  %v8236_v31 = vor.u32 %v9199_v43, %v8233_v41  ;;  %v9192_v56 = vld [vmem:[%s10403_s24 + $0x1dc] sm:$0xf]  ;;  %v8464_v55 = vor.u32 %v9260_v14, %v8463_v6  ;;  %v9252_v43 = vld [vmem:[%s10403_s24 + $0x3b4] sm:$0xf0] }
 0x737   : > { %v8231_v5 = vld [vmem:[%s10403_s24 + $0x210] sm:$0xf]  ;;  %v7976_v9 = vor.u32 %v9139_v23, %v7975_v54  ;;  %v8465_v54 = vld [vmem:[%s10403_s24 + $0x3f8] sm:$0xf0]  ;;  %v9244_v6 = vld [vmem:[%s10403_s24 + $0x374] sm:$0xf0] }
 0x738   : > { %5119 = vmatpush.bf16.msra.mxu2 %v8044_v13  ;;  %5148 = vmatpush.bf16.msra.mxu3 %v8300_v0  ;;  %v9203_v1 = vld [vmem:[%s10403_s24 + $0x22c] sm:$0xf0]  ;;  %v8208_v0 = vor.u32 %v9196_v28, %v8207_v10  ;;  %v9184_v41 = vld [vmem:[%s10403_s24 + $0x19c] sm:$0xf]  ;;  %v8399_v28 = vld [vmem:[%s10403_s24 + $0x358] sm:$0xf] }
 0x739   : > { %5059 = vmatpush.bf16.msra.mxu0 %v8104_v22  ;;  %v8009_v22 = vld [vmem:[%s10403_s24 + $0x70] sm:$0xf0]  ;;  %5090 = vmatpush.bf16.msra.mxu1 %v8296_v21  ;;  %v8232_v30 = vor.u32 %v9203_v1, %v8231_v5  ;;  %v8175_v1 = vld [vmem:[%s10403_s24 + $0x198] sm:$0xf] }
 0x73a   : > { %v8012_v16 = vor.u32 %v9143_v58, %v8009_v22  ;;  %v8209_v58 = vld [vmem:[%s10403_s24 + $0x1f8] sm:$0xf0] }
 0x73c   : > { %5120 = vmatpush.bf16.msra.mxu2 %v8012_v16  ;;  %5149 = vmatpush.bf16.msra.mxu3 %v8268_v63 }
 0x73d   : > { %5060 = vmatpush.bf16.msra.mxu0 %v8072_v15  ;;  %v9135_v15 = vld [vmem:[%s10403_s24 + $0x14] sm:$0xf]  ;;  %5091 = vmatpush.bf16.msra.mxu1 %v8264_v7  ;;  %v9256_v7 = vld [vmem:[%s10403_s24 + $0x3dc] sm:$0xf] }
 0x73e   : > { %4948 = vmatmul.bf16.vlgmr.msrb.gmra.mxu0 %v12061_v17  ;;  %4977 = vmatmul.bf16.vlgmr.msrb.gmra.mxu1 %v12065_v59  ;;  %v7980_v34 = vor.u32 %v9135_v15, %v7977_v61  ;;  %v8468_v63 = vor.u32 %v9256_v7, %v8465_v54  ;;  %v9188_v15 = vld [vmem:[%s10403_s24 + $0x1b4] sm:$0xf0]  ;;  %v8401_v7 = vld [vmem:[%s10403_s24 + $0x378] sm:$0xf0] }
 0x73f   : > { %5006 = vmatmul.bf16.vlgmr.msrb.gmra.mxu2 %v12061_v17  ;;  %5035 = vmatmul.bf16.vlgmr.msrb.gmra.mxu3 %v12065_v59  ;;  %v8176_v61 = vor.u32 %v9188_v15, %v8175_v1  ;;  %v8111_v1 = vld [vmem:[%s10403_s24 + $0x118] sm:$0xf] }
 0x740   : > { %5121 = vmatpush.bf16.msra.mxu2 %v7980_v34  ;;  %5150 = vmatpush.bf16.msra.mxu3 %v8236_v31  ;;  %v9248_v34 = vld [vmem:[%s10403_s24 + $0x39c] sm:$0xf]  ;;  %v9172_v15 = vld [vmem:[%s10403_s24 + $0x134] sm:$0xf0] }
 0x741   : > { %5061 = vmatpush.bf16.msra.mxu0 %v8040_v37  ;;  %5092 = vmatpush.bf16.msra.mxu1 %v8232_v30  ;;  %v8433_v31 = vld [vmem:[%s10403_s24 + $0x3b8] sm:$0xf0] }
 0x744   : > { %5259 = vmatpush.bf16.msrb.mxu3 %v8468_v63 }
 0x745   : > { %5062 = vmatpush.bf16.msra.mxu0 %v8008_v53  ;;  %v8212_v53 = vor.u32 %v9192_v56, %v8209_v58  ;;  %5201 = vmatpush.bf16.msrb.mxu1 %v8464_v55  ;;  %v8400_v58 = vor.u32 %v9244_v6, %v8399_v28  ;;  %v8145_v55 = vld [vmem:[%s10403_s24 + $0x178] sm:$0xf0] }
 0x747   : > { %5230 = vmatpush.bf16.msrb.mxu2 %v8212_v53  ;;  %v9240_v53 = vld [vmem:[%s10403_s24 + $0x35c] sm:$0xf] }
 0x748   : > { %v8404_v63 = vor.u32 %v9240_v53, %v8401_v7  ;;  %v9160_v53 = vld [vmem:[%s10403_s24 + $0xdc] sm:$0xf] }
 0x749   : > { %5063 = vmatpush.bf16.msra.mxu0 %v7976_v9 }
 0x74d   : > { %5172 = vmatpush.bf16.msrb.mxu0 %v8208_v0  ;;  %v9176_v0 = vld [vmem:[%s10403_s24 + $0x15c] sm:$0xf] }
 0x74e   : > { %4953 = vmatmul.bf16.gmra.mxu0 %v12114_v26  ;;  %4982 = vmatmul.bf16.gmra.mxu1 %v12118_v35 }
 0x74f   : > { %5011 = vmatmul.bf16.gmra.mxu2 %v12114_v26  ;;  %5040 = vmatmul.bf16.gmra.mxu3 %v12118_v35 }
 0x751   : > { %5173 = vmatpush.bf16.msrb.mxu0 %v8176_v61 }
 0x75e   : > { %4958 = vmatmul.bf16.gmra.mxu0 %v12235_v8  ;;  %4987 = vmatmul.bf16.gmra.mxu1 %v12239_v29 }
 0x75f   : > { %v4833_v27 = vpop.f32.mrf.mxu0  ;;  %v4862_v46 = vpop.f32.mrf.mxu1  ;;  %5016 = vmatmul.bf16.gmra.mxu2 %v12235_v8  ;;  %5045 = vmatmul.bf16.gmra.mxu3 %v12239_v29 }
 0x760   : > { %v4834_v3 = vadd.f32 %v4833_v27, %v12328_v47  ;;  %v8431_v27 = vld [vmem:[%s10403_s24 + $0x398] sm:$0xf] }
 0x761   : > { %v8432_v9 = vor.u32 %v9252_v43, %v8431_v27  ;;  %v8367_v27 = vld [vmem:[%s10403_s24 + $0x318] sm:$0xf] }
 0x762   : > { %v12363_v62 = vadd.f32 %v4862_v46, %v4834_v3  ;;  %v8177_v3 = vld [vmem:[%s10403_s24 + $0x1b8] sm:$0xf0] }
 0x763   : > { %v8180_v30 = vor.u32 %v9184_v41, %v8177_v3  ;;  %5202 = vmatpush.bf16.msrb.mxu1 %v8432_v9  ;;  %v8112_v41 = vor.u32 %v9172_v15, %v8111_v1  ;;  %v9236_v3 = vld [vmem:[%s10403_s24 + $0x334] sm:$0xf0]  ;;  %v9168_v9 = vld [vmem:[%s10403_s24 + $0x11c] sm:$0xf] }
 0x764   : > { %v5288_v32 = vmax.f32 %v12363_v62, 0.0 }
 0x765   : > { %5231 = vmatpush.bf16.msrb.mxu2 %v8180_v30  ;;  %v8113_v30 = vld [vmem:[%s10403_s24 + $0x138] sm:$0xf0] }
 0x766   : > { %v4891_v37 = vpop.f32.mrf.mxu2  ;;  %v4920_v38 = vpop.f32.mrf.mxu3 }
 0x767   : > { %v4892_v21 = vadd.f32 %v4891_v37, %v12368_v50  ;;  %v12379_v51 = vpop.f32.mrf.mxu0  ;;  %v12381_v13 = vpop.f32.mrf.mxu1  ;;  %v8436_v37 = vor.u32 %v9248_v34, %v8433_v31  ;;  %5203 = vmatpush.bf16.msrb.mxu1 %v8400_v58  ;;  %v8368_v31 = vor.u32 %v9236_v3, %v8367_v27  ;;  %v8335_v58 = vld [vmem:[%s10403_s24 + $0x2d8] sm:$0xf] }
 0x768   : > { %v8303_v3 = vld [vmem:[%s10403_s24 + $0x298] sm:$0xf] }
 0x769   : > { %v12373_v36 = vadd.f32 %v4920_v38, %v4892_v21  ;;  %v8143_v21 = vld [vmem:[%s10403_s24 + $0x158] sm:$0xf]  ;;  %5260 = vmatpush.bf16.msrb.mxu3 %v8436_v37  ;;  %v8116_v37 = vor.u32 %v9168_v9, %v8113_v30 }
 0x76a   : > { %v9180_v38 = vld [vmem:[%s10403_s24 + $0x174] sm:$0xf0] }
 0x76b   : > { %v8144_v10 = vor.u32 %v9180_v38, %v8143_v21  ;;  %v9232_v21 = vld [vmem:[%s10403_s24 + $0x31c] sm:$0xf]  ;;  %5204 = vmatpush.bf16.msrb.mxu1 %v8368_v31  ;;  %v5289_v25 = vmax.f32 %v12373_v36, 0.0 }
 0x76c   : > { %v8369_v38 = vld [vmem:[%s10403_s24 + $0x338] sm:$0xf0] }
 0x76d   : > { %5174 = vmatpush.bf16.msrb.mxu0 %v8144_v10  ;;  %5261 = vmatpush.bf16.msrb.mxu3 %v8404_v63  ;;  %v8372_v10 = vor.u32 %v9232_v21, %v8369_v38  ;;  %v9152_v31 = vld [vmem:[%s10403_s24 + $0x9c] sm:$0xf] }
 0x76e   : > { %4963 = vmatmul.bf16.gmra.mxu0 %v12274_v48  ;;  %4992 = vmatmul.bf16.gmra.mxu1 %v12278_v57  ;;  %v12393_v22 = vpop.f32.mrf.mxu2  ;;  %v12395_v49 = vpop.f32.mrf.mxu3 }
 0x76f   : > { %5021 = vmatmul.bf16.gmra.mxu2 %v12274_v48  ;;  %5050 = vmatmul.bf16.gmra.mxu3 %v12278_v57 }
 0x771   : > { %5175 = vmatpush.bf16.msrb.mxu0 %v8112_v41  ;;  %5262 = vmatpush.bf16.msrb.mxu3 %v8372_v10  ;;  %v9156_v41 = vld [vmem:[%s10403_s24 + $0xb4] sm:$0xf0]  ;;  %v9216_v10 = vld [vmem:[%s10403_s24 + $0x29c] sm:$0xf] }
 0x77e   : > { %5064 = vmatmul.bf16.vlgmr.msra.gmra.mxu0 %v12061_v17  ;;  %5093 = vmatmul.bf16.vlgmr.msra.gmra.mxu1 %v12065_v59 }
 0x77f   : > { %5122 = vmatmul.bf16.vlgmr.msra.gmra.mxu2 %v12061_v17  ;;  %5151 = vmatmul.bf16.vlgmr.msra.gmra.mxu3 %v12065_v59 }
 0x787   : > { %v4838_v23 = vpop.f32.mrf.mxu0  ;;  %v4867_v16 = vpop.f32.mrf.mxu1 }
 0x788   : > { %v4839_v5 = vadd.f32 %v4838_v23, %v12328_v47 }
 0x78a   : > { %v12406_v46 = vadd.f32 %v4867_v16, %v4839_v5  ;;  %v8148_v16 = vor.u32 %v9176_v0, %v8145_v55  ;;  %v8079_v0 = vld [vmem:[%s10403_s24 + $0xd8] sm:$0xf] }
 0x78b   : > { %v9228_v55 = vld [vmem:[%s10403_s24 + $0x2f4] sm:$0xf0] }
 0x78c   : > { %5232 = vmatpush.bf16.msrb.mxu2 %v8148_v16  ;;  %v5304_v28 = vmax.f32 %v12406_v46, 0.0  ;;  %v9224_v16 = vld [vmem:[%s10403_s24 + $0x2dc] sm:$0xf] }
 0x78d   : > { %v8337_v46 = vld [vmem:[%s10403_s24 + $0x2f8] sm:$0xf0] }
 0x78e   : > { %v4896_v14 = vpop.f32.mrf.mxu2  ;;  %v4925_v56 = vpop.f32.mrf.mxu3  ;;  %5069 = vmatmul.bf16.gmra.mxu0 %v12114_v26  ;;  %5098 = vmatmul.bf16.gmra.mxu1 %v12118_v35  ;;  %v8340_v15 = vor.u32 %v9224_v16, %v8337_v46 }
 0x78f   : > { %v4897_v54 = vadd.f32 %v4896_v14, %v12368_v50  ;;  %v4840_v23 = vpop.f32.mrf.mxu0  ;;  %v4869_v43 = vpop.f32.mrf.mxu1  ;;  %5127 = vmatmul.bf16.gmra.mxu2 %v12114_v26  ;;  %5156 = vmatmul.bf16.gmra.mxu3 %v12118_v35  ;;  %v9164_v14 = vld [vmem:[%s10403_s24 + $0xf4] sm:$0xf0] }
 0x790   : > { %v4841_v5 = vadd.f32 %v4840_v23, %v12328_v47  ;;  %5233 = vmatpush.bf16.msrb.mxu2 %v8116_v37  ;;  %v8081_v23 = vld [vmem:[%s10403_s24 + $0xf8] sm:$0xf0]  ;;  %5263 = vmatpush.bf16.msrb.mxu3 %v8340_v15 }
 0x791   : > { %v12423_v61 = vadd.f32 %v4925_v56, %v4897_v54  ;;  %v8080_v56 = vor.u32 %v9164_v14, %v8079_v0  ;;  %v8336_v54 = vor.u32 %v9228_v55, %v8335_v58  ;;  %v8084_v1 = vor.u32 %v9160_v53, %v8081_v23  ;;  %v8049_v37 = vld [vmem:[%s10403_s24 + $0xb8] sm:$0xf0]  ;;  %v9148_v58 = vld [vmem:[%s10403_s24 + $0x74] sm:$0xf0] }
 0x792   : > { %v4870_v34 = vadd.f32 %v4869_v43, %v4841_v5  ;;  %v8047_v43 = vld [vmem:[%s10403_s24 + $0x98] sm:$0xf]  ;;  %v8052_v38 = vor.u32 %v9152_v31, %v8049_v37  ;;  %v8017_v23 = vld [vmem:[%s10403_s24 + $0x78] sm:$0xf0] }
 0x793   : > { %5176 = vmatpush.bf16.msrb.mxu0 %v8080_v56  ;;  %5205 = vmatpush.bf16.msrb.mxu1 %v8336_v54  ;;  %v8048_v30 = vor.u32 %v9156_v41, %v8047_v43  ;;  %v8015_v56 = vld [vmem:[%s10403_s24 + $0x58] sm:$0xf]  ;;  %v9144_v54 = vld [vmem:[%s10403_s24 + $0x5c] sm:$0xf] }
 0x794   : > { %v5312_v6 = vmax.f32 %v4870_v34, 0.0  ;;  %5234 = vmatpush.bf16.msrb.mxu2 %v8084_v1  ;;  %v9220_v34 = vld [vmem:[%s10403_s24 + $0x2b4] sm:$0xf0]  ;;  %v8016_v53 = vor.u32 %v9148_v58, %v8015_v56  ;;  %v8020_v46 = vor.u32 %v9144_v54, %v8017_v23  ;;  %v8273_v1 = vld [vmem:[%s10403_s24 + $0x278] sm:$0xf0] }
 0x795   : > { %v8304_v21 = vor.u32 %v9220_v34, %v8303_v3  ;;  %v8271_v55 = vld [vmem:[%s10403_s24 + $0x258] sm:$0xf]  ;;  %v9136_v37 = vld [vmem:[%s10403_s24 + $0x1c] sm:$0xf] }
 0x796   : > { %v4898_v7 = vpop.f32.mrf.mxu2  ;;  %v12443_v63 = vpack.c.bf16 %v5312_v6, %v5304_v28  ;;  %v4927_v27 = vpop.f32.mrf.mxu3  ;;  %v8305_v28 = vld [vmem:[%s10403_s24 + $0x2b8] sm:$0xf0]  ;;  %v5305_v6 = vmax.f32 %v12423_v61, 0.0  ;;  %v7983_v3 = vld [vmem:[%s10403_s24 + $0x18] sm:$0xf] }
 0x797   : > { %v4899_v5 = vadd.f32 %v4898_v7, %v12368_v50  ;;  %v8308_v14 = vor.u32 %v9216_v10, %v8305_v28  ;;  %5177 = vmatpush.bf16.msrb.mxu0 %v8048_v30  ;;  %5206 = vmatpush.bf16.msrb.mxu1 %v8304_v21  ;;  %v9212_v7 = vld [vmem:[%s10403_s24 + $0x274] sm:$0xf0]  ;;  %v7985_v21 = vld [vmem:[%s10403_s24 + $0x38] sm:$0xf0] }
 0x798   : > { %5235 = vmatpush.bf16.msrb.mxu2 %v8052_v38  ;;  %v8272_v61 = vor.u32 %v9212_v7, %v8271_v55  ;;  %v8239_v30 = vld [vmem:[%s10403_s24 + $0x218] sm:$0xf]  ;;  %v7988_v28 = vor.u32 %v9136_v37, %v7985_v21 }
 0x799   : > { %v4928_v9 = vadd.f32 %v4927_v27, %v4899_v5  ;;  %5264 = vmatpush.bf16.msrb.mxu3 %v8308_v14  ;;  %v9208_v5 = vld [vmem:[%s10403_s24 + $0x25c] sm:$0xf]  ;;  %v9204_v31 = vld [vmem:[%s10403_s24 + $0x234] sm:$0xf0] }
 0x79a   : > { %v8276_v43 = vor.u32 %v9208_v5, %v8273_v1  ;;  %v8240_v10 = vor.u32 %v9204_v31, %v8239_v30 }
 0x79b   : > { %v5313_v0 = vmax.f32 %v4928_v9, 0.0  ;;  %v4843_v15 = vpop.f32.mrf.mxu0  ;;  %v4872_v27 = vpop.f32.mrf.mxu1  ;;  %5178 = vmatpush.bf16.msrb.mxu0 %v8016_v53  ;;  %5207 = vmatpush.bf16.msrb.mxu1 %v8272_v61  ;;  %v9140_v9 = vld [vmem:[%s10403_s24 + $0x34] sm:$0xf0] }
 0x79c   : > { %v4844_v41 = vadd.f32 %v4843_v15, %v12328_v47  ;;  %5236 = vmatpush.bf16.msrb.mxu2 %v8020_v46  ;;  %v7984_v34 = vor.u32 %v9140_v9, %v7983_v3 }
 0x79d   : > { %v12461_v16 = vpack.c.bf16 %v5313_v0, %v5305_v6  ;;  %5265 = vmatpush.bf16.msrb.mxu3 %v8276_v43  ;;  %v9200_v6 = vld [vmem:[%s10403_s24 + $0x21c] sm:$0xf] }
 0x79e   : > { %v4873_v38 = vadd.f32 %v4872_v27, %v4844_v41  ;;  %5074 = vmatmul.bf16.gmra.mxu0 %v12235_v8  ;;  %5103 = vmatmul.bf16.gmra.mxu1 %v12239_v29  ;;  %v8241_v0 = vld [vmem:[%s10403_s24 + $0x238] sm:$0xf0]  ;;  %s13920_s24 = scalar_lea.vmem [#allocation14], %s10395_s13 }
 0x79f   : > { %5132 = vmatmul.bf16.gmra.mxu2 %v12235_v8  ;;  %5161 = vmatmul.bf16.gmra.mxu3 %v12239_v29  ;;  %v8244_v14 = vor.u32 %v9200_v6, %v8241_v0 }
 0x7a0   : > { %5179 = vmatpush.bf16.msrb.mxu0 %v7984_v34  ;;  %5208 = vmatpush.bf16.msrb.mxu1 %v8240_v10  ;;  %v5320_v46 = vmax.f32 %v4873_v38, 0.0 }
 0x7a1   : > { %5237 = vmatpush.bf16.msrb.mxu2 %v7988_v28  ;;  %5266 = vmatpush.bf16.msrb.mxu3 %v8244_v14 }
 0x7a2   : > { %v4901_v56 = vpop.f32.mrf.mxu2  ;;  %v4930_v58 = vpop.f32.mrf.mxu3 }
 0x7a3   : > { %v4902_v55 = vadd.f32 %v4901_v56, %v12368_v50  ;;  %v4845_v53 = vpop.f32.mrf.mxu0  ;;  %v4874_v7 = vpop.f32.mrf.mxu1 }
 0x7a4   : > { %v4846_v54 = vadd.f32 %v4845_v53, %v12328_v47 }
 0x7a5   : > { %v4931_v23 = vadd.f32 %v4930_v58, %v4902_v55 }
 0x7a6   : > { %v4875_v61 = vadd.f32 %v4874_v7, %v4846_v54 }
 0x7a7   : > { %v5321_v31 = vmax.f32 %v4931_v23, 0.0 }
 0x7a8   : > { %v5328_v5 = vmax.f32 %v4875_v61, 0.0 }
 0x7aa   : > { %v4903_v1 = vpop.f32.mrf.mxu2  ;;  %v4932_v15 = vpop.f32.mrf.mxu3  ;;  %v12480_v27 = vpack.c.bf16 %v5328_v5, %v5320_v46 }
 0x7ab   : > { %v4904_v43 = vadd.f32 %v4903_v1, %v12368_v50  ;;  %v4848_v41 = vpop.f32.mrf.mxu0  ;;  %v4877_v3 = vpop.f32.mrf.mxu1 }
 0x7ac   : > { %v4849_v9 = vadd.f32 %v4848_v41, %v12328_v47  ;;  %v8527_v41 = vld [vmem:[%s10405_s3 + $0x70] sm:$0xf] }
 0x7ad   : > { %v4933_v30 = vadd.f32 %v4932_v15, %v4904_v43 }
 0x7ae   : > { %v4878_v34 = vadd.f32 %v4877_v3, %v4849_v9  ;;  %5079 = vmatmul.bf16.gmra.mxu0 %v12274_v48  ;;  %5108 = vmatmul.bf16.gmra.mxu1 %v12278_v57  ;;  %v9276_v3 = vld [vmem:[%s10405_s3 + $0x74] sm:$0xf0] }
 0x7af   : > { %v5329_v37 = vmax.f32 %v4933_v30, 0.0  ;;  %5137 = vmatmul.bf16.gmra.mxu2 %v12274_v48  ;;  %5166 = vmatmul.bf16.gmra.mxu3 %v12278_v57  ;;  %v8528_v9 = vor.u32 %v9276_v3, %v8527_v41  ;;  %v8591_v30 = vld [vmem:[%s10405_s3 + $0xf0] sm:$0xf]  ;;  %v8711_v3 = vld [vmem:[%s10405_s3 + $0x1e0] sm:$0xf] }
 0x7b0   : > { %v5336_v55 = vmax.f32 %v4878_v34, 0.0  ;;  %v9292_v34 = vld [vmem:[%s10405_s3 + $0xf4] sm:$0xf0] }
 0x7b1   : > { %v12488_v21 = vpack.c.bf16 %v5329_v37, %v5321_v31  ;;  %v8655_v31 = vld [vmem:[%s10405_s3 + $0x170] sm:$0xf]  ;;  %6158 = vmatpush.bf16.msra.mxu0 %v8528_v9  ;;  %v9322_v9 = vld [vmem:[%s10405_s3 + $0x1e4] sm:$0xf0] }
 0x7b2   : > { %v4906_v38 = vpop.f32.mrf.mxu2  ;;  %v4935_v10 = vpop.f32.mrf.mxu3 }
 0x7b3   : > { %v4907_v28 = vadd.f32 %v4906_v38, %v12368_v50  ;;  %v4850_v6 = vpop.f32.mrf.mxu0  ;;  %v4879_v0 = vpop.f32.mrf.mxu1 }
 0x7b4   : > { %v4851_v14 = vadd.f32 %v4850_v6, %v12328_v47  ;;  %v9324_v6 = vld [vmem:[%s10405_s3 + $0x1f4] sm:$0xf0] }
 0x7b5   : > { %v4936_v56 = vadd.f32 %v4935_v10, %v4907_v28  ;;  %v8592_v28 = vor.u32 %v9292_v34, %v8591_v30  ;;  %v8712_v30 = vor.u32 %v9322_v9, %v8711_v3  ;;  %v8511_v34 = vld [vmem:[%s10405_s3 + $0x50] sm:$0xf]  ;;  %v9270_v3 = vld [vmem:[%s10405_s3 + $0x44] sm:$0xf0]  ;;  %v8567_v9 = vld [vmem:[%s10405_s3 + $0xc0] sm:$0xf] }
 0x7b6   : > { %v4880_v58 = vadd.f32 %v4879_v0, %v4851_v14 }
 0x7b7   : > { %v5337_v15 = vmax.f32 %v4936_v56, 0.0  ;;  %6187 = vmatpush.bf16.msra.mxu1 %v8592_v28 }
 0x7b8   : > { %v5344_v53 = vmax.f32 %v4880_v58, 0.0 }
 0x7ba   : > { %v4908_v7 = vpop.f32.mrf.mxu2  ;;  %v4937_v54 = vpop.f32.mrf.mxu3  ;;  %v12492_v23 = vpack.c.bf16 %v5344_v53, %v5336_v55  ;;  %v8519_v55 = vld [vmem:[%s10405_s3 + $0x60] sm:$0xf]  ;;  %v9274_v53 = vld [vmem:[%s10405_s3 + $0x64] sm:$0xf0] }
 0x7bb   : > { %v4909_v61 = vadd.f32 %v4908_v7, %v12368_v50  ;;  %v12495_v46 = vpop.f32.mrf.mxu0  ;;  %v12497_v5 = vpop.f32.mrf.mxu1  ;;  %v8583_v7 = vld [vmem:[%s10405_s3 + $0xe0] sm:$0xf] }
 0x7bd   : > { %v4938_v1 = vadd.f32 %v4937_v54, %v4909_v61  ;;  %v8520_v54 = vor.u32 %v9274_v53, %v8519_v55  ;;  %v9290_v61 = vld [vmem:[%s10405_s3 + $0xe4] sm:$0xf0]  ;;  %v9304_v53 = vld [vmem:[%s10405_s3 + $0x154] sm:$0xf0] }
 0x7be   : > { %5180 = vmatmul.bf16.vlgmr.msrb.gmra.mxu0 %v12061_v17  ;;  %5209 = vmatmul.bf16.vlgmr.msrb.gmra.mxu1 %v12065_v59 }
 0x7bf   : > { %v5345_v43 = vmax.f32 %v4938_v1, 0.0  ;;  %5238 = vmatmul.bf16.vlgmr.msrb.gmra.mxu2 %v12061_v17  ;;  %5267 = vmatmul.bf16.vlgmr.msrb.gmra.mxu3 %v12065_v59  ;;  %v9308_v17 = vld [vmem:[%s10405_s3 + $0x174] sm:$0xf0]  ;;  %v8719_v59 = vld [vmem:[%s10405_s3 + $0x1f0] sm:$0xf] }
 0x7c0   : > { %v8656_v56 = vor.u32 %v9308_v17, %v8655_v31  ;;  %v8720_v58 = vor.u32 %v9324_v6, %v8719_v59  ;;  %v8647_v1 = vld [vmem:[%s10405_s3 + $0x160] sm:$0xf]  ;;  %6159 = vmatpush.bf16.msra.mxu0 %v8520_v54  ;;  %v9272_v31 = vld [vmem:[%s10405_s3 + $0x54] sm:$0xf0]  ;;  %v8575_v17 = vld [vmem:[%s10405_s3 + $0xd0] sm:$0xf] }
 0x7c1   : > { %v12508_v37 = vpack.c.bf16 %v5345_v43, %v5337_v15  ;;  %v9306_v15 = vld [vmem:[%s10405_s3 + $0x164] sm:$0xf0]  ;;  %v8584_v43 = vor.u32 %v9290_v61, %v8583_v7  ;;  %v8512_v28 = vor.u32 %v9272_v31, %v8511_v34  ;;  %v9288_v59 = vld [vmem:[%s10405_s3 + $0xd4] sm:$0xf0]  ;;  %v8639_v6 = vld [vmem:[%s10405_s3 + $0x150] sm:$0xf] }
 0x7c2   : > { %v12510_v38 = vpop.f32.mrf.mxu2  ;;  %v12512_v10 = vpop.f32.mrf.mxu3  ;;  %6216 = vmatpush.bf16.msra.mxu2 %v8656_v56  ;;  %6245 = vmatpush.bf16.msra.mxu3 %v8720_v58  ;;  %v8648_v41 = vor.u32 %v9306_v15, %v8647_v1  ;;  %v8576_v55 = vor.u32 %v9288_v59, %v8575_v17  ;;  %v8703_v7 = vld [vmem:[%s10405_s3 + $0x1d0] sm:$0xf]  ;;  %v9320_v54 = vld [vmem:[%s10405_s3 + $0x1d4] sm:$0xf0]  ;;  %v8640_v15 = vor.u32 %v9304_v53, %v8639_v6  ;;  %v9286_v34 = vld [vmem:[%s10405_s3 + $0xc4] sm:$0xf0] }
 0x7c3   : > { %v12517_v0 = vpop.f32.mrf.mxu0  ;;  %v12519_v14 = vpop.f32.mrf.mxu1  ;;  %6188 = vmatpush.bf16.msra.mxu1 %v8584_v43  ;;  %v8704_v43 = vor.u32 %v9320_v54, %v8703_v7  ;;  %v8631_v31 = vld [vmem:[%s10405_s3 + $0x140] sm:$0xf]  ;;  %v9302_v17 = vld [vmem:[%s10405_s3 + $0x144] sm:$0xf0]  ;;  %v8495_v7 = vld [vmem:[%s10405_s3 + $0x30] sm:$0xf] }
 0x7c4   : > { %6160 = vmatpush.bf16.msra.mxu0 %v8512_v28  ;;  %v8568_v28 = vor.u32 %v9286_v34, %v8567_v9  ;;  %v8632_v59 = vor.u32 %v9302_v17, %v8631_v31  ;;  %v8695_v6 = vld [vmem:[%s10405_s3 + $0x1c0] sm:$0xf]  ;;  %v9268_v54 = vld [vmem:[%s10405_s3 + $0x34] sm:$0xf0] }
 0x7c5   : > { %v9300_v34 = vld [vmem:[%s10405_s3 + $0x134] sm:$0xf0] }
 0x7c6   : > { %6217 = vmatpush.bf16.msra.mxu2 %v8648_v41  ;;  %6246 = vmatpush.bf16.msra.mxu3 %v8712_v30  ;;  %v8503_v41 = vld [vmem:[%s10405_s3 + $0x40] sm:$0xf]  ;;  %v9316_v31 = vld [vmem:[%s10405_s3 + $0x1b4] sm:$0xf0] }
 0x7c7   : > { %6189 = vmatpush.bf16.msra.mxu1 %v8576_v55  ;;  %v8504_v30 = vor.u32 %v9270_v3, %v8503_v41  ;;  %v9318_v55 = vld [vmem:[%s10405_s3 + $0x1c4] sm:$0xf0]  ;;  %v9284_v41 = vld [vmem:[%s10405_s3 + $0xb4] sm:$0xf0]  ;;  %v8623_v3 = vld [vmem:[%s10405_s3 + $0x130] sm:$0xf] }
 0x7c8   : > { %v8696_v53 = vor.u32 %v9318_v55, %v8695_v6  ;;  %v8487_v55 = vld [vmem:[%s10405_s3 + $0x20] sm:$0xf] }
 0x7c9   : > { %6161 = vmatpush.bf16.msra.mxu0 %v8504_v30  ;;  %v8687_v30 = vld [vmem:[%s10405_s3 + $0x1b0] sm:$0xf] }
 0x7ca   : > { %v12534_v56 = vpop.f32.mrf.mxu2  ;;  %v12536_v58 = vpop.f32.mrf.mxu3  ;;  %6218 = vmatpush.bf16.msra.mxu2 %v8640_v15  ;;  %6247 = vmatpush.bf16.msra.mxu3 %v8704_v43  ;;  %v8496_v15 = vor.u32 %v9268_v54, %v8495_v7  ;;  %v8559_v43 = vld [vmem:[%s10405_s3 + $0xb0] sm:$0xf]  ;;  %v8688_v6 = vor.u32 %v9316_v31, %v8687_v30  ;;  %v8551_v7 = vld [vmem:[%s10405_s3 + $0xa0] sm:$0xf]  ;;  %v9264_v31 = vld [vmem:[%s10405_s3 + $0x14] sm:$0xf0] }
 0x7cb   : > { %v12541_v61 = vpop.f32.mrf.mxu0  ;;  %v12543_v1 = vpop.f32.mrf.mxu1  ;;  %6190 = vmatpush.bf16.msra.mxu1 %v8568_v28  ;;  %v8479_v30 = vld [vmem:[%s10405_s3 + $0x10] sm:$0xf] }
 0x7cd   : > { %6162 = vmatpush.bf16.msra.mxu0 %v8496_v15  ;;  %v9314_v15 = vld [vmem:[%s10405_s3 + $0x1a4] sm:$0xf0] }
 0x7ce   : > { %5185 = vmatmul.bf16.gmra.mxu0 %v12114_v26  ;;  %5214 = vmatmul.bf16.gmra.mxu1 %v12118_v35 }
 0x7cf   : > { %5243 = vmatmul.bf16.gmra.mxu2 %v12114_v26  ;;  %5272 = vmatmul.bf16.gmra.mxu3 %v12118_v35  ;;  %v8560_v35 = vor.u32 %v9284_v41, %v8559_v43  ;;  %v9282_v43 = vld [vmem:[%s10405_s3 + $0xa4] sm:$0xf0]  ;;  %v8615_v41 = vld [vmem:[%s10405_s3 + $0x120] sm:$0xf] }
 0x7d0   : > { %6219 = vmatpush.bf16.msra.mxu2 %v8632_v59  ;;  %6248 = vmatpush.bf16.msra.mxu3 %v8696_v53  ;;  %v8624_v59 = vor.u32 %v9300_v34, %v8623_v3  ;;  %v9266_v53 = vld [vmem:[%s10405_s3 + $0x24] sm:$0xf0]  ;;  %v8552_v4 = vor.u32 %v9282_v43, %v8551_v7  ;;  %v8616_v3 = vor.u32 %v9298_v52, %v8615_v41  ;;  %v8679_v34 = vld [vmem:[%s10405_s3 + $0x1a0] sm:$0xf]  ;;  %v9296_v41 = vld [vmem:[%s10405_s3 + $0x114] sm:$0xf0] }
 0x7d1   : > { %6191 = vmatpush.bf16.msra.mxu1 %v8560_v35  ;;  %v8488_v54 = vor.u32 %v9266_v53, %v8487_v55  ;;  %v8680_v35 = vor.u32 %v9314_v15, %v8679_v34  ;;  %v9280_v55 = vld [vmem:[%s10405_s3 + $0x94] sm:$0xf0]  ;;  %v8607_v53 = vld [vmem:[%s10405_s3 + $0x110] sm:$0xf] }
 0x7d2   : > { %v12562_v26 = vpop.f32.mrf.mxu2  ;;  %v12564_v9 = vpop.f32.mrf.mxu3  ;;  %v8608_v15 = vor.u32 %v9296_v41, %v8607_v53  ;;  %v8600_v53 = vor.u32 %v9294_v11, %v8599_v44  ;;  %v8663_v41 = vld [vmem:[%s10405_s3 + $0x180] sm:$0xf] }
 0x7d3   : > { %v12569_v17 = vpop.f32.mrf.mxu0  ;;  %v12571_v28 = vpop.f32.mrf.mxu1  ;;  %6163 = vmatpush.bf16.msra.mxu0 %v8488_v54  ;;  %v9312_v54 = vld [vmem:[%s10405_s3 + $0x194] sm:$0xf0] }
 0x7d4   : > { %6220 = vmatpush.bf16.msra.mxu2 %v8624_v59  ;;  %6249 = vmatpush.bf16.msra.mxu3 %v8688_v6  ;;  %v8480_v59 = vor.u32 %v9264_v31, %v8479_v30  ;;  %v8543_v6 = vld [vmem:[%s10405_s3 + $0x90] sm:$0xf]  ;;  %v8471_v30 = vld [vmem:[%s10405_s3] sm:$0xf]  ;;  %v9262_v31 = vld [vmem:[%s10405_s3 + $0x4] sm:$0xf0] }
 0x7d5   : > { %6192 = vmatpush.bf16.msra.mxu1 %v8552_v4  ;;  %v8544_v43 = vor.u32 %v9280_v55, %v8543_v6  ;;  %v8671_v4 = vld [vmem:[%s10405_s3 + $0x190] sm:$0xf]  ;;  %v8472_v6 = vor.u32 %v9262_v31, %v8471_v30  ;;  %v9278_v55 = vld [vmem:[%s10405_s3 + $0x84] sm:$0xf0]  ;;  %v4836_v30 = vadd.f32 %v12379_v51, %v12328_v47  ;;  %v4894_v31 = vadd.f32 %v12393_v22, %v12368_v50 }
 0x7d6   : > { %v8536_v40 = vor.u32 %v9278_v55, %v8535_v45  ;;  %v12631_v45 = vperm.slane %v12311_v39, 3 }
 0x7d7   : > { %6164 = vmatpush.bf16.msra.mxu0 %v8480_v59  ;;  %v4865_v50 = vadd.f32 %v12381_v13, %v4836_v30  ;;  %v4923_v22 = vadd.f32 %v12395_v49, %v4894_v31 }
 0x7d8   : > { %6221 = vmatpush.bf16.msra.mxu2 %v8616_v3  ;;  %6250 = vmatpush.bf16.msra.mxu3 %v8680_v35  ;;  %v8672_v35 = vor.u32 %v9312_v54, %v8671_v4  ;;  %v9310_v4 = vld [vmem:[%s10405_s3 + $0x184] sm:$0xf0]  ;;  %v5010_v55 = vadd.f32 %v12534_v56, %v12631_v45 }
 0x7d9   : > { %6193 = vmatpush.bf16.msra.mxu1 %v8544_v43  ;;  %v8664_v59 = vor.u32 %v9310_v4, %v8663_v41 }
 0x7da   : > { %v12586_v52 = vpop.f32.mrf.mxu2  ;;  %v12588_v7 = vpop.f32.mrf.mxu3  ;;  %v5039_v56 = vadd.f32 %v12536_v58, %v5010_v55  ;;  %v9340_v55 = vld [vmem:[%s10405_s3 + $0x274] sm:$0xf0] }
 0x7db   : > { %v12593_v3 = vpop.f32.mrf.mxu0  ;;  %v12595_v34 = vpop.f32.mrf.mxu1  ;;  %6165 = vmatpush.bf16.msra.mxu0 %v8472_v6 }
 0x7dc   : > { %6222 = vmatpush.bf16.msra.mxu2 %v8608_v15  ;;  %6251 = vmatpush.bf16.msra.mxu3 %v8672_v35 }
 0x7dd   : > { %6194 = vmatpush.bf16.msra.mxu1 %v8536_v40  ;;  %v12628_v40 = vperm.slane %v12311_v39, 2 }
 0x7de   : > { %5190 = vmatmul.bf16.gmra.mxu0 %v12235_v8  ;;  %5219 = vmatmul.bf16.gmra.mxu1 %v12239_v29 }
 0x7df   : > { %5248 = vmatmul.bf16.gmra.mxu2 %v12235_v8  ;;  %5277 = vmatmul.bf16.gmra.mxu3 %v12239_v29  ;;  %v4952_v6 = vadd.f32 %v12517_v0, %v12628_v40 }
 0x7e0   : > { %6223 = vmatpush.bf16.msra.mxu2 %v8600_v53  ;;  %6252 = vmatpush.bf16.msra.mxu3 %v8664_v59  ;;  %v5297_v59 = vmax.f32 %v4923_v22, 0.0 }
 0x7e1   : > { %v4981_v0 = vadd.f32 %v12519_v14, %v4952_v6  ;;  %v8783_v6 = vld [vmem:[%s10405_s3 + $0x270] sm:$0xf] }
 0x7e2   : > { %v12609_v43 = vpop.f32.mrf.mxu2  ;;  %v12611_v54 = vpop.f32.mrf.mxu3  ;;  %v12673_v31 = vpack.c.bf16 %v5297_v59, %v5289_v25  ;;  %v4957_v25 = vadd.f32 %v12569_v17, %v12628_v40  ;;  %v8839_v59 = vld [vmem:[%s10405_s3 + $0x2e0] sm:$0xf] }
 0x7e3   : > { %v12613_v15 = vpop.f32.mrf.mxu0  ;;  %v12615_v35 = vpop.f32.mrf.mxu1  ;;  %v5298_v2 = vmax.f32 %v4981_v0, 0.0 }
 0x7ea   : > { %v12617_v11 = vpop.f32.mrf.mxu2  ;;  %v12619_v44 = vpop.f32.mrf.mxu3 }
 0x7eb   : > { %v12621_v8 = vpop.f32.mrf.mxu0  ;;  %v12623_v29 = vpop.f32.mrf.mxu1 }
 0x7ee   : > { %5195 = vmatmul.bf16.gmra.mxu0 %v12274_v48  ;;  %5224 = vmatmul.bf16.gmra.mxu1 %v12278_v57 }
 0x7ef   : > { %5253 = vmatmul.bf16.gmra.mxu2 %v12274_v48  ;;  %5282 = vmatmul.bf16.gmra.mxu3 %v12278_v57  ;;  %v4950_v48 = vadd.f32 %v12495_v46, %v12628_v40  ;;  %v5008_v57 = vadd.f32 %v12510_v38, %v12631_v45  ;;  %v5296_v46 = vmax.f32 %v4865_v50, 0.0  ;;  %v5299_v38 = vmax.f32 %v5039_v56, 0.0 }
 0x7f0   : > { %v4955_v56 = vadd.f32 %v12541_v61, %v12628_v40 }
 0x7f1   : > { %v4979_v41 = vadd.f32 %v12497_v5, %v4950_v48  ;;  %v5037_v4 = vadd.f32 %v12512_v10, %v5008_v57  ;;  %v12671_v30 = vpack.c.bf16 %v5296_v46, %v5288_v32  ;;  %v5015_v32 = vadd.f32 %v12586_v52, %v12631_v45  ;;  %v8847_v48 = vld [vmem:[%s10405_s3 + $0x2f0] sm:$0xf]  ;;  %v9356_v57 = vld [vmem:[%s10405_s3 + $0x2f4] sm:$0xf0]  ;;  %v8775_v52 = vld [vmem:[%s10405_s3 + $0x260] sm:$0xf] }
 0x7f2   : > { %v12643_v53 = vpop.f32.mrf.mxu2  ;;  %v12645_v39 = vpop.f32.mrf.mxu3  ;;  %v8848_v0 = vor.u32 %v9356_v57, %v8847_v48  ;;  %v9338_v46 = vld [vmem:[%s10405_s3 + $0x264] sm:$0xf0]  ;;  %v9336_v48 = vld [vmem:[%s10405_s3 + $0x254] sm:$0xf0] }
 0x7f3   : > { %v12651_v47 = vpop.f32.mrf.mxu0  ;;  %v12653_v51 = vpop.f32.mrf.mxu1  ;;  %v5290_v14 = vmax.f32 %v4979_v41, 0.0  ;;  %v5291_v58 = vmax.f32 %v5037_v4, 0.0  ;;  %v5013_v41 = vadd.f32 %v12562_v26, %v12631_v45  ;;  %v5044_v61 = vadd.f32 %v12588_v7, %v5015_v32 }
 0x7f4   : > { %6303 = vmatpush.bf16.msrb.mxu1 %v8848_v0 }
 0x7f5   : > { %v12675_v62 = vpack.c.bf16 %v5298_v2, %v5290_v14  ;;  %v12677_v36 = vpack.c.bf16 %v5299_v38, %v5291_v58  ;;  %v8784_v2 = vor.u32 %v9340_v55, %v8783_v6  ;;  %v4986_v38 = vadd.f32 %v12571_v28, %v4957_v25  ;;  %v9354_v58 = vld [vmem:[%s10405_s3 + $0x2e4] sm:$0xf0]  ;;  %v8831_v28 = vld [vmem:[%s10405_s3 + $0x2d0] sm:$0xf]  ;;  %v9352_v25 = vld [vmem:[%s10405_s3 + $0x2d4] sm:$0xf0] }
 0x7f6   : > { %v8776_v14 = vor.u32 %v9338_v46, %v8775_v52  ;;  %v8840_v26 = vor.u32 %v9354_v58, %v8839_v59  ;;  %v4984_v6 = vadd.f32 %v12543_v1, %v4955_v56  ;;  %v5042_v55 = vadd.f32 %v12564_v9, %v5013_v41  ;;  %v8759_v46 = vld [vmem:[%s10405_s3 + $0x240] sm:$0xf]  ;;  %v9334_v59 = vld [vmem:[%s10405_s3 + $0x244] sm:$0xf0] }
 0x7f7   : > { %6274 = vmatpush.bf16.msrb.mxu0 %v8784_v2  ;;  %v8767_v2 = vld [vmem:[%s10405_s3 + $0x250] sm:$0xf]  ;;  %v5314_v57 = vmax.f32 %v4986_v38, 0.0  ;;  %v5315_v0 = vmax.f32 %v5044_v61, 0.0  ;;  %v8832_v1 = vor.u32 %v9352_v25, %v8831_v28  ;;  %v8823_v38 = vld [vmem:[%s10405_s3 + $0x2c0] sm:$0xf]  ;;  %v8760_v58 = vor.u32 %v9334_v59, %v8759_v46 }
 0x7f8   : > { %6304 = vmatpush.bf16.msrb.mxu1 %v8840_v26  ;;  %v8768_v18 = vor.u32 %v9336_v48, %v8767_v2  ;;  %v5306_v56 = vmax.f32 %v4984_v6, 0.0  ;;  %v5307_v9 = vmax.f32 %v5042_v55, 0.0  ;;  %v9350_v26 = vld [vmem:[%s10405_s3 + $0x2c4] sm:$0xf0]  ;;  %v9372_v55 = vld [vmem:[%s10405_s3 + $0x374] sm:$0xf0]  ;;  %v4962_v48 = vadd.f32 %v12613_v15, %v12628_v40 }
 0x7f9   : > { %v8824_v6 = vor.u32 %v9350_v26, %v8823_v38  ;;  %v9332_v28 = vld [vmem:[%s10405_s3 + $0x234] sm:$0xf0]  ;;  %v8903_v15 = vld [vmem:[%s10405_s3 + $0x360] sm:$0xf]  ;;  %v9370_v38 = vld [vmem:[%s10405_s3 + $0x364] sm:$0xf0] }
 0x7fa   : > { %v12663_v13 = vpop.f32.mrf.mxu2  ;;  %v12665_v49 = vpop.f32.mrf.mxu3  ;;  %v12726_v61 = vpack.c.bf16 %v5314_v57, %v5306_v56  ;;  %v5020_v57 = vadd.f32 %v12617_v11, %v12631_v45  ;;  %v9348_v56 = vld [vmem:[%s10405_s3 + $0x2b4] sm:$0xf0]  ;;  %v4960_v11 = vadd.f32 %v12593_v3, %v12628_v40  ;;  %v8807_v3 = vld [vmem:[%s10405_s3 + $0x2a0] sm:$0xf] }
 0x7fb   : > { %v12667_v5 = vpop.f32.mrf.mxu0  ;;  %v12669_v10 = vpop.f32.mrf.mxu1  ;;  %6275 = vmatpush.bf16.msrb.mxu0 %v8776_v14  ;;  %v12728_v14 = vpack.c.bf16 %v5315_v0, %v5307_v9  ;;  %v8751_v0 = vld [vmem:[%s10405_s3 + $0x230] sm:$0xf] }
 0x7fc   : > { %6305 = vmatpush.bf16.msrb.mxu1 %v8832_v1  ;;  %v8752_v25 = vor.u32 %v9332_v28, %v8751_v0  ;;  %v8815_v1 = vld [vmem:[%s10405_s3 + $0x2b0] sm:$0xf]  ;;  %v8743_v0 = vld [vmem:[%s10405_s3 + $0x220] sm:$0xf]  ;;  %v9330_v28 = vld [vmem:[%s10405_s3 + $0x224] sm:$0xf0] }
 0x7fd   : > { %v8816_v59 = vor.u32 %v9348_v56, %v8815_v1  ;;  %v8744_v1 = vor.u32 %v9330_v28, %v8743_v0  ;;  %v8975_v56 = vld [vmem:[%s10405_s3 + $0x3f0] sm:$0xf]  ;;  %v9328_v0 = vld [vmem:[%s10405_s3 + $0x214] sm:$0xf0] }
 0x7fe   : > { %6166 = vmatmul.bf16.vlgmr.msra.gmra.mxu0 %v12671_v30  ;;  %6195 = vmatmul.bf16.vlgmr.msra.gmra.mxu1 %v12673_v31  ;;  %v8799_v28 = vld [vmem:[%s10405_s3 + $0x290] sm:$0xf] }
 0x7ff   : > { %6224 = vmatmul.bf16.vlgmr.msra.gmra.mxu2 %v12675_v62  ;;  %6253 = vmatmul.bf16.vlgmr.msra.gmra.mxu3 %v12677_v36 }
 0x800   : > { %6276 = vmatpush.bf16.msrb.mxu0 %v8768_v18  ;;  %v8911_v18 = vld [vmem:[%s10405_s3 + $0x370] sm:$0xf]  ;;  %6306 = vmatpush.bf16.msrb.mxu1 %v8824_v6 }
 0x801   : > { %v8912_v2 = vor.u32 %v9372_v55, %v8911_v18  ;;  %v8904_v18 = vor.u32 %v9370_v38, %v8903_v15  ;;  %v4991_v55 = vadd.f32 %v12615_v35, %v4962_v48  ;;  %v8976_v15 = vor.u32 %v9388_v19, %v8975_v56  ;;  %v8895_v38 = vld [vmem:[%s10405_s3 + $0x350] sm:$0xf]  ;;  %v9368_v35 = vld [vmem:[%s10405_s3 + $0x354] sm:$0xf0] }
 0x802   : > { %v12691_v50 = vpop.f32.mrf.mxu2  ;;  %v12693_v22 = vpop.f32.mrf.mxu3 }
 0x803   : > { %v12699_v17 = vpop.f32.mrf.mxu0  ;;  %v12701_v4 = vpop.f32.mrf.mxu1  ;;  %6332 = vmatpush.bf16.msrb.mxu2 %v8912_v2  ;;  %v5049_v2 = vadd.f32 %v12619_v44, %v5020_v57  ;;  %v4989_v44 = vadd.f32 %v12595_v34, %v4960_v11  ;;  %v8896_v57 = vor.u32 %v9368_v35, %v8895_v38  ;;  %6361 = vmatpush.bf16.msrb.mxu3 %v8976_v15 }
 0x804   : > { %6277 = vmatpush.bf16.msrb.mxu0 %v8760_v58  ;;  %v5018_v58 = vadd.f32 %v12609_v43, %v12631_v45  ;;  %6307 = vmatpush.bf16.msrb.mxu1 %v8816_v59  ;;  %v9346_v43 = vld [vmem:[%s10405_s3 + $0x2a4] sm:$0xf0] }
 0x805   : > { %v8808_v12 = vor.u32 %v9346_v43, %v8807_v3  ;;  %v5331_v59 = vmax.f32 %v5049_v2, 0.0  ;;  %v9344_v3 = vld [vmem:[%s10405_s3 + $0x294] sm:$0xf0]  ;;  %v8967_v43 = vld [vmem:[%s10405_s3 + $0x3e0] sm:$0xf] }
 0x806   : > { %v5047_v48 = vadd.f32 %v12611_v54, %v5018_v58  ;;  %v8800_v11 = vor.u32 %v9344_v3, %v8799_v28  ;;  %v9386_v58 = vld [vmem:[%s10405_s3 + $0x3e4] sm:$0xf0] }
 0x807   : > { %6333 = vmatpush.bf16.msrb.mxu2 %v8904_v18  ;;  %v8735_v18 = vld [vmem:[%s10405_s3 + $0x210] sm:$0xf]  ;;  %v9366_v2 = vld [vmem:[%s10405_s3 + $0x344] sm:$0xf0]  ;;  %v8968_v38 = vor.u32 %v9386_v58, %v8967_v43  ;;  %v9384_v43 = vld [vmem:[%s10405_s3 + $0x3d4] sm:$0xf0] }
 0x808   : > { %6278 = vmatpush.bf16.msrb.mxu0 %v8752_v25  ;;  %v5330_v25 = vmax.f32 %v4991_v55, 0.0  ;;  %6308 = vmatpush.bf16.msrb.mxu1 %v8808_v12  ;;  %v8736_v19 = vor.u32 %v9328_v0, %v8735_v18  ;;  %v8887_v55 = vld [vmem:[%s10405_s3 + $0x340] sm:$0xf]  ;;  %v5322_v12 = vmax.f32 %v4989_v44, 0.0  ;;  %v9326_v18 = vld [vmem:[%s10405_s3 + $0x204] sm:$0xf0] }
 0x809   : > { %v8888_v35 = vor.u32 %v9366_v2, %v8887_v55  ;;  %v8791_v0 = vld [vmem:[%s10405_s3 + $0x280] sm:$0xf]  ;;  %6362 = vmatpush.bf16.msrb.mxu3 %v8968_v38  ;;  %v9342_v3 = vld [vmem:[%s10405_s3 + $0x284] sm:$0xf0]  ;;  %v8879_v58 = vld [vmem:[%s10405_s3 + $0x330] sm:$0xf] }
 0x80a   : > { %v12715_v7 = vpop.f32.mrf.mxu2  ;;  %v12717_v32 = vpop.f32.mrf.mxu3  ;;  %v12790_v28 = vpack.c.bf16 %v5330_v25, %v5322_v12  ;;  %v9364_v25 = vld [vmem:[%s10405_s3 + $0x334] sm:$0xf0]  ;;  %v8951_v55 = vld [vmem:[%s10405_s3 + $0x3c0] sm:$0xf]  ;;  %v9382_v2 = vld [vmem:[%s10405_s3 + $0x3c4] sm:$0xf0]  ;;  %v4967_v12 = vadd.f32 %v12651_v47, %v12628_v40  ;;  %v5023_v47 = vadd.f32 %v12643_v53, %v12631_v45 }
 0x80b   : > { %v12719_v41 = vpop.f32.mrf.mxu0  ;;  %v12721_v52 = vpop.f32.mrf.mxu1  ;;  %6334 = vmatpush.bf16.msrb.mxu2 %v8896_v57  ;;  %v8727_v57 = vld [vmem:[%s10405_s3 + $0x200] sm:$0xf] }
 0x80c   : > { %6279 = vmatpush.bf16.msrb.mxu0 %v8744_v1  ;;  %v5323_v1 = vmax.f32 %v5047_v48, 0.0  ;;  %6309 = vmatpush.bf16.msrb.mxu1 %v8800_v11  ;;  %v8728_v48 = vor.u32 %v9326_v18, %v8727_v57  ;;  %v8960_v11 = vor.u32 %v9384_v43, %v8959_v42  ;;  %v5025_v42 = vadd.f32 %v12663_v13, %v12631_v45  ;;  %v8871_v57 = vld [vmem:[%s10405_s3 + $0x320] sm:$0xf]  ;;  %v9362_v18 = vld [vmem:[%s10405_s3 + $0x324] sm:$0xf0] }
 0x80d   : > { %v8943_v43 = vld [vmem:[%s10405_s3 + $0x3b0] sm:$0xf]  ;;  %v9360_v45 = vld [vmem:[%s10405_s3 + $0x314] sm:$0xf0] }
 0x80e   : > { %6171 = vmatmul.bf16.gmra.mxu0 %v12443_v63  ;;  %6200 = vmatmul.bf16.gmra.mxu1 %v12461_v16  ;;  %v12792_v44 = vpack.c.bf16 %v5331_v59, %v5323_v1  ;;  %v8880_v59 = vor.u32 %v9364_v25, %v8879_v58  ;;  %v8952_v1 = vor.u32 %v9382_v2, %v8951_v55  ;;  %v8935_v55 = vld [vmem:[%s10405_s3 + $0x3a0] sm:$0xf]  ;;  %v9378_v2 = vld [vmem:[%s10405_s3 + $0x3a4] sm:$0xf0] }
 0x80f   : > { %6229 = vmatmul.bf16.gmra.mxu2 %v12726_v61  ;;  %6258 = vmatmul.bf16.gmra.mxu3 %v12728_v14  ;;  %v5054_v58 = vadd.f32 %v12665_v49, %v5025_v42  ;;  %v5052_v25 = vadd.f32 %v12645_v39, %v5023_v47  ;;  %v8936_v49 = vor.u32 %v9378_v2, %v8935_v55  ;;  %v8919_v55 = vld [vmem:[%s10405_s3 + $0x380] sm:$0xf]  ;;  %v9374_v2 = vld [vmem:[%s10405_s3 + $0x384] sm:$0xf0] }
 0x810   : > { %6280 = vmatpush.bf16.msrb.mxu0 %v8736_v19  ;;  %6335 = vmatpush.bf16.msrb.mxu2 %v8888_v35  ;;  %v8792_v19 = vor.u32 %v9342_v3, %v8791_v0  ;;  %v4965_v0 = vadd.f32 %v12621_v8, %v12628_v40  ;;  %v8872_v3 = vor.u32 %v9362_v18, %v8871_v57  ;;  %v8863_v40 = vld [vmem:[%s10405_s3 + $0x310] sm:$0xf]  ;;  %v9358_v18 = vld [vmem:[%s10405_s3 + $0x304] sm:$0xf0] }
 0x811   : > { %6363 = vmatpush.bf16.msrb.mxu3 %v8960_v11  ;;  %v4996_v11 = vadd.f32 %v12653_v51, %v4967_v12  ;;  %v5347_v51 = vmax.f32 %v5054_v58, 0.0 }
 0x812   : > { %v12745_v9 = vpop.f32.mrf.mxu2  ;;  %v12747_v46 = vpop.f32.mrf.mxu3  ;;  %6310 = vmatpush.bf16.msrb.mxu1 %v8792_v19  ;;  %v9380_v19 = vld [vmem:[%s10405_s3 + $0x3b4] sm:$0xf0]  ;;  %v4994_v53 = vadd.f32 %v12623_v29, %v4965_v0  ;;  %v5339_v0 = vmax.f32 %v5052_v25, 0.0 }
 0x813   : > { %v12755_v26 = vpop.f32.mrf.mxu0  ;;  %v12757_v6 = vpop.f32.mrf.mxu1  ;;  %v8944_v8 = vor.u32 %v9380_v19, %v8943_v43  ;;  %v5346_v57 = vmax.f32 %v4996_v11, 0.0  ;;  %v8927_v43 = vld [vmem:[%s10405_s3 + $0x390] sm:$0xf]  ;;  %v9376_v19 = vld [vmem:[%s10405_s3 + $0x394] sm:$0xf0] }
 0x814   : > { %6281 = vmatpush.bf16.msrb.mxu0 %v8728_v48  ;;  %6336 = vmatpush.bf16.msrb.mxu2 %v8880_v59  ;;  %v8864_v59 = vor.u32 %v9360_v45, %v8863_v40  ;;  %v5338_v29 = vmax.f32 %v4994_v53, 0.0  ;;  %v12847_v58 = vpack.c.bf16 %v5347_v51, %v5339_v0  ;;  %v9743_v40 = vld [vmem:[%s10451_s14] sm:$0xff]  ;;  %s13901_s14 = scalar_lea.vmem [#allocation13], %s10395_s13 }
 0x815   : > { %6364 = vmatpush.bf16.msrb.mxu3 %v8952_v1  ;;  %v8855_v1 = vld [vmem:[%s10405_s3 + $0x300] sm:$0xf]  ;;  %v12850_v45 = vperm.slane %v9743_v40, 4  ;;  %v12852_v53 = vperm.slane %v9743_v40, 5 }
 0x816   : > { %v12845_v11 = vpack.c.bf16 %v5346_v57, %v5338_v29  ;;  %13900 = vst [vmem:[#allocation47_spill] sm:$0xff] %v12847_v58  ;;  %v8920_v57 = vor.u32 %v9374_v2, %v8919_v55 }
 0x817   : > { %v5068_v25 = vadd.f32 %v12699_v17, %v12850_v45  ;;  %v5066_v51 = vadd.f32 %v12667_v5, %v12850_v45 }
 0x818   : > { %6337 = vmatpush.bf16.msrb.mxu2 %v8872_v3  ;;  %v8856_v3 = vor.u32 %v9358_v18, %v8855_v1 }
 0x819   : > { %6365 = vmatpush.bf16.msrb.mxu3 %v8944_v8  ;;  %v8928_v8 = vor.u32 %v9376_v19, %v8927_v43 }
 0x81a   : > { %v12776_v34 = vpop.f32.mrf.mxu2  ;;  %v12778_v54 = vpop.f32.mrf.mxu3 }
 0x81b   : > { %v12783_v56 = vpop.f32.mrf.mxu0  ;;  %v12785_v15 = vpop.f32.mrf.mxu1 }
 0x81c   : > { %6338 = vmatpush.bf16.msrb.mxu2 %v8864_v59  ;;  %v5126_v59 = vadd.f32 %v12715_v7, %v12852_v53  ;;  %v5097_v7 = vadd.f32 %v12701_v4, %v5068_v25 }
 0x81d   : > { %6366 = vmatpush.bf16.msrb.mxu3 %v8936_v49  ;;  %v5124_v49 = vadd.f32 %v12691_v50, %v12852_v53 }
 0x81e   : > { %6176 = vmatmul.bf16.gmra.mxu0 %v12480_v27  ;;  %6205 = vmatmul.bf16.gmra.mxu1 %v12488_v21  ;;  %v5155_v0 = vadd.f32 %v12717_v32, %v5126_v59  ;;  %v5300_v43 = vmax.f32 %v5097_v7, 0.0  ;;  %v8529_v7 = vld [vmem:[%s10405_s3 + $0x78] sm:$0xf0] }
 0x81f   : > { %6234 = vmatmul.bf16.gmra.mxu2 %v12790_v28  ;;  %6263 = vmatmul.bf16.gmra.mxu3 %v12792_v44  ;;  %v5153_v5 = vadd.f32 %v12693_v22, %v5124_v49  ;;  %v5073_v22 = vadd.f32 %v12755_v26, %v12850_v45  ;;  %v9275_v49 = vld [vmem:[%s10405_s3 + $0x74] sm:$0xf] }
 0x820   : > { %6339 = vmatpush.bf16.msrb.mxu2 %v8856_v3  ;;  %v5095_v3 = vadd.f32 %v12669_v10, %v5066_v51  ;;  %v5301_v50 = vmax.f32 %v5155_v0, 0.0  ;;  %v12888_v10 = vperm.slane %v9743_v40, 6  ;;  %v8532_v0 = vor.u32 %v9275_v49, %v8529_v7 }
 0x821   : > { %6367 = vmatpush.bf16.msrb.mxu3 %v8928_v8  ;;  %v5293_v8 = vmax.f32 %v5153_v5, 0.0  ;;  %v8593_v5 = vld [vmem:[%s10405_s3 + $0xf8] sm:$0xf0]  ;;  %v12907_v49 = vperm.slane %v9743_v40, 7 }
 0x822   : > { %v12809_v38 = vpop.f32.mrf.mxu2  ;;  %v12811_v35 = vpop.f32.mrf.mxu3  ;;  %v5292_v19 = vmax.f32 %v5095_v3, 0.0  ;;  %v9291_v3 = vld [vmem:[%s10405_s3 + $0xf4] sm:$0xf]  ;;  %6390 = vmatpush.bf16.msra.mxu0 %v8532_v0 }
 0x823   : > { %v12819_v48 = vpop.f32.mrf.mxu0  ;;  %v12821_v13 = vpop.f32.mrf.mxu1  ;;  %v12886_v59 = vpack.c.bf16 %v5301_v50, %v5293_v8  ;;  %v5129_v50 = vadd.f32 %v12745_v9, %v12852_v53  ;;  %v5102_v8 = vadd.f32 %v12757_v6, %v5073_v22  ;;  %v8521_v9 = vld [vmem:[%s10405_s3 + $0x68] sm:$0xf0] }
 0x824   : > { %v12884_v32 = vpack.c.bf16 %v5300_v43, %v5292_v19  ;;  %v5071_v43 = vadd.f32 %v12719_v41, %v12850_v45 }
 0x825   : > { %6368 = vmatpush.bf16.msrb.mxu3 %v8920_v57  ;;  %v5131_v57 = vadd.f32 %v12776_v34, %v12852_v53  ;;  %v8596_v34 = vor.u32 %v9291_v3, %v8593_v5  ;;  %v8585_v3 = vld [vmem:[%s10405_s3 + $0xe8] sm:$0xf0] }
 0x826   : > { %v5100_v6 = vadd.f32 %v12721_v52, %v5071_v43  ;;  %v8588_v22 = vor.u32 %v9289_v60, %v8585_v3  ;;  %v9287_v52 = vld [vmem:[%s10405_s3 + $0xd4] sm:$0xf]  ;;  %v8577_v43 = vld [vmem:[%s10405_s3 + $0xd8] sm:$0xf0] }
 0x827   : > { %6419 = vmatpush.bf16.msra.mxu1 %v8596_v34  ;;  %v9271_v34 = vld [vmem:[%s10405_s3 + $0x54] sm:$0xf] }
 0x82a   : > { %v12833_v12 = vpop.f32.mrf.mxu2  ;;  %v12835_v42 = vpop.f32.mrf.mxu3 }
 0x82b   : > { %v12839_v39 = vpop.f32.mrf.mxu0  ;;  %v12841_v47 = vpop.f32.mrf.mxu1  ;;  %6420 = vmatpush.bf16.msra.mxu1 %v8588_v22 }
 0x82e   : > { %6181 = vmatmul.bf16.gmra.mxu0 %v12492_v23  ;;  %6210 = vmatmul.bf16.gmra.mxu1 %v12508_v37 }
 0x82f   : > { %6239 = vmatmul.bf16.gmra.mxu2 %v12845_v11  ;;  %6268 = vmatmul.bf16.gmra.mxu3 %v12847_v58  ;;  %v8524_v58 = vor.u32 %v9273_v33, %v8521_v9  ;;  %v5076_v33 = vadd.f32 %v12783_v56, %v12850_v45 }
 0x831   : > { %6391 = vmatpush.bf16.msra.mxu0 %v8524_v58  ;;  %v12935_v22 = vadd.f32 %v12785_v15, %v5076_v33  ;;  %v9307_v15 = vld [vmem:[%s10405_s3 + $0x174] sm:$0xf] }
 0x832   : > { %v12868_v1 = vpop.f32.mrf.mxu2  ;;  %v12870_v18 = vpop.f32.mrf.mxu3 }
 0x833   : > { %v12872_v29 = vpop.f32.mrf.mxu0  ;;  %v12874_v17 = vpop.f32.mrf.mxu1 }
 0x83a   : > { %v12880_v55 = vpop.f32.mrf.mxu2  ;;  %v12882_v2 = vpop.f32.mrf.mxu3 }
 0x83b   : > { %v5181_v4 = vpop.f32.mrf.mxu0  ;;  %v5210_v25 = vpop.f32.mrf.mxu1 }
 0x83c   : > { %v5182_v51 = vadd.f32 %v5181_v4, %v12888_v10  ;;  %v5160_v4 = vadd.f32 %v12778_v54, %v5131_v57  ;;  %v5158_v54 = vadd.f32 %v12747_v46, %v5129_v50  ;;  %v5316_v57 = vmax.f32 %v5102_v8, 0.0 }
 0x83d   : > { %v5308_v46 = vmax.f32 %v5100_v6, 0.0  ;;  %v9269_v6 = vld [vmem:[%s10405_s3 + $0x44] sm:$0xf] }
 0x83e   : > { %6282 = vmatmul.bf16.vlgmr.msrb.gmra.mxu0 %v12884_v32  ;;  %6311 = vmatmul.bf16.vlgmr.msrb.gmra.mxu1 %v12886_v59  ;;  %v5211_v20 = vadd.f32 %v5210_v25, %v5182_v51  ;;  %v5317_v25 = vmax.f32 %v5160_v4, 0.0  ;;  %v5309_v60 = vmax.f32 %v5158_v54, 0.0  ;;  %v8505_v54 = vld [vmem:[%s10405_s3 + $0x48] sm:$0xf0] }
 0x83f   : > { %v12927_v56 = vpack.c.bf16 %v5316_v57, %v5308_v46  ;;  %v5078_v57 = vadd.f32 %v12819_v48, %v12850_v45 }
 0x840   : > { %v5294_v0 = vmax.f32 %v5211_v20, 0.0  ;;  %v8580_v20 = vor.u32 %v9287_v52, %v8577_v43  ;;  %v12929_v3 = vpack.c.bf16 %v5317_v25, %v5309_v60  ;;  %v9267_v52 = vld [vmem:[%s10405_s3 + $0x34] sm:$0xf]  ;;  %v8497_v43 = vld [vmem:[%s10405_s3 + $0x38] sm:$0xf0] }
 0x841   : > { %v8500_v60 = vor.u32 %v9267_v52, %v8497_v43 }
 0x842   : > { %v5239_v26 = vpop.f32.mrf.mxu2  ;;  %v5268_v19 = vpop.f32.mrf.mxu3  ;;  %6421 = vmatpush.bf16.msra.mxu1 %v8580_v20 }
 0x843   : > { %v5183_v7 = vpop.f32.mrf.mxu0  ;;  %v5212_v24 = vpop.f32.mrf.mxu1  ;;  %v5240_v51 = vadd.f32 %v5239_v26, %v12907_v49 }
 0x844   : > { %v5184_v41 = vadd.f32 %v5183_v7, %v12888_v10  ;;  %v8513_v7 = vld [vmem:[%s10405_s3 + $0x58] sm:$0xf0] }
 0x845   : > { %v8516_v9 = vor.u32 %v9271_v34, %v8513_v7  ;;  %v5269_v26 = vadd.f32 %v5268_v19, %v5240_v51  ;;  %v8508_v51 = vor.u32 %v9269_v6, %v8505_v54  ;;  %v8657_v34 = vld [vmem:[%s10405_s3 + $0x178] sm:$0xf0]  ;;  %v5136_v7 = vadd.f32 %v12833_v12, %v12852_v53  ;;  %v9305_v6 = vld [vmem:[%s10405_s3 + $0x164] sm:$0xf] }
 0x846   : > { %v5213_v40 = vadd.f32 %v5212_v24, %v5184_v41  ;;  %v5324_v54 = vmax.f32 %v12935_v22, 0.0  ;;  %v9265_v22 = vld [vmem:[%s10405_s3 + $0x24] sm:$0xf] }
 0x847   : > { %6392 = vmatpush.bf16.msra.mxu0 %v8516_v9  ;;  %v5295_v33 = vmax.f32 %v5269_v26, 0.0 }
 0x848   : > { %v5302_v5 = vmax.f32 %v5213_v40, 0.0  ;;  %v9285_v40 = vld [vmem:[%s10405_s3 + $0xc4] sm:$0xf] }
 0x84a   : > { %v12923_v24 = vpack.c.bf16 %v5302_v5, %v5294_v0  ;;  %v5241_v50 = vpop.f32.mrf.mxu2  ;;  %v5270_v58 = vpop.f32.mrf.mxu3  ;;  %v8569_v0 = vld [vmem:[%s10405_s3 + $0xc8] sm:$0xf0]  ;;  %v5134_v5 = vadd.f32 %v12809_v38, %v12852_v53  ;;  %v8660_v38 = vor.u32 %v9307_v15, %v8657_v34  ;;  %v9281_v34 = vld [vmem:[%s10405_s3 + $0xa4] sm:$0xf] }
 0x84b   : > { %v5242_v8 = vadd.f32 %v5241_v50, %v12907_v49  ;;  %v5186_v4 = vpop.f32.mrf.mxu0  ;;  %v5215_v41 = vpop.f32.mrf.mxu1  ;;  %v8572_v25 = vor.u32 %v9285_v40, %v8569_v0  ;;  %6393 = vmatpush.bf16.msra.mxu0 %v8508_v51  ;;  %v9283_v50 = vld [vmem:[%s10405_s3 + $0xb4] sm:$0xf]  ;;  %v5107_v40 = vadd.f32 %v12821_v13, %v5078_v57  ;;  %v8489_v15 = vld [vmem:[%s10405_s3 + $0x28] sm:$0xf0] }
 0x84c   : > { %6340 = vmatmul.bf16.vlgmr.msrb.gmra.mxu2 %v12923_v24  ;;  %v5187_v48 = vadd.f32 %v5186_v4, %v12888_v10  ;;  %v12956_v20 = vadd.f32 %v12811_v35, %v5134_v5  ;;  %v8649_v4 = vld [vmem:[%s10405_s3 + $0x168] sm:$0xf0]  ;;  %v8492_v13 = vor.u32 %v9265_v22, %v8489_v15  ;;  %v9301_v15 = vld [vmem:[%s10405_s3 + $0x144] sm:$0xf] }
 0x84d   : > { %v5271_v19 = vadd.f32 %v5270_v58, %v5242_v8  ;;  %6422 = vmatpush.bf16.msra.mxu1 %v8572_v25  ;;  %6448 = vmatpush.bf16.msra.mxu2 %v8660_v38  ;;  %v8561_v58 = vld [vmem:[%s10405_s3 + $0xb8] sm:$0xf0]  ;;  %v8652_v0 = vor.u32 %v9305_v6, %v8649_v4  ;;  %v8553_v57 = vld [vmem:[%s10405_s3 + $0xa8] sm:$0xf0]  ;;  %v5332_v43 = vmax.f32 %v5107_v40, 0.0 }
 0x84e   : > { %6287 = vmatmul.bf16.gmra.mxu0 %v12927_v56  ;;  %6316 = vmatmul.bf16.gmra.mxu1 %v12929_v3  ;;  %v8564_v8 = vor.u32 %v9283_v50, %v8561_v58  ;;  %v5216_v5 = vadd.f32 %v5215_v41, %v5187_v48  ;;  %v8556_v38 = vor.u32 %v9281_v34, %v8553_v57  ;;  %v9303_v41 = vld [vmem:[%s10405_s3 + $0x154] sm:$0xf]  ;;  %v8641_v48 = vld [vmem:[%s10405_s3 + $0x158] sm:$0xf0]  ;;  %v8633_v34 = vld [vmem:[%s10405_s3 + $0x148] sm:$0xf0] }
 0x84f   : > { %v5303_v9 = vmax.f32 %v5271_v19, 0.0  ;;  %v5165_v19 = vadd.f32 %v12835_v42, %v5136_v7  ;;  %6394 = vmatpush.bf16.msra.mxu0 %v8500_v60  ;;  %v9323_v42 = vld [vmem:[%s10405_s3 + $0x1f4] sm:$0xf]  ;;  %v8721_v7 = vld [vmem:[%s10405_s3 + $0x1f8] sm:$0xf0]  ;;  %v8644_v58 = vor.u32 %v9303_v41, %v8641_v48 }
 0x850   : > { %v8724_v52 = vor.u32 %v9323_v42, %v8721_v7  ;;  %v8481_v4 = vld [vmem:[%s10405_s3 + $0x18] sm:$0xf0]  ;;  %v9261_v48 = vld [vmem:[%s10405_s3 + $0x4] sm:$0xf] }
 0x851   : > { %v12951_v46 = vpack.c.bf16 %v5303_v9, %v5295_v33  ;;  %6423 = vmatpush.bf16.msra.mxu1 %v8564_v8  ;;  %6449 = vmatpush.bf16.msra.mxu2 %v8652_v0  ;;  %v5325_v33 = vmax.f32 %v12956_v20, 0.0  ;;  %v5333_v60 = vmax.f32 %v5165_v19, 0.0  ;;  %v5310_v8 = vmax.f32 %v5216_v5, 0.0  ;;  %v9263_v20 = vld [vmem:[%s10405_s3 + $0x14] sm:$0xf] }
 0x852   : > { %v5244_v12 = vpop.f32.mrf.mxu2  ;;  %v5273_v26 = vpop.f32.mrf.mxu3  ;;  %6477 = vmatpush.bf16.msra.mxu3 %v8724_v52  ;;  %v8545_v0 = vld [vmem:[%s10405_s3 + $0x98] sm:$0xf0]  ;;  %v8713_v5 = vld [vmem:[%s10405_s3 + $0x1e8] sm:$0xf0]  ;;  %v12987_v52 = vpack.c.bf16 %v5332_v43, %v5324_v54  ;;  %v9299_v43 = vld [vmem:[%s10405_s3 + $0x134] sm:$0xf] }
 0x853   : > { %6369 = vmatmul.bf16.vlgmr.msrb.gmra.mxu3 %v12951_v46  ;;  %v5188_v35 = vpop.f32.mrf.mxu0  ;;  %v5217_v51 = vpop.f32.mrf.mxu1  ;;  %v5245_v50 = vadd.f32 %v5244_v12, %v12907_v49  ;;  %6395 = vmatpush.bf16.msra.mxu0 %v8492_v13  ;;  %v12989_v41 = vpack.c.bf16 %v5333_v60, %v5325_v33  ;;  %v8705_v33 = vld [vmem:[%s10405_s3 + $0x1d8] sm:$0xf0] }
 0x854   : > { %v5189_v25 = vadd.f32 %v5188_v35, %v12888_v10  ;;  %v8484_v35 = vor.u32 %v9263_v20, %v8481_v4  ;;  %v9319_v20 = vld [vmem:[%s10405_s3 + $0x1d4] sm:$0xf] }
 0x855   : > { %6424 = vmatpush.bf16.msra.mxu1 %v8556_v38  ;;  %6450 = vmatpush.bf16.msra.mxu2 %v8644_v58  ;;  %v5274_v13 = vadd.f32 %v5273_v26, %v5245_v50  ;;  %v8636_v38 = vor.u32 %v9301_v15, %v8633_v34  ;;  %v8473_v26 = vld [vmem:[%s10405_s3 + $0x8] sm:$0xf0]  ;;  %v9277_v50 = vld [vmem:[%s10405_s3 + $0x84] sm:$0xf] }
 0x856   : > { %v5218_v9 = vadd.f32 %v5217_v51, %v5189_v25  ;;  %v9279_v51 = vld [vmem:[%s10405_s3 + $0x94] sm:$0xf]  ;;  %v9321_v25 = vld [vmem:[%s10405_s3 + $0x1e4] sm:$0xf] }
 0x857   : > { %v8548_v12 = vor.u32 %v9279_v51, %v8545_v0  ;;  %6396 = vmatpush.bf16.msra.mxu0 %v8484_v35  ;;  %v5311_v60 = vmax.f32 %v5274_v13, 0.0  ;;  %v8708_v35 = vor.u32 %v9319_v20, %v8705_v33  ;;  %v8625_v51 = vld [vmem:[%s10405_s3 + $0x138] sm:$0xf0]  ;;  %v9317_v0 = vld [vmem:[%s10405_s3 + $0x1c4] sm:$0xf]  ;;  %v5081_v13 = vadd.f32 %v12839_v39, %v12850_v45 }
 0x858   : > { %v5318_v6 = vmax.f32 %v5218_v9, 0.0  ;;  %v8716_v9 = vor.u32 %v9321_v25, %v8713_v5  ;;  %v5083_v25 = vadd.f32 %v12872_v29, %v12850_v45  ;;  %v8697_v5 = vld [vmem:[%s10405_s3 + $0x1c8] sm:$0xf0]  ;;  %v5139_v29 = vadd.f32 %v12868_v1, %v12852_v53  ;;  %v9315_v1 = vld [vmem:[%s10405_s3 + $0x1b4] sm:$0xf] }
 0x859   : > { %6425 = vmatpush.bf16.msra.mxu1 %v8548_v12  ;;  %6451 = vmatpush.bf16.msra.mxu2 %v8636_v38  ;;  %v8628_v12 = vor.u32 %v9299_v43, %v8625_v51  ;;  %v8700_v34 = vor.u32 %v9317_v0, %v8697_v5  ;;  %v9295_v33 = vld [vmem:[%s10405_s3 + $0x114] sm:$0xf]  ;;  %v8609_v43 = vld [vmem:[%s10405_s3 + $0x118] sm:$0xf0]  ;;  %v9293_v5 = vld [vmem:[%s10405_s3 + $0x104] sm:$0xf] }
 0x85a   : > { %v5246_v40 = vpop.f32.mrf.mxu2  ;;  %v5275_v19 = vpop.f32.mrf.mxu3  ;;  %v12980_v22 = vpack.c.bf16 %v5318_v6, %v5310_v8  ;;  %6478 = vmatpush.bf16.msra.mxu3 %v8716_v9  ;;  %v8476_v8 = vor.u32 %v9261_v48, %v8473_v26  ;;  %v8537_v6 = vld [vmem:[%s10405_s3 + $0x88] sm:$0xf0]  ;;  %v5168_v20 = vadd.f32 %v12870_v18, %v5139_v29 }
 0x85b   : > { %v5247_v57 = vadd.f32 %v5246_v40, %v12907_v49  ;;  %v5191_v42 = vpop.f32.mrf.mxu0  ;;  %v5220_v7 = vpop.f32.mrf.mxu1  ;;  %v8540_v54 = vor.u32 %v9277_v50, %v8537_v6  ;;  %v5141_v40 = vadd.f32 %v12880_v55, %v12852_v53  ;;  %v9297_v55 = vld [vmem:[%s10405_s3 + $0x124] sm:$0xf]  ;;  %v5112_v50 = vadd.f32 %v12874_v17, %v5083_v25 }
 0x85c   : > { %6345 = vmatmul.bf16.gmra.mxu2 %v12980_v22  ;;  %6397 = vmatpush.bf16.msra.mxu0 %v8476_v8  ;;  %v5110_v6 = vadd.f32 %v12841_v47, %v5081_v13  ;;  %v5341_v18 = vmax.f32 %v5168_v20, 0.0 }
 0x85d   : > { %v5276_v58 = vadd.f32 %v5275_v19, %v5247_v57  ;;  %v5192_v19 = vadd.f32 %v5191_v42, %v12888_v10  ;;  %6426 = vmatpush.bf16.msra.mxu1 %v8540_v54  ;;  %6452 = vmatpush.bf16.msra.mxu2 %v8628_v12  ;;  %v8617_v42 = vld [vmem:[%s10405_s3 + $0x128] sm:$0xf0]  ;;  %v5170_v39 = vadd.f32 %v12882_v2, %v5141_v40 }
 0x85e   : > { %6292 = vmatmul.bf16.gmra.mxu0 %v12987_v52  ;;  %6321 = vmatmul.bf16.gmra.mxu1 %v12989_v41  ;;  %v8620_v26 = vor.u32 %v9297_v55, %v8617_v42  ;;  %v8612_v2 = vor.u32 %v9295_v33, %v8609_v43  ;;  %v5340_v47 = vmax.f32 %v5110_v6, 0.0 }
 0x85f   : > { %v5319_v4 = vmax.f32 %v5276_v58, 0.0  ;;  %6479 = vmatpush.bf16.msra.mxu3 %v8708_v35  ;;  %v5221_v45 = vadd.f32 %v5220_v7, %v5192_v19  ;;  %v8689_v58 = vld [vmem:[%s10405_s3 + $0x1b8] sm:$0xf0]  ;;  %v8681_v7 = vld [vmem:[%s10405_s3 + $0x1a8] sm:$0xf0]  ;;  %v5349_v35 = vmax.f32 %v5170_v39, 0.0 }
 0x860   : > { %v8692_v8 = vor.u32 %v9315_v1, %v8689_v58 }
 0x861   : > { %v13008_v15 = vpack.c.bf16 %v5319_v4, %v5311_v60  ;;  %6453 = vmatpush.bf16.msra.mxu2 %v8620_v26  ;;  %v9313_v60 = vld [vmem:[%s10405_s3 + $0x1a4] sm:$0xf]  ;;  %v5348_v4 = vmax.f32 %v5112_v50, 0.0  ;;  %v5326_v51 = vmax.f32 %v5221_v45, 0.0  ;;  %v9311_v26 = vld [vmem:[%s10405_s3 + $0x194] sm:$0xf] }
 0x862   : > { %v5249_v57 = vpop.f32.mrf.mxu2  ;;  %v5278_v9 = vpop.f32.mrf.mxu3  ;;  %v8684_v25 = vor.u32 %v9313_v60, %v8681_v7  ;;  %v8673_v50 = vld [vmem:[%s10405_s3 + $0x198] sm:$0xf0]  ;;  %v13052_v7 = vld [vmem:[%s13901_s14] sm:$0x3] }
 0x863   : > { %6374 = vmatmul.bf16.gmra.mxu3 %v13008_v15  ;;  %v5193_v38 = vpop.f32.mrf.mxu0  ;;  %v5222_v48 = vpop.f32.mrf.mxu1  ;;  %v5250_v17 = vadd.f32 %v5249_v57, %v12907_v49  ;;  %v8676_v45 = vor.u32 %v9311_v26, %v8673_v50  ;;  %v9355_v26 = vld [vmem:[%s10405_s3 + $0x2f4] sm:$0xf] }
 0x864   : > { %v5194_v53 = vadd.f32 %v5193_v38, %v12888_v10  ;;  %6480 = vmatpush.bf16.msra.mxu3 %v8700_v34  ;;  %v8601_v34 = vld [vmem:[%s10405_s3 + $0x108] sm:$0xf0]  ;;  %v13035_v38 = vpack.c.bf16 %v5348_v4, %v5340_v47 }
 0x865   : > { %6454 = vmatpush.bf16.msra.mxu2 %v8612_v2  ;;  %v5279_v13 = vadd.f32 %v5278_v9, %v5250_v17  ;;  %v8604_v42 = vor.u32 %v9293_v5, %v8601_v34  ;;  %v9309_v9 = vld [vmem:[%s10405_s3 + $0x184] sm:$0xf] }
 0x866   : > { %v5223_v54 = vadd.f32 %v5222_v48, %v5194_v53  ;;  %v13037_v48 = vpack.c.bf16 %v5349_v35, %v5341_v18  ;;  %v8665_v53 = vld [vmem:[%s10405_s3 + $0x188] sm:$0xf0] }
 0x867   : > { %v5327_v1 = vmax.f32 %v5279_v13, 0.0  ;;  %v8668_v20 = vor.u32 %v9309_v9, %v8665_v53 }
 0x868   : > { %v5334_v0 = vmax.f32 %v5223_v54, 0.0  ;;  %6481 = vmatpush.bf16.msra.mxu3 %v8692_v8 }
 0x869   : > { %6455 = vmatpush.bf16.msra.mxu2 %v8604_v42  ;;  %v8785_v42 = vld [vmem:[%s10405_s3 + $0x278] sm:$0xf0] }
 0x86a   : > { %v5251_v40 = vpop.f32.mrf.mxu2  ;;  %v5280_v19 = vpop.f32.mrf.mxu3  ;;  %v13029_v12 = vpack.c.bf16 %v5334_v0, %v5326_v51 }
 0x86b   : > { %v5252_v29 = vadd.f32 %v5251_v40, %v12907_v49  ;;  %v5196_v57 = vpop.f32.mrf.mxu0  ;;  %v5225_v55 = vpop.f32.mrf.mxu1 }
 0x86c   : > { %6350 = vmatmul.bf16.gmra.mxu2 %v13029_v12  ;;  %6482 = vmatpush.bf16.msra.mxu3 %v8684_v25  ;;  %v5197_v8 = vadd.f32 %v5196_v57, %v12888_v10  ;;  %v13056_v25 = vperm.slane %v13052_v7, 0 }
 0x86d   : > { %v5281_v39 = vadd.f32 %v5280_v19, %v5252_v29 }
 0x86e   : > { %6297 = vmatmul.bf16.gmra.mxu0 %v13035_v38  ;;  %6326 = vmatmul.bf16.gmra.mxu1 %v13037_v48  ;;  %v5226_v17 = vadd.f32 %v5225_v55, %v5197_v8  ;;  %v9339_v55 = vld [vmem:[%s10405_s3 + $0x274] sm:$0xf] }
 0x86f   : > { %v5335_v58 = vmax.f32 %v5281_v39, 0.0 }
 0x870   : > { %6483 = vmatpush.bf16.msra.mxu3 %v8676_v45  ;;  %v5342_v51 = vmax.f32 %v5226_v17, 0.0  ;;  %v8849_v45 = vld [vmem:[%s10405_s3 + $0x2f8] sm:$0xf0] }
 0x871   : > { %v13046_v6 = vpack.c.bf16 %v5335_v58, %v5327_v1  ;;  %v8852_v9 = vor.u32 %v9355_v26, %v8849_v45  ;;  %v9349_v26 = vld [vmem:[%s10405_s3 + $0x2c4] sm:$0xf] }
 0x872   : > { %v5254_v54 = vpop.f32.mrf.mxu2  ;;  %v5283_v33 = vpop.f32.mrf.mxu3 }
 0x873   : > { %6379 = vmatmul.bf16.gmra.mxu3 %v13046_v6  ;;  %v5198_v43 = vpop.f32.mrf.mxu0  ;;  %v5227_v60 = vpop.f32.mrf.mxu1  ;;  %v5255_v35 = vadd.f32 %v5254_v54, %v12907_v49  ;;  %6535 = vmatpush.bf16.msrb.mxu1 %v8852_v9  ;;  %v9337_v54 = vld [vmem:[%s10405_s3 + $0x264] sm:$0xf]  ;;  %v9371_v9 = vld [vmem:[%s10405_s3 + $0x374] sm:$0xf] }
 0x874   : > { %v5199_v2 = vadd.f32 %v5198_v43, %v12888_v10  ;;  %6484 = vmatpush.bf16.msra.mxu3 %v8668_v20  ;;  %v9353_v43 = vld [vmem:[%s10405_s3 + $0x2e4] sm:$0xf] }
 0x875   : > { %v5284_v10 = vadd.f32 %v5283_v33, %v5255_v35  ;;  %v8777_v33 = vld [vmem:[%s10405_s3 + $0x268] sm:$0xf0] }
 0x876   : > { %v5228_v4 = vadd.f32 %v5227_v60, %v5199_v2  ;;  %v8780_v17 = vor.u32 %v9337_v54, %v8777_v33  ;;  %v8841_v2 = vld [vmem:[%s10405_s3 + $0x2e8] sm:$0xf0]  ;;  %v9369_v33 = vld [vmem:[%s10405_s3 + $0x364] sm:$0xf] }
 0x877   : > { %v5343_v50 = vmax.f32 %v5284_v10, 0.0  ;;  %v8844_v35 = vor.u32 %v9353_v43, %v8841_v2  ;;  %v8833_v10 = vld [vmem:[%s10405_s3 + $0x2d8] sm:$0xf0]  ;;  %v8905_v43 = vld [vmem:[%s10405_s3 + $0x368] sm:$0xf0] }
 0x878   : > { %v5350_v0 = vmax.f32 %v5228_v4, 0.0 }
 0x879   : > { %6536 = vmatpush.bf16.msrb.mxu1 %v8844_v35 }
 0x87a   : > { %v5256_v47 = vpop.f32.mrf.mxu2  ;;  %v5285_v18 = vpop.f32.mrf.mxu3  ;;  %v13058_v40 = vpack.c.bf16 %v5350_v0, %v5342_v51  ;;  %v9335_v51 = vld [vmem:[%s10405_s3 + $0x254] sm:$0xf]  ;;  %v8769_v0 = vld [vmem:[%s10405_s3 + $0x258] sm:$0xf0] }
 0x87b   : > { %v5257_v19 = vadd.f32 %v5256_v47, %v12907_v49  ;;  %v6167_v5 = vpop.f32.mrf.mxu0  ;;  %v6196_v34 = vpop.f32.mrf.mxu1  ;;  %v8788_v49 = vor.u32 %v9339_v55, %v8785_v42  ;;  %v9351_v47 = vld [vmem:[%s10405_s3 + $0x2d4] sm:$0xf]  ;;  %v9333_v55 = vld [vmem:[%s10405_s3 + $0x244] sm:$0xf]  ;;  %v8761_v42 = vld [vmem:[%s10405_s3 + $0x248] sm:$0xf0] }
 0x87c   : > { %v6168_v13 = vadd.f32 %v6167_v5, %v13056_v25  ;;  %6355 = vmatmul.bf16.gmra.mxu2 %v13058_v40 }
 0x87d   : > { %v5286_v29 = vadd.f32 %v5285_v18, %v5257_v19  ;;  %6506 = vmatpush.bf16.msrb.mxu0 %v8788_v49  ;;  %v8772_v18 = vor.u32 %v9335_v51, %v8769_v0  ;;  %v8836_v19 = vor.u32 %v9351_v47, %v8833_v10  ;;  %v8908_v51 = vor.u32 %v9369_v33, %v8905_v43  ;;  %v9329_v47 = vld [vmem:[%s10405_s3 + $0x224] sm:$0xf]  ;;  %v8889_v33 = vld [vmem:[%s10405_s3 + $0x348] sm:$0xf0] }
 0x87e   : > { %v6197_v57 = vadd.f32 %v6196_v34, %v6168_v13  ;;  %6398 = vmatmul.bf16.vlgmr.msra.gmra.mxu0 %v12671_v30  ;;  %6427 = vmatmul.bf16.vlgmr.msra.gmra.mxu1 %v12673_v31  ;;  %v9345_v10 = vld [vmem:[%s10405_s3 + $0x2a4] sm:$0xf] }
 0x87f   : > { %v5351_v39 = vmax.f32 %v5286_v29, 0.0  ;;  %6537 = vmatpush.bf16.msrb.mxu1 %v8836_v19 }
 0x881   : > { %v13069_v53 = vpack.c.bf16 %v5351_v39, %v5343_v50  ;;  %6507 = vmatpush.bf16.msrb.mxu0 %v8780_v17  ;;  %v8764_v50 = vor.u32 %v9333_v55, %v8761_v42  ;;  %v8825_v39 = vld [vmem:[%s10405_s3 + $0x2c8] sm:$0xf0] }
 0x882   : > { %v6225_v1 = vpop.f32.mrf.mxu2  ;;  %v6254_v30 = vpop.f32.mrf.mxu3  ;;  %v8828_v45 = vor.u32 %v9349_v26, %v8825_v39  ;;  %v8897_v39 = vld [vmem:[%s10405_s3 + $0x358] sm:$0xf0] }
 0x883   : > { %v6226_v31 = vadd.f32 %v6225_v1, %v6197_v57  ;;  %6384 = vmatmul.bf16.gmra.mxu3 %v13069_v53  ;;  %v6169_v58 = vpop.f32.mrf.mxu0  ;;  %v6198_v8 = vpop.f32.mrf.mxu1  ;;  %v8913_v1 = vld [vmem:[%s10405_s3 + $0x378] sm:$0xf0] }
 0x884   : > { %v6170_v20 = vadd.f32 %v6169_v58, %v13056_v25  ;;  %v9347_v58 = vld [vmem:[%s10405_s3 + $0x2b4] sm:$0xf]  ;;  %6538 = vmatpush.bf16.msrb.mxu1 %v8828_v45 }
 0x885   : > { %v13076_v60 = vadd.f32 %v6254_v30, %v6226_v31  ;;  %6508 = vmatpush.bf16.msrb.mxu0 %v8772_v18  ;;  %v8916_v30 = vor.u32 %v9371_v9, %v8913_v1  ;;  %v8753_v31 = vld [vmem:[%s10405_s3 + $0x238] sm:$0xf0]  ;;  %v8745_v18 = vld [vmem:[%s10405_s3 + $0x228] sm:$0xf0]  ;;  %v9343_v1 = vld [vmem:[%s10405_s3 + $0x294] sm:$0xf] }
 0x886   : > { %v13079_v4 = vadd.f32 %v6198_v8, %v6170_v20  ;;  %v8817_v8 = vld [vmem:[%s10405_s3 + $0x2b8] sm:$0xf0] }
 0x887   : > { %v8820_v54 = vor.u32 %v9347_v58, %v8817_v8  ;;  %6564 = vmatpush.bf16.msrb.mxu2 %v8916_v30  ;;  %v8737_v9 = vld [vmem:[%s10405_s3 + $0x218] sm:$0xf0]  ;;  %v9385_v58 = vld [vmem:[%s10405_s3 + $0x3e4] sm:$0xf]  ;;  %v8969_v8 = vld [vmem:[%s10405_s3 + $0x3e8] sm:$0xf0] }
 0x889   : > { %6509 = vmatpush.bf16.msrb.mxu0 %v8764_v50  ;;  %6539 = vmatpush.bf16.msrb.mxu1 %v8820_v54  ;;  %v9367_v50 = vld [vmem:[%s10405_s3 + $0x354] sm:$0xf] }
 0x88a   : > { %v13085_v5 = vpop.f32.mrf.mxu2  ;;  %v13087_v34 = vpop.f32.mrf.mxu3  ;;  %v8900_v45 = vor.u32 %v9367_v50, %v8897_v39  ;;  %v9381_v50 = vld [vmem:[%s10405_s3 + $0x3c4] sm:$0xf] }
 0x88b   : > { %v6172_v13 = vpop.f32.mrf.mxu0  ;;  %v6201_v29 = vpop.f32.mrf.mxu1  ;;  %6565 = vmatpush.bf16.msrb.mxu2 %v8908_v51  ;;  %v9325_v51 = vld [vmem:[%s10405_s3 + $0x204] sm:$0xf] }
 0x88c   : > { %v6173_v57 = vadd.f32 %v6172_v13, %v13056_v25  ;;  %6456 = vmatmul.bf16.vlgmr.msra.gmra.mxu2 %v12675_v62  ;;  %v9331_v62 = vld [vmem:[%s10405_s3 + $0x234] sm:$0xf]  ;;  %v8809_v13 = vld [vmem:[%s10405_s3 + $0x2a8] sm:$0xf0] }
 0x88d   : > { %v8756_v20 = vor.u32 %v9331_v62, %v8753_v31  ;;  %v8812_v42 = vor.u32 %v9345_v10, %v8809_v13  ;;  %v8801_v62 = vld [vmem:[%s10405_s3 + $0x298] sm:$0xf0]  ;;  %v8793_v10 = vld [vmem:[%s10405_s3 + $0x288] sm:$0xf0] }
 0x88e   : > { %v6202_v49 = vadd.f32 %v6201_v29, %v6173_v57  ;;  %6403 = vmatmul.bf16.gmra.mxu0 %v12443_v63  ;;  %6432 = vmatmul.bf16.gmra.mxu1 %v12461_v16  ;;  %v9387_v29 = vld [vmem:[%s10405_s3 + $0x3f4] sm:$0xf]  ;;  %v8977_v57 = vld [vmem:[%s10405_s3 + $0x3f8] sm:$0xf0]  ;;  %v8804_v31 = vor.u32 %v9343_v1, %v8801_v62 }
 0x88f   : > { %6510 = vmatpush.bf16.msrb.mxu0 %v8756_v20  ;;  %v8980_v26 = vor.u32 %v9387_v29, %v8977_v57  ;;  %6540 = vmatpush.bf16.msrb.mxu1 %v8812_v42  ;;  %v8972_v20 = vor.u32 %v9385_v58, %v8969_v8  ;;  %v8961_v13 = vld [vmem:[%s10405_s3 + $0x3d8] sm:$0xf0]  ;;  %v9363_v42 = vld [vmem:[%s10405_s3 + $0x334] sm:$0xf] }
 0x890   : > { %6566 = vmatpush.bf16.msrb.mxu2 %v8900_v45  ;;  %v9361_v45 = vld [vmem:[%s10405_s3 + $0x324] sm:$0xf] }
 0x891   : > { %6593 = vmatpush.bf16.msrb.mxu3 %v8980_v26  ;;  %v8881_v26 = vld [vmem:[%s10405_s3 + $0x338] sm:$0xf0] }
 0x892   : > { %v6230_v63 = vpop.f32.mrf.mxu2  ;;  %v6259_v16 = vpop.f32.mrf.mxu3  ;;  %v8884_v39 = vor.u32 %v9363_v42, %v8881_v26  ;;  %v9375_v26 = vld [vmem:[%s10405_s3 + $0x394] sm:$0xf] }
 0x893   : > { %v6231_v17 = vadd.f32 %v6230_v63, %v6202_v49  ;;  %6485 = vmatmul.bf16.vlgmr.msra.gmra.mxu3 %v12677_v36  ;;  %v6174_v2 = vpop.f32.mrf.mxu0  ;;  %v6203_v35 = vpop.f32.mrf.mxu1  ;;  %v8748_v36 = vor.u32 %v9329_v47, %v8745_v18  ;;  %v9327_v49 = vld [vmem:[%s10405_s3 + $0x214] sm:$0xf]  ;;  %6541 = vmatpush.bf16.msrb.mxu1 %v8804_v31  ;;  %v9341_v47 = vld [vmem:[%s10405_s3 + $0x284] sm:$0xf] }
 0x894   : > { %v6175_v0 = vadd.f32 %v6174_v2, %v13056_v25  ;;  %v8740_v30 = vor.u32 %v9327_v49, %v8737_v9  ;;  %v8953_v49 = vld [vmem:[%s10405_s3 + $0x3c8] sm:$0xf0] }
 0x895   : > { %v13110_v19 = vadd.f32 %v6259_v16, %v6231_v17  ;;  %6511 = vmatpush.bf16.msrb.mxu0 %v8748_v36  ;;  %v9365_v16 = vld [vmem:[%s10405_s3 + $0x344] sm:$0xf]  ;;  %6594 = vmatpush.bf16.msrb.mxu3 %v8972_v20  ;;  %v9383_v36 = vld [vmem:[%s10405_s3 + $0x3d4] sm:$0xf]  ;;  %v8873_v9 = vld [vmem:[%s10405_s3 + $0x328] sm:$0xf0]  ;;  %v8956_v1 = vor.u32 %v9381_v50, %v8953_v49 }
 0x896   : > { %v13115_v55 = vadd.f32 %v6203_v35, %v6175_v0  ;;  %v8892_v2 = vor.u32 %v9365_v16, %v8889_v33  ;;  %v8729_v0 = vld [vmem:[%s10405_s3 + $0x208] sm:$0xf0]  ;;  %v8964_v57 = vor.u32 %v9383_v36, %v8961_v13  ;;  %v9379_v20 = vld [vmem:[%s10405_s3 + $0x3b4] sm:$0xf]  ;;  %v8945_v16 = vld [vmem:[%s10405_s3 + $0x3b8] sm:$0xf0] }
 0x897   : > { %v8732_v18 = vor.u32 %v9325_v51, %v8729_v0  ;;  %v9377_v51 = vld [vmem:[%s10405_s3 + $0x3a4] sm:$0xf]  ;;  %v8937_v0 = vld [vmem:[%s10405_s3 + $0x3a8] sm:$0xf0]  ;;  %v8929_v50 = vld [vmem:[%s10405_s3 + $0x398] sm:$0xf0] }
 0x898   : > { %6567 = vmatpush.bf16.msrb.mxu2 %v8892_v2  ;;  %v9359_v2 = vld [vmem:[%s10405_s3 + $0x314] sm:$0xf] }
 0x899   : > { %6512 = vmatpush.bf16.msrb.mxu0 %v8740_v30  ;;  %6595 = vmatpush.bf16.msrb.mxu3 %v8964_v57 }
 0x89a   : > { %v13125_v54 = vpop.f32.mrf.mxu2  ;;  %v13127_v63 = vpop.f32.mrf.mxu3 }
 0x89b   : > { %v6177_v43 = vpop.f32.mrf.mxu0  ;;  %v6206_v17 = vpop.f32.mrf.mxu1 }
 0x89c   : > { %v6178_v35 = vadd.f32 %v6177_v43, %v13056_v25  ;;  %6461 = vmatmul.bf16.gmra.mxu2 %v12726_v61  ;;  %v8796_v61 = vor.u32 %v9341_v47, %v8793_v10  ;;  %v8948_v43 = vor.u32 %v9379_v20, %v8945_v16  ;;  %v9357_v47 = vld [vmem:[%s10405_s3 + $0x304] sm:$0xf]  ;;  %v8940_v10 = vor.u32 %v9377_v51, %v8937_v0 }
 0x89d   : > { %6513 = vmatpush.bf16.msrb.mxu0 %v8732_v18  ;;  %6568 = vmatpush.bf16.msrb.mxu2 %v8884_v39  ;;  %v8857_v18 = vld [vmem:[%s10405_s3 + $0x308] sm:$0xf0]  ;;  %v8932_v39 = vor.u32 %v9375_v26, %v8929_v50  ;;  %v6228_v16 = vadd.f32 %v13085_v5, %v13079_v4 }
 0x89e   : > { %v6207_v29 = vadd.f32 %v6206_v17, %v6178_v35  ;;  %6408 = vmatmul.bf16.gmra.mxu0 %v12480_v27  ;;  %6437 = vmatmul.bf16.gmra.mxu1 %v12488_v21  ;;  %v8876_v27 = vor.u32 %v9361_v45, %v8873_v9  ;;  %v8865_v35 = vld [vmem:[%s10405_s3 + $0x318] sm:$0xf0]  ;;  %v8860_v36 = vor.u32 %v9357_v47, %v8857_v18  ;;  %v9373_v45 = vld [vmem:[%s10405_s3 + $0x384] sm:$0xf]  ;;  %v8921_v9 = vld [vmem:[%s10405_s3 + $0x388] sm:$0xf0] }
 0x89f   : > { %6542 = vmatpush.bf16.msrb.mxu1 %v8796_v61  ;;  %6596 = vmatpush.bf16.msrb.mxu3 %v8956_v1  ;;  %v8924_v1 = vor.u32 %v9373_v45, %v8921_v9 }
 0x8a1   : > { %6569 = vmatpush.bf16.msrb.mxu2 %v8876_v27 }
 0x8a2   : > { %v6235_v21 = vpop.f32.mrf.mxu2  ;;  %v6264_v62 = vpop.f32.mrf.mxu3 }
 0x8a3   : > { %v6236_v30 = vadd.f32 %v6235_v21, %v6207_v29  ;;  %6490 = vmatmul.bf16.gmra.mxu3 %v12728_v14  ;;  %v6179_v31 = vpop.f32.mrf.mxu0  ;;  %v6208_v58 = vpop.f32.mrf.mxu1  ;;  %v8868_v14 = vor.u32 %v9359_v2, %v8865_v35 }
 0x8a4   : > { %v6180_v8 = vadd.f32 %v6179_v31, %v13056_v25  ;;  %6597 = vmatpush.bf16.msrb.mxu3 %v8948_v43  ;;  %v13902_v43 = vld [vmem:[#allocation47_spill] sm:$0xff] }
 0x8a5   : > { %v13151_v33 = vadd.f32 %v6264_v62, %v6236_v30  ;;  %6570 = vmatpush.bf16.msrb.mxu2 %v8868_v14 }
 0x8a6   : > { %v13153_v17 = vadd.f32 %v6208_v58, %v6180_v8 }
 0x8a8   : > { %6598 = vmatpush.bf16.msrb.mxu3 %v8940_v10 }
 0x8a9   : > { %6571 = vmatpush.bf16.msrb.mxu2 %v8860_v36 }
 0x8aa   : > { %v13161_v13 = vpop.f32.mrf.mxu2  ;;  %v13163_v29 = vpop.f32.mrf.mxu3 }
 0x8ab   : > { %v6182_v61 = vpop.f32.mrf.mxu0  ;;  %v6211_v57 = vpop.f32.mrf.mxu1 }
 0x8ac   : > { %v6183_v42 = vadd.f32 %v6182_v61, %v13056_v25  ;;  %6466 = vmatmul.bf16.gmra.mxu2 %v12790_v28  ;;  %6599 = vmatpush.bf16.msrb.mxu3 %v8932_v39 }
 0x8ae   : > { %v6212_v49 = vadd.f32 %v6211_v57, %v6183_v42  ;;  %6413 = vmatmul.bf16.gmra.mxu0 %v12492_v23  ;;  %6442 = vmatmul.bf16.gmra.mxu1 %v12508_v37 }
 0x8b0   : > { %6600 = vmatpush.bf16.msrb.mxu3 %v8924_v1 }
 0x8b2   : > { %v6240_v27 = vpop.f32.mrf.mxu2  ;;  %v6269_v30 = vpop.f32.mrf.mxu3 }
 0x8b3   : > { %v6241_v21 = vadd.f32 %v6240_v27, %v6212_v49  ;;  %6495 = vmatmul.bf16.gmra.mxu3 %v12792_v44  ;;  %v6184_v62 = vpop.f32.mrf.mxu0  ;;  %v6213_v28 = vpop.f32.mrf.mxu1 }
 0x8b4   : > { %v6185_v31 = vadd.f32 %v6184_v62, %v13056_v25  ;;  %v6257_v25 = vadd.f32 %v13087_v34, %v6228_v16 }
 0x8b5   : > { %v13175_v58 = vadd.f32 %v6269_v30, %v6241_v21 }
 0x8b6   : > { %v13177_v8 = vadd.f32 %v6213_v28, %v6185_v31 }
 0x8ba   : > { %v6242_v0 = vpop.f32.mrf.mxu2  ;;  %v6271_v4 = vpop.f32.mrf.mxu3 }
 0x8bb   : > { %v6283_v23 = vpop.f32.mrf.mxu0  ;;  %v6312_v37 = vpop.f32.mrf.mxu1  ;;  %v6243_v28 = vadd.f32 %v6242_v0, %v13177_v8 }
 0x8bc   : > { %v6284_v20 = vadd.f32 %v6283_v23, %v13076_v60  ;;  %6471 = vmatmul.bf16.gmra.mxu2 %v12845_v11 }
 0x8be   : > { %v6313_v44 = vadd.f32 %v6312_v37, %v6284_v20  ;;  %6514 = vmatmul.bf16.vlgmr.msrb.gmra.mxu0 %v12884_v32  ;;  %6543 = vmatmul.bf16.vlgmr.msrb.gmra.mxu1 %v12886_v59  ;;  %v6233_v32 = vadd.f32 %v13125_v54, %v13115_v55  ;;  %v6272_v37 = vadd.f32 %v6271_v4, %v6243_v28 }
 0x8c0   : > { %v6262_v18 = vadd.f32 %v13127_v63, %v6233_v32 }
 0x8c3   : > { %6500 = vmatmul.bf16.gmra.mxu3 %v13902_v43  ;;  %v6285_v2 = vpop.f32.mrf.mxu0  ;;  %v6314_v35 = vpop.f32.mrf.mxu1 }
 0x8c4   : > { %v6286_v51 = vadd.f32 %v6285_v2, %v6257_v25 }
 0x8c6   : > { %v6315_v14 = vadd.f32 %v6314_v35, %v6286_v51 }
 0x8cb   : > { %v6288_v60 = vpop.f32.mrf.mxu0  ;;  %v6317_v47 = vpop.f32.mrf.mxu1 }
 0x8cc   : > { %v6289_v11 = vadd.f32 %v6288_v60, %v13110_v19  ;;  %6572 = vmatmul.bf16.vlgmr.msrb.gmra.mxu2 %v12923_v24 }
 0x8ce   : > { %v6318_v59 = vadd.f32 %v6317_v47, %v6289_v11  ;;  %6519 = vmatmul.bf16.gmra.mxu0 %v12927_v56  ;;  %6548 = vmatmul.bf16.gmra.mxu1 %v12929_v3  ;;  %v6238_v3 = vadd.f32 %v13161_v13, %v13153_v17 }
 0x8cf   : > { %v6341_v5 = vpop.f32.mrf.mxu2 }
 0x8d0   : > { %v6342_v34 = vadd.f32 %v6341_v5, %v6313_v44  ;;  %v6267_v45 = vadd.f32 %v13163_v29, %v6238_v3 }
 0x8d3   : > { %6601 = vmatmul.bf16.vlgmr.msrb.gmra.mxu3 %v12951_v46  ;;  %v6290_v10 = vpop.f32.mrf.mxu0  ;;  %v6319_v36 = vpop.f32.mrf.mxu1 }
 0x8d4   : > { %v6291_v19 = vadd.f32 %v6290_v10, %v6262_v18 }
 0x8d6   : > { %v6320_v61 = vadd.f32 %v6319_v36, %v6291_v19  ;;  %v6370_v24 = vpop.f32.mrf.mxu3 }
 0x8d7   : > { %v13195_v57 = vadd.f32 %v6370_v24, %v6342_v34  ;;  %v6343_v55 = vpop.f32.mrf.mxu2 }
 0x8d8   : > { %v6344_v54 = vadd.f32 %v6343_v55, %v6315_v14 }
 0x8db   : > { %v6293_v42 = vpop.f32.mrf.mxu0  ;;  %v6322_v26 = vpop.f32.mrf.mxu1 }
 0x8dc   : > { %v6294_v56 = vadd.f32 %v6293_v42, %v13151_v33  ;;  %6577 = vmatmul.bf16.gmra.mxu2 %v12980_v22 }
 0x8de   : > { %v6323_v63 = vadd.f32 %v6322_v26, %v6294_v56  ;;  %v6372_v46 = vpop.f32.mrf.mxu3  ;;  %6524 = vmatmul.bf16.gmra.mxu0 %v12987_v52  ;;  %6553 = vmatmul.bf16.gmra.mxu1 %v12989_v41 }
 0x8df   : > { %v13203_v50 = vadd.f32 %v6372_v46, %v6344_v54  ;;  %v6346_v39 = vpop.f32.mrf.mxu2 }
 0x8e0   : > { %v6347_v49 = vadd.f32 %v6346_v39, %v6318_v59 }
 0x8e3   : > { %6606 = vmatmul.bf16.gmra.mxu3 %v13008_v15  ;;  %v6295_v33 = vpop.f32.mrf.mxu0  ;;  %v6324_v9 = vpop.f32.mrf.mxu1 }
 0x8e4   : > { %v6296_v22 = vadd.f32 %v6295_v33, %v6267_v45 }
 0x8e6   : > { %v6325_v1 = vadd.f32 %v6324_v9, %v6296_v22  ;;  %v6375_v27 = vpop.f32.mrf.mxu3 }
 0x8e7   : > { %v13207_v17 = vadd.f32 %v6375_v27, %v6347_v49  ;;  %v6348_v13 = vpop.f32.mrf.mxu2 }
 0x8e8   : > { %v6349_v21 = vadd.f32 %v6348_v13, %v6320_v61  ;;  %v13256_v13 = vperm.slane %v13052_v7, 1 }
 0x8eb   : > { %v6298_v52 = vpop.f32.mrf.mxu0  ;;  %v6327_v62 = vpop.f32.mrf.mxu1 }
 0x8ec   : > { %v6299_v41 = vadd.f32 %v6298_v52, %v13175_v58  ;;  %6582 = vmatmul.bf16.gmra.mxu2 %v13029_v12 }
 0x8ee   : > { %v6328_v29 = vadd.f32 %v6327_v62, %v6299_v41  ;;  %v6377_v30 = vpop.f32.mrf.mxu3  ;;  %6529 = vmatmul.bf16.gmra.mxu0 %v13035_v38  ;;  %6558 = vmatmul.bf16.gmra.mxu1 %v13037_v48 }
 0x8ef   : > { %v13214_v15 = vadd.f32 %v6377_v30, %v6349_v21  ;;  %v6351_v31 = vpop.f32.mrf.mxu2 }
 0x8f0   : > { %v6352_v23 = vadd.f32 %v6351_v31, %v6323_v63 }
 0x8f3   : > { %6611 = vmatmul.bf16.gmra.mxu3 %v13046_v6  ;;  %v6300_v20 = vpop.f32.mrf.mxu0  ;;  %v6329_v16 = vpop.f32.mrf.mxu1 }
 0x8f4   : > { %v6301_v58 = vadd.f32 %v6300_v20, %v6272_v37 }
 0x8f6   : > { %v6330_v44 = vadd.f32 %v6329_v16, %v6301_v58  ;;  %v6380_v12 = vpop.f32.mrf.mxu3 }
 0x8f7   : > { %v13217_v25 = vadd.f32 %v6380_v12, %v6352_v23  ;;  %v6353_v8 = vpop.f32.mrf.mxu2 }
 0x8f8   : > { %v6354_v43 = vadd.f32 %v6353_v8, %v6325_v1 }
 0x8fb   : > { %v6399_v2 = vpop.f32.mrf.mxu0  ;;  %v6428_v38 = vpop.f32.mrf.mxu1 }
 0x8fc   : > { %6587 = vmatmul.bf16.gmra.mxu2 %v13058_v40  ;;  %v6400_v52 = vadd.f32 %v6399_v2, %v13256_v13 }
 0x8fe   : > { %v6382_v48 = vpop.f32.mrf.mxu3 }
 0x8ff   : > { %v13220_v35 = vadd.f32 %v6382_v48, %v6354_v43  ;;  %v6356_v51 = vpop.f32.mrf.mxu2 }
 0x900   : > { %v6357_v14 = vadd.f32 %v6356_v51, %v6328_v29  ;;  %v6429_v29 = vadd.f32 %v6428_v38, %v6400_v52 }
 0x903   : > { %6616 = vmatmul.bf16.gmra.mxu3 %v13069_v53  ;;  %v6401_v6 = vpop.f32.mrf.mxu0  ;;  %v6430_v0 = vpop.f32.mrf.mxu1 }
 0x904   : > { %v6402_v31 = vadd.f32 %v6401_v6, %v13256_v13  ;;  %v13903_v6 = vld [vmem:[#allocation31_spill] sm:$0xff] }
 0x906   : > { %v6385_v60 = vpop.f32.mrf.mxu3  ;;  %v6431_v7 = vadd.f32 %v6430_v0, %v6402_v31  ;;  %v13905_v31 = vld [vmem:[#allocation33_spill] sm:$0xff] }
 0x907   : > { %v13223_v47 = vadd.f32 %v6385_v60, %v6357_v14  ;;  %v6358_v11 = vpop.f32.mrf.mxu2 }
 0x908   : > { %v6359_v32 = vadd.f32 %v6358_v11, %v6330_v44 }
 0x90b   : > { %v6404_v4 = vpop.f32.mrf.mxu0  ;;  %v6433_v59 = vpop.f32.mrf.mxu1 }
 0x90c   : > { %v6405_v43 = vadd.f32 %v6404_v4, %v13256_v13 }
 0x90e   : > { %v6387_v5 = vpop.f32.mrf.mxu3 }
 0x90f   : > { %v13225_v34 = vadd.f32 %v6387_v5, %v6359_v32  ;;  %v6457_v40 = vpop.f32.mrf.mxu2  ;;  %v13269_v32 = vadd.f32 %v13195_v57, %v13903_v6  ;;  %v6434_v5 = vadd.f32 %v6433_v59, %v6405_v43  ;;  %v13279_v59 = vadd.f32 %v13203_v50, %v13905_v31 }
 0x910   : > { %v6458_v30 = vadd.f32 %v6457_v40, %v6429_v29  ;;  %v13904_v40 = vld [vmem:[#allocation32_spill] sm:$0xff] }
 0x913   : > { %v6406_v18 = vpop.f32.mrf.mxu0  ;;  %v13227_v10 = vpop.f32.mrf.mxu1 }
 0x916   : > { %v6486_v36 = vpop.f32.mrf.mxu3 }
 0x917   : > { %v6459_v19 = vpop.f32.mrf.mxu2  ;;  %v6487_v23 = vadd.f32 %v6486_v36, %v6458_v30 }
 0x918   : > { %v6460_v12 = vadd.f32 %v6459_v19, %v6431_v7 }
 0x91b   : > { %v13229_v61 = vpop.f32.mrf.mxu0  ;;  %v13231_v53 = vpop.f32.mrf.mxu1 }
 0x91e   : > { %v6488_v24 = vpop.f32.mrf.mxu3 }
 0x91f   : > { %v6462_v55 = vpop.f32.mrf.mxu2  ;;  %v6489_v2 = vadd.f32 %v6488_v24, %v6460_v12 }
 0x920   : > { %v6463_v0 = vadd.f32 %v6462_v55, %v6434_v5 }
 0x923   : > { %v13233_v54 = vpop.f32.mrf.mxu0  ;;  %v13235_v42 = vpop.f32.mrf.mxu1 }
 0x924   : > { %v6412_v6 = vadd.f32 %v13233_v54, %v13256_v13 }
 0x926   : > { %v6491_v26 = vpop.f32.mrf.mxu3 }
 0x927   : > { %v6464_v56 = vpop.f32.mrf.mxu2 }
 0x92b   : > { %v13237_v3 = vpop.f32.mrf.mxu0  ;;  %v13241_v39 = vpop.f32.mrf.mxu1 }
 0x92e   : > { %v6493_v63 = vpop.f32.mrf.mxu3 }
 0x92f   : > { %v13239_v46 = vpop.f32.mrf.mxu2 }
 0x933   : > { %v13243_v49 = vpop.f32.mrf.mxu0  ;;  %v13249_v9 = vpop.f32.mrf.mxu1 }
 0x936   : > { %v13245_v45 = vpop.f32.mrf.mxu3 }
 0x937   : > { %v13247_v33 = vpop.f32.mrf.mxu2 }
 0x93b   : > { %v6515_v22 = vpop.f32.mrf.mxu0  ;;  %v6544_v21 = vpop.f32.mrf.mxu1 }
 0x93c   : > { %v6516_v16 = vadd.f32 %v6515_v22, %v6487_v23  ;;  %v6407_v22 = vadd.f32 %v6406_v18, %v13256_v13  ;;  %v13906_v23 = vld [vmem:[#allocation34_spill] sm:$0xff] }
 0x93e   : > { %v13251_v1 = vpop.f32.mrf.mxu3  ;;  %v6545_v8 = vadd.f32 %v6544_v21, %v6516_v16  ;;  %v6492_v21 = vadd.f32 %v6491_v26, %v6463_v0  ;;  %v6436_v55 = vadd.f32 %v13227_v10, %v6407_v22  ;;  %v6410_v26 = vadd.f32 %v13229_v61, %v13256_v13 }
 0x93f   : > { %v13253_v27 = vpop.f32.mrf.mxu2  ;;  %v6441_v22 = vadd.f32 %v13235_v42, %v6412_v6 }
 0x941   : > { %v6470_v54 = vadd.f32 %v13247_v33, %v6441_v22 }
 0x943   : > { %v6517_v28 = vpop.f32.mrf.mxu0  ;;  %v6546_v37 = vpop.f32.mrf.mxu1 }
 0x944   : > { %v6518_v14 = vadd.f32 %v6517_v28, %v6489_v2 }
 0x946   : > { %v13259_v62 = vpop.f32.mrf.mxu3  ;;  %v6547_v19 = vadd.f32 %v6546_v37, %v6518_v14  ;;  %v13908_v14 = vld [vmem:[#allocation36_spill] sm:$0xff] }
 0x947   : > { %v13261_v41 = vpop.f32.mrf.mxu2 }
 0x94b   : > { %v6520_v44 = vpop.f32.mrf.mxu0  ;;  %v6549_v11 = vpop.f32.mrf.mxu1 }
 0x94c   : > { %v6521_v29 = vadd.f32 %v6520_v44, %v6492_v21  ;;  %v13910_v21 = vld [vmem:[#allocation38_spill] sm:$0xff] }
 0x94e   : > { %v13264_v20 = vpop.f32.mrf.mxu3  ;;  %v6550_v7 = vadd.f32 %v6549_v11, %v6521_v29  ;;  %v6415_v29 = vadd.f32 %v13237_v3, %v13256_v13 }
 0x94f   : > { %v6573_v58 = vpop.f32.mrf.mxu2 }
 0x950   : > { %v6574_v48 = vadd.f32 %v6573_v58, %v6545_v8  ;;  %v6465_v58 = vadd.f32 %v6464_v56, %v6436_v55  ;;  %v6439_v56 = vadd.f32 %v13231_v53, %v6410_v26  ;;  %v6444_v33 = vadd.f32 %v13241_v39, %v6415_v29 }
 0x952   : > { %v6494_v44 = vadd.f32 %v6493_v63, %v6465_v58  ;;  %v6473_v3 = vadd.f32 %v13253_v27, %v6444_v33 }
 0x953   : > { %v6522_v24 = vpop.f32.mrf.mxu0  ;;  %v6551_v16 = vpop.f32.mrf.mxu1 }
 0x954   : > { %v6523_v43 = vadd.f32 %v6522_v24, %v6494_v44  ;;  %v13909_v24 = vld [vmem:[#allocation37_spill] sm:$0xff] }
 0x956   : > { %v6602_v51 = vpop.f32.mrf.mxu3  ;;  %v6552_v61 = vadd.f32 %v6551_v16, %v6523_v43  ;;  %v13911_v16 = vld [vmem:[#allocation39_spill] sm:$0xff] }
 0x957   : > { %v6603_v38 = vadd.f32 %v6602_v51, %v6574_v48  ;;  %v6575_v60 = vpop.f32.mrf.mxu2  ;;  %v13907_v48 = vld [vmem:[#allocation35_spill] sm:$0xff]  ;;  %v13319_v58 = vadd.f32 %v13217_v25, %v13911_v16 }
 0x958   : > { %v6576_v52 = vadd.f32 %v6575_v60, %v6547_v19  ;;  %v13291_v51 = vadd.f32 %v13207_v17, %v13907_v48  ;;  %v6468_v60 = vadd.f32 %v13239_v46, %v6439_v56  ;;  %v13305_v46 = vadd.f32 %v13214_v15, %v13909_v24  ;;  %v13913_v48 = vld [vmem:[#allocation41_spill] sm:$0xff] }
 0x959   : > { %v13272_v36 = vadd.f32 %v6603_v38, %v13904_v40  ;;  %v13333_v56 = vadd.f32 %v13220_v35, %v13913_v48 }
 0x95a   : > { %v6497_v5 = vadd.f32 %v13245_v45, %v6468_v60 }
 0x95b   : > { %v6640_v4 = vadd.f32 %v13272_v36, %v13269_v32  ;;  %v6525_v8 = vpop.f32.mrf.mxu0  ;;  %v6554_v11 = vpop.f32.mrf.mxu1 }
 0x95c   : > { %v6526_v0 = vadd.f32 %v6525_v8, %v6497_v5  ;;  %v6502_v8 = vadd.f32 %v13259_v62, %v6473_v3 }
 0x95d   : > { %6641 = vadd.xlane.f32.xlu1 %v6640_v4 }
 0x95e   : > { %v6604_v28 = vpop.f32.mrf.mxu3 }
 0x95f   : > { %v6605_v30 = vadd.f32 %v6604_v28, %v6576_v52  ;;  %v6578_v57 = vpop.f32.mrf.mxu2  ;;  %v6555_v28 = vadd.f32 %v6554_v11, %v6526_v0 }
 0x960   : > { %v6579_v12 = vadd.f32 %v6578_v57, %v6550_v7  ;;  %v13912_v7 = vld [vmem:[#allocation40_spill] sm:$0xff] }
 0x961   : > { %v13283_v37 = vadd.f32 %v6605_v30, %v13906_v23  ;;  %v6499_v30 = vadd.f32 %v13251_v1, %v6470_v54 }
 0x963   : > { %v6643_v18 = vadd.f32 %v13283_v37, %v13279_v59  ;;  %v6527_v4 = vpop.f32.mrf.mxu0  ;;  %v6556_v15 = vpop.f32.mrf.mxu1 }
 0x964   : > { %v6528_v55 = vadd.f32 %v6527_v4, %v6499_v30  ;;  %v13919_v30 = vld [vmem:[#allocation30_spill] sm:$0xff] }
 0x965   : > { %6644 = vadd.xlane.f32.xlu2 %v6643_v18 }
 0x966   : > { %v6607_v50 = vpop.f32.mrf.mxu3  ;;  %v6557_v1 = vadd.f32 %v6556_v15, %v6528_v55 }
 0x967   : > { %v6608_v2 = vadd.f32 %v6607_v50, %v6579_v12  ;;  %v6580_v10 = vpop.f32.mrf.mxu2  ;;  %v6417_v12 = vadd.f32 %v13243_v49, %v13256_v13 }
 0x968   : > { %v6581_v40 = vadd.f32 %v6580_v10, %v6552_v61 }
 0x969   : > { %v13295_v38 = vadd.f32 %v6608_v2, %v13908_v14  ;;  %v6446_v27 = vadd.f32 %v13249_v9, %v6417_v12  ;;  %v13914_v14 = vld [vmem:[#allocation42_spill] sm:$0xff] }
 0x96b   : > { %v6646_v63 = vadd.f32 %v13295_v38, %v13291_v51  ;;  %v6530_v26 = vpop.f32.mrf.mxu0  ;;  %v6559_v2 = vpop.f32.mrf.mxu1  ;;  %v6475_v49 = vadd.f32 %v13261_v41, %v6446_v27 }
 0x96c   : > { %v6531_v43 = vadd.f32 %v6530_v26, %v6502_v8 }
 0x96d   : > { %6647 = vadd.xlane.f32.xlu0 %v6646_v63  ;;  %v6504_v63 = vadd.f32 %v13264_v20, %v6475_v49 }
 0x96e   : > { %v6609_v17 = vpop.f32.mrf.mxu3  ;;  %v6560_v13 = vadd.f32 %v6559_v2, %v6531_v43 }
 0x96f   : > { %v6610_v53 = vadd.f32 %v6609_v17, %v6581_v40  ;;  %v6583_v19 = vpop.f32.mrf.mxu2  ;;  %v13915_v40 = vld [vmem:[#allocation43_spill] sm:$0xff]  ;;  %v13916_v17 = vld [vmem:[#allocation44_spill] sm:$0xff] }
 0x970   : > { %v6584_v57 = vadd.f32 %v6583_v19, %v6555_v28  ;;  %v13345_v9 = vadd.f32 %v13223_v47, %v13915_v40  ;;  %v13918_v28 = vld [vmem:[#allocation46_spill] sm:$0xff] }
 0x971   : > { %v13309_v52 = vadd.f32 %v6610_v53, %v13910_v21  ;;  %v13917_v21 = vld [vmem:[#allocation45_spill] sm:$0xff] }
 0x972   : > { %v6636_v54 = vadd.f32 %v13225_v34, %v13917_v21 }
 0x973   : > { %v6649_v45 = vadd.f32 %v13309_v52, %v13305_v46  ;;  %v6532_v61 = vpop.f32.mrf.mxu0  ;;  %v6561_v41 = vpop.f32.mrf.mxu1 }
 0x974   : > { %v6533_v5 = vadd.f32 %v6532_v61, %v6504_v63 }
 0x975   : > { %6650 = vadd.xlane.f32.xlu1 %v6649_v45 }
 0x976   : > { %v6612_v31 = vpop.f32.mrf.mxu3  ;;  %v6562_v19 = vadd.f32 %v6561_v41, %v6533_v5 }
 0x977   : > { %v6613_v42 = vadd.f32 %v6612_v31, %v6584_v57  ;;  %v6585_v23 = vpop.f32.mrf.mxu2 }
 0x978   : > { %v6586_v50 = vadd.f32 %v6585_v23, %v6557_v1 }
 0x979   : > { %v13323_v18 = vadd.f32 %v6613_v42, %v13912_v7 }
 0x97b   : > { %v6652_v44 = vadd.f32 %v13323_v18, %v13319_v58 }
 0x97d   : > { %6653 = vadd.xlane.f32.xlu2 %v6652_v44 }
 0x97e   : > { %v6614_v25 = vpop.f32.mrf.mxu3 }
 0x97f   : > { %v6615_v39 = vadd.f32 %v6614_v25, %v6586_v50  ;;  %v6588_v10 = vpop.f32.mrf.mxu2 }
 0x980   : > { %v6589_v11 = vadd.f32 %v6588_v10, %v6560_v13 }
 0x981   : > { %v13337_v60 = vadd.f32 %v6615_v39, %v13914_v14 }
 0x983   : > { %v6655_v62 = vadd.f32 %v13337_v60, %v13333_v56 }
 0x985   : > { %6656 = vadd.xlane.f32.xlu0 %v6655_v62 }
 0x986   : > { %v6617_v6 = vpop.f32.mrf.mxu3 }
 0x987   : > { %v6618_v35 = vadd.f32 %v6617_v6, %v6589_v11  ;;  %v6590_v53 = vpop.f32.mrf.mxu2 }
 0x988   : > { %v6591_v24 = vadd.f32 %v6590_v53, %v6562_v19 }
 0x989   : > { %v13348_v0 = vadd.f32 %v6618_v35, %v13916_v17 }
 0x98b   : > { %v6658_v4 = vadd.f32 %v13348_v0, %v13345_v9 }
 0x98d   : > { %6659 = vadd.xlane.f32.xlu1 %v6658_v4 }
 0x98e   : > { %v6619_v20 = vpop.f32.mrf.mxu3 }
 0x98f   : > { %v6620_v22 = vadd.f32 %v6619_v20, %v6591_v24 }
 0x991   : > { %v6637_v45 = vadd.f32 %v6620_v22, %v13918_v28 }
 0x993   : > { %v6661_v47 = vadd.f32 %v6637_v45, %v6636_v54 }
 0x995   : > { %6662 = vadd.xlane.f32.xlu2 %v6661_v47 }
 0x9d0   : > { %v6642_v29 = vpop.xlane.xlu1 %6641 }
 0x9d1   : > { %v6664_v57 = vmul.f32 %v6642_v29, %v13919_v30 }
 0x9d3   : > { %v13357_v15 = vsub.f32 %v13269_v32, %v6664_v57  ;;  %v13360_v31 = vsub.f32 %v13272_v36, %v6664_v57 }
 0x9d5   : > { %v6688_v55 = vmul.f32 %v13357_v15, %v13357_v15  ;;  %v6689_v42 = vmul.f32 %v13360_v31, %v13360_v31 }
 0x9d7   : > { %v6704_v34 = vadd.f32 %v6689_v42, %v6688_v55 }
 0x9d8   : > { %v6645_v23 = vpop.xlane.xlu2 %6644 }
 0x9d9   : > { %v6665_v16 = vmul.f32 %v6645_v23, %v13919_v30  ;;  %6705 = vadd.xlane.f32.xlu0 %v6704_v34  ;;  %v6638_v23 = vld [vmem:[%s13920_s24] sm:$0x3] }
 0x9db   : > { %v13368_v33 = vsub.f32 %v13279_v59, %v6665_v16  ;;  %v13371_v32 = vsub.f32 %v13283_v37, %v6665_v16 }
 0x9dd   : > { %v6690_v36 = vmul.f32 %v13368_v33, %v13368_v33  ;;  %v6691_v7 = vmul.f32 %v13371_v32, %v13371_v32 }
 0x9df   : > { %v6707_v26 = vadd.f32 %v6691_v7, %v6690_v36 }
 0x9e0   : > { %v6648_v3 = vpop.xlane.xlu0 %6647 }
 0x9e1   : > { %v6666_v1 = vmul.f32 %v6648_v3, %v13919_v30  ;;  %6708 = vadd.xlane.f32.xlu1 %v6707_v26  ;;  %v6639_v26 = vld [vmem:[%s833_s25] sm:$0x3]  ;;  %s13921_s25 = sld [smem:[#allocation24_spill]] }
 0x9e3   : > { %v13379_v44 = vsub.f32 %v13291_v51, %v6666_v1  ;;  %v13382_v59 = vsub.f32 %v13295_v38, %v6666_v1 }
 0x9e5   : > { %v6692_v37 = vmul.f32 %v13379_v44, %v13379_v44  ;;  %v6693_v12 = vmul.f32 %v13382_v59, %v13382_v59 }
 0x9e7   : > { %v6710_v8 = vadd.f32 %v6693_v12, %v6692_v37  ;;  %v13448_v37 = vperm.slane %v6638_v23, 0  ;;  %v13450_v12 = vperm.slane %v6638_v23, 1  ;;  %p8981_p5 = scmp.ne.s32.totalorder %s13921_s25, 1 }
 0x9e8   : > { %v6651_v50 = vpop.xlane.xlu1 %6650  ;;  %s13922_s11 = sld [smem:[#allocation63_spill]] (!%p8981_p5) }
 0x9e9   : > { %v6667_v25 = vmul.f32 %v6651_v50, %v13919_v30  ;;  %6711 = vadd.xlane.f32.xlu2 %v6710_v8 }
 0x9eb   : > { %v13390_v43 = vsub.f32 %v13305_v46, %v6667_v25  ;;  %v13393_v51 = vsub.f32 %v13309_v52, %v6667_v25  ;;  %v13452_v25 = vperm.slane %v6639_v26, 0 }
 0x9ed   : > { %v6694_v38 = vmul.f32 %v13390_v43, %v13390_v43  ;;  %v6695_v39 = vmul.f32 %v13393_v51, %v13393_v51 }
 0x9ef   : > { %v6713_v2 = vadd.f32 %v6695_v39, %v6694_v38  ;;  %v13454_v38 = vperm.slane %v6639_v26, 1 }
 0x9f0   : > { %v6654_v10 = vpop.xlane.xlu2 %6653 }
 0x9f1   : > { %v6668_v48 = vmul.f32 %v6654_v10, %v13919_v30  ;;  %6714 = vadd.xlane.f32.xlu0 %v6713_v2 }
 0x9f3   : > { %v13401_v27 = vsub.f32 %v13319_v58, %v6668_v48  ;;  %v13404_v46 = vsub.f32 %v13323_v18, %v6668_v48 }
 0x9f5   : > { %v6696_v52 = vmul.f32 %v13401_v27, %v13401_v27  ;;  %v6697_v14 = vmul.f32 %v13404_v46, %v13404_v46 }
 0x9f7   : > { %v6716_v49 = vadd.f32 %v6697_v14, %v6696_v52 }
 0x9f8   : > { %v6657_v13 = vpop.xlane.xlu0 %6656 }
 0x9f9   : > { %v6669_v62 = vmul.f32 %v6657_v13, %v13919_v30  ;;  %6717 = vadd.xlane.f32.xlu1 %v6716_v49 }
 0x9fb   : > { %v13412_v61 = vsub.f32 %v13333_v56, %v6669_v62  ;;  %v13415_v58 = vsub.f32 %v13337_v60, %v6669_v62 }
 0x9fd   : > { %v6698_v18 = vmul.f32 %v13412_v61, %v13412_v61  ;;  %v6699_v63 = vmul.f32 %v13415_v58, %v13415_v58 }
 0x9ff   : > { %v6719_v11 = vadd.f32 %v6699_v63, %v6698_v18 }
 0xa00   : > { %v6660_v6 = vpop.xlane.xlu1 %6659 }
 0xa01   : > { %v6670_v5 = vmul.f32 %v6660_v6, %v13919_v30  ;;  %6720 = vadd.xlane.f32.xlu2 %v6719_v11 }
 0xa03   : > { %v13423_v35 = vsub.f32 %v13345_v9, %v6670_v5  ;;  %v13426_v56 = vsub.f32 %v13348_v0, %v6670_v5 }
 0xa05   : > { %v6700_v60 = vmul.f32 %v13423_v35, %v13423_v35  ;;  %v6701_v40 = vmul.f32 %v13426_v56, %v13426_v56 }
 0xa07   : > { %v6722_v17 = vadd.f32 %v6701_v40, %v6700_v60 }
 0xa08   : > { %v6663_v41 = vpop.xlane.xlu2 %6662 }
 0xa09   : > { %v6671_v53 = vmul.f32 %v6663_v41, %v13919_v30  ;;  %6723 = vadd.xlane.f32.xlu0 %v6722_v17 }
 0xa0b   : > { %v13433_v19 = vsub.f32 %v6636_v54, %v6671_v53  ;;  %v13435_v4 = vsub.f32 %v6637_v45, %v6671_v53 }
 0xa0d   : > { %v6702_v9 = vmul.f32 %v13433_v19, %v13433_v19  ;;  %v6703_v0 = vmul.f32 %v13435_v4, %v13435_v4 }
 0xa0f   : > { %v6725_v24 = vadd.f32 %v6703_v0, %v6702_v9 }
 0xa11   : > { %6726 = vadd.xlane.f32.xlu1 %v6725_v24 }
 0xa4c   : > { %v6706_v20 = vpop.xlane.xlu0 %6705 }
 0xa4d   : > { %v6728_v22 = vmul.f32 %v6706_v20, %v13919_v30 }
 0xa4f   : > { %v6736_v21 = vadd.f32 1e-05, %v6728_v22 }
 0xa51   : > { %9711 = vrsqrt.f32 %v6736_v21  ;;  %vm6750_vm3 = vweird.f32 %v6736_v21 }
 0xa54   : > { %v6709_v28 = vpop.xlane.xlu1 %6708 }
 0xa55   : > { %v6729_v54 = vmul.f32 %v6709_v28, %v13919_v30 }
 0xa57   : > { %v9712_v45 = vpop.eup %9711  ;;  %v6737_v47 = vadd.f32 1e-05, %v6729_v54 }
 0xa58   : > { %v6745_v29 = vmul.f32 %v9712_v45, %v6736_v21  ;;  %vm6751_vm2 = vweird.f32 %v9712_v45 }
 0xa59   : > { %9713 = vrsqrt.f32 %v6737_v47  ;;  %vm6752_vm4 = vmor %vm6750_vm3, %vm6751_vm2  ;;  %vm6760_vm6 = vweird.f32 %v6737_v47 }
 0xa5a   : > { %v6746_v57 = vmul.f32 %v9712_v45, %v6745_v29 }
 0xa5c   : > { %v6747_v55 = vmul.f32 0.5, %v6746_v57  ;;  %v6712_v42 = vpop.xlane.xlu2 %6711 }
 0xa5d   : > { %v6730_v34 = vmul.f32 %v6712_v42, %v13919_v30 }
 0xa5e   : > { %v6748_v16 = vsub.f32 1.5, %v6747_v55 }
 0xa5f   : > { %v9714_v36 = vpop.eup %9713  ;;  %v6738_v7 = vadd.f32 1e-05, %v6730_v34 }
 0xa60   : > { %v6749_v3 = vmul.f32 %v9712_v45, %v6748_v16  ;;  %v6755_v1 = vmul.f32 %v9714_v36, %v6737_v47  ;;  %vm6761_vm5 = vweird.f32 %v9714_v36 }
 0xa61   : > { %9715 = vrsqrt.f32 %v6738_v7  ;;  %vm6762_vm7 = vmor %vm6760_vm6, %vm6761_vm5  ;;  %vm6770_vm0 = vweird.f32 %v6738_v7 }
 0xa62   : > { %v6753_v8 = vsel %vm6752_vm4, %v9712_v45, %v6749_v3  ;;  %v6756_v50 = vmul.f32 %v9714_v36, %v6755_v1 }
 0xa63   : > { %v6824_v39 = vmul.f32 %v6753_v8, %v13357_v15  ;;  %v6825_v2 = vmul.f32 %v6753_v8, %v13360_v31 }
 0xa64   : > { %v6757_v10 = vmul.f32 0.5, %v6756_v50  ;;  %v6715_v48 = vpop.xlane.xlu0 %6714 }
 0xa65   : > { %v6845_v52 = vmul.f32 %v13448_v37, %v6824_v39  ;;  %v6846_v14 = vmul.f32 %v13450_v12, %v6825_v2  ;;  %v6731_v49 = vmul.f32 %v6715_v48, %v13919_v30 }
 0xa66   : > { %v6758_v13 = vsub.f32 1.5, %v6757_v10 }
 0xa67   : > { %v9716_v62 = vpop.eup %9715  ;;  %v13462_v18 = vadd.f32 %v13452_v25, %v6845_v52  ;;  %v13465_v63 = vadd.f32 %v13454_v38, %v6846_v14  ;;  %v6739_v15 = vadd.f32 1e-05, %v6731_v49 }
 0xa68   : > { %v6759_v11 = vmul.f32 %v9714_v36, %v6758_v13  ;;  %v6765_v31 = vmul.f32 %v9716_v62, %v6738_v7  ;;  %vm6771_vm8 = vweird.f32 %v9716_v62 }
 0xa69   : > { %6882 = vst [vmem:[#allocation2 + $0x30] sm:$0xff] %v13462_v18  ;;  %9717 = vrsqrt.f32 %v6739_v15  ;;  %vm6772_vm9 = vmor %vm6770_vm0, %vm6771_vm8  ;;  %vm6780_vm11 = vweird.f32 %v6739_v15 }
 0xa6a   : > { %6883 = vst [vmem:[#allocation2] sm:$0xff] %v13465_v63  ;;  %v6763_v6 = vsel %vm6762_vm7, %v9714_v36, %v6759_v11  ;;  %v6766_v5 = vmul.f32 %v9716_v62, %v6765_v31 }
 0xa6b   : > { %v6826_v60 = vmul.f32 %v6763_v6, %v13368_v33  ;;  %v6827_v40 = vmul.f32 %v6763_v6, %v13371_v32 }
 0xa6c   : > { %v6767_v17 = vmul.f32 0.5, %v6766_v5  ;;  %v6718_v41 = vpop.xlane.xlu1 %6717 }
 0xa6d   : > { %v6847_v53 = vmul.f32 %v13448_v37, %v6826_v60  ;;  %v6848_v9 = vmul.f32 %v13450_v12, %v6827_v40  ;;  %v6732_v0 = vmul.f32 %v6718_v41, %v13919_v30 }
 0xa6e   : > { %v6768_v24 = vsub.f32 1.5, %v6767_v17 }
 0xa6f   : > { %v9718_v20 = vpop.eup %9717  ;;  %v13475_v22 = vadd.f32 %v13452_v25, %v6847_v53  ;;  %v13478_v21 = vadd.f32 %v13454_v38, %v6848_v9  ;;  %v6740_v33 = vadd.f32 1e-05, %v6732_v0 }
 0xa70   : > { %v6769_v28 = vmul.f32 %v9716_v62, %v6768_v24  ;;  %v6775_v32 = vmul.f32 %v9718_v20, %v6739_v15  ;;  %vm6781_vm10 = vweird.f32 %v9718_v20 }
 0xa71   : > { %6884 = vst [vmem:[#allocation2 + $0x58] sm:$0xff] %v13475_v22  ;;  %9719 = vrsqrt.f32 %v6740_v33  ;;  %vm6782_vm12 = vmor %vm6780_vm11, %vm6781_vm10  ;;  %vm6790_vm14 = vweird.f32 %v6740_v33 }
 0xa72   : > { %6885 = vst [vmem:[#allocation2 + $0x18] sm:$0xff] %v13478_v21  ;;  %v6773_v54 = vsel %vm6772_vm9, %v9716_v62, %v6769_v28  ;;  %v6776_v45 = vmul.f32 %v9718_v20, %v6775_v32 }
 0xa73   : > { %v6828_v47 = vmul.f32 %v6773_v54, %v13379_v44  ;;  %v6829_v29 = vmul.f32 %v6773_v54, %v13382_v59 }
 0xa74   : > { %v6777_v57 = vmul.f32 0.5, %v6776_v45  ;;  %v6721_v55 = vpop.xlane.xlu2 %6720 }
 0xa75   : > { %v6849_v42 = vmul.f32 %v13448_v37, %v6828_v47  ;;  %v6850_v34 = vmul.f32 %v13450_v12, %v6829_v29  ;;  %v6733_v23 = vmul.f32 %v6721_v55, %v13919_v30 }
 0xa76   : > { %v6778_v16 = vsub.f32 1.5, %v6777_v57 }
 0xa77   : > { %v9720_v36 = vpop.eup %9719  ;;  %v13488_v7 = vadd.f32 %v13452_v25, %v6849_v42  ;;  %v13491_v26 = vadd.f32 %v13454_v38, %v6850_v34  ;;  %v6741_v44 = vadd.f32 1e-05, %v6733_v23 }
 0xa78   : > { %v6779_v3 = vmul.f32 %v9718_v20, %v6778_v16  ;;  %v6785_v59 = vmul.f32 %v9720_v36, %v6740_v33  ;;  %vm6791_vm13 = vweird.f32 %v9720_v36 }
 0xa79   : > { %6886 = vst [vmem:[#allocation2 + $0x50] sm:$0xff] %v13488_v7  ;;  %9721 = vrsqrt.f32 %v6741_v44  ;;  %vm6792_vm15 = vmor %vm6790_vm14, %vm6791_vm13  ;;  %vm6800_vm2 = vweird.f32 %v6741_v44 }
 0xa7a   : > { %6887 = vst [vmem:[#allocation2 + $0x68] sm:$0xff] %v13491_v26  ;;  %v6783_v1 = vsel %vm6782_vm12, %v9718_v20, %v6779_v3  ;;  %v6786_v8 = vmul.f32 %v9720_v36, %v6785_v59 }
 0xa7b   : > { %v6830_v50 = vmul.f32 %v6783_v1, %v13390_v43  ;;  %v6831_v39 = vmul.f32 %v6783_v1, %v13393_v51 }
 0xa7c   : > { %v6787_v2 = vmul.f32 0.5, %v6786_v8  ;;  %v6724_v10 = vpop.xlane.xlu0 %6723 }
 0xa7d   : > { %v6851_v48 = vmul.f32 %v13448_v37, %v6830_v50  ;;  %v6852_v52 = vmul.f32 %v13450_v12, %v6831_v39  ;;  %v6734_v14 = vmul.f32 %v6724_v10, %v13919_v30 }
 0xa7e   : > { %v6788_v49 = vsub.f32 1.5, %v6787_v2 }
 0xa7f   : > { %v9722_v13 = vpop.eup %9721  ;;  %v13501_v62 = vadd.f32 %v13452_v25, %v6851_v48  ;;  %v13504_v15 = vadd.f32 %v13454_v38, %v6852_v52  ;;  %v6742_v43 = vadd.f32 1e-05, %v6734_v14 }
 0xa80   : > { %v6789_v11 = vmul.f32 %v9720_v36, %v6788_v49  ;;  %v6795_v51 = vmul.f32 %v9722_v13, %v6741_v44  ;;  %vm6801_vm1 = vweird.f32 %v9722_v13 }
 0xa81   : > { %6888 = vst [vmem:[#allocation2 + $0x8] sm:$0xff] %v13501_v62  ;;  %9723 = vrsqrt.f32 %v6742_v43  ;;  %vm6802_vm3 = vmor %vm6800_vm2, %vm6801_vm1  ;;  %vm6810_vm5 = vweird.f32 %v6742_v43 }
 0xa82   : > { %6889 = vst [vmem:[#allocation2 + $0x48] sm:$0xff] %v13504_v15  ;;  %v6793_v31 = vsel %vm6792_vm15, %v9720_v36, %v6789_v11  ;;  %v6796_v6 = vmul.f32 %v9722_v13, %v6795_v51 }
 0xa83   : > { %v6832_v5 = vmul.f32 %v6793_v31, %v13401_v27  ;;  %v6833_v60 = vmul.f32 %v6793_v31, %v13404_v46 }
 0xa84   : > { %v6797_v40 = vmul.f32 0.5, %v6796_v6  ;;  %v6727_v17 = vpop.xlane.xlu1 %6726 }
 0xa85   : > { %v6853_v41 = vmul.f32 %v13448_v37, %v6832_v5  ;;  %v6854_v53 = vmul.f32 %v13450_v12, %v6833_v60  ;;  %v6735_v9 = vmul.f32 %v6727_v17, %v13919_v30 }
 0xa86   : > { %v6798_v0 = vsub.f32 1.5, %v6797_v40 }
 0xa87   : > { %v9724_v24 = vpop.eup %9723  ;;  %v13514_v20 = vadd.f32 %v13452_v25, %v6853_v41  ;;  %v13517_v33 = vadd.f32 %v13454_v38, %v6854_v53  ;;  %v6743_v27 = vadd.f32 1e-05, %v6735_v9 }
 0xa88   : > { %v6799_v28 = vmul.f32 %v9722_v13, %v6798_v0  ;;  %v6805_v46 = vmul.f32 %v9724_v24, %v6742_v43  ;;  %vm6811_vm4 = vweird.f32 %v9724_v24 }
 0xa89   : > { %6890 = vst [vmem:[#allocation2 + $0x40] sm:$0xff] %v13514_v20  ;;  %9725 = vrsqrt.f32 %v6743_v27  ;;  %vm6812_vm6 = vmor %vm6810_vm5, %vm6811_vm4  ;;  %vm6820_vm8 = vweird.f32 %v6743_v27 }
 0xa8a   : > { %6891 = vst [vmem:[#allocation2 + $0x20] sm:$0xff] %v13517_v33  ;;  %v6803_v30 = vsel %vm6802_vm3, %v9722_v13, %v6799_v28  ;;  %v6806_v32 = vmul.f32 %v9724_v24, %v6805_v46 }
 0xa8b   : > { %v6834_v54 = vmul.f32 %v6803_v30, %v13412_v61  ;;  %v6835_v45 = vmul.f32 %v6803_v30, %v13415_v58 }
 0xa8c   : > { %v6807_v47 = vmul.f32 0.5, %v6806_v32 }
 0xa8d   : > { %v6855_v29 = vmul.f32 %v13448_v37, %v6834_v54  ;;  %v6856_v57 = vmul.f32 %v13450_v12, %v6835_v45 }
 0xa8e   : > { %v6808_v55 = vsub.f32 1.5, %v6807_v47 }
 0xa8f   : > { %v9726_v42 = vpop.eup %9725  ;;  %v13526_v34 = vadd.f32 %v13452_v25, %v6855_v29  ;;  %v13529_v23 = vadd.f32 %v13454_v38, %v6856_v57 }
 0xa90   : > { %v6809_v16 = vmul.f32 %v9724_v24, %v6808_v55  ;;  %v6815_v36 = vmul.f32 %v9726_v42, %v6743_v27  ;;  %vm6821_vm7 = vweird.f32 %v9726_v42 }
 0xa91   : > { %6892 = vst [vmem:[#allocation2 + $0x10] sm:$0xff] %v13526_v34  ;;  %vm6822_vm0 = vmor %vm6820_vm8, %vm6821_vm7 }
 0xa92   : > { %6893 = vst [vmem:[#allocation2 + $0x38] sm:$0xff] %v13529_v23  ;;  %v6813_v61 = vsel %vm6812_vm6, %v9724_v24, %v6809_v16  ;;  %v6816_v58 = vmul.f32 %v9726_v42, %v6815_v36 }
 0xa93   : > { %v6836_v44 = vmul.f32 %v6813_v61, %v13423_v35  ;;  %v6837_v3 = vmul.f32 %v6813_v61, %v13426_v56 }
 0xa94   : > { %v6817_v59 = vmul.f32 0.5, %v6816_v58 }
 0xa95   : > { %v6857_v1 = vmul.f32 %v13448_v37, %v6836_v44  ;;  %v6858_v8 = vmul.f32 %v13450_v12, %v6837_v3 }
 0xa96   : > { %v6818_v50 = vsub.f32 1.5, %v6817_v59 }
 0xa97   : > { %v13538_v39 = vadd.f32 %v13452_v25, %v6857_v1  ;;  %v13541_v2 = vadd.f32 %v13454_v38, %v6858_v8 }
 0xa98   : > { %v6819_v10 = vmul.f32 %v9726_v42, %v6818_v50 }
 0xa99   : > { %6894 = vst [vmem:[#allocation2 + $0x60] sm:$0xff] %v13538_v39 }
 0xa9a   : > { %6895 = vst [vmem:[#allocation2 + $0x70] sm:$0xff] %v13541_v2  ;;  %v6823_v35 = vsel %vm6822_vm0, %v9726_v42, %v6819_v10 }
 0xa9b   : > { %v6838_v56 = vmul.f32 %v6823_v35, %v13433_v19  ;;  %v6839_v48 = vmul.f32 %v6823_v35, %v13435_v4 }
 0xa9d   : > { %v6859_v52 = vmul.f32 %v13448_v37, %v6838_v56  ;;  %v6860_v14 = vmul.f32 %v13450_v12, %v6839_v48 }
 0xa9e   : > { %6901 = sbr.rel (%p8981_p5) target bundleno = 2946 (0xb82), region = 128 }
 0xa9f   : > { %v13550_v49 = vadd.f32 %v13452_v25, %v6859_v52  ;;  %v13553_v13 = vadd.f32 %v13454_v38, %v6860_v14 }
 0xaa1   : > { %6896 = vst [vmem:[#allocation2 + $0x78] sm:$0xff] %v13550_v49 }
 0xaa2   : > { %6897 = vst [vmem:[#allocation2 + $0x28] sm:$0xff] %v13553_v13 }
 0xaa3   : > { %v6918_v19 = vld [vmem:[%s13922_s11] sm:$0xff]  ;;  %v6919_v4 = vld [vmem:[%s13922_s11 + $0x8] sm:$0xff]  ;;  %v6920_v37 = vld [vmem:[%s13922_s11 + $0x10] sm:$0xff] }
 0xaa4   : > { %v6921_v12 = vld [vmem:[%s13922_s11 + $0x18] sm:$0xff]  ;;  %v6934_v25 = vmul.f32 %v6918_v19, %v13462_v18  ;;  %v6935_v38 = vmul.f32 %v6919_v4, %v13465_v63  ;;  %v6936_v43 = vmul.f32 %v6920_v37, %v13475_v22  ;;  %v6922_v11 = vld [vmem:[%s13922_s11 + $0x20] sm:$0xff]  ;;  %v6923_v6 = vld [vmem:[%s13922_s11 + $0x28] sm:$0xff] }
 0xaa5   : > { %v6937_v51 = vmul.f32 %v6921_v12, %v13478_v21  ;;  %v6938_v5 = vmul.f32 %v6922_v11, %v13488_v7  ;;  %v8982_v40 = vld [vmem:[%s13922_s11 + $0x80] sm:$0xff]  ;;  %v8983_v17 = vld [vmem:[%s13922_s11 + $0x88] sm:$0xff]  ;;  %v6924_v41 = vld [vmem:[%s13922_s11 + $0x30] sm:$0xff]  ;;  %v6939_v27 = vmul.f32 %v6923_v6, %v13491_v26 }
 0xaa6   : > { %v6950_v31 = vadd.f32 %v6935_v38, %v6934_v25  ;;  %v8984_v53 = vld [vmem:[%s13922_s11 + $0x90] sm:$0xff]  ;;  %v8985_v9 = vld [vmem:[%s13922_s11 + $0x98] sm:$0xff]  ;;  %v6991_v0 = vmul.f32 %v8982_v40, %v13462_v18  ;;  %v6992_v24 = vmul.f32 %v8983_v17, %v13465_v63  ;;  %v8986_v46 = vld [vmem:[%s13922_s11 + $0xa0] sm:$0xff]  ;;  %v6940_v47 = vmul.f32 %v6924_v41, %v13501_v62 }
 0xaa7   : > { %v6993_v30 = vmul.f32 %v8984_v53, %v13475_v22  ;;  %v6925_v32 = vld [vmem:[%s13922_s11 + $0x38] sm:$0xff]  ;;  %v6994_v54 = vmul.f32 %v8985_v9, %v13478_v21  ;;  %v8987_v57 = vld [vmem:[%s13922_s11 + $0xa8] sm:$0xff]  ;;  %v6926_v55 = vld [vmem:[%s13922_s11 + $0x40] sm:$0xff]  ;;  %v6995_v42 = vmul.f32 %v8986_v46, %v13488_v7 }
 0xaa8   : > { %v6951_v60 = vadd.f32 %v6950_v31, %v6936_v43  ;;  %v7007_v45 = vadd.f32 %v6992_v24, %v6991_v0  ;;  %v6941_v36 = vmul.f32 %v6925_v32, %v13504_v15  ;;  %v8988_v58 = vld [vmem:[%s13922_s11 + $0xb0] sm:$0xff]  ;;  %v6927_v44 = vld [vmem:[%s13922_s11 + $0x48] sm:$0xff]  ;;  %v6996_v3 = vmul.f32 %v8987_v57, %v13491_v26  ;;  %v8989_v50 = vld [vmem:[%s13922_s11 + $0xb8] sm:$0xff] }
 0xaa9   : > { %v6942_v1 = vmul.f32 %v6926_v55, %v13514_v20  ;;  %v6928_v10 = vld [vmem:[%s13922_s11 + $0x50] sm:$0xff]  ;;  %v6997_v35 = vmul.f32 %v8988_v58, %v13501_v62  ;;  %v6943_v48 = vmul.f32 %v6927_v44, %v13517_v33  ;;  %v8990_v14 = vld [vmem:[%s13922_s11 + $0xc0] sm:$0xff]  ;;  %v6929_v19 = vld [vmem:[%s13922_s11 + $0x58] sm:$0xff]  ;;  %v6998_v4 = vmul.f32 %v8989_v50, %v13504_v15 }
 0xaaa   : > { %v6952_v28 = vadd.f32 %v6951_v60, %v6937_v51  ;;  %v7008_v16 = vadd.f32 %v7007_v45, %v6993_v30  ;;  %v6944_v12 = vmul.f32 %v6928_v10, %v13526_v34  ;;  %v8991_v38 = vld [vmem:[%s13922_s11 + $0xc8] sm:$0xff]  ;;  %v6930_v43 = vld [vmem:[%s13922_s11 + $0x60] sm:$0xff]  ;;  %v6999_v11 = vmul.f32 %v8990_v14, %v13514_v20  ;;  %v8993_v9 = vld [vmem:[%s13922_s11 + $0xd8] sm:$0xff] }
 0xaab   : > { %v6945_v31 = vmul.f32 %v6929_v19, %v13529_v23  ;;  %v6931_v60 = vld [vmem:[%s13922_s11 + $0x68] sm:$0xff]  ;;  %v7000_v40 = vmul.f32 %v8991_v38, %v13517_v33  ;;  %v6946_v41 = vmul.f32 %v6930_v43, %v13538_v39  ;;  %v6932_v0 = vld [vmem:[%s13922_s11 + $0x70] sm:$0xff]  ;;  %v8994_v30 = vld [vmem:[%s13922_s11 + $0xe0] sm:$0xff]  ;;  %v6903_v14 = vpack.c.bf16 %v13478_v21, %v13475_v22 }
 0xaac   : > { %v6953_v29 = vadd.f32 %v6952_v28, %v6938_v5  ;;  %v7009_v59 = vadd.f32 %v7008_v16, %v6994_v54  ;;  %v8992_v5 = vld [vmem:[%s13922_s11 + $0xd0] sm:$0xff]  ;;  %v6947_v28 = vmul.f32 %v6931_v60, %v13541_v2  ;;  %v6933_v32 = vld [vmem:[%s13922_s11 + $0x78] sm:$0xff]  ;;  %v7002_v54 = vmul.f32 %v8993_v9, %v13529_v23  ;;  %v8995_v57 = vld [vmem:[%s13922_s11 + $0xe8] sm:$0xff] }
 0xaad   : > { %v7001_v24 = vmul.f32 %v8992_v5, %v13526_v34  ;;  %v7003_v55 = vmul.f32 %v8994_v30, %v13538_v39  ;;  %v6949_v16 = vmul.f32 %v6933_v32, %v13553_v13  ;;  %v7004_v58 = vmul.f32 %v8995_v57, %v13541_v2  ;;  %6911 = vst [vmem:[%s10457_s15 + $0x8] sm:$0xff] %v6903_v14 }
 0xaae   : > { %v6954_v61 = vadd.f32 %v6953_v29, %v6939_v27  ;;  %v7010_v56 = vadd.f32 %v7009_v59, %v6995_v42  ;;  %v8997_v59 = vld [vmem:[%s13922_s11 + $0xf8] sm:$0xff]  ;;  %v6904_v19 = vpack.c.bf16 %v13491_v26, %v13488_v7 }
 0xab0   : > { %v6955_v8 = vadd.f32 %v6954_v61, %v6940_v47  ;;  %v7011_v37 = vadd.f32 %v7010_v56, %v6996_v3  ;;  %v6948_v47 = vmul.f32 %v6932_v0, %v13550_v49  ;;  %v8996_v61 = vld [vmem:[%s13922_s11 + $0xf0] sm:$0xff]  ;;  %6912 = vst [vmem:[%s10457_s15 + $0x10] sm:$0xff] %v6904_v19 }
 0xab2   : > { %v6956_v52 = vadd.f32 %v6955_v8, %v6941_v36  ;;  %v7012_v51 = vadd.f32 %v7011_v37, %v6997_v35  ;;  %v7006_v35 = vmul.f32 %v8997_v59, %v13553_v13  ;;  %v6906_v37 = vpack.c.bf16 %v13517_v33, %v13514_v20 }
 0xab4   : > { %v6957_v25 = vadd.f32 %v6956_v52, %v6942_v1  ;;  %v7013_v17 = vadd.f32 %v7012_v51, %v6998_v4  ;;  %v7005_v1 = vmul.f32 %v8996_v61, %v13550_v49  ;;  %v6902_v52 = vpack.c.bf16 %v13465_v63, %v13462_v18  ;;  %6914 = vst [vmem:[%s10457_s15 + $0x20] sm:$0xff] %v6906_v37 }
 0xab5   : > { %v6905_v4 = vpack.c.bf16 %v13504_v15, %v13501_v62  ;;  %v6908_v18 = vpack.c.bf16 %v13541_v2, %v13538_v39  ;;  %v6909_v63 = vpack.c.bf16 %v13553_v13, %v13550_v49 }
 0xab6   : > { %v6958_v6 = vadd.f32 %v6957_v25, %v6943_v48  ;;  %v7014_v27 = vadd.f32 %v7013_v17, %v6999_v11  ;;  %6910 = vst [vmem:[%s10457_s15] sm:$0xff] %v6902_v52  ;;  %v7031_v25 = vlaneseq }
 0xab7   : > { %6913 = vst [vmem:[%s10457_s15 + $0x18] sm:$0xff] %v6905_v4 }
 0xab8   : > { %v6959_v53 = vadd.f32 %v6958_v6, %v6944_v12  ;;  %v7015_v45 = vadd.f32 %v7014_v27, %v7000_v40  ;;  %v6907_v12 = vpack.c.bf16 %v13529_v23, %v13526_v34  ;;  %6916 = vst [vmem:[%s10457_s15 + $0x30] sm:$0xff] %v6908_v18  ;;  %v7032_v38 = vand.u32 127, %v7031_v25 }
 0xab9   : > { %6917 = vst [vmem:[%s10457_s15 + $0x38] sm:$0xff] %v6909_v63 }
 0xaba   : > { %v6960_v46 = vadd.f32 %v6959_v53, %v6945_v31  ;;  %v7016_v42 = vadd.f32 %v7015_v45, %v7001_v24  ;;  %6915 = vst [vmem:[%s10457_s15 + $0x28] sm:$0xff] %v6907_v12  ;;  %vm7034_vm9 = vcmp.eq.s32.totalorder %v7032_v38, 1  ;;  %vm7033_vm10 = vcmp.eq.s32.totalorder %v7032_v38, 0 }
 0xabc   : > { %v6961_v29 = vadd.f32 %v6960_v46, %v6946_v41  ;;  %v7017_v44 = vadd.f32 %v7016_v42, %v7002_v54 }
 0xabe   : > { %v6962_v36 = vadd.f32 %v6961_v29, %v6947_v28  ;;  %v7018_v8 = vadd.f32 %v7017_v44, %v7003_v55 }
 0xac0   : > { %v6963_v3 = vadd.f32 %v6962_v36, %v6948_v47  ;;  %v7019_v10 = vadd.f32 %v7018_v8, %v7004_v58 }
 0xac2   : > { %v6964_v50 = vadd.f32 %v6963_v3, %v6949_v16  ;;  %v7020_v56 = vadd.f32 %v7019_v10, %v7005_v1 }
 0xac4   : > { %6965 = vadd.xlane.f32.xlu0 %v6964_v50  ;;  %v7021_v48 = vadd.f32 %v7020_v56, %v7006_v35 }
 0xacc   : > { %7022 = vadd.xlane.f32.xlu0 %v7021_v48 }
 0xb37   : > { %v6966_v22 = vpop.xlane.xlu0 %6965 }
 0xb38   : > { %v6967_v21 = vrot.slane %v6966_v22, 4 }
 0xb3a   : > { %v6968_v7 = vadd.f32 %v6967_v21, %v6966_v22 }
 0xb3c   : > { %v6969_v26 = vrot.slane %v6968_v7, 2 }
 0xb3e   : > { %v6970_v62 = vadd.f32 %v6969_v26, %v6968_v7 }
 0xb3f   : > { %v7023_v15 = vpop.xlane.xlu0 %7022 }
 0xb40   : > { %v7024_v20 = vrot.slane %v7023_v15, 4  ;;  %v6971_v33 = vrot.slane %v6970_v62, 1 }
 0xb42   : > { %v7025_v34 = vadd.f32 %v7024_v20, %v7023_v15  ;;  %v6972_v23 = vadd.f32 %v6971_v33, %v6970_v62 }
 0xb44   : > { %v7026_v39 = vrot.slane %v7025_v34, 2  ;;  %9393 = vpush %v6972_v23 }
 0xb46   : > { %v7027_v2 = vadd.f32 %v7026_v39, %v7025_v34 }
 0xb48   : > { %v7028_v49 = vrot.slane %v7027_v2, 1 }
 0xb4a   : > { %v7029_v13 = vadd.f32 %v7028_v49, %v7027_v2 }
 0xb4c   : > { %9395 = vpush %v7029_v13 }
 0xb75   : > { %s9394_s15 = spop %9393 }
 0xb76   : > { %v7037_v11 = vstv %s9394_s15 }
 0xb7d   : > { %s9396_s23 = spop %9395 }
 0xb7e   : > { %v7035_v43 = vstv %s9396_s23 }
 0xb7f   : > { %v7036_v51 = vsel %vm7034_vm9, %v7035_v43, 0.0 }
 0xb80   : > { %v7038_v31 = vsel %vm7033_vm10, %v7037_v11, %v7036_v51 }
 0xb81   : > { %7039 = vst [vmem:[%s980_s17] sm:$0x1] %v7038_v31 }
 0xb82 PF: > { %s41_s30 = sadd.s32 1, %s10096_s30   ;;  %s13924_s24 = sld [smem:[#allocation22_spill]] }
 0xb83   : > { %p38_p6 = scmp.ge.s32.totalorder %s41_s30, 6   ;;  %s13925_s25 = sld [smem:[#allocation23_spill]] }
 0xb84   : > { %s13926_s26 = sld [smem:[#allocation29_spill]] }
 0xb85   : > { %s13927_s27 = sld [smem:[#allocation25_spill]]  ;;  %40 = sbr.rel (!%p38_p6) target bundleno = 31 (0x1f), region = 251 }
 0xb86   : > { %s13928_s28 = sld [smem:[#allocation26_spill]] }
 0xb87   : > { %s13929_s29 = sld [smem:[#allocation27_spill]] }
 0xb88   : > { %s13930_s0 = sld [smem:[#allocation28_spill]] }
 0xb8a   :  { %7073 = vsyncpa [#allocation4], 1 }
 0xb8b   :  { %7075 = vsyncpa [#allocation4 + $0x1], 1 }
 0xb8c   :  { %7076 = vsyncpa [#allocation6], 1 }
 0xb8d   :  { %7078 = vsyncpa [#allocation6 + $0x1], 1 }
 0xb8e   :  { %7079 = vsyncpa [#allocation9], 1 }
 0xb8f   :  { %7081 = vsyncpa [#allocation9 + $0x1], 1 }
 0xb90   :  { %7082 = vsyncpa [#allocation12], 1 }
 0xb91   :  { %7084 = vsyncpa [#allocation12 + $0x1], 1 }
 0xb92   :  { %7085 = vsyncpa [#allocation15], 1 }
 0xb93   :  { %7087 = vsyncpa [#allocation15 + $0x1], 1 }

</bundles_post_ra>
